<compile_context>
chip_gen: v6e
topology: v6e:2x2x1
jax: 0.10.0
libtpu: 0.0.40
codegen_flags: <defaults>
</compile_context>

<pallas_src>
import functools

import jax
import jax.numpy as jnp
from jax import lax
from jax.experimental import pallas as pl
from jax.experimental.pallas import tpu as pltpu

_VMEM_LIMIT = 32 * 1024 * 1024   # explicit scoped-VMEM limit (v5e default is 16 MiB)


# ---------------------------------------------------------------------------
# Kernel 1: fused Conv2d(3x3, pad=1) + folded BatchNorm + ReLU + MaxPool2d(2,2)
# Spatial order inside the kernel is (time, mel) = (S0, S1).
# ---------------------------------------------------------------------------
def _conv_bn_relu_pool_kernel(x_ref, w_ref, b_ref, o_ref, *,
                              S0, S1, Cin, Cout, prepatched, pad_out):
    """One batch image per grid step.

    x_ref : prepatched -> (1, S0, S1, 9*Cin)  precomputed zero-padded im2col taps
            otherwise  -> (1, S0+2, S1+2, Cin) zero-bordered NHWC tile
    w_ref : (9*Cin, Cout) bf16 weight slab (BN scale folded), row = (d0*3+d1)*Cin+ci
    b_ref : (1, Cout) f32 folded bias ((conv_bias - mean)*scale + beta)
    o_ref : pad_out -> (1, S0//2+2, S1//2+2, Cout)  (zero border for next block)
            else    -> (1, S0//2, S1//2, Cout)
    """
    if prepatched:
        patch = x_ref[0].reshape(S0 * S1, 9 * Cin)
    else:
        # 9 shifted windows concatenated along K -> a single MXU matmul.
        taps = [x_ref[0, d0:d0 + S0, d1:d1 + S1, :]
                for d0 in range(3) for d1 in range(3)]
        patch = jnp.concatenate(taps, axis=-1).reshape(S0 * S1, 9 * Cin)

    y = jnp.dot(patch, w_ref[...], preferred_element_type=jnp.float32) + b_ref[...]
    y = jnp.maximum(y, 0.0)                                   # (S0*S1, Cout) f32

    # Fused MaxPool2d(2,2): adjacent S1 (mel) pairs, then adjacent S0 (time) pairs.
    m = jnp.max(y.reshape(S0 * S1 // 2, 2, Cout), axis=1)     # (S0*(S1//2), Cout)
    m = m.reshape(S0 // 2, S1, Cout)
    p = jnp.maximum(m[:, :S1 // 2, :], m[:, S1 // 2:, :])     # (S0//2, S1//2, Cout)
    p = p.astype(o_ref.dtype)

    if pad_out:
        # Write into a 1-pixel zero-bordered buffer so the next conv block reads
        # an already-padded input (no HBM pad round trip between layers).
        o_ref[0] = jnp.zeros(o_ref.shape[1:], o_ref.dtype)
        o_ref[0, 1:1 + S0 // 2, 1:1 + S1 // 2, :] = p
    else:
        o_ref[0] = p


def _im2col_9tap(x):
    """XLA-side zero-padded 3x3 im2col: (B, S0, S1, Cin) -> (B, S0, S1, 9*Cin).

    Only used for the tiny 1-channel first layer so its kernel still does one
    well-shaped MXU dot instead of 9 (M, 1) broadcast-FMAs.
    """
    B, S0, S1, Cin = x.shape
    xp = jnp.pad(x, ((0, 0), (1, 1), (1, 1), (0, 0)))
    taps = [xp[:, d0:d0 + S0, d1:d1 + S1, :] for d0 in range(3) for d1 in range(3)]
    return jnp.concatenate(taps, axis=-1)


def conv_bn_relu_pool(x, blk, *, prepatched, pad_out, eps=1e-5):
    """Conv(3x3,pad=1)+BN+ReLU+MaxPool(2,2) on (time, mel)-ordered NHWC input."""
    B = x.shape[0]
    Cout = blk["w"].shape[0]
    if prepatched:
        _, S0, S1, k9 = x.shape
        Cin = k9 // 9
        assert k9 == 9 * Cin
    else:
        _, s0p, s1p, Cin = x.shape
        S0, S1 = s0p - 2, s1p - 2
    assert S0 % 2 == 0 and S1 % 2 == 0

    # Fold BatchNorm:  y = conv_nobias * s + (conv_bias - mean) * s + beta
    s = blk["gamma"] / jnp.sqrt(blk["var"] + eps)
    bias = (blk["b"] - blk["mean"]) * s + blk["beta"]
    # PyTorch OIHW (Cout, Cin, kh=mel, kw=time); spatial order in-kernel is
    # (time, mel) -> slab row index (kw*3 + kh)*Cin + ci, BN scale pre-folded.
    w_slab = jnp.transpose(blk["w"], (3, 2, 1, 0)).reshape(9 * Cin, Cout) * s[None, :]

    P0, P1 = S0 // 2, S1 // 2
    if pad_out:
        out_shape = jax.ShapeDtypeStruct((B, P0 + 2, P1 + 2, Cout), jnp.bfloat16)
        out_spec = pl.BlockSpec((1, P0 + 2, P1 + 2, Cout), lambda b: (b, 0, 0, 0))
    else:
        out_shape = jax.ShapeDtypeStruct((B, P0, P1, Cout), jnp.bfloat16)
        out_spec = pl.BlockSpec((1, P0, P1, Cout), lambda b: (b, 0, 0, 0))

    x_block = (1,) + x.shape[1:]
    kernel = functools.partial(_conv_bn_relu_pool_kernel, S0=S0, S1=S1, Cin=Cin,
                               Cout=Cout, prepatched=prepatched, pad_out=pad_out)
    return pl.pallas_call(
        kernel,
        out_shape=out_shape,
        grid=(B,),
        in_specs=[
            pl.BlockSpec(x_block, lambda b: (b, 0, 0, 0)),
            pl.BlockSpec((9 * Cin, Cout), lambda b: (0, 0)),
            pl.BlockSpec((1, Cout), lambda b: (0, 0)),
        ],
        out_specs=out_spec,
        compiler_params=pltpu.CompilerParams(
            dimension_semantics=("parallel",),
            vmem_limit_bytes=_VMEM_LIMIT),
    )(x.astype(jnp.bfloat16),
      w_slab.astype(jnp.bfloat16),
      bias.reshape(1, Cout).astype(jnp.float32))


# ---------------------------------------------------------------------------
# Kernel 2: fc1 -> ReLU -> (Dropout = identity in eval) -> fc2 -> ReLU
#           -> max_t + mean_t   (per-batch grid, result stays in VMEM)
# ---------------------------------------------------------------------------
def _trunk_kernel(x_ref, w1_ref, b1_ref, w2_ref, b2_ref, o_ref, *, inv_t):
    x = x_ref[0]                                                   # (T, feat) bf16
    h = jnp.dot(x, w1_ref[...], preferred_element_type=jnp.float32) + b1_ref[...]
    h = jnp.maximum(h, 0.0)
    h = jnp.dot(h.astype(jnp.bfloat16), w2_ref[...],
                preferred_element_type=jnp.float32) + b2_ref[...]
    h = jnp.maximum(h, 0.0)                                        # (T, d) f32
    # torch.max(x, 1).values + torch.mean(x, 1)   (mean as sum * 1/T)
    o_ref[0] = (jnp.max(h, axis=0, keepdims=True)
                + jnp.sum(h, axis=0, keepdims=True) * inv_t)       # (1, d) f32


def trunk_pool(h_btf, params):
    B, T, feat = h_btf.shape
    d = params["fc1"]["w"].shape[1]
    bf = lambda a: a.astype(jnp.bfloat16)
    fb = lambda a: a.reshape(1, -1).astype(jnp.float32)
    full2 = lambda shape: pl.BlockSpec(shape, lambda b: (0, 0))

    pooled = pl.pallas_call(
        functools.partial(_trunk_kernel, inv_t=1.0 / T),
        out_shape=jax.ShapeDtypeStruct((B, 1, d), jnp.float32),
        grid=(B,),
        in_specs=[
            pl.BlockSpec((1, T, feat), lambda b: (b, 0, 0)),
            full2((feat, d)), full2((1, d)),       # fc1
            full2((d, d)), full2((1, d)),          # fc2
        ],
        out_specs=pl.BlockSpec((1, 1, d), lambda b: (b, 0, 0)),
        compiler_params=pltpu.CompilerParams(
            dimension_semantics=("parallel",),
            vmem_limit_bytes=_VMEM_LIMIT),
    )(bf(h_btf),
      bf(params["fc1"]["w"]), fb(params["fc1"]["b"]),
      bf(params["fc2"]["w"]), fb(params["fc2"]["b"]))
    return pooled.reshape(B, d)


# ---------------------------------------------------------------------------
# Kernel 3: batched (M = B) instance head + cluster MLP + exact softmax
# ---------------------------------------------------------------------------
def _heads_kernel(p_ref, wi_ref, bi_ref, wc1_ref, bc1_ref, wc2_ref, bc2_ref,
                  inst_ref, clus_ref):
    p = p_ref[...]                                                 # (B, d) f32
    inst_ref[...] = (jnp.dot(p, wi_ref[...], preferred_element_type=jnp.float32)
                     + bi_ref[...])
    c = jnp.maximum(jnp.dot(p, wc1_ref[...], preferred_element_type=jnp.float32)
                    + bc1_ref[...], 0.0)
    logits = (jnp.dot(c, wc2_ref[...], preferred_element_type=jnp.float32)
              + bc2_ref[...])
    logits = logits - jnp.max(logits, axis=-1, keepdims=True)
    e = jnp.exp(logits)
    clus_ref[...] = e / jnp.sum(e, axis=-1, keepdims=True)         # exact softmax


def heads(pooled, params):
    B, d = pooled.shape
    di = params["instance"]["w"].shape[1]
    dc = params["cluster2"]["w"].shape[1]
    f32 = lambda a: a.astype(jnp.float32)
    fb = lambda a: a.reshape(1, -1).astype(jnp.float32)
    full2 = lambda shape: pl.BlockSpec(shape, lambda i: (0, 0))

    inst, clus = pl.pallas_call(
        _heads_kernel,
        out_shape=(jax.ShapeDtypeStruct((B, di), jnp.float32),
                   jax.ShapeDtypeStruct((B, dc), jnp.float32)),
        grid=(1,),
        in_specs=[
            full2((B, d)),
            full2((d, di)), full2((1, di)),        # instance projector
            full2((d, d)), full2((1, d)),          # cluster projector layer 1
            full2((d, dc)), full2((1, dc)),        # cluster projector layer 2
        ],
        out_specs=(full2((B, di)), full2((B, dc))),
        compiler_params=pltpu.CompilerParams(
            dimension_semantics=("arbitrary",),
            vmem_limit_bytes=_VMEM_LIMIT),
    )(f32(pooled),
      f32(params["instance"]["w"]), fb(params["instance"]["b"]),
      f32(params["cluster1"]["w"]), fb(params["cluster1"]["b"]),
      f32(params["cluster2"]["w"]), fb(params["cluster2"]["b"]))
    return inst, clus


# ---------------------------------------------------------------------------
# Full SLICER forward (eval mode)
# ---------------------------------------------------------------------------
def slicer_forward(params, x_nchw):
    # x_nchw: (B, 1, n_mels, time) like PyTorch.
    # Work in (time, mel) spatial order so the PyTorch permute(0,3,2,1) before
    # the FC trunk becomes a free trailing-dims reshape instead of an HBM pass.
    x = jnp.transpose(x_nchw, (0, 3, 2, 1)).astype(jnp.bfloat16)   # (B, time, mel, 1)
    x = _im2col_9tap(x)                                            # (B, time, mel, 9)
    blks = params["features"]
    for i, blk in enumerate(blks):
        x = conv_bn_relu_pool(x, blk, prepatched=(i == 0),
                              pad_out=(i != len(blks) - 1))
    B, T, Mo, C = x.shape
    h = x.reshape(B, T, Mo * C)        # trailing-dims merge: bitcast, no HBM copy
    pooled = trunk_pool(h, params)     # (B, d) f32
    return heads(pooled, params)       # (B, instance_dim), (B, cluster_dim)


# ---------------------------------------------------------------------------
# Deterministic parameter construction + pure-JAX f32 reference
# ---------------------------------------------------------------------------
def init_params(key, n_mels=16, d=64, instance_dim=32, cluster_dim=16):
    keys = iter(jax.random.split(key, 32))
    nrm = lambda shape: 0.1 * jax.random.normal(next(keys), shape, jnp.float32)

    def lin(kin, kout):
        return {"w": nrm((kin, kout)), "b": nrm((kout,))}

    def conv_block(cin, cout=64):
        return {"w": nrm((cout, cin, 3, 3)), "b": nrm((cout,)),
                "gamma": 1.0 + nrm((cout,)), "beta": nrm((cout,)),
                "mean": nrm((cout,)),
                "var": 0.5 + jax.random.uniform(next(keys), (cout,), jnp.float32)}

    feat = 64 * (n_mels // 8)
    return {
        "features": [conv_block(1), conv_block(64), conv_block(64)],
        "fc1": lin(feat, d),
        "fc2": lin(d, d),
        "instance": lin(d, instance_dim),
        "cluster1": lin(d, d),
        "cluster2": lin(d, cluster_dim),
    }


def reference_forward(params, x_nchw, eps=1e-5):
    x = jnp.transpose(x_nchw, (0, 2, 3, 1)).astype(jnp.float32)
    for blk in params["features"]:
        w_hwio = jnp.transpose(blk["w"], (2, 3, 1, 0))
        y = lax.conv_general_dilated(x, w_hwio, (1, 1), "SAME",
                                     dimension_numbers=("NHWC", "HWIO", "NHWC"))
        y = y + blk["b"]
        s = blk["gamma"] / jnp.sqrt(blk["var"] + eps)
        y = (y - blk["mean"]) * s + blk["beta"]
        y = jnp.maximum(y, 0.0)
        x = lax.reduce_window(y, -jnp.inf, lax.max, (1, 2, 2, 1), (1, 2, 2, 1), "VALID")
    B, Hm, Wt, C = x.shape
    h = jnp.transpose(x, (0, 2, 1, 3)).reshape(B, Wt, Hm * C)
    h = jnp.maximum(h @ params["fc1"]["w"] + params["fc1"]["b"], 0.0)
    h = jnp.maximum(h @ params["fc2"]["w"] + params["fc2"]["b"], 0.0)
    pooled = jnp.max(h, axis=1) + jnp.mean(h, axis=1)
    xi = pooled @ params["instance"]["w"] + params["instance"]["b"]
    c = jnp.maximum(pooled @ params["cluster1"]["w"] + params["cluster1"]["b"], 0.0)
    xc = jax.nn.softmax(c @ params["cluster2"]["w"] + params["cluster2"]["b"], axis=1)
    return xi, xc


if __name__ == "__main__":
    key = jax.random.PRNGKey(0)
    kp, kx = jax.random.split(key)

    B, n_mels, T_frames = 2, 16, 32
    d, instance_dim, cluster_dim = 64, 32, 16

    params = init_params(kp, n_mels=n_mels, d=d,
                         instance_dim=instance_dim, cluster_dim=cluster_dim)
    x = jax.random.normal(kx, (B, 1, n_mels, T_frames), jnp.float32)  # NCHW

    x_instance, x_cluster = jax.jit(slicer_forward)(params, x)
    jax.block_until_ready((x_instance, x_cluster))

    # Sanity check against a pure-JAX f32 reference (tolerance loosened for the
    # bf16 MXU operands used inside the kernels).
    ri, rc = reference_forward(params, x)
    assert x_instance.shape == (B, instance_dim) and x_cluster.shape == (B, cluster_dim)
    assert jnp.allclose(x_instance, ri, rtol=5e-2, atol=5e-2)
    assert jnp.allclose(x_cluster, rc, rtol=5e-2, atol=5e-2)

    # TODO(synk): training-mode Dropout / BatchNorm running-stat updates are not
    # modeled (eval-mode semantics only).
    print("KERNEL_OK")
</pallas_src>

<mosaic_0001>
module attributes {stable_mosaic.version = 11 : i64} {
  func.func @_conv_bn_relu_pool_kernel(%arg0: i32, %arg1: memref<1x18x10x64xbf16, #tpu.memory_space<vmem>>, %arg2: memref<576x64xbf16, #tpu.memory_space<vmem>>, %arg3: memref<1x64xf32, #tpu.memory_space<vmem>>, %arg4: memref<1x10x6x64xbf16, #tpu.memory_space<vmem>>) attributes {dimension_semantics = [#tpu.dimension_semantics<parallel>], iteration_bounds = array<i64: 2>, scalar_prefetch = 0 : i64, scratch_operands = 0 : i64, tpu.core_type = #tpu.core_type<tc>, window_params = [{transform_indices = @transform_0, window_bounds = array<i64: 1, 18, 10, 64>}, {pipeline_mode = #tpu.pipeline_mode<synchronous>, transform_indices = @transform_1, window_bounds = array<i64: 576, 64>}, {pipeline_mode = #tpu.pipeline_mode<synchronous>, transform_indices = @transform_2, window_bounds = array<i64: 1, 64>}, {transform_indices = @transform_3, window_bounds = array<i64: 1, 10, 6, 64>}]} {
    %c0 = arith.constant 0 : index
    %c0_0 = arith.constant 0 : index
    %c0_1 = arith.constant 0 : index
    %c0_2 = arith.constant 0 : index
    %0 = vector.load %arg1[%c0, %c0_0, %c0_1, %c0_2] : memref<1x18x10x64xbf16, #tpu.memory_space<vmem>>, vector<1x16x8x64xbf16>
    %1 = vector.shape_cast %0 : vector<1x16x8x64xbf16> to vector<16x8x64xbf16>
    %c0_3 = arith.constant 0 : index
    %c0_4 = arith.constant 0 : index
    %c1 = arith.constant 1 : index
    %c0_5 = arith.constant 0 : index
    %2 = vector.load %arg1[%c0_3, %c0_4, %c1, %c0_5] : memref<1x18x10x64xbf16, #tpu.memory_space<vmem>>, vector<1x16x8x64xbf16>
    %3 = vector.shape_cast %2 : vector<1x16x8x64xbf16> to vector<16x8x64xbf16>
    %c0_6 = arith.constant 0 : index
    %c0_7 = arith.constant 0 : index
    %c2 = arith.constant 2 : index
    %c0_8 = arith.constant 0 : index
    %4 = vector.load %arg1[%c0_6, %c0_7, %c2, %c0_8] : memref<1x18x10x64xbf16, #tpu.memory_space<vmem>>, vector<1x16x8x64xbf16>
    %5 = vector.shape_cast %4 : vector<1x16x8x64xbf16> to vector<16x8x64xbf16>
    %c0_9 = arith.constant 0 : index
    %c1_10 = arith.constant 1 : index
    %c0_11 = arith.constant 0 : index
    %c0_12 = arith.constant 0 : index
    %6 = vector.load %arg1[%c0_9, %c1_10, %c0_11, %c0_12] : memref<1x18x10x64xbf16, #tpu.memory_space<vmem>>, vector<1x16x8x64xbf16>
    %7 = vector.shape_cast %6 : vector<1x16x8x64xbf16> to vector<16x8x64xbf16>
    %c0_13 = arith.constant 0 : index
    %c1_14 = arith.constant 1 : index
    %c1_15 = arith.constant 1 : index
    %c0_16 = arith.constant 0 : index
    %8 = vector.load %arg1[%c0_13, %c1_14, %c1_15, %c0_16] : memref<1x18x10x64xbf16, #tpu.memory_space<vmem>>, vector<1x16x8x64xbf16>
    %9 = vector.shape_cast %8 : vector<1x16x8x64xbf16> to vector<16x8x64xbf16>
    %c0_17 = arith.constant 0 : index
    %c1_18 = arith.constant 1 : index
    %c2_19 = arith.constant 2 : index
    %c0_20 = arith.constant 0 : index
    %10 = vector.load %arg1[%c0_17, %c1_18, %c2_19, %c0_20] : memref<1x18x10x64xbf16, #tpu.memory_space<vmem>>, vector<1x16x8x64xbf16>
    %11 = vector.shape_cast %10 : vector<1x16x8x64xbf16> to vector<16x8x64xbf16>
    %c0_21 = arith.constant 0 : index
    %c2_22 = arith.constant 2 : index
    %c0_23 = arith.constant 0 : index
    %c0_24 = arith.constant 0 : index
    %12 = vector.load %arg1[%c0_21, %c2_22, %c0_23, %c0_24] : memref<1x18x10x64xbf16, #tpu.memory_space<vmem>>, vector<1x16x8x64xbf16>
    %13 = vector.shape_cast %12 : vector<1x16x8x64xbf16> to vector<16x8x64xbf16>
    %c0_25 = arith.constant 0 : index
    %c2_26 = arith.constant 2 : index
    %c1_27 = arith.constant 1 : index
    %c0_28 = arith.constant 0 : index
    %14 = vector.load %arg1[%c0_25, %c2_26, %c1_27, %c0_28] : memref<1x18x10x64xbf16, #tpu.memory_space<vmem>>, vector<1x16x8x64xbf16>
    %15 = vector.shape_cast %14 : vector<1x16x8x64xbf16> to vector<16x8x64xbf16>
    %c0_29 = arith.constant 0 : index
    %c2_30 = arith.constant 2 : index
    %c2_31 = arith.constant 2 : index
    %c0_32 = arith.constant 0 : index
    %16 = vector.load %arg1[%c0_29, %c2_30, %c2_31, %c0_32] : memref<1x18x10x64xbf16, #tpu.memory_space<vmem>>, vector<1x16x8x64xbf16>
    %17 = vector.shape_cast %16 : vector<1x16x8x64xbf16> to vector<16x8x64xbf16>
    %18 = tpu.concatenate %1, %3, %5, %7, %9, %11, %13, %15, %17 in 2 : vector<16x8x64xbf16>, vector<16x8x64xbf16>, vector<16x8x64xbf16>, vector<16x8x64xbf16>, vector<16x8x64xbf16>, vector<16x8x64xbf16>, vector<16x8x64xbf16>, vector<16x8x64xbf16>, vector<16x8x64xbf16> -> vector<16x8x576xbf16>
    %19 = vector.shape_cast %18 : vector<16x8x576xbf16> to vector<128x576xbf16>
    %c0_33 = arith.constant 0 : index
    %c0_34 = arith.constant 0 : index
    %20 = vector.load %arg2[%c0_33, %c0_34] : memref<576x64xbf16, #tpu.memory_space<vmem>>, vector<576x64xbf16>
    %cst = arith.constant dense<0.000000e+00> : vector<128x64xf32>
    %21 = tpu.matmul %19, %20, %cst {dimension_numbers = #tpu.dot_dimension_numbers<[1], [0], [0], [1], [0, 0, 1, 1], [], []>} : vector<128x576xbf16>, vector<576x64xbf16>, vector<128x64xf32> -> vector<128x64xf32>
    %c0_35 = arith.constant 0 : index
    %c0_36 = arith.constant 0 : index
    %22 = vector.load %arg3[%c0_35, %c0_36] : memref<1x64xf32, #tpu.memory_space<vmem>>, vector<1x64xf32>
    %23 = vector.broadcast %22 : vector<1x64xf32> to vector<128x64xf32>
    %24 = arith.addf %21, %23 : vector<128x64xf32>
    %cst_37 = arith.constant 0.000000e+00 : f32
    %25 = vector.broadcast %cst_37 : f32 to vector<128x64xf32>
    %26 = arith.maximumf %24, %25 : vector<128x64xf32>
    %27 = vector.shape_cast %26 : vector<128x64xf32> to vector<64x2x64xf32>
    %cst_38 = arith.constant dense<0xFF800000> : vector<64x64xf32>
    %28 = vector.multi_reduction <maximumf>, %27, %cst_38 [1] : vector<64x2x64xf32> to vector<64x64xf32>
    %29 = vector.shape_cast %28 : vector<64x64xf32> to vector<8x8x64xf32>
    %30 = vector.extract_strided_slice %29 {offsets = [0, 0, 0], sizes = [8, 4, 64], strides = [1, 1, 1]} : vector<8x8x64xf32> to vector<8x4x64xf32>
    %31 = vector.extract_strided_slice %29 {offsets = [0, 4, 0], sizes = [8, 4, 64], strides = [1, 1, 1]} : vector<8x8x64xf32> to vector<8x4x64xf32>
    %32 = arith.maximumf %30, %31 : vector<8x4x64xf32>
    %33 = arith.truncf %32 : vector<8x4x64xf32> to vector<8x4x64xbf16>
    %cst_39 = arith.constant 0.000000e+00 : bf16
    %34 = vector.broadcast %cst_39 : bf16 to vector<10x6x64xbf16>
    %c0_40 = arith.constant 0 : index
    %c0_41 = arith.constant 0 : index
    %c0_42 = arith.constant 0 : index
    %c0_43 = arith.constant 0 : index
    %35 = vector.load %arg4[%c0_40, %c0_41, %c0_42, %c0_43] : memref<1x10x6x64xbf16, #tpu.memory_space<vmem>>, vector<1x10x6x64xbf16>
    %36 = vector.shape_cast %35 : vector<1x10x6x64xbf16> to vector<10x6x64xbf16>
    %37 = vector.shape_cast %34 : vector<10x6x64xbf16> to vector<1x10x6x64xbf16>
    tpu.vector_store %arg4[%c0_40, %c0_41, %c0_42, %c0_43], %37 {strides = array<i32>} : memref<1x10x6x64xbf16, #tpu.memory_space<vmem>>, vector<1x10x6x64xbf16>,
    %c0_44 = arith.constant 0 : index
    %c1_45 = arith.constant 1 : index
    %c1_46 = arith.constant 1 : index
    %c0_47 = arith.constant 0 : index
    %38 = vector.load %arg4[%c0_44, %c1_45, %c1_46, %c0_47] : memref<1x10x6x64xbf16, #tpu.memory_space<vmem>>, vector<1x8x4x64xbf16>
    %39 = vector.shape_cast %38 : vector<1x8x4x64xbf16> to vector<8x4x64xbf16>
    %40 = vector.shape_cast %33 : vector<8x4x64xbf16> to vector<1x8x4x64xbf16>
    tpu.vector_store %arg4[%c0_44, %c1_45, %c1_46, %c0_47], %40 {strides = array<i32>} : memref<1x10x6x64xbf16, #tpu.memory_space<vmem>>, vector<1x8x4x64xbf16>,
    return
  }
  func.func @transform_0(%arg0: i32) -> (i32, i32, i32, i32) {
    %c0_i32 = arith.constant 0 : i32
    %c0_i32_0 = arith.constant 0 : i32
    %c0_i32_1 = arith.constant 0 : i32
    %c0_i32_2 = arith.constant 0 : i32
    return %arg0, %c0_i32, %c0_i32_0, %c0_i32_1 : i32, i32, i32, i32
  }
  func.func @transform_1(%arg0: i32) -> (i32, i32) {
    %c0_i32 = arith.constant 0 : i32
    %c0_i32_0 = arith.constant 0 : i32
    %c0_i32_1 = arith.constant 0 : i32
    return %c0_i32, %c0_i32_0 : i32, i32
  }
  func.func @transform_2(%arg0: i32) -> (i32, i32) {
    %c0_i32 = arith.constant 0 : i32
    %c0_i32_0 = arith.constant 0 : i32
    %c0_i32_1 = arith.constant 0 : i32
    return %c0_i32, %c0_i32_0 : i32, i32
  }
  func.func @transform_3(%arg0: i32) -> (i32, i32, i32, i32) {
    %c0_i32 = arith.constant 0 : i32
    %c0_i32_0 = arith.constant 0 : i32
    %c0_i32_1 = arith.constant 0 : i32
    %c0_i32_2 = arith.constant 0 : i32
    return %arg0, %c0_i32, %c0_i32_0, %c0_i32_1 : i32, i32, i32, i32
  }
}

module attributes {stable_mosaic.version = 11 : i64} {
  func.func @_conv_bn_relu_pool_kernel(%arg0: i32, %arg1: memref<1x32x16x9xbf16, #tpu.memory_space<vmem>>, %arg2: memref<9x64xbf16, #tpu.memory_space<vmem>>, %arg3: memref<1x64xf32, #tpu.memory_space<vmem>>, %arg4: memref<1x18x10x64xbf16, #tpu.memory_space<vmem>>) attributes {dimension_semantics = [#tpu.dimension_semantics<parallel>], iteration_bounds = array<i64: 2>, scalar_prefetch = 0 : i64, scratch_operands = 0 : i64, tpu.core_type = #tpu.core_type<tc>, window_params = [{transform_indices = @transform_0, window_bounds = array<i64: 1, 32, 16, 9>}, {pipeline_mode = #tpu.pipeline_mode<synchronous>, transform_indices = @transform_1, window_bounds = array<i64: 9, 64>}, {pipeline_mode = #tpu.pipeline_mode<synchronous>, transform_indices = @transform_2, window_bounds = array<i64: 1, 64>}, {transform_indices = @transform_3, window_bounds = array<i64: 1, 18, 10, 64>}]} {
    %c0 = arith.constant 0 : index
    %c0_0 = arith.constant 0 : index
    %c0_1 = arith.constant 0 : index
    %c0_2 = arith.constant 0 : index
    %0 = vector.load %arg1[%c0, %c0_0, %c0_1, %c0_2] : memref<1x32x16x9xbf16, #tpu.memory_space<vmem>>, vector<1x32x16x9xbf16>
    %1 = vector.shape_cast %0 : vector<1x32x16x9xbf16> to vector<32x16x9xbf16>
    %2 = vector.shape_cast %1 : vector<32x16x9xbf16> to vector<512x9xbf16>
    %c0_3 = arith.constant 0 : index
    %c0_4 = arith.constant 0 : index
    %3 = vector.load %arg2[%c0_3, %c0_4] : memref<9x64xbf16, #tpu.memory_space<vmem>>, vector<9x64xbf16>
    %cst = arith.constant dense<0.000000e+00> : vector<512x64xf32>
    %4 = tpu.matmul %2, %3, %cst {dimension_numbers = #tpu.dot_dimension_numbers<[1], [0], [0], [1], [0, 0, 1, 1], [], []>} : vector<512x9xbf16>, vector<9x64xbf16>, vector<512x64xf32> -> vector<512x64xf32>
    %c0_5 = arith.constant 0 : index
    %c0_6 = arith.constant 0 : index
    %5 = vector.load %arg3[%c0_5, %c0_6] : memref<1x64xf32, #tpu.memory_space<vmem>>, vector<1x64xf32>
    %6 = vector.broadcast %5 : vector<1x64xf32> to vector<512x64xf32>
    %7 = arith.addf %4, %6 : vector<512x64xf32>
    %cst_7 = arith.constant 0.000000e+00 : f32
    %8 = vector.broadcast %cst_7 : f32 to vector<512x64xf32>
    %9 = arith.maximumf %7, %8 : vector<512x64xf32>
    %10 = vector.shape_cast %9 : vector<512x64xf32> to vector<256x2x64xf32>
    %cst_8 = arith.constant dense<0xFF800000> : vector<256x64xf32>
    %11 = vector.multi_reduction <maximumf>, %10, %cst_8 [1] : vector<256x2x64xf32> to vector<256x64xf32>
    %12 = vector.shape_cast %11 : vector<256x64xf32> to vector<16x16x64xf32>
    %13 = vector.extract_strided_slice %12 {offsets = [0, 0, 0], sizes = [16, 8, 64], strides = [1, 1, 1]} : vector<16x16x64xf32> to vector<16x8x64xf32>
    %14 = vector.extract_strided_slice %12 {offsets = [0, 8, 0], sizes = [16, 8, 64], strides = [1, 1, 1]} : vector<16x16x64xf32> to vector<16x8x64xf32>
    %15 = arith.maximumf %13, %14 : vector<16x8x64xf32>
    %16 = arith.truncf %15 : vector<16x8x64xf32> to vector<16x8x64xbf16>
    %cst_9 = arith.constant 0.000000e+00 : bf16
    %17 = vector.broadcast %cst_9 : bf16 to vector<18x10x64xbf16>
    %c0_10 = arith.constant 0 : index
    %c0_11 = arith.constant 0 : index
    %c0_12 = arith.constant 0 : index
    %c0_13 = arith.constant 0 : index
    %18 = vector.load %arg4[%c0_10, %c0_11, %c0_12, %c0_13] : memref<1x18x10x64xbf16, #tpu.memory_space<vmem>>, vector<1x18x10x64xbf16>
    %19 = vector.shape_cast %18 : vector<1x18x10x64xbf16> to vector<18x10x64xbf16>
    %20 = vector.shape_cast %17 : vector<18x10x64xbf16> to vector<1x18x10x64xbf16>
    tpu.vector_store %arg4[%c0_10, %c0_11, %c0_12, %c0_13], %20 {strides = array<i32>} : memref<1x18x10x64xbf16, #tpu.memory_space<vmem>>, vector<1x18x10x64xbf16>,
    %c0_14 = arith.constant 0 : index
    %c1 = arith.constant 1 : index
    %c1_15 = arith.constant 1 : index
    %c0_16 = arith.constant 0 : index
    %21 = vector.load %arg4[%c0_14, %c1, %c1_15, %c0_16] : memref<1x18x10x64xbf16, #tpu.memory_space<vmem>>, vector<1x16x8x64xbf16>
    %22 = vector.shape_cast %21 : vector<1x16x8x64xbf16> to vector<16x8x64xbf16>
    %23 = vector.shape_cast %16 : vector<16x8x64xbf16> to vector<1x16x8x64xbf16>
    tpu.vector_store %arg4[%c0_14, %c1, %c1_15, %c0_16], %23 {strides = array<i32>} : memref<1x18x10x64xbf16, #tpu.memory_space<vmem>>, vector<1x16x8x64xbf16>,
    return
  }
  func.func @transform_0(%arg0: i32) -> (i32, i32, i32, i32) {
    %c0_i32 = arith.constant 0 : i32
    %c0_i32_0 = arith.constant 0 : i32
    %c0_i32_1 = arith.constant 0 : i32
    %c0_i32_2 = arith.constant 0 : i32
    return %arg0, %c0_i32, %c0_i32_0, %c0_i32_1 : i32, i32, i32, i32
  }
  func.func @transform_1(%arg0: i32) -> (i32, i32) {
    %c0_i32 = arith.constant 0 : i32
    %c0_i32_0 = arith.constant 0 : i32
    %c0_i32_1 = arith.constant 0 : i32
    return %c0_i32, %c0_i32_0 : i32, i32
  }
  func.func @transform_2(%arg0: i32) -> (i32, i32) {
    %c0_i32 = arith.constant 0 : i32
    %c0_i32_0 = arith.constant 0 : i32
    %c0_i32_1 = arith.constant 0 : i32
    return %c0_i32, %c0_i32_0 : i32, i32
  }
  func.func @transform_3(%arg0: i32) -> (i32, i32, i32, i32) {
    %c0_i32 = arith.constant 0 : i32
    %c0_i32_0 = arith.constant 0 : i32
    %c0_i32_1 = arith.constant 0 : i32
    %c0_i32_2 = arith.constant 0 : i32
    return %arg0, %c0_i32, %c0_i32_0, %c0_i32_1 : i32, i32, i32, i32
  }
}

module attributes {stable_mosaic.version = 11 : i64} {
  func.func @_conv_bn_relu_pool_kernel(%arg0: i32, %arg1: memref<1x10x6x64xbf16, #tpu.memory_space<vmem>>, %arg2: memref<576x64xbf16, #tpu.memory_space<vmem>>, %arg3: memref<1x64xf32, #tpu.memory_space<vmem>>, %arg4: memref<1x4x2x64xbf16, #tpu.memory_space<vmem>>) attributes {dimension_semantics = [#tpu.dimension_semantics<parallel>], iteration_bounds = array<i64: 2>, scalar_prefetch = 0 : i64, scratch_operands = 0 : i64, tpu.core_type = #tpu.core_type<tc>, window_params = [{transform_indices = @transform_0, window_bounds = array<i64: 1, 10, 6, 64>}, {pipeline_mode = #tpu.pipeline_mode<synchronous>, transform_indices = @transform_1, window_bounds = array<i64: 576, 64>}, {pipeline_mode = #tpu.pipeline_mode<synchronous>, transform_indices = @transform_2, window_bounds = array<i64: 1, 64>}, {transform_indices = @transform_3, window_bounds = array<i64: 1, 4, 2, 64>}]} {
    %c0 = arith.constant 0 : index
    %c0_0 = arith.constant 0 : index
    %c0_1 = arith.constant 0 : index
    %c0_2 = arith.constant 0 : index
    %0 = vector.load %arg1[%c0, %c0_0, %c0_1, %c0_2] : memref<1x10x6x64xbf16, #tpu.memory_space<vmem>>, vector<1x8x4x64xbf16>
    %1 = vector.shape_cast %0 : vector<1x8x4x64xbf16> to vector<8x4x64xbf16>
    %c0_3 = arith.constant 0 : index
    %c0_4 = arith.constant 0 : index
    %c1 = arith.constant 1 : index
    %c0_5 = arith.constant 0 : index
    %2 = vector.load %arg1[%c0_3, %c0_4, %c1, %c0_5] : memref<1x10x6x64xbf16, #tpu.memory_space<vmem>>, vector<1x8x4x64xbf16>
    %3 = vector.shape_cast %2 : vector<1x8x4x64xbf16> to vector<8x4x64xbf16>
    %c0_6 = arith.constant 0 : index
    %c0_7 = arith.constant 0 : index
    %c2 = arith.constant 2 : index
    %c0_8 = arith.constant 0 : index
    %4 = vector.load %arg1[%c0_6, %c0_7, %c2, %c0_8] : memref<1x10x6x64xbf16, #tpu.memory_space<vmem>>, vector<1x8x4x64xbf16>
    %5 = vector.shape_cast %4 : vector<1x8x4x64xbf16> to vector<8x4x64xbf16>
    %c0_9 = arith.constant 0 : index
    %c1_10 = arith.constant 1 : index
    %c0_11 = arith.constant 0 : index
    %c0_12 = arith.constant 0 : index
    %6 = vector.load %arg1[%c0_9, %c1_10, %c0_11, %c0_12] : memref<1x10x6x64xbf16, #tpu.memory_space<vmem>>, vector<1x8x4x64xbf16>
    %7 = vector.shape_cast %6 : vector<1x8x4x64xbf16> to vector<8x4x64xbf16>
    %c0_13 = arith.constant 0 : index
    %c1_14 = arith.constant 1 : index
    %c1_15 = arith.constant 1 : index
    %c0_16 = arith.constant 0 : index
    %8 = vector.load %arg1[%c0_13, %c1_14, %c1_15, %c0_16] : memref<1x10x6x64xbf16, #tpu.memory_space<vmem>>, vector<1x8x4x64xbf16>
    %9 = vector.shape_cast %8 : vector<1x8x4x64xbf16> to vector<8x4x64xbf16>
    %c0_17 = arith.constant 0 : index
    %c1_18 = arith.constant 1 : index
    %c2_19 = arith.constant 2 : index
    %c0_20 = arith.constant 0 : index
    %10 = vector.load %arg1[%c0_17, %c1_18, %c2_19, %c0_20] : memref<1x10x6x64xbf16, #tpu.memory_space<vmem>>, vector<1x8x4x64xbf16>
    %11 = vector.shape_cast %10 : vector<1x8x4x64xbf16> to vector<8x4x64xbf16>
    %c0_21 = arith.constant 0 : index
    %c2_22 = arith.constant 2 : index
    %c0_23 = arith.constant 0 : index
    %c0_24 = arith.constant 0 : index
    %12 = vector.load %arg1[%c0_21, %c2_22, %c0_23, %c0_24] : memref<1x10x6x64xbf16, #tpu.memory_space<vmem>>, vector<1x8x4x64xbf16>
    %13 = vector.shape_cast %12 : vector<1x8x4x64xbf16> to vector<8x4x64xbf16>
    %c0_25 = arith.constant 0 : index
    %c2_26 = arith.constant 2 : index
    %c1_27 = arith.constant 1 : index
    %c0_28 = arith.constant 0 : index
    %14 = vector.load %arg1[%c0_25, %c2_26, %c1_27, %c0_28] : memref<1x10x6x64xbf16, #tpu.memory_space<vmem>>, vector<1x8x4x64xbf16>
    %15 = vector.shape_cast %14 : vector<1x8x4x64xbf16> to vector<8x4x64xbf16>
    %c0_29 = arith.constant 0 : index
    %c2_30 = arith.constant 2 : index
    %c2_31 = arith.constant 2 : index
    %c0_32 = arith.constant 0 : index
    %16 = vector.load %arg1[%c0_29, %c2_30, %c2_31, %c0_32] : memref<1x10x6x64xbf16, #tpu.memory_space<vmem>>, vector<1x8x4x64xbf16>
    %17 = vector.shape_cast %16 : vector<1x8x4x64xbf16> to vector<8x4x64xbf16>
    %18 = tpu.concatenate %1, %3, %5, %7, %9, %11, %13, %15, %17 in 2 : vector<8x4x64xbf16>, vector<8x4x64xbf16>, vector<8x4x64xbf16>, vector<8x4x64xbf16>, vector<8x4x64xbf16>, vector<8x4x64xbf16>, vector<8x4x64xbf16>, vector<8x4x64xbf16>, vector<8x4x64xbf16> -> vector<8x4x576xbf16>
    %19 = vector.shape_cast %18 : vector<8x4x576xbf16> to vector<32x576xbf16>
    %c0_33 = arith.constant 0 : index
    %c0_34 = arith.constant 0 : index
    %20 = vector.load %arg2[%c0_33, %c0_34] : memref<576x64xbf16, #tpu.memory_space<vmem>>, vector<576x64xbf16>
    %cst = arith.constant dense<0.000000e+00> : vector<32x64xf32>
    %21 = tpu.matmul %19, %20, %cst {dimension_numbers = #tpu.dot_dimension_numbers<[1], [0], [0], [1], [0, 0, 1, 1], [], []>} : vector<32x576xbf16>, vector<576x64xbf16>, vector<32x64xf32> -> vector<32x64xf32>
    %c0_35 = arith.constant 0 : index
    %c0_36 = arith.constant 0 : index
    %22 = vector.load %arg3[%c0_35, %c0_36] : memref<1x64xf32, #tpu.memory_space<vmem>>, vector<1x64xf32>
    %23 = vector.broadcast %22 : vector<1x64xf32> to vector<32x64xf32>
    %24 = arith.addf %21, %23 : vector<32x64xf32>
    %cst_37 = arith.constant 0.000000e+00 : f32
    %25 = vector.broadcast %cst_37 : f32 to vector<32x64xf32>
    %26 = arith.maximumf %24, %25 : vector<32x64xf32>
    %27 = vector.shape_cast %26 : vector<32x64xf32> to vector<16x2x64xf32>
    %cst_38 = arith.constant dense<0xFF800000> : vector<16x64xf32>
    %28 = vector.multi_reduction <maximumf>, %27, %cst_38 [1] : vector<16x2x64xf32> to vector<16x64xf32>
    %29 = vector.shape_cast %28 : vector<16x64xf32> to vector<4x4x64xf32>
    %30 = vector.extract_strided_slice %29 {offsets = [0, 0, 0], sizes = [4, 2, 64], strides = [1, 1, 1]} : vector<4x4x64xf32> to vector<4x2x64xf32>
    %31 = vector.extract_strided_slice %29 {offsets = [0, 2, 0], sizes = [4, 2, 64], strides = [1, 1, 1]} : vector<4x4x64xf32> to vector<4x2x64xf32>
    %32 = arith.maximumf %30, %31 : vector<4x2x64xf32>
    %33 = arith.truncf %32 : vector<4x2x64xf32> to vector<4x2x64xbf16>
    %c0_39 = arith.constant 0 : index
    %c0_40 = arith.constant 0 : index
    %c0_41 = arith.constant 0 : index
    %c0_42 = arith.constant 0 : index
    %34 = vector.load %arg4[%c0_39, %c0_40, %c0_41, %c0_42] : memref<1x4x2x64xbf16, #tpu.memory_space<vmem>>, vector<1x4x2x64xbf16>
    %35 = vector.shape_cast %34 : vector<1x4x2x64xbf16> to vector<4x2x64xbf16>
    %36 = vector.shape_cast %33 : vector<4x2x64xbf16> to vector<1x4x2x64xbf16>
    tpu.vector_store %arg4[%c0_39, %c0_40, %c0_41, %c0_42], %36 {strides = array<i32>} : memref<1x4x2x64xbf16, #tpu.memory_space<vmem>>, vector<1x4x2x64xbf16>,
    return
  }
  func.func @transform_0(%arg0: i32) -> (i32, i32, i32, i32) {
    %c0_i32 = arith.constant 0 : i32
    %c0_i32_0 = arith.constant 0 : i32
    %c0_i32_1 = arith.constant 0 : i32
    %c0_i32_2 = arith.constant 0 : i32
    return %arg0, %c0_i32, %c0_i32_0, %c0_i32_1 : i32, i32, i32, i32
  }
  func.func @transform_1(%arg0: i32) -> (i32, i32) {
    %c0_i32 = arith.constant 0 : i32
    %c0_i32_0 = arith.constant 0 : i32
    %c0_i32_1 = arith.constant 0 : i32
    return %c0_i32, %c0_i32_0 : i32, i32
  }
  func.func @transform_2(%arg0: i32) -> (i32, i32) {
    %c0_i32 = arith.constant 0 : i32
    %c0_i32_0 = arith.constant 0 : i32
    %c0_i32_1 = arith.constant 0 : i32
    return %c0_i32, %c0_i32_0 : i32, i32
  }
  func.func @transform_3(%arg0: i32) -> (i32, i32, i32, i32) {
    %c0_i32 = arith.constant 0 : i32
    %c0_i32_0 = arith.constant 0 : i32
    %c0_i32_1 = arith.constant 0 : i32
    %c0_i32_2 = arith.constant 0 : i32
    return %arg0, %c0_i32, %c0_i32_0, %c0_i32_1 : i32, i32, i32, i32
  }
}

module attributes {stable_mosaic.version = 11 : i64} {
  func.func @_trunk_kernel(%arg0: i32, %arg1: memref<1x4x128xbf16, #tpu.memory_space<vmem>>, %arg2: memref<128x64xbf16, #tpu.memory_space<vmem>>, %arg3: memref<1x64xf32, #tpu.memory_space<vmem>>, %arg4: memref<64x64xbf16, #tpu.memory_space<vmem>>, %arg5: memref<1x64xf32, #tpu.memory_space<vmem>>, %arg6: memref<1x1x64xf32, #tpu.memory_space<vmem>>) attributes {dimension_semantics = [#tpu.dimension_semantics<parallel>], iteration_bounds = array<i64: 2>, scalar_prefetch = 0 : i64, scratch_operands = 0 : i64, tpu.core_type = #tpu.core_type<tc>, window_params = [{transform_indices = @transform_0, window_bounds = array<i64: 1, 4, 128>}, {pipeline_mode = #tpu.pipeline_mode<synchronous>, transform_indices = @transform_1, window_bounds = array<i64: 128, 64>}, {pipeline_mode = #tpu.pipeline_mode<synchronous>, transform_indices = @transform_2, window_bounds = array<i64: 1, 64>}, {pipeline_mode = #tpu.pipeline_mode<synchronous>, transform_indices = @transform_3, window_bounds = array<i64: 64, 64>}, {pipeline_mode = #tpu.pipeline_mode<synchronous>, transform_indices = @transform_4, window_bounds = array<i64: 1, 64>}, {transform_indices = @transform_5, window_bounds = array<i64: 1, 1, 64>}]} {
    %c0 = arith.constant 0 : index
    %c0_0 = arith.constant 0 : index
    %c0_1 = arith.constant 0 : index
    %0 = vector.load %arg1[%c0, %c0_0, %c0_1] : memref<1x4x128xbf16, #tpu.memory_space<vmem>>, vector<1x4x128xbf16>
    %1 = vector.shape_cast %0 : vector<1x4x128xbf16> to vector<4x128xbf16>
    %c0_2 = arith.constant 0 : index
    %c0_3 = arith.constant 0 : index
    %2 = vector.load %arg2[%c0_2, %c0_3] : memref<128x64xbf16, #tpu.memory_space<vmem>>, vector<128x64xbf16>
    %cst = arith.constant dense<0.000000e+00> : vector<4x64xf32>
    %3 = tpu.matmul %1, %2, %cst {dimension_numbers = #tpu.dot_dimension_numbers<[1], [0], [0], [1], [0, 0, 1, 1], [], []>} : vector<4x128xbf16>, vector<128x64xbf16>, vector<4x64xf32> -> vector<4x64xf32>
    %c0_4 = arith.constant 0 : index
    %c0_5 = arith.constant 0 : index
    %4 = vector.load %arg3[%c0_4, %c0_5] : memref<1x64xf32, #tpu.memory_space<vmem>>, vector<1x64xf32>
    %5 = vector.broadcast %4 : vector<1x64xf32> to vector<4x64xf32>
    %6 = arith.addf %3, %5 : vector<4x64xf32>
    %cst_6 = arith.constant 0.000000e+00 : f32
    %7 = vector.broadcast %cst_6 : f32 to vector<4x64xf32>
    %8 = arith.maximumf %6, %7 : vector<4x64xf32>
    %9 = arith.truncf %8 : vector<4x64xf32> to vector<4x64xbf16>
    %c0_7 = arith.constant 0 : index
    %c0_8 = arith.constant 0 : index
    %10 = vector.load %arg4[%c0_7, %c0_8] : memref<64x64xbf16, #tpu.memory_space<vmem>>, vector<64x64xbf16>
    %cst_9 = arith.constant dense<0.000000e+00> : vector<4x64xf32>
    %11 = tpu.matmul %9, %10, %cst_9 {dimension_numbers = #tpu.dot_dimension_numbers<[1], [0], [0], [1], [0, 0, 1, 1], [], []>} : vector<4x64xbf16>, vector<64x64xbf16>, vector<4x64xf32> -> vector<4x64xf32>
    %c0_10 = arith.constant 0 : index
    %c0_11 = arith.constant 0 : index
    %12 = vector.load %arg5[%c0_10, %c0_11] : memref<1x64xf32, #tpu.memory_space<vmem>>, vector<1x64xf32>
    %13 = vector.broadcast %12 : vector<1x64xf32> to vector<4x64xf32>
    %14 = arith.addf %11, %13 : vector<4x64xf32>
    %cst_12 = arith.constant 0.000000e+00 : f32
    %15 = vector.broadcast %cst_12 : f32 to vector<4x64xf32>
    %16 = arith.maximumf %14, %15 : vector<4x64xf32>
    %cst_13 = arith.constant dense<0xFF800000> : vector<64xf32>
    %17 = vector.multi_reduction <maximumf>, %16, %cst_13 [0] : vector<4x64xf32> to vector<64xf32>
    %18 = vector.shape_cast %17 : vector<64xf32> to vector<1x64xf32>
    %cst_14 = arith.constant dense<0.000000e+00> : vector<64xf32>
    %19 = vector.multi_reduction <add>, %16, %cst_14 [0] : vector<4x64xf32> to vector<64xf32>
    %20 = vector.shape_cast %19 : vector<64xf32> to vector<1x64xf32>
    %cst_15 = arith.constant 2.500000e-01 : f32
    %21 = vector.broadcast %cst_15 : f32 to vector<1x64xf32>
    %22 = arith.mulf %20, %21 : vector<1x64xf32>
    %23 = arith.addf %18, %22 : vector<1x64xf32>
    %c0_16 = arith.constant 0 : index
    %c0_17 = arith.constant 0 : index
    %c0_18 = arith.constant 0 : index
    %24 = vector.load %arg6[%c0_16, %c0_17, %c0_18] : memref<1x1x64xf32, #tpu.memory_space<vmem>>, vector<1x1x64xf32>
    %25 = vector.shape_cast %24 : vector<1x1x64xf32> to vector<1x64xf32>
    %26 = vector.shape_cast %23 : vector<1x64xf32> to vector<1x1x64xf32>
    tpu.vector_store %arg6[%c0_16, %c0_17, %c0_18], %26 {strides = array<i32>} : memref<1x1x64xf32, #tpu.memory_space<vmem>>, vector<1x1x64xf32>,
    return
  }
  func.func @transform_0(%arg0: i32) -> (i32, i32, i32) {
    %c0_i32 = arith.constant 0 : i32
    %c0_i32_0 = arith.constant 0 : i32
    %c0_i32_1 = arith.constant 0 : i32
    return %arg0, %c0_i32, %c0_i32_0 : i32, i32, i32
  }
  func.func @transform_1(%arg0: i32) -> (i32, i32) {
    %c0_i32 = arith.constant 0 : i32
    %c0_i32_0 = arith.constant 0 : i32
    %c0_i32_1 = arith.constant 0 : i32
    return %c0_i32, %c0_i32_0 : i32, i32
  }
  func.func @transform_2(%arg0: i32) -> (i32, i32) {
    %c0_i32 = arith.constant 0 : i32
    %c0_i32_0 = arith.constant 0 : i32
    %c0_i32_1 = arith.constant 0 : i32
    return %c0_i32, %c0_i32_0 : i32, i32
  }
  func.func @transform_3(%arg0: i32) -> (i32, i32) {
    %c0_i32 = arith.constant 0 : i32
    %c0_i32_0 = arith.constant 0 : i32
    %c0_i32_1 = arith.constant 0 : i32
    return %c0_i32, %c0_i32_0 : i32, i32
  }
  func.func @transform_4(%arg0: i32) -> (i32, i32) {
    %c0_i32 = arith.constant 0 : i32
    %c0_i32_0 = arith.constant 0 : i32
    %c0_i32_1 = arith.constant 0 : i32
    return %c0_i32, %c0_i32_0 : i32, i32
  }
  func.func @transform_5(%arg0: i32) -> (i32, i32, i32) {
    %c0_i32 = arith.constant 0 : i32
    %c0_i32_0 = arith.constant 0 : i32
    %c0_i32_1 = arith.constant 0 : i32
    return %arg0, %c0_i32, %c0_i32_0 : i32, i32, i32
  }
}

module attributes {stable_mosaic.version = 11 : i64} {
  func.func @_heads_kernel(%arg0: i32, %arg1: memref<2x64xf32, #tpu.memory_space<vmem>>, %arg2: memref<64x32xf32, #tpu.memory_space<vmem>>, %arg3: memref<1x32xf32, #tpu.memory_space<vmem>>, %arg4: memref<64x64xf32, #tpu.memory_space<vmem>>, %arg5: memref<1x64xf32, #tpu.memory_space<vmem>>, %arg6: memref<64x16xf32, #tpu.memory_space<vmem>>, %arg7: memref<1x16xf32, #tpu.memory_space<vmem>>, %arg8: memref<2x32xf32, #tpu.memory_space<vmem>>, %arg9: memref<2x16xf32, #tpu.memory_space<vmem>>) attributes {dimension_semantics = [#tpu.dimension_semantics<arbitrary>], iteration_bounds = array<i64: 1>, scalar_prefetch = 0 : i64, scratch_operands = 0 : i64, tpu.core_type = #tpu.core_type<tc>, window_params = [{pipeline_mode = #tpu.pipeline_mode<synchronous>, transform_indices = @transform_0, window_bounds = array<i64: 2, 64>}, {pipeline_mode = #tpu.pipeline_mode<synchronous>, transform_indices = @transform_1, window_bounds = array<i64: 64, 32>}, {pipeline_mode = #tpu.pipeline_mode<synchronous>, transform_indices = @transform_2, window_bounds = array<i64: 1, 32>}, {pipeline_mode = #tpu.pipeline_mode<synchronous>, transform_indices = @transform_3, window_bounds = array<i64: 64, 64>}, {pipeline_mode = #tpu.pipeline_mode<synchronous>, transform_indices = @transform_4, window_bounds = array<i64: 1, 64>}, {pipeline_mode = #tpu.pipeline_mode<synchronous>, transform_indices = @transform_5, window_bounds = array<i64: 64, 16>}, {pipeline_mode = #tpu.pipeline_mode<synchronous>, transform_indices = @transform_6, window_bounds = array<i64: 1, 16>}, {pipeline_mode = #tpu.pipeline_mode<synchronous>, transform_indices = @transform_7, window_bounds = array<i64: 2, 32>}, {pipeline_mode = #tpu.pipeline_mode<synchronous>, transform_indices = @transform_8, window_bounds = array<i64: 2, 16>}]} {
    %c0 = arith.constant 0 : index
    %c0_0 = arith.constant 0 : index
    %0 = vector.load %arg1[%c0, %c0_0] : memref<2x64xf32, #tpu.memory_space<vmem>>, vector<2x64xf32>
    %c0_1 = arith.constant 0 : index
    %c0_2 = arith.constant 0 : index
    %1 = vector.load %arg2[%c0_1, %c0_2] : memref<64x32xf32, #tpu.memory_space<vmem>>, vector<64x32xf32>
    %cst = arith.constant dense<0.000000e+00> : vector<2x32xf32>
    %2 = tpu.matmul %0, %1, %cst {dimension_numbers = #tpu.dot_dimension_numbers<[1], [0], [0], [1], [0, 0, 1, 1], [], []>} : vector<2x64xf32>, vector<64x32xf32>, vector<2x32xf32> -> vector<2x32xf32>
    %c0_3 = arith.constant 0 : index
    %c0_4 = arith.constant 0 : index
    %3 = vector.load %arg3[%c0_3, %c0_4] : memref<1x32xf32, #tpu.memory_space<vmem>>, vector<1x32xf32>
    %4 = vector.broadcast %3 : vector<1x32xf32> to vector<2x32xf32>
    %5 = arith.addf %2, %4 : vector<2x32xf32>
    %c0_5 = arith.constant 0 : index
    %c0_6 = arith.constant 0 : index
    %6 = vector.load %arg8[%c0_5, %c0_6] : memref<2x32xf32, #tpu.memory_space<vmem>>, vector<2x32xf32>
    tpu.vector_store %arg8[%c0_5, %c0_6], %5 {strides = array<i32>} : memref<2x32xf32, #tpu.memory_space<vmem>>, vector<2x32xf32>,
    %c0_7 = arith.constant 0 : index
    %c0_8 = arith.constant 0 : index
    %7 = vector.load %arg4[%c0_7, %c0_8] : memref<64x64xf32, #tpu.memory_space<vmem>>, vector<64x64xf32>
    %cst_9 = arith.constant dense<0.000000e+00> : vector<2x64xf32>
    %8 = tpu.matmul %0, %7, %cst_9 {dimension_numbers = #tpu.dot_dimension_numbers<[1], [0], [0], [1], [0, 0, 1, 1], [], []>} : vector<2x64xf32>, vector<64x64xf32>, vector<2x64xf32> -> vector<2x64xf32>
    %c0_10 = arith.constant 0 : index
    %c0_11 = arith.constant 0 : index
    %9 = vector.load %arg5[%c0_10, %c0_11] : memref<1x64xf32, #tpu.memory_space<vmem>>, vector<1x64xf32>
    %10 = vector.broadcast %9 : vector<1x64xf32> to vector<2x64xf32>
    %11 = arith.addf %8, %10 : vector<2x64xf32>
    %cst_12 = arith.constant 0.000000e+00 : f32
    %12 = vector.broadcast %cst_12 : f32 to vector<2x64xf32>
    %13 = arith.maximumf %11, %12 : vector<2x64xf32>
    %c0_13 = arith.constant 0 : index
    %c0_14 = arith.constant 0 : index
    %14 = vector.load %arg6[%c0_13, %c0_14] : memref<64x16xf32, #tpu.memory_space<vmem>>, vector<64x16xf32>
    %cst_15 = arith.constant dense<0.000000e+00> : vector<2x16xf32>
    %15 = tpu.matmul %13, %14, %cst_15 {dimension_numbers = #tpu.dot_dimension_numbers<[1], [0], [0], [1], [0, 0, 1, 1], [], []>} : vector<2x64xf32>, vector<64x16xf32>, vector<2x16xf32> -> vector<2x16xf32>
    %c0_16 = arith.constant 0 : index
    %c0_17 = arith.constant 0 : index
    %16 = vector.load %arg7[%c0_16, %c0_17] : memref<1x16xf32, #tpu.memory_space<vmem>>, vector<1x16xf32>
    %17 = vector.broadcast %16 : vector<1x16xf32> to vector<2x16xf32>
    %18 = arith.addf %15, %17 : vector<2x16xf32>
    %cst_18 = arith.constant dense<0xFF800000> : vector<2xf32>
    %19 = vector.multi_reduction <maximumf>, %18, %cst_18 [1] : vector<2x16xf32> to vector<2xf32>
    %20 = vector.shape_cast %19 : vector<2xf32> to vector<2x1xf32>
    %21 = vector.broadcast %20 : vector<2x1xf32> to vector<2x16xf32>
    %22 = arith.subf %18, %21 : vector<2x16xf32>
    %23 = math.exp %22 : vector<2x16xf32>
    %cst_19 = arith.constant dense<0.000000e+00> : vector<2xf32>
    %24 = vector.multi_reduction <add>, %23, %cst_19 [1] : vector<2x16xf32> to vector<2xf32>
    %25 = vector.shape_cast %24 : vector<2xf32> to vector<2x1xf32>
    %26 = vector.broadcast %25 : vector<2x1xf32> to vector<2x16xf32>
    %27 = arith.divf %23, %26 : vector<2x16xf32>
    %c0_20 = arith.constant 0 : index
    %c0_21 = arith.constant 0 : index
    %28 = vector.load %arg9[%c0_20, %c0_21] : memref<2x16xf32, #tpu.memory_space<vmem>>, vector<2x16xf32>
    tpu.vector_store %arg9[%c0_20, %c0_21], %27 {strides = array<i32>} : memref<2x16xf32, #tpu.memory_space<vmem>>, vector<2x16xf32>,
    return
  }
  func.func @transform_0(%arg0: i32) -> (i32, i32) {
    %c0_i32 = arith.constant 0 : i32
    %c0_i32_0 = arith.constant 0 : i32
    %c0_i32_1 = arith.constant 0 : i32
    return %c0_i32, %c0_i32_0 : i32, i32
  }
  func.func @transform_1(%arg0: i32) -> (i32, i32) {
    %c0_i32 = arith.constant 0 : i32
    %c0_i32_0 = arith.constant 0 : i32
    %c0_i32_1 = arith.constant 0 : i32
    return %c0_i32, %c0_i32_0 : i32, i32
  }
  func.func @transform_2(%arg0: i32) -> (i32, i32) {
    %c0_i32 = arith.constant 0 : i32
    %c0_i32_0 = arith.constant 0 : i32
    %c0_i32_1 = arith.constant 0 : i32
    return %c0_i32, %c0_i32_0 : i32, i32
  }
  func.func @transform_3(%arg0: i32) -> (i32, i32) {
    %c0_i32 = arith.constant 0 : i32
    %c0_i32_0 = arith.constant 0 : i32
    %c0_i32_1 = arith.constant 0 : i32
    return %c0_i32, %c0_i32_0 : i32, i32
  }
  func.func @transform_4(%arg0: i32) -> (i32, i32) {
    %c0_i32 = arith.constant 0 : i32
    %c0_i32_0 = arith.constant 0 : i32
    %c0_i32_1 = arith.constant 0 : i32
    return %c0_i32, %c0_i32_0 : i32, i32
  }
  func.func @transform_5(%arg0: i32) -> (i32, i32) {
    %c0_i32 = arith.constant 0 : i32
    %c0_i32_0 = arith.constant 0 : i32
    %c0_i32_1 = arith.constant 0 : i32
    return %c0_i32, %c0_i32_0 : i32, i32
  }
  func.func @transform_6(%arg0: i32) -> (i32, i32) {
    %c0_i32 = arith.constant 0 : i32
    %c0_i32_0 = arith.constant 0 : i32
    %c0_i32_1 = arith.constant 0 : i32
    return %c0_i32, %c0_i32_0 : i32, i32
  }
  func.func @transform_7(%arg0: i32) -> (i32, i32) {
    %c0_i32 = arith.constant 0 : i32
    %c0_i32_0 = arith.constant 0 : i32
    %c0_i32_1 = arith.constant 0 : i32
    return %c0_i32, %c0_i32_0 : i32, i32
  }
  func.func @transform_8(%arg0: i32) -> (i32, i32) {
    %c0_i32 = arith.constant 0 : i32
    %c0_i32_0 = arith.constant 0 : i32
    %c0_i32_1 = arith.constant 0 : i32
    return %c0_i32, %c0_i32_0 : i32, i32
  }
}

</mosaic_0001>

<bundles_post_ra>
// kernel: slicer_forward.7
= control target key start
LH: loop header
LB: loop body
LE: loop exit
PB: predicated region body
PF: predicated region fallthrough
CT: control target
= control target key end

     0   :  { %s2514_s12 = smov 0   ;;  %s2941_s0 = inlined_call_operand.vmem [shape: bf16[2,10,6,64], index: 0, kind: input, shape index: {}]   ;;  %s2942_s1 = inlined_call_operand.vmem [shape: bf16[576,64], index: 1, kind: input, shape index: {}]   ;;  %s2943_s2 = inlined_call_operand.vmem [shape: f32[1,64], index: 2, kind: input, shape index: {}]   ;;  %s2944_s3 = inlined_call_operand.vmem [shape: bf16[2,4,2,64], index: 3, kind: output, shape index: {}]  }
   0x1 LB: > { %s2143_s13 = sadd.s32 4294967295, %s2488_s12   ;;  %p2147_p0 = scmp.ge.s32.totalorder %s2488_s12, 1  ;;  %s2488_s12 = sphi %s2514_s12, %s13_s12  }
   0x2   : > { %p137_p1 = scmp.lt.s32.totalorder %s2488_s12, 3 }
   0x4   : > { %p138_p2 = pnand %p2147_p0, %p137_p1 }
   0x5   : > { %p160_p3 = scmp.lt.s32.totalorder (!%p138_p2), %s2143_s13, 1  ;;  %s2490_s5 = smov (!%p138_p2), 64  }
   0x6   : > { %141 = sbr.rel (%p138_p2) target bundleno = 472 (0x1d8), region = 32 }
   0xb   : > { %v2422_v0 = vld [vmem:[%s2942_s1 + $0x78] sm:$0xff]   ;;  %s2946_s13 = smov (!%p160_p3, %s2143_s13), 1  ;;  %v2426_v2 = vld [vmem:[%s2942_s1 + $0x70] sm:$0xff]   ;;  %v2430_v4 = vld [vmem:[%s2942_s1 + $0x68] sm:$0xff]   ;;  %vm668_vm0 = vcmask 523264   ;;  %vm1643_vm1 = vcmask 517120  }
   0xc   : > { %v2423_v1 = vld [vmem:[%s2942_s1 + $0x38] sm:$0xff]   ;;  %2303 = vmatprep.subr.bf16.mxu0 %v2422_v0  ;;  %s2377_s20 = smul.u32 40, %s2946_s13  ;;  %v2427_v3 = vld [vmem:[%s2942_s1 + $0x30] sm:$0xff]   ;;  %v2431_v6 = vld [vmem:[%s2942_s1 + $0x28] sm:$0xff]   ;;  %vm2013_vm2 = vcmask 1041409   ;;  %vm2085_vm3 = vcmask 516096  }
   0xd   : > { %2304 = vmatpush3.bf16.msra.mxu0 %v2423_v1  ;;  %v2435_v8 = vld [vmem:[%s2942_s1 + $0xf8] sm:$0xff]   ;;  %v2434_v10 = vld [vmem:[%s2942_s1 + $0x60] sm:$0xff]   ;;  %v2439_v26 = vld [vmem:[%s2942_s1 + $0xf0] sm:$0xff]  }
   0xe   : > { %2305 = vmatprep.subr.bf16.mxu0 %v2426_v2  ;;  %s2543_s27 = scalar_lea.vmem %s2941_s0, %s2377_s20  ;;  %2331 = vmatprep.subr.bf16.mxu1 %v2435_v8  ;;  %v2437_v12 = vld [vmem:[%s2942_s1 + $0xb8] sm:$0xff]   ;;  %v2436_v14 = vld [vmem:[%s2942_s1 + $0x20] sm:$0xff]   ;;  %v2441_v49 = vld [vmem:[%s2942_s1 + $0xb0] sm:$0xff]   ;;  %s2149_s20 = sshll.u32 %s2946_s13, 2 }
   0xf   : > { %v2390_v5 = vld [vmem:[%s2543_s27 + $0x8] ss:$0 sps:$4 sm:$0x33]   ;;  %v2391_v7 = vld [vmem:[%s2543_s27 + $0x4] ss:$0 sps:$4 sm:$0x33]   ;;  %2332 = vmatpush3.bf16.msra.mxu1 %v2437_v12  ;;  %s2899_s23 = scalar_lea.vmem %s2944_s3, %s2149_s20 }
  0x10   : > { %398 = vrot.lane.b32.xlu1 %v2390_v5, %s2490_s5  ;;  %v2392_v9 = vld [vmem:[%s2543_s27 + $0x10] ss:$0 sps:$4 sm:$0x33]   ;;  %396 = vrot.lane.b32.xlu0 %v2391_v7, %s2490_s5  ;;  %v2393_v11 = vld [vmem:[%s2543_s27 + $0xc] ss:$0 sps:$4 sm:$0x33]  }
  0x11   : > { %2306 = vmatpush3.bf16.msra.mxu0 %v2427_v3  ;;  %v2394_v13 = vld [vmem:[%s2543_s27 + $0x8] ss:$0 sps:$4 sm:$0x66]   ;;  %v2395_v15 = vld [vmem:[%s2543_s27 + $0x4] ss:$0 sps:$4 sm:$0x66]   ;;  %2333 = vmatprep.subr.bf16.mxu1 %v2439_v26 }
  0x12   : > { %2307 = vmatprep.subr.bf16.mxu0 %v2430_v4  ;;  %v2438_v16 = vld [vmem:[%s2942_s1 + $0x58] sm:$0xff]   ;;  %v517_v17 = vrot.slane %v2394_v13, 1  ;;  %v2396_v18 = vld [vmem:[%s2543_s27 + $0x8] ss:$0 sps:$4 sm:$0x77]   ;;  %v516_v19 = vrot.slane %v2395_v15, 1 }
  0x13   : > { %v2397_v20 = vld [vmem:[%s2543_s27] ss:$0 sps:$4 sm:$0x77]   ;;  %v283_v21 = vshrl.u32 %v2396_v18, 16  ;;  %v285_v22 = vshll.u32 %v2396_v18, 16  ;;  %v2440_v39 = vld [vmem:[%s2942_s1 + $0x18] sm:$0xff]   ;;  %2334 = vmatpush3.bf16.msra.mxu1 %v2441_v49 }
  0x14   : > { %402 = vrot.lane.b32.xlu1 %v2392_v9, %s2490_s5  ;;  %400 = vrot.lane.b32.xlu0 %v2393_v11, %s2490_s5  ;;  %v269_v23 = vshrl.u32 %v2397_v20, 16  ;;  %v271_v24 = vshll.u32 %v2397_v20, 16  ;;  %v2398_v25 = vld [vmem:[%s2543_s27 + $0xc] ss:$0 sps:$4 sm:$0x77]  }
  0x15   : > { %2308 = vmatpush3.bf16.msra.mxu0 %v2431_v6  ;;  %v287_v27 = vrot.slane %v285_v22, 1  ;;  %v2399_v28 = vld [vmem:[%s2543_s27 + $0x4] ss:$0 sps:$4 sm:$0x77]   ;;  %v290_v30 = vshrl.u32 %v2398_v25, 16  ;;  %v292_v31 = vshll.u32 %v2398_v25, 16 }
  0x16   : > { %2309 = vmatprep.subr.bf16.mxu0 %v2434_v10  ;;  %v273_v29 = vrot.slane %v271_v24, 1  ;;  %v2400_v32 = vld [vmem:[%s2543_s27 + $0x10] ss:$0 sps:$4 sm:$0x66]   ;;  %v276_v34 = vshrl.u32 %v2399_v28, 16  ;;  %v278_v35 = vshll.u32 %v2399_v28, 16 }
  0x17   : > { %v288_v33 = vor.u32 %v287_v27, %v283_v21  ;;  %v294_v37 = vrot.slane %v292_v31, 1  ;;  %v2401_v38 = vld [vmem:[%s2543_s27 + $0xc] ss:$0 sps:$4 sm:$0x66]   ;;  %v519_v43 = vrot.slane %v2400_v32, 1 }
  0x18   : > { %526 = vrot.lane.b32.xlu1 %v517_v17, %s2490_s5  ;;  %524 = vrot.lane.b32.xlu0 %v516_v19, %s2490_s5  ;;  %v274_v36 = vor.u32 %v273_v29, %v269_v23  ;;  %v280_v40 = vrot.slane %v278_v35, 1  ;;  %v2402_v41 = vld [vmem:[%s2543_s27 + $0xc] ss:$0 sps:$4 sm:$0x77]   ;;  %v518_v46 = vrot.slane %v2401_v38, 1  ;;  %v2444_v29 = vld [vmem:[%s2942_s1 + $0x10] sm:$0xff]  }
  0x19   : > { %2310 = vmatpush3.bf16.msra.mxu0 %v2436_v14  ;;  %v295_v42 = vor.u32 %v294_v37, %v290_v30  ;;  %v2403_v44 = vld [vmem:[%s2543_s27 + $0x8] ss:$0 sps:$4 sm:$0x77]   ;;  %v574_v47 = vshll.u32 %v2402_v41, 16  ;;  %v572_v50 = vshrl.u32 %v2402_v41, 16  ;;  %v2442_v14 = vld [vmem:[%s2942_s1 + $0x50] sm:$0xff]  }
  0x1a   : > { %2311 = vmatprep.subr.bf16.mxu0 %v2438_v16  ;;  %v281_v45 = vor.u32 %v280_v40, %v276_v34  ;;  %v2404_v48 = vld [vmem:[%s2543_s27 + $0x14] ss:$0 sps:$4 sm:$0x77]   ;;  %v567_v51 = vshll.u32 %v2403_v44, 16  ;;  %v565_v53 = vshrl.u32 %v2403_v44, 16  ;;  %v2443_v23 = vld [vmem:[%s2942_s1 + $0xe8] sm:$0xff]  }
  0x1b   : > { %v576_v52 = vrot.slane %v574_v47, 1  ;;  %v588_v54 = vshll.u32 %v2404_v48, 16  ;;  %v2405_v55 = vld [vmem:[%s2543_s27 + $0x10] ss:$0 sps:$4 sm:$0x77]   ;;  %v586_v60 = vshrl.u32 %v2404_v48, 16  ;;  %2335 = vmatprep.subr.bf16.mxu1 %v2443_v23 }
  0x1c   : > { %328 = vrot.lane.b32.xlu1 %v288_v33, %s2490_s5  ;;  %324 = vrot.lane.b32.xlu0 %v274_v36, %s2490_s5  ;;  %v569_v56 = vrot.slane %v567_v51, 1  ;;  %v2406_v57 = vld [vmem:[%s2543_s27 + $0x14] ss:$0 sps:$4 sm:$0x77]   ;;  %v581_v58 = vshll.u32 %v2405_v55, 16  ;;  %v579_v63 = vshrl.u32 %v2405_v55, 16 }
  0x1d   : > { %2312 = vmatpush3.bf16.msra.mxu0 %v2440_v39  ;;  %v2407_v59 = vld [vmem:[%s2543_s27 + $0x10] ss:$0 sps:$4 sm:$0x77]   ;;  %v590_v61 = vrot.slane %v588_v54, 1  ;;  %v577_v62 = vor.u32 %v576_v52, %v572_v50  ;;  %v306_v1 = vshll.u32 %v2406_v57, 16  ;;  %v304_v7 = vshrl.u32 %v2406_v57, 16 }
  0x1e   : > { %v583_v0 = vrot.slane %v581_v58, 1  ;;  %v2408_v2 = vld [vmem:[%s2543_s27 + $0x1c] ss:$0 sps:$4 sm:$0x77]   ;;  %v570_v3 = vor.u32 %v569_v56, %v565_v53  ;;  %v299_v4 = vshll.u32 %v2407_v59, 16  ;;  %v297_v11 = vshrl.u32 %v2407_v59, 16  ;;  %2313 = vmatprep.subr.bf16.mxu0 %v2442_v14 }
  0x1f   : > { %v2409_v5 = vld [vmem:[%s2543_s27 + $0x18] ss:$0 sps:$4 sm:$0x77]   ;;  %v591_v6 = vor.u32 %v590_v61, %v586_v60  ;;  %v308_v8 = vrot.slane %v306_v1, 1  ;;  %v320_v9 = vshll.u32 %v2408_v2, 16  ;;  %v318_v16 = vshrl.u32 %v2408_v2, 16 }
  0x20   : > { %330 = vrot.lane.b32.xlu1 %v295_v42, %s2490_s5  ;;  %326 = vrot.lane.b32.xlu0 %v281_v45, %s2490_s5  ;;  %v584_v10 = vor.u32 %v583_v0, %v579_v63  ;;  %v301_v12 = vrot.slane %v299_v4, 1  ;;  %v313_v13 = vshll.u32 %v2409_v5, 16  ;;  %v311_v19 = vshrl.u32 %v2409_v5, 16  ;;  %v2410_v24 = vld [vmem:[%s2543_s27 + $0x18] ss:$0 sps:$4 sm:$0x33]  }
  0x21   : > { %v309_v15 = vor.u32 %v308_v8, %v304_v7  ;;  %v322_v17 = vrot.slane %v320_v9, 1  ;;  %v2411_v25 = vld [vmem:[%s2543_s27 + $0x14] ss:$0 sps:$4 sm:$0x33]   ;;  %2314 = vmatpush3.bf16.msra.mxu0 %v2444_v29  ;;  %v2445_v42 = vld [vmem:[%s2942_s1 + $0xa8] sm:$0xff]   ;;  %v2449_v54 = vld [vmem:[%s2942_s1 + $0xe0] sm:$0xff]  }
  0x22   : > { %v302_v18 = vor.u32 %v301_v12, %v297_v11  ;;  %v315_v20 = vrot.slane %v313_v13, 1  ;;  %v2414_v26 = vld [vmem:[%s2543_s27 + $0x18] ss:$0 sps:$4 sm:$0x66]   ;;  %2336 = vmatpush3.bf16.msra.mxu1 %v2445_v42  ;;  %v2450_v58 = vld [vmem:[%s2942_s1 + $0x8] sm:$0xff]   ;;  %v2451_v60 = vld [vmem:[%s2942_s1 + $0xa0] sm:$0xff]  }
  0x23   : > { %v323_v21 = vor.u32 %v322_v17, %v318_v16  ;;  %v2415_v27 = vld [vmem:[%s2543_s27 + $0x14] ss:$0 sps:$4 sm:$0x66]   ;;  %v2416_v28 = vld [vmem:[%s2543_s27 + $0x20] ss:$0 sps:$4 sm:$0x66]   ;;  %2337 = vmatprep.subr.bf16.mxu1 %v2449_v54 }
  0x24   : > { %530 = vrot.lane.b32.xlu1 %v519_v43, %s2490_s5  ;;  %528 = vrot.lane.b32.xlu0 %v518_v46, %s2490_s5  ;;  %v316_v22 = vor.u32 %v315_v20, %v311_v19  ;;  %v2412_v30 = vld [vmem:[%s2543_s27 + $0x20] ss:$0 sps:$4 sm:$0x33]   ;;  %v2417_v31 = vld [vmem:[%s2543_s27 + $0x1c] ss:$0 sps:$4 sm:$0x66]   ;;  %v802_v20 = vlaneseq }
  0x25   : > { %v2418_v32 = vld [vmem:[%s2543_s27 + $0x1c] ss:$0 sps:$4 sm:$0x77]   ;;  %v521_v34 = vrot.slane %v2414_v26, 1  ;;  %v520_v35 = vrot.slane %v2415_v27, 1  ;;  %v523_v37 = vrot.slane %v2416_v28, 1 }
  0x26   : > { %v2413_v33 = vld [vmem:[%s2543_s27 + $0x1c] ss:$0 sps:$4 sm:$0x33]   ;;  %v2419_v36 = vld [vmem:[%s2543_s27 + $0x18] ss:$0 sps:$4 sm:$0x77]   ;;  %2338 = vmatpush3.bf16.msra.mxu1 %v2451_v60 }
  0x27   : > { %v522_v38 = vrot.slane %v2417_v31, 1  ;;  %v600_v39 = vshrl.u32 %v2418_v32, 16  ;;  %v602_v40 = vshll.u32 %v2418_v32, 16  ;;  %v2420_v41 = vld [vmem:[%s2543_s27 + $0x24] ss:$0 sps:$4 sm:$0x77]  }
  0x28   : > { %622 = vrot.lane.b32.xlu1 %v577_v62, %s2490_s5  ;;  %620 = vrot.lane.b32.xlu0 %v570_v3, %s2490_s5  ;;  %v593_v43 = vshrl.u32 %v2419_v36, 16  ;;  %v595_v44 = vshll.u32 %v2419_v36, 16  ;;  %v2421_v45 = vld [vmem:[%s2543_s27 + $0x20] ss:$0 sps:$4 sm:$0x77]   ;;  %v2448_v46 = vld [vmem:[%s2942_s1 + $0x48] sm:$0xff]  }
  0x29   : > { %2315 = vmatprep.subr.bf16.mxu0 %v2448_v46  ;;  %v604_v47 = vrot.slane %v602_v40, 1  ;;  %v616_v48 = vshll.u32 %v2420_v41, 16  ;;  %v609_v50 = vshll.u32 %v2421_v45, 16  ;;  %v614_v52 = vshrl.u32 %v2420_v41, 16  ;;  %v2452_v62 = vld [vmem:[%s2942_s1 + $0x40] sm:$0xff]   ;;  %v2453_v63 = vld [vmem:[%s2942_s1 + $0xd8] sm:$0xff]  }
  0x2a   : > { %v597_v49 = vrot.slane %v595_v44, 1  ;;  %v607_v56 = vshrl.u32 %v2421_v45, 16  ;;  %2316 = vmatpush3.bf16.msra.mxu0 %v2450_v58  ;;  %v2454_v0 = vld [vmem:[%s2942_s1] sm:$0xff]   ;;  %2339 = vmatprep.subr.bf16.mxu1 %v2453_v63  ;;  %v2455_v1 = vld [vmem:[%s2942_s1 + $0x98] sm:$0xff]   ;;  %v2456_v2 = vld [vmem:[%s2942_s1 + $0xd0] sm:$0xff]   ;;  %v2708_v31 = vshrl.u32 %v802_v20, 7 }
  0x2b   : > { %v605_v51 = vor.u32 %v604_v47, %v600_v39  ;;  %v618_v53 = vrot.slane %v616_v48, 1  ;;  %v611_v57 = vrot.slane %v609_v50, 1  ;;  %2317 = vmatprep.subr.bf16.mxu0 %v2452_v62  ;;  %2340 = vmatpush3.bf16.msra.mxu1 %v2455_v1  ;;  %v2457_v3 = vld [vmem:[%s2942_s1 + $0x90] sm:$0xff]   ;;  %v2458_v4 = vld [vmem:[%s2942_s1 + $0xc8] sm:$0xff]   ;;  %v2690_v7 = vld [vmem:[%s2942_s1 + $0x118] sm:$0xff]  }
  0x2c   : > { %626 = vrot.lane.b32.xlu1 %v591_v6, %s2490_s5  ;;  %624 = vrot.lane.b32.xlu0 %v584_v10, %s2490_s5  ;;  %v598_v55 = vor.u32 %v597_v49, %v593_v43  ;;  %v2459_v5 = vld [vmem:[%s2942_s1 + $0x88] sm:$0xff]   ;;  %v2460_v6 = vld [vmem:[%s2942_s1 + $0xc0] sm:$0xff]  }
  0x2d   : > { %v619_v59 = vor.u32 %v618_v53, %v614_v52  ;;  %v612_v61 = vor.u32 %v611_v57, %v607_v56  ;;  %2341 = vmatprep.subr.bf16.mxu1 %v2456_v2  ;;  %v2461_v8 = vld [vmem:[%s2942_s1 + $0x80] sm:$0xff]   ;;  %v2429_v13 = vld [vmem:[%s2543_s27 + $0x8] ss:$0 sps:$4 sm:$0x66]   ;;  %v173_v39 = vld [vmem:[%s2543_s27 + $0xc] sm:$0x3] }
  0x2e   : > { %2318 = vmatpush3.bf16.msra.mxu0 %v2454_v0  ;;  %v2432_v14 = vld [vmem:[%s2543_s27 + $0x8] ss:$0 sps:$4 sm:$0x77]   ;;  %v2433_v17 = vld [vmem:[%s2543_s27 + $0x4] ss:$0 sps:$4 sm:$0x77]  }
  0x2f   : > { %2342 = vmatpush3.bf16.msra.mxu1 %v2457_v3  ;;  %2365 = vmatprep.subr.bf16.mxu0 %v2690_v7  ;;  %v2424_v23 = vld [vmem:[%s2543_s27 + $0x4] ss:$0 sps:$4 sm:$0x66]   ;;  %v446_v26 = vshll.u32 %v2432_v14, 16  ;;  %v170_v27 = vld [vmem:[%s2543_s27] sm:$0x3] }
  0x30   : > { %334 = vrot.lane.b32.xlu1 %v309_v15, %s2490_s5  ;;  %332 = vrot.lane.b32.xlu0 %v302_v18, %s2490_s5  ;;  %v2425_v15 = vld [vmem:[%s2543_s27] ss:$0 sps:$4 sm:$0x66]   ;;  %v2491_v18 = vmov 1983009808   ;;  %v439_v29 = vshll.u32 %v2433_v17, 16 }
  0x31   : > { %2343 = vmatprep.subr.bf16.mxu1 %v2458_v4  ;;  %v800_v19 = vunpack.c.l.s4 %v2491_v18  ;;  %v364_v28 = vrot.slane %v2425_v15, 1  ;;  %v2446_v36 = vld [vmem:[%s2543_s27 + $0x10] ss:$0 sps:$4 sm:$0x77]   ;;  %v444_v42 = vshrl.u32 %v2432_v14, 16  ;;  %v448_v43 = vrot.slane %v446_v26, 1 }
  0x32   : > { %v2447_v40 = vld [vmem:[%s2543_s27 + $0xc] ss:$0 sps:$4 sm:$0x77]   ;;  %v437_v44 = vshrl.u32 %v2433_v17, 16  ;;  %v171_v45 = vld [vmem:[%s2543_s27 + $0x4] sm:$0x3] }
  0x33   : > { %2344 = vmatpush3.bf16.msra.mxu1 %v2459_v5  ;;  %v441_v47 = vrot.slane %v439_v29, 1  ;;  %v458_v3 = vshrl.u32 %v2446_v36, 16  ;;  %v2176_v29 = vld [vmem:[%s2543_s27 + $0x10] sm:$0x3] }
  0x34   : > { %338 = vrot.lane.b32.xlu1 %v323_v21, %s2490_s5  ;;  %336 = vrot.lane.b32.xlu0 %v316_v22, %s2490_s5  ;;  %v2428_v21 = vld [vmem:[%s2543_s27 + $0xc] ss:$0 sps:$4 sm:$0x66]  }
  0x35   : > { %2345 = vmatprep.subr.bf16.mxu1 %v2460_v6  ;;  %v442_v6 = vor.u32 %v441_v47, %v437_v44 }
  0x37   : > { %2346 = vmatpush3.bf16.msra.mxu1 %v2461_v8  ;;  %v451_v8 = vshrl.u32 %v2447_v40, 16 }
  0x38   : > { %406 = vrot.lane.b32.xlu1 %v2410_v24, %s2490_s5  ;;  %404 = vrot.lane.b32.xlu0 %v2411_v25, %s2490_s5  ;;  %v172_v24 = vld [vmem:[%s2543_s27 + $0x8] sm:$0x3]  ;;  %v366_v25 = vrot.slane %v2429_v13, 1 }
  0x3c   : > { %410 = vrot.lane.b32.xlu1 %v2412_v30, %s2490_s5  ;;  %408 = vrot.lane.b32.xlu0 %v2413_v33, %s2490_s5  ;;  %v801_v30 = vunpack.c.0.s8 %v800_v19  ;;  %v367_v33 = vrot.slane %v2428_v21, 1 }
  0x3e   : > { %v2719_v48 = vsub.s32 %v801_v30, %v2708_v31 }
  0x40   : > { %534 = vrot.lane.b32.xlu1 %v521_v34, %s2490_s5  ;;  %532 = vrot.lane.b32.xlu0 %v520_v35, %s2490_s5 }
  0x44   : > { %538 = vrot.lane.b32.xlu1 %v523_v37, %s2490_s5  ;;  %536 = vrot.lane.b32.xlu0 %v522_v38, %s2490_s5  ;;  %v365_v37 = vrot.slane %v2424_v23, 1 }
  0x48   : > { %630 = vrot.lane.b32.xlu1 %v605_v51, %s2490_s5  ;;  %628 = vrot.lane.b32.xlu0 %v598_v55, %s2490_s5  ;;  %v460_v55 = vshll.u32 %v2446_v36, 16 }
  0x4a   : > { %v462_v4 = vrot.slane %v460_v55, 1  ;;  %v2476_v55 = vld [vmem:[%s2543_s27 + $0x10] ss:$0 sps:$4 sm:$0x66]  }
  0x4c   : > { %634 = vrot.lane.b32.xlu1 %v619_v59, %s2490_s5  ;;  %632 = vrot.lane.b32.xlu0 %v612_v61, %s2490_s5  ;;  %v453_v59 = vshll.u32 %v2447_v40, 16  ;;  %v449_v61 = vor.u32 %v448_v43, %v444_v42  ;;  %v463_v18 = vor.u32 %v462_v4, %v458_v3  ;;  %v2462_v42 = vld [vmem:[%s2543_s27 + $0x14] ss:$0 sps:$4 sm:$0x66]   ;;  %v174_v3 = vld [vmem:[%s2543_s27 + $0x10] sm:$0x3] }
  0x82   : > { %v399_v9 = vpop.permute.xlu1 %398  ;;  %v397_v10 = vpop.permute.xlu0 %396 }
  0x83   : > { %v695_v46 = vsel %vm668_vm0, %v364_v28, %v397_v10  ;;  %v698_v56 = vsel %vm668_vm0, %v365_v37, %v399_v9  ;;  %v455_v9 = vrot.slane %v453_v59, 1  ;;  %v2175_v10 = vld [vmem:[%s2543_s27 + $0xc] sm:$0x3]  ;;  %v369_v59 = vrot.slane %v2462_v42, 1 }
  0x86   : > { %v403_v11 = vpop.permute.xlu1 %402  ;;  %v401_v12 = vpop.permute.xlu0 %400 }
  0x87   : > { %v701_v41 = vsel %vm668_vm0, %v366_v25, %v401_v12  ;;  %v704_v51 = vsel %vm668_vm0, %v367_v33, %v403_v11  ;;  %v2174_v12 = vld [vmem:[%s2543_s27 + $0x8] sm:$0x3]  ;;  %v2471_v33 = vld [vmem:[%s2942_s1 + $0x110] sm:$0xff]  }
  0x8a   : > { %v2699_v16 = vpop.permute.xlu1 %526  ;;  %v2703_v22 = vpop.permute.xlu0 %524 }
  0x8b   : > { %v722_v17 = vsel %vm668_vm0, %v449_v61, %v2699_v16  ;;  %v719_v23 = vsel %vm668_vm0, %v442_v6, %v2703_v22  ;;  %v2473_v61 = vld [vmem:[%s2942_s1 + $0x100] sm:$0xff]  }
  0x8e   : > { %v329_v32 = vpop.permute.xlu1 %328  ;;  %v325_v35 = vpop.permute.xlu0 %324 }
  0x8f   : > { %v677_v34 = vsel %vm668_vm0, %v172_v24, %v329_v32  ;;  %v671_v38 = vsel %vm668_vm0, %v170_v27, %v325_v35  ;;  %v456_v24 = vor.u32 %v455_v9, %v451_v8  ;;  %v2177_v27 = vld [vmem:[%s2543_s27 + $0x14] sm:$0x3] }
  0x90   : > { %v845_v49 = vcombine.low %v677_v34, %v701_v41  ;;  %v797_v52 = vcombine.low %v671_v38, %v695_v46  ;;  %v2472_v46 = vld [vmem:[%s2942_s1 + $0x108] sm:$0xff]  }
  0x92   : > { %v331_v50 = vpop.permute.xlu1 %330  ;;  %v327_v54 = vpop.permute.xlu0 %326  ;;  %v853_v62 = vrot.slane %v845_v49, %v2719_v48  ;;  %v805_v1 = vrot.slane %v797_v52, %v2719_v48  ;;  %v2762_v52 = vld [vmem:[%s2543_s27 + $0x18] ss:$0 sps:$4 sm:$0x66]  }
  0x93   : > { %v680_v53 = vsel %vm668_vm0, %v173_v39, %v331_v50  ;;  %v674_v58 = vsel %vm668_vm0, %v171_v45, %v327_v54  ;;  %v2463_v45 = vld [vmem:[%s2543_s27 + $0x10] ss:$0 sps:$4 sm:$0x66]  }
  0x94   : > { %v869_v57 = vcombine.low %v680_v53, %v704_v51  ;;  %v821_v60 = vcombine.low %v674_v58, %v698_v56  ;;  %v2759_v51 = vld [vmem:[%s2543_s27 + $0x1c] ss:$0 sps:$4 sm:$0x66]   ;;  %v2475_v53 = vld [vmem:[%s2543_s27 + $0xc] ss:$0 sps:$4 sm:$0x66]  }
  0x95   : > { %v2477_v56 = vld [vmem:[%s2543_s27 + $0x14] ss:$0 sps:$4 sm:$0x66]   ;;  %v371_v4 = vrot.slane %v2759_v51, 1  ;;  %v661_v8 = vrot.slane %v2475_v53, 1 }
  0x96   : > { %v877_v63 = vrot.slane %v869_v57, %v2719_v48  ;;  %v531_v0 = vpop.permute.xlu1 %530  ;;  %v829_v2 = vrot.slane %v821_v60, %v2719_v48  ;;  %v529_v5 = vpop.permute.xlu0 %528  ;;  %v175_v57 = vld [vmem:[%s2543_s27 + $0x14] sm:$0x3]  ;;  %v368_v60 = vrot.slane %v2463_v45, 1 }
  0x97   : > { %v728_v34 = vsel %vm668_vm0, %v463_v18, %v531_v0  ;;  %v725_v38 = vsel %vm668_vm0, %v456_v24, %v529_v5  ;;  %v370_v5 = vrot.slane %v2762_v52, 1 }
  0x98   : > { %v2257_v11 = vcombine.low %v853_v62, %v877_v63  ;;  %v2255_v13 = vcombine.low %v805_v1, %v829_v2  ;;  %v2775_v1 = vld [vmem:[%s2543_s27 + $0x18] ss:$0 sps:$4 sm:$0x77]   ;;  %v2778_v2 = vld [vmem:[%s2543_s27 + $0x14] ss:$0 sps:$4 sm:$0x77]  }
  0x99   : > { %v472_v51 = vshrl.u32 %v2775_v1, 16 }
  0x9a   : > { %v623_v14 = vpop.permute.xlu1 %622  ;;  %v1092_v15 = vrot.slane %v2257_v11, %v2719_v48  ;;  %v621_v20 = vpop.permute.xlu0 %620  ;;  %v1078_v21 = vrot.slane %v2255_v13, %v2719_v48  ;;  %v662_v11 = vrot.slane %v2476_v55, 1  ;;  %v2478_v13 = vld [vmem:[%s2543_s27 + $0x18] ss:$0 sps:$4 sm:$0x66]  }
  0x9b   : > { %v746_v19 = vsel %vm668_vm0, %v2175_v10, %v623_v14  ;;  %v743_v26 = vsel %vm668_vm0, %v2174_v12, %v621_v20  ;;  %v663_v12 = vrot.slane %v2477_v56, 1 }
  0x9c   : > { %v822_v25 = vcombine.low %v722_v17, %v746_v19  ;;  %v798_v28 = vcombine.low %v719_v23, %v743_v26  ;;  %v1101_v30 = vcombine.high %v1078_v21, %v1092_v15  ;;  %v1100_v32 = vcombine.low %v1078_v21, %v1092_v15  ;;  %v2479_v15 = vld [vmem:[%s2543_s27 + $0x1c] ss:$0 sps:$4 sm:$0x66]   ;;  %v2480_v17 = vld [vmem:[%s2543_s27 + $0x20] ss:$0 sps:$4 sm:$0x66]  }
  0x9d   : > { %v474_v21 = vshll.u32 %v2775_v1, 16  ;;  %v467_v23 = vshll.u32 %v2778_v2, 16 }
  0x9e   : > { %v627_v16 = vpop.permute.xlu1 %626  ;;  %v836_v22 = vrot.slane %v822_v25, %v2719_v48  ;;  %v812_v35 = vrot.slane %v798_v28, %v2719_v48  ;;  %v625_v37 = vpop.permute.xlu0 %624  ;;  %1436 = vmatprep.mubr.bf16.mxu0 %v1101_v30  ;;  %v177_v25 = vld [vmem:[%s2543_s27 + $0x1c] sm:$0x3]  ;;  %v176_v30 = vld [vmem:[%s2543_s27 + $0x18] sm:$0x3] }
  0x9f   : > { %v752_v36 = vsel %vm668_vm0, %v2177_v27, %v627_v16  ;;  %v749_v40 = vsel %vm668_vm0, %v2176_v29, %v625_v37  ;;  %1437 = vmatmul.mubr.bf16.vlgmr.msra.gmra.mxu0 %v1100_v32  ;;  %v2481_v29 = vld [vmem:[%s2543_s27 + $0x24] ss:$0 sps:$4 sm:$0x66]   ;;  %v2469_v16 = vld [vmem:[%s2543_s27 + $0x20] ss:$0 sps:$4 sm:$0x77]  }
  0xa0   : > { %v870_v39 = vcombine.low %v728_v34, %v752_v36  ;;  %v846_v41 = vcombine.low %v725_v38, %v749_v40  ;;  %2366 = vmatpush3.bf16.msra.mxu0 %v2690_v7  ;;  %v2256_v50 = vcombine.low %v812_v35, %v836_v22  ;;  %v2474_v7 = vld [vmem:[%s2543_s27 + $0x8] ss:$0 sps:$4 sm:$0x66]   ;;  %v868_v34 = vrot.slane %v662_v11, %v2719_v48  ;;  %v2470_v36 = vld [vmem:[%s2543_s27 + $0x1c] ss:$0 sps:$4 sm:$0x77]  }
  0xa1   : > { %2367 = vmatprep.subr.bf16.mxu0 %v2471_v33  ;;  %v660_v6 = vrot.slane %v2474_v7, 1  ;;  %v892_v22 = vrot.slane %v663_v12, %v2719_v48  ;;  %v664_v37 = vrot.slane %v2478_v13, 1  ;;  %v665_v38 = vrot.slane %v2479_v15, 1 }
  0xa2   : > { %v884_v43 = vrot.slane %v870_v39, %v2719_v48  ;;  %v335_v44 = vpop.permute.xlu1 %334  ;;  %v860_v47 = vrot.slane %v846_v41, %v2719_v48  ;;  %v333_v49 = vpop.permute.xlu0 %332  ;;  %v1085_v63 = vrot.slane %v2256_v50, %v2719_v48  ;;  %v666_v39 = vrot.slane %v2480_v17, 1 }
  0xa3   : > { %v686_v18 = vsel %vm668_vm0, %v175_v57, %v335_v44  ;;  %v683_v24 = vsel %vm668_vm0, %v174_v3, %v333_v49  ;;  %v820_v28 = vrot.slane %v660_v6, %v2719_v48  ;;  %v667_v49 = vrot.slane %v2481_v29, 1 }
  0xa4   : > { %v2258_v54 = vcombine.low %v860_v47, %v884_v43  ;;  %2368 = vmatpush3.bf16.msra.mxu0 %v2471_v33  ;;  %v844_v33 = vrot.slane %v661_v8, %v2719_v48  ;;  %v1105_v7 = vcombine.low %v868_v34, %v892_v22  ;;  %v488_v56 = vshll.u32 %v2469_v16, 16 }
  0xa5   : > { %2369 = vmatprep.subr.bf16.mxu0 %v2472_v46  ;;  %v481_v57 = vshll.u32 %v2470_v36, 16  ;;  %v964_v1 = vrot.slane %v666_v39, %v2719_v48  ;;  %v988_v3 = vrot.slane %v667_v49, %v2719_v48  ;;  %v479_v12 = vshrl.u32 %v2470_v36, 16 }
  0xa6   : > { %v339_v58 = vpop.permute.xlu1 %338  ;;  %v337_v62 = vpop.permute.xlu0 %336  ;;  %v1099_v0 = vrot.slane %v2258_v54, %v2719_v48  ;;  %v1104_v52 = vcombine.low %v820_v28, %v844_v33  ;;  %v476_v54 = vrot.slane %v474_v21, 1  ;;  %v1119_v6 = vrot.slane %v1105_v7, %v2719_v48  ;;  %v2178_v21 = vld [vmem:[%s2543_s27 + $0x18] sm:$0x3] }
  0xa7   : > { %v692_v40 = vsel %vm668_vm0, %v177_v25, %v339_v58  ;;  %v689_v45 = vsel %vm668_vm0, %v176_v30, %v337_v62  ;;  %v940_v62 = vrot.slane %v665_v38, %v2719_v48  ;;  %v483_v13 = vrot.slane %v481_v57, 1  ;;  %v2180_v38 = vld [vmem:[%s2543_s27 + $0x20] sm:$0x3] }
  0xa8   : > { %v1103_v9 = vcombine.high %v1085_v63, %v1099_v0  ;;  %v1102_v10 = vcombine.low %v1085_v63, %v1099_v0  ;;  %2370 = vmatpush3.bf16.msra.mxu0 %v2472_v46  ;;  %v465_v63 = vshrl.u32 %v2778_v2, 16  ;;  %v469_v0 = vrot.slane %v467_v23, 1 }
  0xa9   : > { %2371 = vmatprep.subr.bf16.mxu0 %v2473_v61  ;;  %v477_v8 = vor.u32 %v476_v54, %v472_v51  ;;  %v484_v29 = vor.u32 %v483_v13, %v479_v12 }
  0xaa   : > { %v407_v14 = vpop.permute.xlu1 %406  ;;  %1485 = vmatprep.mubr.bf16.mxu1 %v1103_v9  ;;  %v405_v20 = vpop.permute.xlu0 %404  ;;  %v486_v9 = vshrl.u32 %v2469_v16, 16 }
  0xab   : > { %v710_v19 = vsel %vm668_vm0, %v369_v59, %v407_v14  ;;  %v707_v27 = vsel %vm668_vm0, %v368_v60, %v405_v20  ;;  %1486 = vmatmul.mubr.bf16.vlgmr.msra.gmra.mxu1 %v1102_v10  ;;  %v490_v10 = vrot.slane %v488_v56, 1  ;;  %v1158_v20 = vcombine.low %v964_v1, %v988_v3 }
  0xac   : > { %v917_v26 = vcombine.low %v686_v18, %v710_v19  ;;  %v893_v32 = vcombine.low %v683_v24, %v707_v27  ;;  %2372 = vmatpush3.bf16.msra.mxu0 %v2473_v61  ;;  %v916_v61 = vrot.slane %v664_v37, %v2719_v48  ;;  %v470_v18 = vor.u32 %v469_v0, %v465_v63  ;;  %v2179_v19 = vld [vmem:[%s2543_s27 + $0x1c] sm:$0x3] }
  0xad   : > { %v1172_v36 = vrot.slane %v1158_v20, %v2719_v48 }
  0xae   : > { %v411_v35 = vpop.permute.xlu1 %410  ;;  %v925_v41 = vrot.slane %v917_v26, %v2719_v48  ;;  %v901_v42 = vrot.slane %v893_v32, %v2719_v48  ;;  %v409_v44 = vpop.permute.xlu0 %408  ;;  %v1157_v17 = vcombine.low %v916_v61, %v940_v62  ;;  %v491_v26 = vor.u32 %v490_v10, %v486_v9 }
  0xaf   : > { %v716_v43 = vsel %vm668_vm0, %v371_v4, %v411_v35  ;;  %v713_v47 = vsel %vm668_vm0, %v370_v5, %v409_v44  ;;  %v1112_v5 = vrot.slane %v1104_v52, %v2719_v48  ;;  %v2181_v35 = vld [vmem:[%s2543_s27 + $0x24] sm:$0x3] }
  0xb0   : > { %v965_v46 = vcombine.low %v692_v40, %v716_v43  ;;  %v941_v50 = vcombine.low %v689_v45, %v713_v47  ;;  %v2259_v58 = vcombine.low %v901_v42, %v925_v41  ;;  %v1165_v16 = vrot.slane %v1157_v17, %v2719_v48 }
  0xb1   : > { %v1120_v25 = vcombine.low %v1112_v5, %v1119_v6  ;;  %v2254_v5 = vld [vmem:[%s2943_s2] ss:$0 sm:$0xff]  ;;  %v2492_v17 = vmov 1966171168  }
  0xb2   : > { %v973_v53 = vrot.slane %v965_v46, %v2719_v48  ;;  %v535_v55 = vpop.permute.xlu1 %534  ;;  %v949_v59 = vrot.slane %v941_v50, %v2719_v48  ;;  %v533_v60 = vpop.permute.xlu0 %532  ;;  %v1131_v2 = vrot.slane %v2259_v58, %v2719_v48  ;;  %v1173_v49 = vcombine.low %v1165_v16, %v1172_v36 }
  0xb3   : > { %v734_v28 = vsel %vm668_vm0, %v477_v8, %v535_v55  ;;  %v731_v33 = vsel %vm668_vm0, %v470_v18, %v533_v60  ;;  %v1781_v18 = vunpack.c.l.s4 %v2492_v17 }
  0xb4   : > { %v2261_v4 = vcombine.low %v949_v59, %v973_v53 }
  0xb6   : > { %v539_v11 = vpop.permute.xlu1 %538  ;;  %v537_v14 = vpop.permute.xlu0 %536  ;;  %v1145_v15 = vrot.slane %v2261_v4, %v2719_v48 }
  0xb7   : > { %v740_v40 = vsel %vm668_vm0, %v491_v26, %v539_v11  ;;  %v737_v45 = vsel %vm668_vm0, %v484_v29, %v537_v14 }
  0xb8   : > { %v1154_v23 = vcombine.high %v1131_v2, %v1145_v15  ;;  %v1153_v24 = vcombine.low %v1131_v2, %v1145_v15 }
  0xba   : > { %v631_v27 = vpop.permute.xlu1 %630  ;;  %v629_v32 = vpop.permute.xlu0 %628  ;;  %1444 = vmatprep.mubr.bf16.mxu0 %v1154_v23 }
  0xbb   : > { %v758_v30 = vsel %vm668_vm0, %v2179_v19, %v631_v27  ;;  %v755_v22 = vsel %vm668_vm0, %v2178_v21, %v629_v32  ;;  %1445 = vmatmul.mubr.bf16.gmra.mxu0 %v1153_v24  ;;  %v2493_v19 = vmov 1935823168  }
  0xbc   : > { %v918_v34 = vcombine.low %v734_v28, %v758_v30  ;;  %v894_v37 = vcombine.low %v731_v33, %v755_v22  ;;  %2373 = vmatprep.mubr.msk.bf16.mxu0 %vm668_vm0, %v1120_v25  ;;  %v1893_v20 = vunpack.c.l.s4 %v2493_v19  ;;  %v1782_v28 = vunpack.c.0.s8 %v1781_v18 }
  0xbe   : > { %v635_v39 = vpop.permute.xlu1 %634  ;;  %v932_v41 = vrot.slane %v918_v34, %v2719_v48  ;;  %v908_v42 = vrot.slane %v894_v37, %v2719_v48  ;;  %v633_v44 = vpop.permute.xlu0 %632  ;;  %v1894_v29 = vunpack.c.0.s8 %v1893_v20 }
  0xbf   : > { %v764_v43 = vsel %vm668_vm0, %v2181_v35, %v635_v39  ;;  %v761_v47 = vsel %vm668_vm0, %v2180_v38, %v633_v44 }
  0xc0   : > { %v966_v46 = vcombine.low %v740_v40, %v764_v43  ;;  %v942_v50 = vcombine.low %v737_v45, %v761_v47  ;;  %v2260_v52 = vcombine.low %v908_v42, %v932_v41  ;;  %v2852_v41 = vsub.s32 %v1782_v28, %v2708_v31 }
  0xc1   : > { %v2855_v42 = vsub.s32 %v1894_v29, %v2708_v31 }
  0xc2   : > { %v980_v51 = vrot.slane %v966_v46, %v2719_v48  ;;  %v956_v7 = vrot.slane %v942_v50, %v2719_v48  ;;  %v1138_v54 = vrot.slane %v2260_v52, %v2719_v48 }
  0xc3   : > { %2374 = vmatmul.mubr.msk.bf16.vlgmr.msra.gmra.mxu0 %vm668_vm0, %v1173_v49 }
  0xc4   : > { %v2262_v53 = vcombine.low %v956_v7, %v980_v51 }
  0xc6   : > { %v1152_v55 = vrot.slane %v2262_v53, %v2719_v48 }
  0xc8   : > { %v1156_v56 = vcombine.high %v1138_v54, %v1152_v55  ;;  %v1155_v57 = vcombine.low %v1138_v54, %v1152_v55 }
  0xca   : > { %1493 = vmatprep.mubr.bf16.mxu1 %v1156_v56 }
  0xcb   : > { %1494 = vmatmul.mubr.bf16.gmra.mxu1 %v1155_v57 }
 0x15f   : > { %v2319_v58 = vpop.f32.mrf.mxu0 }
 0x161   : > { %v2320_v59 = vpop.f32.mrf.mxu0 }
 0x162   : > { %v2321_v4 = vadd.f32 %v2320_v59, %v2319_v58 }
 0x163   : > { %v2322_v60 = vpop.f32.mrf.mxu0 }
 0x164   : > { %v1439_v11 = vadd.f32 %v2321_v4, %v2254_v5 }
 0x165   : > { %v2323_v62 = vpop.f32.mrf.mxu0 }
 0x166   : > { %v2324_v12 = vadd.f32 %v2323_v62, %v2322_v60 }
 0x168   : > { %v1442_v21 = vadd.f32 %v2324_v12, %v2254_v5 }
 0x16b   : > { %v2347_v61 = vpop.f32.mrf.mxu1 }
 0x16d   : > { %v2348_v63 = vpop.f32.mrf.mxu1 }
 0x16e   : > { %v2349_v8 = vadd.f32 %v2348_v63, %v2347_v61 }
 0x16f   : > { %v2350_v1 = vpop.f32.mrf.mxu1 }
 0x170   : > { %v1488_v2 = vadd.f32 %v2349_v8, %v1439_v11 }
 0x171   : > { %v2351_v9 = vpop.f32.mrf.mxu1 }
 0x172   : > { %v2352_v14 = vadd.f32 %v2351_v9, %v2350_v1 }
 0x174   : > { %v1491_v26 = vadd.f32 %v2352_v14, %v1442_v21 }
 0x17b   : > { %v2325_v0 = vpop.f32.mrf.mxu0 }
 0x17d   : > { %v2326_v3 = vpop.f32.mrf.mxu0 }
 0x17e   : > { %v2327_v27 = vadd.f32 %v2326_v3, %v2325_v0 }
 0x17f   : > { %v2328_v6 = vpop.f32.mrf.mxu0 }
 0x180   : > { %v1447_v39 = vadd.f32 %v2327_v27, %v2254_v5 }
 0x181   : > { %v2329_v10 = vpop.f32.mrf.mxu0 }
 0x182   : > { %v2330_v34 = vadd.f32 %v2329_v10, %v2328_v6 }
 0x183   : > { %v2844_v13 = vpop.f32.mrf.mxu0 }
 0x184   : > { %v1450_v7 = vadd.f32 %v2330_v34, %v2254_v5 }
 0x185   : > { %v1536_v15 = vpop.f32.mrf.mxu0 }
 0x186   : > { %v1537_v23 = vadd.f32 %v1536_v15, %v1488_v2 }
 0x187   : > { %v2846_v24 = vpop.f32.mrf.mxu0 }
 0x188   : > { %v1551_v25 = vmax.f32 %v1537_v23, 0.0 }
 0x189   : > { %v1539_v30 = vpop.f32.mrf.mxu0 }
 0x18a   : > { %v1559_v32 = vcombine.high %v1551_v25, %v1551_v25  ;;  %v1566_v16 = vrot.slane %v1551_v25, %v2719_v48  ;;  %v1540_v33 = vadd.f32 %v1539_v30, %v1491_v26 }
 0x18b   : > { %v2353_v22 = vpop.f32.mrf.mxu1 }
 0x18c   : > { %v1573_v35 = vrot.slane %v1559_v32, %v2719_v48  ;;  %v1574_v36 = vcombine.high %v1566_v16, %v1566_v16  ;;  %v1644_v37 = vsel %vm1643_vm1, %v1566_v16, -inf  ;;  %v1552_v38 = vmax.f32 %v1540_v33, 0.0 }
 0x18d   : > { %v1645_v40 = vrot.slane %v1644_v37, 4  ;;  %v2354_v43 = vpop.f32.mrf.mxu1 }
 0x18e   : > { %v1575_v44 = vcombine.high %v1573_v35, %v1573_v35  ;;  %v1651_v45 = vsel %vm1643_vm1, %v1574_v36, -inf  ;;  %v1658_v46 = vsel %vm1643_vm1, %v1573_v35, -inf  ;;  %v1576_v47 = vcombine.high %v1552_v38, %v1552_v38 }
 0x18f   : > { %v1646_v49 = vmax.f32 %v1644_v37, %v1645_v40  ;;  %v1652_v50 = vrot.slane %v1651_v45, 4  ;;  %v1659_v51 = vrot.slane %v1658_v46, 4  ;;  %v1583_v52 = vrot.slane %v1552_v38, %v2719_v48  ;;  %v2356_v9 = vpop.f32.mrf.mxu1 }
 0x190   : > { %v1665_v53 = vsel %vm1643_vm1, %v1575_v44, -inf  ;;  %v1590_v54 = vrot.slane %v1576_v47, %v2719_v48  ;;  %v2355_v55 = vadd.f32 %v2354_v43, %v2353_v22 }
 0x191   : > { %v1647_v31 = vrot.slane %v1646_v49, 2  ;;  %v1653_v56 = vmax.f32 %v1651_v45, %v1652_v50  ;;  %v1660_v57 = vmax.f32 %v1658_v46, %v1659_v51  ;;  %v1666_v58 = vrot.slane %v1665_v53, 4  ;;  %v2357_v29 = vpop.f32.mrf.mxu1 }
 0x192   : > { %v1591_v59 = vcombine.high %v1583_v52, %v1583_v52  ;;  %v1592_v60 = vcombine.high %v1590_v54, %v1590_v54  ;;  %v1672_v61 = vsel %vm1643_vm1, %v1583_v52, -inf  ;;  %v1686_v62 = vsel %vm1643_vm1, %v1590_v54, -inf }
 0x193   : > { %v1648_v63 = vmax.f32 %v1646_v49, %v1647_v31  ;;  %v1654_v0 = vrot.slane %v1653_v56, 2  ;;  %v1661_v1 = vrot.slane %v1660_v57, 2  ;;  %v1667_v3 = vmax.f32 %v1665_v53, %v1666_v58 }
 0x194   : > { %v1673_v4 = vrot.slane %v1672_v61, 4  ;;  %v1679_v5 = vsel %vm1643_vm1, %v1591_v59, -inf  ;;  %v1687_v6 = vrot.slane %v1686_v62, 4  ;;  %v1693_v8 = vsel %vm1643_vm1, %v1592_v60, -inf }
 0x195   : > { %v1649_v10 = vrot.slane %v1648_v63, 1  ;;  %v1655_v11 = vmax.f32 %v1653_v56, %v1654_v0  ;;  %v1662_v12 = vmax.f32 %v1660_v57, %v1661_v1  ;;  %v1668_v14 = vrot.slane %v1667_v3, 2 }
 0x196   : > { %v1674_v2 = vmax.f32 %v1672_v61, %v1673_v4  ;;  %v1680_v15 = vrot.slane %v1679_v5, 4  ;;  %v1688_v17 = vmax.f32 %v1686_v62, %v1687_v6  ;;  %v1694_v18 = vrot.slane %v1693_v8, 4 }
 0x197   : > { %v1650_v19 = vmax.f32 %v1648_v63, %v1649_v10  ;;  %v1656_v20 = vrot.slane %v1655_v11, 1  ;;  %v1663_v21 = vrot.slane %v1662_v12, 1  ;;  %v1669_v23 = vmax.f32 %v1667_v3, %v1668_v14 }
 0x198   : > { %v1675_v25 = vrot.slane %v1674_v2, 2  ;;  %v1681_v26 = vmax.f32 %v1679_v5, %v1680_v15  ;;  %v1689_v27 = vrot.slane %v1688_v17, 2  ;;  %v1695_v28 = vmax.f32 %v1693_v8, %v1694_v18 }
 0x199   : > { %v1657_v30 = vmax.f32 %v1655_v11, %v1656_v20  ;;  %v1664_v32 = vmax.f32 %v1662_v12, %v1663_v21  ;;  %v1670_v16 = vrot.slane %v1669_v23, 1  ;;  %v1496_v33 = vadd.f32 %v2355_v55, %v1447_v39 }
 0x19a   : > { %v1676_v34 = vmax.f32 %v1674_v2, %v1675_v25  ;;  %v1682_v22 = vrot.slane %v1681_v26, 2  ;;  %v1690_v35 = vmax.f32 %v1688_v17, %v1689_v27  ;;  %v1696_v36 = vrot.slane %v1695_v28, 2 }
 0x19b   : > { %v1671_v37 = vmax.f32 %v1669_v23, %v1670_v16  ;;  %v1756_v38 = vmax.f32 %v1650_v19, %v1664_v32  ;;  %v1545_v40 = vadd.f32 %v2844_v13, %v1496_v33  ;;  %v2358_v43 = vadd.f32 %v2357_v29, %v2356_v9 }
 0x19c   : > { %v1677_v44 = vrot.slane %v1676_v34, 1  ;;  %v1683_v45 = vmax.f32 %v1681_v26, %v1682_v22  ;;  %v1691_v46 = vrot.slane %v1690_v35, 1  ;;  %v1697_v47 = vmax.f32 %v1695_v28, %v1696_v36 }
 0x19d   : > { %v1757_v49 = vmax.f32 %v1657_v30, %v1671_v37  ;;  %v1764_v50 = vpack.c.bf16 %v1756_v38, %v1756_v38  ;;  %v1553_v51 = vmax.f32 %v1545_v40, 0.0  ;;  %v1499_v52 = vadd.f32 %v2358_v43, %v1450_v7 }
 0x19e   : > { %v1678_v53 = vmax.f32 %v1676_v34, %v1677_v44  ;;  %v1684_v54 = vrot.slane %v1683_v45, 1  ;;  %v1692_v39 = vmax.f32 %v1690_v35, %v1691_v46  ;;  %v1698_v55 = vrot.slane %v1697_v47, 1 }
 0x19f   : > { %v1765_v31 = vpack.c.bf16 %v1757_v49, %v1757_v49  ;;  %v1786_v56 = vrot.slane %v1764_v50, %v2852_v41  ;;  %v1593_v57 = vcombine.high %v1553_v51, %v1553_v51  ;;  %v1600_v58 = vrot.slane %v1553_v51, %v2719_v48 }
 0x1a0   : > { %v1685_v13 = vmax.f32 %v1683_v45, %v1684_v54  ;;  %v1699_v59 = vmax.f32 %v1697_v47, %v1698_v55  ;;  %v1758_v60 = vmax.f32 %v1678_v53, %v1692_v39  ;;  %v1548_v61 = vadd.f32 %v2846_v24, %v1499_v52 }
 0x1a1   : > { %v1793_v62 = vrot.slane %v1786_v56, %v2852_v41  ;;  %v1800_v63 = vrot.slane %v1765_v31, %v2852_v41  ;;  %v1607_v7 = vrot.slane %v1593_v57, %v2719_v48  ;;  %v1608_v0 = vcombine.high %v1600_v58, %v1600_v58 }
 0x1a2   : > { %v1759_v1 = vmax.f32 %v1685_v13, %v1699_v59  ;;  %v1766_v3 = vpack.c.bf16 %v1758_v60, %v1758_v60  ;;  %v1700_v4 = vsel %vm1643_vm1, %v1600_v58, -inf  ;;  %v1554_v5 = vmax.f32 %v1548_v61, 0.0 }
 0x1a3   : > { %v1807_v6 = vrot.slane %v1800_v63, %v2852_v41  ;;  %v1898_v8 = vrot.slane %v1793_v62, %v2855_v42  ;;  %v1609_v9 = vcombine.high %v1607_v7, %v1607_v7  ;;  %v1701_v10 = vrot.slane %v1700_v4, 4 }
 0x1a4   : > { %v1767_v24 = vpack.c.bf16 %v1759_v1, %v1759_v1  ;;  %v1814_v11 = vrot.slane %v1766_v3, %v2852_v41  ;;  %v1707_v12 = vsel %vm1643_vm1, %v1608_v0, -inf  ;;  %v1714_v14 = vsel %vm1643_vm1, %v1607_v7, -inf }
 0x1a5   : > { %v1905_v2 = vrot.slane %v1898_v8, %v2855_v42  ;;  %v1912_v15 = vrot.slane %v1807_v6, %v2855_v42  ;;  %v1702_v17 = vmax.f32 %v1700_v4, %v1701_v10  ;;  %v1708_v18 = vrot.slane %v1707_v12, 4 }
 0x1a6   : > { %v1821_v19 = vrot.slane %v1814_v11, %v2852_v41  ;;  %v1828_v20 = vrot.slane %v1767_v24, %v2852_v41  ;;  %v1715_v21 = vrot.slane %v1714_v14, 4  ;;  %v1721_v23 = vsel %vm1643_vm1, %v1609_v9, -inf }
 0x1a7   : > { %v1919_v25 = vrot.slane %v1912_v15, %v2855_v42  ;;  %v2004_v26 = vunpack.c.l.b16 %v1905_v2  ;;  %v1703_v27 = vrot.slane %v1702_v17, 2  ;;  %v1709_v28 = vmax.f32 %v1707_v12, %v1708_v18 }
 0x1a8   : > { %v1835_v29 = vrot.slane %v1828_v20, %v2852_v41  ;;  %v1926_v30 = vrot.slane %v1821_v19, %v2855_v42  ;;  %v1716_v32 = vmax.f32 %v1714_v14, %v1715_v21  ;;  %v1722_v16 = vrot.slane %v1721_v23, 4 }
 0x1a9   : > { %v2005_v33 = vunpack.c.l.b16 %v1919_v25  ;;  %v1704_v34 = vmax.f32 %v1702_v17, %v1703_v27  ;;  %v1710_v22 = vrot.slane %v1709_v28, 2  ;;  %v1610_v35 = vcombine.high %v1554_v5, %v1554_v5 }
 0x1aa   : > { %v1933_v36 = vrot.slane %v1926_v30, %v2855_v42  ;;  %v1940_v37 = vrot.slane %v1835_v29, %v2855_v42  ;;  %v1717_v38 = vrot.slane %v1716_v32, 2  ;;  %v1723_v40 = vmax.f32 %v1721_v23, %v1722_v16 }
 0x1ab   : > { %v2012_v43 = vrot.slane %v2005_v33, 7  ;;  %v1705_v44 = vrot.slane %v1704_v34, 1  ;;  %v1711_v45 = vmax.f32 %v1709_v28, %v1710_v22  ;;  %v1617_v46 = vrot.slane %v1554_v5, %v2719_v48 }
 0x1ac   : > { %v1947_v47 = vrot.slane %v1940_v37, %v2855_v42  ;;  %v2006_v49 = vunpack.c.l.b16 %v1933_v36  ;;  %v1718_v50 = vmax.f32 %v1716_v32, %v1717_v38  ;;  %v1724_v51 = vrot.slane %v1723_v40, 2 }
 0x1ad   : > { %v2014_v52 = vsel %vm2013_vm2, %v2012_v43, %v2004_v26  ;;  %v1706_v53 = vmax.f32 %v1704_v34, %v1705_v44  ;;  %v1712_v54 = vrot.slane %v1711_v45, 1  ;;  %v1624_v39 = vrot.slane %v1610_v35, %v2719_v48 }
 0x1ae   : > { %v2021_v55 = vpack.c.b16 %v2014_v52, %v2014_v52  ;;  %v2007_v31 = vunpack.c.l.b16 %v1947_v47  ;;  %v1719_v56 = vrot.slane %v1718_v50, 1  ;;  %v1725_v57 = vmax.f32 %v1723_v40, %v1724_v51 }
 0x1af   : > { %v1713_v58 = vmax.f32 %v1711_v45, %v1712_v54  ;;  %v1625_v13 = vcombine.high %v1617_v46, %v1617_v46  ;;  %v1626_v59 = vcombine.high %v1624_v39, %v1624_v39  ;;  %v1728_v60 = vsel %vm1643_vm1, %v1617_v46, -inf }
 0x1b0   : > { %v2031_v61 = vrot.slane %v2021_v55, %v2852_v41  ;;  %v2015_v62 = vrot.slane %v2007_v31, 7  ;;  %v1720_v63 = vmax.f32 %v1718_v50, %v1719_v56  ;;  %v1726_v7 = vrot.slane %v1725_v57, 1 }
 0x1b1   : > { %v1729_v48 = vrot.slane %v1728_v60, 4  ;;  %v1735_v0 = vsel %vm1643_vm1, %v1625_v13, -inf  ;;  %v1742_v1 = vsel %vm1643_vm1, %v1624_v39, -inf  ;;  %v1749_v3 = vsel %vm1643_vm1, %v1626_v59, -inf }
 0x1b2   : > { %v2038_v4 = vrot.slane %v2031_v61, %v2852_v41  ;;  %v2016_v5 = vsel %vm2013_vm2, %v2015_v62, %v2006_v49  ;;  %v1727_v6 = vmax.f32 %v1725_v57, %v1726_v7  ;;  %v1760_v8 = vmax.f32 %v1706_v53, %v1720_v63 }
 0x1b3   : > { %v2022_v9 = vpack.c.b16 %v2016_v5, %v2016_v5  ;;  %v1730_v10 = vmax.f32 %v1728_v60, %v1729_v48  ;;  %v1736_v24 = vrot.slane %v1735_v0, 4  ;;  %v1743_v11 = vrot.slane %v1742_v1, 4 }
 0x1b4   : > { %2086 = vst.msk [vmem:[%s2899_s23] sm:$0x1] %vm2085_vm3, %v2038_v4  ;;  %v1761_v12 = vmax.f32 %v1713_v58, %v1727_v6  ;;  %v1768_v14 = vpack.c.bf16 %v1760_v8, %v1760_v8  ;;  %v1750_v2 = vrot.slane %v1749_v3, 4 }
 0x1b5   : > { %v2045_v15 = vrot.slane %v2022_v9, %v2852_v41  ;;  %v1731_v17 = vrot.slane %v1730_v10, 2  ;;  %v1737_v18 = vmax.f32 %v1735_v0, %v1736_v24  ;;  %v1744_v19 = vmax.f32 %v1742_v1, %v1743_v11 }
 0x1b6   : > { %v1769_v20 = vpack.c.bf16 %v1761_v12, %v1761_v12  ;;  %v1842_v21 = vrot.slane %v1768_v14, %v2852_v41  ;;  %v1751_v23 = vmax.f32 %v1749_v3, %v1750_v2 }
 0x1b7   : > { %v2052_v25 = vrot.slane %v2045_v15, %v2852_v41  ;;  %v1732_v26 = vmax.f32 %v1730_v10, %v1731_v17  ;;  %v1738_v27 = vrot.slane %v1737_v18, 2  ;;  %v1745_v28 = vrot.slane %v1744_v19, 2 }
 0x1b8   : > { %v1849_v29 = vrot.slane %v1842_v21, %v2852_v41  ;;  %v1856_v30 = vrot.slane %v1769_v20, %v2852_v41  ;;  %v1752_v32 = vrot.slane %v1751_v23, 2 }
 0x1b9   : > { %2087 = vst.msk [vmem:[%s2899_s23 + $0x1] sm:$0x1] %vm2085_vm3, %v2052_v25  ;;  %v1733_v16 = vrot.slane %v1732_v26, 1  ;;  %v1739_v33 = vmax.f32 %v1737_v18, %v1738_v27  ;;  %v1746_v34 = vmax.f32 %v1744_v19, %v1745_v28 }
 0x1ba   : > { %v1863_v22 = vrot.slane %v1856_v30, %v2852_v41  ;;  %v1954_v35 = vrot.slane %v1849_v29, %v2855_v42  ;;  %v1753_v36 = vmax.f32 %v1751_v23, %v1752_v32 }
 0x1bb   : > { %v1740_v37 = vrot.slane %v1739_v33, 1  ;;  %v1747_v38 = vrot.slane %v1746_v34, 1  ;;  %v1734_v44 = vmax.f32 %v1732_v26, %v1733_v16 }
 0x1bc   : > { %v1968_v40 = vrot.slane %v1863_v22, %v2855_v42  ;;  %v1754_v43 = vrot.slane %v1753_v36, 1  ;;  %v1961_v46 = vrot.slane %v1954_v35, %v2855_v42 }
 0x1bd   : > { %v1748_v45 = vmax.f32 %v1746_v34, %v1747_v38  ;;  %v1741_v49 = vmax.f32 %v1739_v33, %v1740_v37 }
 0x1be   : > { %v1975_v47 = vrot.slane %v1968_v40, %v2855_v42  ;;  %v1755_v50 = vmax.f32 %v1753_v36, %v1754_v43  ;;  %v2008_v39 = vunpack.c.l.b16 %v1961_v46 }
 0x1bf   : > { %v1762_v51 = vmax.f32 %v1734_v44, %v1748_v45 }
 0x1c0   : > { %v2009_v52 = vunpack.c.l.b16 %v1975_v47  ;;  %v1763_v53 = vmax.f32 %v1741_v49, %v1755_v50 }
 0x1c1   : > { %v1770_v54 = vpack.c.bf16 %v1762_v51, %v1762_v51 }
 0x1c2   : > { %v2017_v55 = vrot.slane %v2009_v52, 7  ;;  %v1771_v31 = vpack.c.bf16 %v1763_v53, %v1763_v53 }
 0x1c3   : > { %v1870_v56 = vrot.slane %v1770_v54, %v2852_v41 }
 0x1c4   : > { %v2018_v57 = vsel %vm2013_vm2, %v2017_v55, %v2008_v39  ;;  %v1884_v58 = vrot.slane %v1771_v31, %v2852_v41 }
 0x1c5   : > { %v2023_v13 = vpack.c.b16 %v2018_v57, %v2018_v57  ;;  %v1877_v59 = vrot.slane %v1870_v56, %v2852_v41 }
 0x1c6   : > { %v1891_v60 = vrot.slane %v1884_v58, %v2852_v41 }
 0x1c7   : > { %v2059_v61 = vrot.slane %v2023_v13, %v2852_v41  ;;  %v1982_v62 = vrot.slane %v1877_v59, %v2855_v42 }
 0x1c8   : > { %v1996_v63 = vrot.slane %v1891_v60, %v2855_v42 }
 0x1c9   : > { %v2066_v7 = vrot.slane %v2059_v61, %v2852_v41  ;;  %v1989_v48 = vrot.slane %v1982_v62, %v2855_v42 }
 0x1ca   : > { %v2003_v0 = vrot.slane %v1996_v63, %v2855_v42 }
 0x1cb   : > { %2088 = vst.msk [vmem:[%s2899_s23 + $0x2] sm:$0x1] %vm2085_vm3, %v2066_v7  ;;  %v2010_v3 = vunpack.c.l.b16 %v1989_v48 }
 0x1cc   : > { %v2011_v1 = vunpack.c.l.b16 %v2003_v0 }
 0x1ce   : > { %v2019_v4 = vrot.slane %v2011_v1, 7 }
 0x1d0   : > { %v2020_v5 = vsel %vm2013_vm2, %v2019_v4, %v2010_v3 }
 0x1d1   : > { %v2024_v6 = vpack.c.b16 %v2020_v5, %v2020_v5 }
 0x1d3   : > { %v2073_v8 = vrot.slane %v2024_v6, %v2852_v41 }
 0x1d5   : > { %v2080_v9 = vrot.slane %v2073_v8, %v2852_v41 }
 0x1d7   : > { %2089 = vst.msk [vmem:[%s2899_s23 + $0x3] sm:$0x1] %vm2085_vm3, %v2080_v9 }
 0x1d8 PF: > { %s13_s12 = sadd.s32 1, %s2488_s12  }
 0x1d9   : > { %p10_p4 = scmp.ge.s32.totalorder %s13_s12, 4  }
 0x1db   :  { %12 = sbr.rel (!%p10_p4) target bundleno = 1 (0x1), region = 64 }

// kernel: slicer_forward.6
= control target key start
LH: loop header
LB: loop body
LE: loop exit
PB: predicated region body
PF: predicated region fallthrough
CT: control target
= control target key end

     0   :  { %s4161_s12 = smov 0   ;;  %s5444_s0 = inlined_call_operand.vmem [shape: bf16[2,18,10,64], index: 0, kind: input, shape index: {}]   ;;  %s5445_s1 = inlined_call_operand.vmem [shape: bf16[576,64], index: 1, kind: input, shape index: {}]   ;;  %s5446_s2 = inlined_call_operand.vmem [shape: f32[1,64], index: 2, kind: input, shape index: {}]   ;;  %s5447_s3 = inlined_call_operand.vmem [shape: bf16[2,10,6,64], index: 3, kind: output, shape index: {}]  }
   0x1 LB: > { %s3395_s13 = sadd.s32 4294967295, %s4136_s12   ;;  %p3399_p0 = scmp.ge.s32.totalorder %s4136_s12, 1  ;;  %s4136_s12 = sphi %s4161_s12, %s13_s12  }
   0x2   : > { %p137_p1 = scmp.lt.s32.totalorder %s4136_s12, 3 }
   0x4   : > { %p138_p2 = pnand %p3399_p0, %p137_p1 }
   0x6   : > { %141 = sbr.rel (%p138_p2) target bundleno = 647 (0x287), region = 32 }
   0xb   : > { %p161_p3 = scmp.lt.s32.totalorder %s3395_s13, 1  ;;  %v4028_v0 = vld [vmem:[%s5445_s1 + $0xf8] sm:$0xff]   ;;  %v4034_v4 = vld [vmem:[%s5445_s1 + $0xf0] sm:$0xff]   ;;  %s4138_s30 = smov 64   ;;  %v4040_v34 = vld [vmem:[%s5445_s1 + $0xe8] sm:$0xff]   ;;  %vm1230_vm0 = vcmask 523264  }
   0xc   : > { %v4029_v1 = vld [vmem:[%s5445_s1 + $0xb8] sm:$0xff]   ;;  %3841 = vmatprep.subr.bf16.mxu1 %v4028_v0  ;;  %v4035_v5 = vld [vmem:[%s5445_s1 + $0xb0] sm:$0xff]   ;;  %v4041_v44 = vld [vmem:[%s5445_s1 + $0xa8] sm:$0xff]   ;;  %vm3130_vm1 = vcmask 518144   ;;  %vm2617_vm2 = vcmask 517120   ;;  %vm3269_vm3 = vcmask 1042434  }
   0xd   : > { %s5522_s13 = smov (!%p161_p3, %s3395_s13), 1  ;;  %v4032_v2 = vld [vmem:[%s5445_s1 + $0x78] sm:$0xff]   ;;  %3842 = vmatpush3.bf16.msra.mxu1 %v4029_v1  ;;  %v4038_v27 = vld [vmem:[%s5445_s1 + $0x70] sm:$0xff]   ;;  %v4046_v49 = vld [vmem:[%s5445_s1 + $0x68] sm:$0xff]   ;;  %vm3271_vm4 = vcmask 1043459   ;;  %vm3273_vm5 = vcmask 1044484  }
   0xe   : > { %s3949_s20 = smul.u32 144, %s5522_s13  ;;  %v4033_v3 = vld [vmem:[%s5445_s1 + $0x38] sm:$0xff]   ;;  %3777 = vmatprep.subr.bf16.mxu0 %v4032_v2  ;;  %3843 = vmatprep.subr.bf16.mxu1 %v4034_v4  ;;  %v4039_v29 = vld [vmem:[%s5445_s1 + $0x30] sm:$0xff]   ;;  %v4047_v55 = vld [vmem:[%s5445_s1 + $0x28] sm:$0xff]   ;;  %vm3314_vm6 = vsmask.f32 2306 }
   0xf   : > { %3778 = vmatpush3.bf16.msra.mxu0 %v4033_v3  ;;  %v4048_v3 = vld [vmem:[%s5445_s1 + $0xe0] sm:$0xff]   ;;  %vm5185_vm7 = vmand %vm3130_vm1, %vm3314_vm6 }
  0x10   : > { %s4190_s27 = scalar_lea.vmem %s5444_s0, %s3949_s20  ;;  %3779 = vmatprep.subr.bf16.mxu0 %v4038_v27 }
  0x11   : > { %v3405_v6 = vld [vmem:[%s4190_s27 + $0x20] sm:$0xf]  ;;  %v4197_v7 = vld [vmem:[%s4190_s27 + $0x24] sm:$0x1]  ;;  %v3402_v8 = vld [vmem:[%s4190_s27 + $0x8] sm:$0xf]  ;;  %3844 = vmatpush3.bf16.msra.mxu1 %v4035_v5 }
  0x12   : > { %v3533_v9 = vcombine.low %v3405_v6, %v3405_v6  ;;  %v4201_v10 = vcombine.low %v3405_v6, %v4197_v7  ;;  %v3418_v11 = vld [vmem:[%s4190_s27 + $0xc] sm:$0x1]  ;;  %v3530_v12 = vcombine.low %v3402_v8, %v3402_v8  ;;  %v3419_v13 = vld [vmem:[%s4190_s27 + $0x14] sm:$0x1]  ;;  %v3435_v14 = vld [vmem:[%s4190_s27 + $0x10] sm:$0xe]  ;;  %3845 = vmatprep.subr.bf16.mxu1 %v4040_v34 }
  0x13   : > { %v4206_v15 = vcombine.low %v3402_v8, %v3418_v11  ;;  %v3563_v16 = vcombine.low %v3435_v14, %v3419_v13  ;;  %v3403_v17 = vld [vmem:[%s4190_s27 + $0x10] sm:$0xf]  ;;  %v3466_v19 = vld [vmem:[%s4190_s27 + $0x14] sm:$0x1]  ;;  %v3451_v22 = vld [vmem:[%s4190_s27 + $0x18] sm:$0xf]  ;;  %3780 = vmatpush3.bf16.msra.mxu0 %v4039_v29 }
  0x14   : > { %v3450_v18 = vld [vmem:[%s4190_s27 + $0x10] sm:$0xf]  ;;  %660 = vrot.lane.b32.xlu1 %v3533_v9, %s4138_s30  ;;  %654 = vrot.lane.b32.xlu0 %v3530_v12, %s4138_s30  ;;  %v3531_v20 = vcombine.low %v3403_v17, %v3403_v17  ;;  %v4213_v21 = vcombine.low %v3403_v17, %v3419_v13  ;;  %v4217_v25 = vld [vmem:[%s4190_s27 + $0x18] sm:$0xf] }
  0x15   : > { %v895_v23 = vrot.slane %v3563_v16, 1  ;;  %v3578_v24 = vcombine.low %v3450_v18, %v3466_v19  ;;  %v3467_v26 = vld [vmem:[%s4190_s27 + $0x1c] sm:$0x1]  ;;  %v3434_v28 = vld [vmem:[%s4190_s27 + $0x8] sm:$0xe]  ;;  %v3532_v35 = vcombine.low %v4217_v25, %v4217_v25  ;;  %3846 = vmatpush3.bf16.msra.mxu1 %v4041_v44  ;;  %3781 = vmatprep.subr.bf16.mxu0 %v4046_v49  ;;  %v4054_v44 = vld [vmem:[%s5445_s1 + $0x20] sm:$0xff]  }
  0x16   : > { %v3579_v32 = vcombine.low %v3451_v22, %v3467_v26  ;;  %v173_v33 = vld [vmem:[%s4190_s27 + $0x8] sm:$0xf]  ;;  %v3562_v36 = vcombine.low %v3434_v28, %v3418_v11  ;;  %v4236_v37 = vld [vmem:[%s4190_s27 + $0xc] sm:$0x1]  ;;  %v172_v38 = vld [vmem:[%s4190_s27] sm:$0xf]  ;;  %3847 = vmatprep.subr.bf16.mxu1 %v4048_v3 }
  0x17   : > { %v1023_v30 = vshrl.u32 %v3578_v24, 16  ;;  %v1025_v31 = vshll.u32 %v3578_v24, 16  ;;  %v3499_v42 = vcombine.low %v173_v33, %v4236_v37  ;;  %v4241_v43 = vld [vmem:[%s4190_s27 + $0x4] sm:$0x1]  ;;  %v3453_v47 = vld [vmem:[%s4190_s27 + $0x28] sm:$0xf]  ;;  %3782 = vmatpush3.bf16.msra.mxu0 %v4047_v55 }
  0x18   : > { %912 = vrot.lane.b32.xlu1 %v895_v23, %s4138_s30  ;;  %656 = vrot.lane.b32.xlu0 %v3531_v20, %s4138_s30  ;;  %v1030_v40 = vshrl.u32 %v3579_v32, 16  ;;  %v1032_v41 = vshll.u32 %v3579_v32, 16  ;;  %v894_v45 = vrot.slane %v3562_v36, 1  ;;  %v3498_v46 = vcombine.low %v172_v38, %v4241_v43  ;;  %v3469_v48 = vld [vmem:[%s4190_s27 + $0x2c] sm:$0x1]  ;;  %v4049_v23 = vld [vmem:[%s5445_s1 + $0xa0] sm:$0xff]  }
  0x19   : > { %v1027_v39 = vrot.slane %v1025_v31, 1  ;;  %v406_v52 = vshrl.u32 %v3499_v42, 16  ;;  %v408_v53 = vshll.u32 %v3499_v42, 16  ;;  %v3485_v54 = vld [vmem:[%s4190_s27 + $0x28] sm:$0xe]  ;;  %v3581_v58 = vcombine.low %v3453_v47, %v3469_v48  ;;  %3848 = vmatpush3.bf16.msra.mxu1 %v4049_v23  ;;  %v4055_v47 = vld [vmem:[%s5445_s1 + $0xd8] sm:$0xff]  }
  0x1a   : > { %v1034_v51 = vrot.slane %v1032_v41, 1  ;;  %v399_v56 = vshrl.u32 %v3498_v46, 16  ;;  %v401_v57 = vshll.u32 %v3498_v46, 16  ;;  %v3597_v59 = vcombine.low %v3485_v54, %v3469_v48  ;;  %v3452_v60 = vld [vmem:[%s4190_s27 + $0x20] sm:$0xf]  ;;  %3849 = vmatprep.subr.bf16.mxu1 %v4055_v47 }
  0x1b   : > { %v1028_v50 = vor.u32 %v1027_v39, %v1023_v30  ;;  %v3468_v61 = vld [vmem:[%s4190_s27 + $0x24] sm:$0x1]  ;;  %v410_v63 = vrot.slane %v408_v53, 1  ;;  %v3484_v0 = vld [vmem:[%s4190_s27 + $0x20] sm:$0xe]  ;;  %v1044_v5 = vshrl.u32 %v3581_v58, 16 }
  0x1c   : > { %658 = vrot.lane.b32.xlu0 %v3532_v35, %s4138_s30  ;;  %v1035_v62 = vor.u32 %v1034_v51, %v1030_v40  ;;  %v3580_v1 = vcombine.low %v3452_v60, %v3468_v61  ;;  %v175_v2 = vld [vmem:[%s4190_s27 + $0x18] sm:$0xf]  ;;  %v403_v4 = vrot.slane %v401_v57, 1  ;;  %v1046_v6 = vshll.u32 %v3581_v58, 16  ;;  %v4266_v8 = vld [vmem:[%s4190_s27 + $0x1c] sm:$0x1] }
  0x1d   : > { %1134 = vrot.lane.b32.xlu1 %v1028_v50, %s4138_s30  ;;  %v411_v9 = vor.u32 %v410_v63, %v406_v52  ;;  %v4268_v11 = vrot.slane %v3597_v59, 1  ;;  %v3596_v13 = vcombine.low %v3484_v0, %v3468_v61  ;;  %v174_v14 = vld [vmem:[%s4190_s27 + $0x10] sm:$0xf]  ;;  %v4272_v16 = vld [vmem:[%s4190_s27 + $0x14] sm:$0x1]  ;;  %v3501_v19 = vcombine.low %v175_v2, %v4266_v8  ;;  %v4052_v30 = vld [vmem:[%s5445_s1 + $0x60] sm:$0xff]  }
  0x1e   : > { %v1039_v12 = vshll.u32 %v3580_v1, 16  ;;  %v404_v17 = vor.u32 %v403_v4, %v399_v56  ;;  %v1037_v18 = vshrl.u32 %v3580_v1, 16  ;;  %v3500_v20 = vcombine.low %v174_v14, %v4272_v16  ;;  %v3420_v22 = vld [vmem:[%s4190_s27 + $0x1c] sm:$0x1]  ;;  %v3437_v33 = vld [vmem:[%s4190_s27 + $0x20] sm:$0xe]  ;;  %3783 = vmatprep.subr.bf16.mxu0 %v4052_v30 }
  0x1f   : > { %5471 = vst [vmem:[#allocation2_spill] sm:$0xff] %v4268_v11  ;;  %v1048_v24 = vrot.slane %v1046_v6, 1  ;;  %v4282_v27 = vrot.slane %v3596_v13, 1  ;;  %v4285_v28 = vcombine.low %v4217_v25, %v3420_v22  ;;  %v422_v29 = vshll.u32 %v3501_v19, 16  ;;  %v3436_v38 = vld [vmem:[%s4190_s27 + $0x18] sm:$0xe]  ;;  %3784 = vmatpush3.bf16.msra.mxu0 %v4054_v44 }
  0x20   : > { %910 = vrot.lane.b32.xlu0 %v894_v45, %s4138_s30  ;;  %v1041_v26 = vrot.slane %v1039_v12, 1  ;;  %v415_v32 = vshll.u32 %v3500_v20, 16  ;;  %v420_v25 = vshrl.u32 %v3501_v19, 16  ;;  %v413_v36 = vshrl.u32 %v3500_v20, 16  ;;  %v3454_v41 = vld [vmem:[%s4190_s27 + $0x30] sm:$0xf] }
  0x21   : > { %1136 = vrot.lane.b32.xlu1 %v1035_v62, %s4138_s30  ;;  %5472 = vst [vmem:[#allocation3_spill] sm:$0xff] %v4282_v27  ;;  %v424_v35 = vrot.slane %v422_v29, 1  ;;  %v1049_v39 = vor.u32 %v1048_v24, %v1044_v5  ;;  %v3470_v42 = vld [vmem:[%s4190_s27 + $0x34] sm:$0x1]  ;;  %v3455_v45 = vld [vmem:[%s4190_s27 + $0x38] sm:$0xf]  ;;  %v3565_v48 = vcombine.low %v3437_v33, %v4197_v7  ;;  %v3564_v52 = vcombine.low %v3436_v38, %v3420_v22 }
  0x22   : > { %v1042_v34 = vor.u32 %v1041_v26, %v1037_v18  ;;  %v417_v40 = vrot.slane %v415_v32, 1  ;;  %v3471_v46 = vld [vmem:[%s4190_s27 + $0x3c] sm:$0x1]  ;;  %v4308_v49 = vld [vmem:[%s4190_s27 + $0x30] sm:$0xf]  ;;  %v3582_v54 = vcombine.low %v3454_v41, %v3470_v42 }
  0x23   : > { %v4056_v50 = vld [vmem:[%s5445_s1 + $0x98] sm:$0xff]   ;;  %v3406_v53 = vld [vmem:[%s4190_s27 + $0x28] sm:$0xf]  ;;  %v4316_v55 = vld [vmem:[%s4190_s27 + $0x34] sm:$0x1]  ;;  %v425_v56 = vor.u32 %v424_v35, %v420_v25  ;;  %v3583_v57 = vcombine.low %v3455_v45, %v3471_v46  ;;  %v896_v2 = vrot.slane %v3564_v52, 1  ;;  %v3535_v26 = vcombine.low %v4308_v49, %v4308_v49 }
  0x24   : > { %510 = vrot.lane.b32.xlu0 %v404_v17, %s4138_s30  ;;  %v418_v51 = vor.u32 %v417_v40, %v413_v36  ;;  %v4059_v7 = vld [vmem:[%s5445_s1 + $0x58] sm:$0xff]   ;;  %v176_v58 = vld [vmem:[%s4190_s27 + $0x20] sm:$0xf]  ;;  %v4324_v59 = vld [vmem:[%s4190_s27 + $0x24] sm:$0x1]  ;;  %v4328_v60 = vcombine.low %v4308_v49, %v4316_v55  ;;  %3850 = vmatpush3.bf16.msra.mxu1 %v4056_v50  ;;  %v1053_v3 = vshll.u32 %v3582_v54, 16  ;;  %v3534_v17 = vcombine.low %v3406_v53, %v3406_v53 }
  0x25   : > { %512 = vrot.lane.b32.xlu1 %v411_v9, %s4138_s30  ;;  %v4060_v61 = vld [vmem:[%s5445_s1 + $0x18] sm:$0xff]   ;;  %v177_v62 = vld [vmem:[%s4190_s27 + $0x28] sm:$0xf]  ;;  %v4335_v63 = vld [vmem:[%s4190_s27 + $0x2c] sm:$0x1]  ;;  %3785 = vmatprep.subr.bf16.mxu0 %v4059_v7  ;;  %v3502_v4 = vcombine.low %v176_v58, %v4324_v59  ;;  %v897_v6 = vrot.slane %v3565_v48, 1 }
  0x26   : > { %v4338_v0 = vld [vmem:[%s4190_s27 + $0x2c] sm:$0x1]  ;;  %3786 = vmatpush3.bf16.msra.mxu0 %v4060_v61  ;;  %v4061_v5 = vld [vmem:[%s5445_s1 + $0xd0] sm:$0xff]   ;;  %v1060_v9 = vshll.u32 %v3583_v57, 16  ;;  %v3503_v12 = vcombine.low %v177_v62, %v4335_v63  ;;  %v4357_v18 = vld [vmem:[%s4190_s27 + $0x40] sm:$0xf] }
  0x27   : > { %v4341_v1 = vcombine.low %v3406_v53, %v4338_v0  ;;  %v4062_v13 = vld [vmem:[%s5445_s1 + $0x90] sm:$0xff]   ;;  %3851 = vmatprep.subr.bf16.mxu1 %v4061_v5  ;;  %v4360_v19 = vld [vmem:[%s4190_s27 + $0x44] sm:$0x1]  ;;  %v1051_v20 = vshrl.u32 %v3582_v54, 16  ;;  %v1055_v22 = vrot.slane %v1053_v3, 1  ;;  %v429_v23 = vshll.u32 %v3502_v4, 16 }
  0x28   : > { %1138 = vrot.lane.b32.xlu0 %v1042_v34, %s4138_s30  ;;  %v4065_v14 = vld [vmem:[%s5445_s1 + $0x50] sm:$0xff]   ;;  %3852 = vmatpush3.bf16.msra.mxu1 %v4062_v13  ;;  %v4365_v24 = vcombine.low %v4357_v18, %v4360_v19  ;;  %v1058_v29 = vshrl.u32 %v3583_v57, 16  ;;  %v1062_v30 = vrot.slane %v1060_v9, 1  ;;  %v436_v32 = vshll.u32 %v3503_v12, 16  ;;  %v4374_v34 = vld [vmem:[%s4190_s27 + $0x38] sm:$0xf] }
  0x29   : > { %1140 = vrot.lane.b32.xlu1 %v1049_v39, %s4138_s30  ;;  %3787 = vmatprep.subr.bf16.mxu0 %v4065_v14  ;;  %v4069_v33 = vld [vmem:[%s5445_s1 + $0x10] sm:$0xff]   ;;  %v4377_v25 = vld [vmem:[%s4190_s27 + $0x3c] sm:$0x1]  ;;  %v434_v35 = vshrl.u32 %v3503_v12, 16  ;;  %v427_v36 = vshrl.u32 %v3502_v4, 16  ;;  %v1056_v40 = vor.u32 %v1055_v22, %v1051_v20  ;;  %v431_v41 = vrot.slane %v429_v23, 1 }
  0x2a   : > { %v3438_v38 = vld [vmem:[%s4190_s27 + $0x28] sm:$0xe]  ;;  %v4382_v39 = vcombine.low %v4374_v34, %v4377_v25  ;;  %3788 = vmatpush3.bf16.msra.mxu0 %v4069_v33  ;;  %v3473_v44 = vld [vmem:[%s4190_s27 + $0x4c] sm:$0x1]  ;;  %v1063_v46 = vor.u32 %v1062_v30, %v1058_v29  ;;  %v438_v47 = vrot.slane %v436_v32, 1  ;;  %v4078_v23 = vld [vmem:[%s5445_s1 + $0xc0] sm:$0xff]  }
  0x2b   : > { %v4386_v42 = vld [vmem:[%s4190_s27 + $0x48] sm:$0xf]  ;;  %v4394_v48 = vld [vmem:[%s4190_s27 + $0x40] sm:$0xf]  ;;  %v3472_v49 = vld [vmem:[%s4190_s27 + $0x44] sm:$0x1]  ;;  %v3566_v53 = vcombine.low %v3438_v38, %v4338_v0  ;;  %v432_v57 = vor.u32 %v431_v41, %v427_v36 }
  0x2c   : > { %514 = vrot.lane.b32.xlu0 %v418_v51, %s4138_s30  ;;  %v4070_v45 = vld [vmem:[%s5445_s1 + $0xc8] sm:$0xff]   ;;  %v3439_v51 = vld [vmem:[%s4190_s27 + $0x30] sm:$0xe]  ;;  %v4406_v54 = vcombine.low %v4386_v42, %v3473_v44  ;;  %v3584_v58 = vcombine.low %v4394_v48, %v3472_v49  ;;  %v4420_v62 = vld [vmem:[%s4190_s27 + $0x34] sm:$0x1] }
  0x2d   : > { %516 = vrot.lane.b32.xlu1 %v425_v56, %s4138_s30  ;;  %v4071_v50 = vld [vmem:[%s5445_s1 + $0x88] sm:$0xff]   ;;  %3853 = vmatprep.subr.bf16.mxu1 %v4070_v45  ;;  %v4409_v7 = vld [vmem:[%s4190_s27 + $0x50] sm:$0xf]  ;;  %v4412_v56 = vld [vmem:[%s4190_s27 + $0x54] sm:$0x1]  ;;  %v3567_v3 = vcombine.low %v3439_v51, %v4316_v55  ;;  %v898_v14 = vrot.slane %v3566_v53, 1  ;;  %v3537_v51 = vcombine.low %v4357_v18, %v4357_v18 }
  0x2e   : > { %v4076_v52 = vld [vmem:[%s5445_s1 + $0x48] sm:$0xff]   ;;  %3854 = vmatpush3.bf16.msra.mxu1 %v4071_v50  ;;  %v4417_v61 = vld [vmem:[%s4190_s27 + $0x30] sm:$0xf]  ;;  %v4424_v0 = vcombine.low %v4409_v7, %v4412_v56  ;;  %v4429_v4 = vld [vmem:[%s4190_s27 + $0x38] sm:$0xf]  ;;  %v1067_v20 = vshll.u32 %v3584_v58, 16 }
  0x2f   : > { %3789 = vmatprep.subr.bf16.mxu0 %v4076_v52  ;;  %v4077_v5 = vld [vmem:[%s5445_s1 + $0x8] sm:$0xff]   ;;  %v4445_v13 = vcombine.low %v4417_v61, %v4420_v62  ;;  %v4079_v32 = vld [vmem:[%s5445_s1 + $0x80] sm:$0xff]   ;;  %3855 = vmatprep.subr.bf16.mxu1 %v4078_v23  ;;  %v1072_v41 = vshrl.u32 %v4406_v54, 16  ;;  %v3440_v18 = vld [vmem:[%s4190_s27 + $0x38] sm:$0xe] }
  0x30   : > { %914 = vrot.lane.b32.xlu0 %v896_v2, %s4138_s30  ;;  %v439_v2 = vor.u32 %v438_v47, %v434_v35  ;;  %v4438_v9 = vld [vmem:[%s4190_s27 + $0x48] sm:$0xf]  ;;  %v4441_v12 = vld [vmem:[%s4190_s27 + $0x4c] sm:$0x1]  ;;  %3790 = vmatpush3.bf16.msra.mxu0 %v4077_v5  ;;  %v4468_v35 = vld [vmem:[%s4190_s27 + $0x64] sm:$0x1] }
  0x31   : > { %916 = vrot.lane.b32.xlu1 %v897_v6, %s4138_s30  ;;  %v4435_v6 = vld [vmem:[%s4190_s27 + $0x3c] sm:$0x1]  ;;  %v4449_v55 = vcombine.low %v4438_v9, %v4441_v12  ;;  %v3493_v22 = vld [vmem:[%s4190_s27 + $0x68] sm:$0xe]  ;;  %v4461_v30 = vld [vmem:[%s4190_s27 + $0x6c] sm:$0x1] }
  0x32   : > { %v3505_v29 = vcombine.low %v4429_v4, %v4435_v6  ;;  %v3605_v33 = vcombine.low %v3493_v22, %v4461_v30  ;;  %v3492_v36 = vld [vmem:[%s4190_s27 + $0x60] sm:$0xe]  ;;  %v443_v44 = vshll.u32 %v4445_v13, 16  ;;  %3856 = vmatpush3.bf16.msra.mxu1 %v4079_v32  ;;  %v1065_v47 = vshrl.u32 %v3584_v58, 16  ;;  %v3474_v22 = vld [vmem:[%s4190_s27 + $0x54] sm:$0x1] }
  0x33   : > { %v4080_v38 = vld [vmem:[%s5445_s1 + $0x40] sm:$0xff]   ;;  %v3604_v45 = vcombine.low %v3492_v36, %v4468_v35  ;;  %v1069_v49 = vrot.slane %v1067_v20, 1  ;;  %v4511_v23 = vld [vmem:[%s4190_s27 + $0x58] sm:$0xf] }
  0x34   : > { %662 = vrot.lane.b32.xlu0 %v3534_v17, %s4138_s30  ;;  %v1074_v17 = vshll.u32 %v4406_v54, 16  ;;  %v4480_v50 = vrot.slane %v3605_v33, 1  ;;  %3791 = vmatprep.subr.bf16.mxu0 %v4080_v38  ;;  %v450_v52 = vshll.u32 %v3505_v29, 16  ;;  %v4489_v53 = vld [vmem:[%s4190_s27 + $0x60] sm:$0xf]  ;;  %v445_v5 = vrot.slane %v443_v44, 1 }
  0x35   : > { %664 = vrot.lane.b32.xlu1 %v3535_v26, %s4138_s30  ;;  %v899_v26 = vrot.slane %v3567_v3, 1  ;;  %v4491_v54 = vrot.slane %v3604_v45, 1  ;;  %v3441_v58 = vld [vmem:[%s4190_s27 + $0x40] sm:$0xe]  ;;  %v441_v3 = vshrl.u32 %v4445_v13, 16  ;;  %v1070_v20 = vor.u32 %v1069_v49, %v1065_v47 }
  0x36   : > { %5473 = vst [vmem:[#allocation4_spill] sm:$0xff] %v4480_v50  ;;  %v448_v32 = vshrl.u32 %v3505_v29, 16  ;;  %v452_v33 = vrot.slane %v450_v52, 1  ;;  %v3569_v38 = vcombine.low %v3441_v58, %v4360_v19  ;;  %v3475_v44 = vld [vmem:[%s4190_s27 + $0x5c] sm:$0x1]  ;;  %v3568_v45 = vcombine.low %v3440_v18, %v4377_v25 }
  0x37   : > { %5474 = vst [vmem:[#allocation5_spill] sm:$0xff] %v4491_v54  ;;  %v4529_v49 = vld [vmem:[%s4190_s27 + $0x48] sm:$0xf]  ;;  %v446_v29 = vor.u32 %v445_v5, %v441_v3  ;;  %v4539_v19 = vld [vmem:[%s4190_s27 + $0x44] sm:$0x1]  ;;  %v3539_v50 = vcombine.low %v4409_v7, %v4409_v7 }
  0x38   : > { %1142 = vrot.lane.b32.xlu0 %v1056_v40, %s4138_s30  ;;  %v3536_v40 = vcombine.low %v4374_v34, %v4374_v34  ;;  %v4081_v34 = vld [vmem:[%s5445_s1] sm:$0xff]   ;;  %v453_v25 = vor.u32 %v452_v33, %v448_v32  ;;  %v900_v52 = vrot.slane %v3568_v45, 1  ;;  %v4549_v5 = vld [vmem:[%s4190_s27 + $0x70] sm:$0xf]  ;;  %v4563_v33 = vld [vmem:[%s4190_s27 + $0x6c] sm:$0x1] }
  0x39   : > { %1144 = vrot.lane.b32.xlu1 %v1063_v46, %s4138_s30  ;;  %v1076_v46 = vrot.slane %v1074_v17, 1  ;;  %3792 = vmatpush3.bf16.msra.mxu0 %v4081_v34  ;;  %v4590_v7 = vld [vmem:[%s4190_s27 + $0x60] sm:$0xf] }
  0x3b   : > { %v1077_v13 = vor.u32 %v1076_v46, %v1072_v41  ;;  %v4532_v41 = vld [vmem:[%s4190_s27 + $0x4c] sm:$0x1]  ;;  %v4536_v46 = vld [vmem:[%s4190_s27 + $0x40] sm:$0xf] }
  0x3c   : > { %518 = vrot.lane.b32.xlu0 %v432_v57, %s4138_s30  ;;  %v4494_v57 = vld [vmem:[%s4190_s27 + $0x64] sm:$0x1]  ;;  %v3507_v18 = vcombine.low %v4529_v49, %v4532_v41  ;;  %v3506_v3 = vcombine.low %v4536_v46, %v4539_v19 }
  0x3d   : > { %520 = vrot.lane.b32.xlu1 %v439_v2, %s4138_s30  ;;  %v4499_v2 = vcombine.low %v4489_v53, %v4494_v57 }
  0x3e   : > { %v464_v45 = vshll.u32 %v3507_v18, 16  ;;  %v462_v27 = vshrl.u32 %v3507_v18, 16  ;;  %v4599_v18 = vld [vmem:[%s4190_s27 + $0x50] sm:$0xf] }
  0x3f   : > { %5475 = vst [vmem:[#allocation6_spill] sm:$0xff] %v4499_v2  ;;  %v3442_v2 = vld [vmem:[%s4190_s27 + $0x48] sm:$0xe]  ;;  %5480 = vst [vmem:[#allocation11_spill] sm:$0xff] %v4599_v18 }
  0x40   : > { %918 = vrot.lane.b32.xlu0 %v898_v14, %s4138_s30  ;;  %v4504_v14 = vld [vmem:[%s4190_s27 + $0x50] sm:$0xf] }
  0x41   : > { %920 = vrot.lane.b32.xlu1 %v899_v26, %s4138_s30  ;;  %v4514_v26 = vld [vmem:[%s4190_s27 + $0x5c] sm:$0x1]  ;;  %v3586_v47 = vcombine.low %v4504_v14, %v3474_v22 }
  0x42   : > { %v4519_v36 = vcombine.low %v4511_v23, %v4514_v26 }
  0x43   : > { %v1081_v58 = vshll.u32 %v3586_v47, 16  ;;  %v1079_v17 = vshrl.u32 %v3586_v47, 16 }
  0x44   : > { %666 = vrot.lane.b32.xlu0 %v3536_v40, %s4138_s30  ;;  %v4523_v40 = vld [vmem:[%s4190_s27 + $0x58] sm:$0xf] }
  0x45   : > { %668 = vrot.lane.b32.xlu1 %v3537_v51, %s4138_s30  ;;  %v3587_v34 = vcombine.low %v4523_v40, %v3475_v44  ;;  %v901_v51 = vrot.slane %v3569_v38, 1  ;;  %v4568_v38 = vld [vmem:[%s5445_s1 + $0x118] sm:$0xff]   ;;  %v1083_v31 = vrot.slane %v1081_v58, 1 }
  0x46   : > { %3917 = vmatprep.subr.bf16.mxu0 %v4568_v38  ;;  %3941 = vmatprep.subr.bf16.mxu1 %v4568_v38 }
  0x47   : > { %v1088_v22 = vshll.u32 %v3587_v34, 16  ;;  %v1086_v54 = vshrl.u32 %v3587_v34, 16  ;;  %v1084_v47 = vor.u32 %v1083_v31, %v1079_v17  ;;  %v4593_v34 = vld [vmem:[%s4190_s27 + $0x58] sm:$0xf] }
  0x48   : > { %1146 = vrot.lane.b32.xlu0 %v1070_v20, %s4138_s30  ;;  %v4552_v20 = vld [vmem:[%s4190_s27 + $0x74] sm:$0x1]  ;;  %5479 = vst [vmem:[#allocation10_spill] sm:$0xff] %v4593_v34 }
  0x49   : > { %1148 = vrot.lane.b32.xlu1 %v1077_v13, %s4138_s30  ;;  %v4556_v13 = vld [vmem:[%s4190_s27 + $0x68] sm:$0xf]  ;;  %v4560_v32 = vcombine.low %v4549_v5, %v4552_v20  ;;  %v1090_v11 = vrot.slane %v1088_v22, 1  ;;  %v4596_v22 = vld [vmem:[%s4190_s27 + $0x5c] sm:$0x1] }
  0x4a   : > { %v4572_v44 = vcombine.low %v4556_v13, %v4563_v33  ;;  %v3509_v17 = vcombine.low %v4593_v34, %v4596_v22  ;;  %v4655_v34 = vld [vmem:[%s4190_s27 + $0x74] sm:$0x1] }
  0x4b   : > { %5476 = vst [vmem:[#allocation7_spill] sm:$0xff] %v4560_v32  ;;  %v466_v32 = vrot.slane %v464_v45, 1  ;;  %v1091_v58 = vor.u32 %v1090_v11, %v1086_v54  ;;  %v3588_v11 = vcombine.low %v4590_v7, %v4468_v35  ;;  %5484 = vst [vmem:[#allocation15_spill] sm:$0xff] %v4655_v34 }
  0x4c   : > { %522 = vrot.lane.b32.xlu0 %v446_v29, %s4138_s30  ;;  %5477 = vst [vmem:[#allocation8_spill] sm:$0xff] %v4572_v44  ;;  %v457_v29 = vshll.u32 %v3506_v3, 16 }
  0x4d   : > { %524 = vrot.lane.b32.xlu1 %v453_v25, %s4138_s30  ;;  %v3538_v25 = vcombine.low %v4438_v9, %v4438_v9  ;;  %v4584_v9 = vld [vmem:[%s4190_s27 + $0x68] sm:$0xf] }
  0x4e   : > { %v459_v44 = vrot.slane %v457_v29, 1  ;;  %5478 = vst [vmem:[#allocation9_spill] sm:$0xff] %v4584_v9  ;;  %v3570_v29 = vcombine.low %v3442_v2, %v4441_v12  ;;  %v3589_v31 = vcombine.low %v4584_v9, %v4461_v30  ;;  %v1095_v30 = vshll.u32 %v3588_v11, 16  ;;  %v4675_v9 = vld [vmem:[%s4190_s27 + $0x60] sm:$0xf] }
  0x4f   : > { %5487 = vst [vmem:[#allocation18_spill] sm:$0xff] %v4675_v9 }
  0x50   : > { %922 = vrot.lane.b32.xlu0 %v900_v52, %s4138_s30  ;;  %v455_v52 = vshrl.u32 %v3506_v3, 16  ;;  %v4602_v3 = vld [vmem:[%s4190_s27 + $0x54] sm:$0x1]  ;;  %v902_v12 = vrot.slane %v3570_v29, 1  ;;  %v1102_v2 = vshll.u32 %v3589_v31, 16 }
  0x51   : > { %924 = vrot.lane.b32.xlu1 %v901_v51, %s4138_s30  ;;  %v3443_v51 = vld [vmem:[%s4190_s27 + $0x50] sm:$0xe] }
  0x52   : > { %v460_v45 = vor.u32 %v459_v44, %v455_v52  ;;  %v3571_v54 = vcombine.low %v3443_v51, %v4412_v56  ;;  %v1093_v56 = vshrl.u32 %v3588_v11, 16  ;;  %v3540_v52 = vcombine.low %v4511_v23, %v4511_v23  ;;  %v4628_v11 = vld [vmem:[%s4190_s27 + $0x78] sm:$0xf]  ;;  %v4634_v23 = vld [vmem:[%s4190_s27 + $0x7c] sm:$0x1] }
  0x53   : > { %v1097_v51 = vrot.slane %v1095_v30, 1  ;;  %v3445_v30 = vld [vmem:[%s4190_s27 + $0x60] sm:$0xe] }
  0x54   : > { %670 = vrot.lane.b32.xlu0 %v3538_v25, %s4138_s30  ;;  %v3508_v25 = vcombine.low %v4599_v18, %v4602_v3  ;;  %v903_v35 = vrot.slane %v3571_v54, 1  ;;  %v4668_v18 = vld [vmem:[%s4190_s27 + $0x6c] sm:$0x1] }
  0x55   : > { %672 = vrot.lane.b32.xlu1 %v3539_v50, %s4138_s30  ;;  %v467_v50 = vor.u32 %v466_v32, %v462_v27  ;;  %v1100_v27 = vshrl.u32 %v3589_v31, 16  ;;  %v478_v32 = vshll.u32 %v3509_v17, 16  ;;  %v4625_v31 = vld [vmem:[%s4190_s27 + $0x80] sm:$0xf] }
  0x56   : > { %v471_v44 = vshll.u32 %v3508_v25, 16  ;;  %v469_v29 = vshrl.u32 %v3508_v25, 16  ;;  %v1098_v25 = vor.u32 %v1097_v51, %v1093_v56  ;;  %v4665_v51 = vld [vmem:[%s4190_s27 + $0x68] sm:$0xf] }
  0x57   : > { %v480_v54 = vrot.slane %v478_v32, 1  ;;  %5486 = vst [vmem:[#allocation17_spill] sm:$0xff] %v4665_v51 }
  0x58   : > { %1150 = vrot.lane.b32.xlu0 %v1084_v47, %s4138_s30  ;;  %v1104_v47 = vrot.slane %v1102_v2, 1  ;;  %v3444_v2 = vld [vmem:[%s4190_s27 + $0x58] sm:$0xe] }
  0x59   : > { %1152 = vrot.lane.b32.xlu1 %v1091_v58, %s4138_s30  ;;  %v3541_v58 = vcombine.low %v4489_v53, %v4489_v53 }
  0x5a   : > { %v1105_v32 = vor.u32 %v1104_v47, %v1100_v27  ;;  %v3573_v47 = vcombine.low %v3445_v30, %v4494_v57 }
  0x5c   : > { %526 = vrot.lane.b32.xlu0 %v460_v45, %s4138_s30  ;;  %v476_v45 = vshrl.u32 %v3509_v17, 16  ;;  %v4643_v17 = vcombine.low %v4628_v11, %v4634_v23  ;;  %v905_v57 = vrot.slane %v3573_v47, 1 }
  0x5d   : > { %528 = vrot.lane.b32.xlu1 %v467_v50, %s4138_s30  ;;  %v4631_v50 = vld [vmem:[%s4190_s27 + $0x84] sm:$0x1] }
  0x5e   : > { %v4639_v53 = vcombine.low %v4625_v31, %v4631_v50  ;;  %5482 = vst [vmem:[#allocation13_spill] sm:$0xff] %v4643_v17  ;;  %v481_v27 = vor.u32 %v480_v54, %v476_v45 }
  0x60   : > { %926 = vrot.lane.b32.xlu0 %v902_v12, %s4138_s30  ;;  %v473_v12 = vrot.slane %v471_v44, 1  ;;  %5481 = vst [vmem:[#allocation12_spill] sm:$0xff] %v4639_v53  ;;  %v4652_v44 = vld [vmem:[%s4190_s27 + $0x70] sm:$0xf]  ;;  %v4658_v53 = vld [vmem:[%s4190_s27 + $0x7c] sm:$0x1] }
  0x61   : > { %928 = vrot.lane.b32.xlu1 %v903_v35, %s4138_s30  ;;  %v4648_v35 = vld [vmem:[%s4190_s27 + $0x78] sm:$0xf]  ;;  %5485 = vst [vmem:[#allocation16_spill] sm:$0xff] %v4658_v53  ;;  %v3590_v56 = vcombine.low %v4652_v44, %v4655_v34 }
  0x62   : > { %5483 = vst [vmem:[#allocation14_spill] sm:$0xff] %v4648_v35  ;;  %v474_v17 = vor.u32 %v473_v12, %v469_v29  ;;  %v4678_v29 = vld [vmem:[%s4190_s27 + $0x64] sm:$0x1] }
  0x63   : > { %v1107_v54 = vshrl.u32 %v3590_v56, 16 }
  0x64   : > { %674 = vrot.lane.b32.xlu0 %v3540_v52, %s4138_s30  ;;  %v3572_v52 = vcombine.low %v3444_v2, %v4514_v26  ;;  %v3511_v26 = vcombine.low %v4665_v51, %v4668_v18  ;;  %v1109_v2 = vshll.u32 %v3590_v56, 16 }
  0x65   : > { %676 = vrot.lane.b32.xlu1 %v3541_v58, %s4138_s30  ;;  %v3591_v58 = vcombine.low %v4648_v35, %v4658_v53 }
  0x66   : > { %v904_v12 = vrot.slane %v3572_v52, 1  ;;  %v492_v30 = vshll.u32 %v3511_v26, 16  ;;  %v1111_v53 = vrot.slane %v1109_v2, 1  ;;  %v3543_v52 = vcombine.low %v4549_v5, %v4549_v5  ;;  %v4699_v5 = vld [vmem:[%s4190_s27 + $0x84] sm:$0x1] }
  0x67   : > { %v1116_v45 = vshll.u32 %v3591_v58, 16  ;;  %v1114_v56 = vshrl.u32 %v3591_v58, 16  ;;  %v490_v47 = vshrl.u32 %v3511_v26, 16  ;;  %v3447_v58 = vld [vmem:[%s4190_s27 + $0x70] sm:$0xe] }
  0x68   : > { %1154 = vrot.lane.b32.xlu0 %v1098_v25, %s4138_s30  ;;  %v3510_v25 = vcombine.low %v4675_v9, %v4678_v29  ;;  %v494_v34 = vrot.slane %v492_v30, 1  ;;  %v4696_v9 = vld [vmem:[%s4190_s27 + $0x80] sm:$0xf]  ;;  %v4703_v26 = vld [vmem:[%s4190_s27 + $0x88] sm:$0xf] }
  0x69   : > { %1156 = vrot.lane.b32.xlu1 %v1105_v32, %s4138_s30  ;;  %v3542_v32 = vcombine.low %v4556_v13, %v4556_v13  ;;  %5488 = vst [vmem:[#allocation19_spill] sm:$0xff] %v4696_v9  ;;  %5489 = vst [vmem:[#allocation20_spill] sm:$0xff] %v4703_v26 }
  0x6a   : > { %v483_v13 = vshrl.u32 %v3510_v25, 16  ;;  %v495_v30 = vor.u32 %v494_v34, %v490_v47 }
  0x6c   : > { %530 = vrot.lane.b32.xlu0 %v474_v17, %s4138_s30  ;;  %v485_v17 = vshll.u32 %v3510_v25, 16 }
  0x6d   : > { %532 = vrot.lane.b32.xlu1 %v481_v27, %s4138_s30  ;;  %v1118_v27 = vrot.slane %v1116_v45, 1  ;;  %v4706_v45 = vld [vmem:[%s4190_s27 + $0x8c] sm:$0x1] }
  0x6e   : > { %v487_v51 = vrot.slane %v485_v17, 1  ;;  %v3593_v17 = vcombine.low %v4703_v26, %v4706_v45  ;;  %v205_v26 = vld [vmem:[%s4190_s27 + $0x8] sm:$0xe] }
  0x6f   : > { %v1119_v2 = vor.u32 %v1118_v27, %v1114_v56  ;;  %v4720_v56 = vld [vmem:[%s4190_s27 + $0x74] sm:$0x1]  ;;  %v4723_v27 = vld [vmem:[%s4190_s27 + $0x78] sm:$0xf] }
  0x70   : > { %930 = vrot.lane.b32.xlu0 %v904_v12, %s4138_s30  ;;  %v1112_v12 = vor.u32 %v1111_v53, %v1107_v54  ;;  %v488_v53 = vor.u32 %v487_v51, %v483_v13  ;;  %v3592_v54 = vcombine.low %v4696_v9, %v4699_v5  ;;  %5491 = vst [vmem:[#allocation22_spill] sm:$0xff] %v4720_v56  ;;  %5492 = vst [vmem:[#allocation23_spill] sm:$0xff] %v4723_v27 }
  0x71   : > { %932 = vrot.lane.b32.xlu1 %v905_v57, %s4138_s30  ;;  %v3446_v57 = vld [vmem:[%s4190_s27 + $0x68] sm:$0xe]  ;;  %v1130_v47 = vshll.u32 %v3593_v17, 16 }
  0x72   : > { %v3574_v25 = vcombine.low %v3446_v57, %v4563_v33  ;;  %v4726_v33 = vld [vmem:[%s4190_s27 + $0x7c] sm:$0x1]  ;;  %v3544_v57 = vcombine.low %v4628_v11, %v4628_v11  ;;  %v207_v11 = vld [vmem:[%s4190_s27 + $0x18] sm:$0xe] }
  0x73   : > { %5493 = vst [vmem:[#allocation24_spill] sm:$0xff] %v4726_v33  ;;  %v3513_v13 = vcombine.low %v4723_v27, %v4726_v33  ;;  %v1132_v27 = vrot.slane %v1130_v47, 1  ;;  %v737_v47 = vshll.u32 %v4206_v15, 16 }
  0x74   : > { %678 = vrot.lane.b32.xlu0 %v3542_v32, %s4138_s30  ;;  %v3575_v32 = vcombine.low %v3447_v58, %v4552_v20  ;;  %v906_v51 = vrot.slane %v3574_v25, 1  ;;  %v204_v25 = vld [vmem:[%s4190_s27] sm:$0xe] }
  0x75   : > { %680 = vrot.lane.b32.xlu1 %v3543_v52, %s4138_s30  ;;  %v4717_v52 = vld [vmem:[%s4190_s27 + $0x70] sm:$0xf] }
  0x76   : > { %5490 = vst [vmem:[#allocation21_spill] sm:$0xff] %v4717_v52  ;;  %v3512_v20 = vcombine.low %v4717_v52, %v4720_v56  ;;  %v907_v34 = vrot.slane %v3575_v32, 1  ;;  %v1128_v32 = vshrl.u32 %v3593_v17, 16  ;;  %v506_v52 = vshll.u32 %v3513_v13, 16  ;;  %v206_v56 = vld [vmem:[%s4190_s27 + $0x10] sm:$0xe] }
  0x77   : > { %v3448_v17 = vld [vmem:[%s4190_s27 + $0x78] sm:$0xe] }
  0x78   : > { %1158 = vrot.lane.b32.xlu0 %v1112_v12, %s4138_s30  ;;  %v1123_v12 = vshll.u32 %v3592_v54, 16  ;;  %v497_v9 = vshrl.u32 %v3512_v20, 16  ;;  %v508_v35 = vrot.slane %v506_v52, 1  ;;  %v3576_v52 = vcombine.low %v3448_v17, %v4634_v23 }
  0x79   : > { %1160 = vrot.lane.b32.xlu1 %v1119_v2, %s4138_s30  ;;  %v1121_v2 = vshrl.u32 %v3592_v54, 16  ;;  %v3514_v54 = vcombine.low %v204_v25, %v4241_v43  ;;  %v744_v43 = vshll.u32 %v4213_v21, 16 }
  0x7a   : > { %v1125_v58 = vrot.slane %v1123_v12, 1 }
  0x7c   : > { %534 = vrot.lane.b32.xlu0 %v488_v53, %s4138_s30  ;;  %v499_v53 = vshll.u32 %v3512_v20, 16  ;;  %v1126_v12 = vor.u32 %v1125_v58, %v1121_v2  ;;  %v3516_v2 = vcombine.low %v206_v56, %v4272_v16  ;;  %v590_v20 = vrot.slane %v3514_v54, 1 }
  0x7d   : > { %536 = vrot.lane.b32.xlu1 %v495_v30, %s4138_s30  ;;  %v3545_v30 = vcombine.low %v4625_v31, %v4625_v31  ;;  %v504_v31 = vshrl.u32 %v3513_v13, 16  ;;  %v746_v16 = vrot.slane %v744_v43, 1  ;;  %v3496_v43 = vld [vmem:[%s4190_s27 + $0x80] sm:$0xe] }
  0x7e   : > { %v501_v33 = vrot.slane %v499_v53, 1 }
  0x7f   : > { %v509_v13 = vor.u32 %v508_v35, %v504_v31 }
  0x80   : > { %934 = vrot.lane.b32.xlu0 %v906_v51, %s4138_s30  ;;  %v3515_v51 = vcombine.low %v205_v26, %v4236_v37  ;;  %v3449_v26 = vld [vmem:[%s4190_s27 + $0x80] sm:$0xe] }
  0x81   : > { %936 = vrot.lane.b32.xlu1 %v907_v34, %s4138_s30  ;;  %v1133_v34 = vor.u32 %v1132_v27, %v1128_v32  ;;  %v502_v27 = vor.u32 %v501_v33, %v497_v9  ;;  %v3577_v53 = vcombine.low %v3449_v26, %v4631_v50  ;;  %v739_v32 = vrot.slane %v737_v47, 1 }
  0x82   : > { %v591_v58 = vrot.slane %v3515_v51, 1  ;;  %v592_v51 = vrot.slane %v3516_v2, 1  ;;  %v908_v50 = vrot.slane %v3576_v52, 1  ;;  %v3608_v26 = vcombine.low %v3496_v43, %v4699_v5 }
  0x83   : > { %v756_v43 = vshrl.u32 %v4201_v10, 16 }
  0x84   : > { %682 = vrot.lane.b32.xlu0 %v3544_v57, %s4138_s30  ;;  %v3517_v57 = vcombine.low %v207_v11, %v4266_v8  ;;  %v742_v8 = vshrl.u32 %v4213_v21, 16 }
  0x85   : > { %684 = vrot.lane.b32.xlu1 %v3545_v30, %s4138_s30  ;;  %v735_v30 = vshrl.u32 %v4206_v15, 16  ;;  %v909_v15 = vrot.slane %v3577_v53, 1  ;;  %v4110_v53 = vld [vmem:[%s4190_s27 + $0x10] sm:$0xf] }
  0x86   : > { %v661_v25 = vpop.permute.xlu1 %660  ;;  %v655_v37 = vpop.permute.xlu0 %654  ;;  %v593_v54 = vrot.slane %v3517_v57, 1  ;;  %v747_v33 = vor.u32 %v746_v16, %v742_v8  ;;  %v751_v16 = vshll.u32 %v4285_v28, 16 }
  0x87   : > { %v740_v17 = vor.u32 %v739_v32, %v735_v30  ;;  %v4111_v32 = vld [vmem:[%s4190_s27 + $0x18] sm:$0xf] }
  0x88   : > { %1162 = vrot.lane.b32.xlu0 %v1126_v12, %s4138_s30  ;;  %v1281_v12 = vsel %vm1230_vm0, %v590_v20, %v655_v37  ;;  %v1290_v21 = vsel %vm1230_vm0, %v593_v54, %v661_v25  ;;  %v3497_v37 = vld [vmem:[%s4190_s27 + $0x88] sm:$0xe]  ;;  %v4112_v54 = vld [vmem:[%s4190_s27] sm:$0xf] }
  0x89   : > { %1164 = vrot.lane.b32.xlu1 %v1133_v34, %s4138_s30  ;;  %v3609_v57 = vcombine.low %v3497_v37, %v4706_v45 }
  0x8a   : > { %v913_v11 = vpop.permute.xlu1 %912  ;;  %v657_v56 = vpop.permute.xlu0 %656 }
  0x8b   : > { %v1284_v9 = vsel %vm1230_vm0, %v591_v58, %v657_v56  ;;  %v1332_v25 = vsel %vm1230_vm0, %v747_v33, %v913_v11  ;;  %v4776_v52 = vrot.slane %v3609_v57, 1  ;;  %v4114_v33 = vld [vmem:[%s4190_s27 + $0x20] sm:$0xf] }
  0x8c   : > { %538 = vrot.lane.b32.xlu0 %v502_v27, %s4138_s30  ;;  %v3612_v23 = vcombine.low %v1281_v12, %v1284_v9  ;;  %v4774_v27 = vrot.slane %v3608_v26, 1  ;;  %v758_v12 = vshll.u32 %v4201_v10, 16  ;;  %v4113_v9 = vld [vmem:[%s4190_s27 + $0x8] sm:$0xf] }
  0x8d   : > { %540 = vrot.lane.b32.xlu1 %v509_v13, %s4138_s30  ;;  %v4115_v26 = vld [vmem:[%s4190_s27 + $0x28] sm:$0xf] }
  0x8e   : > { %v659_v35 = vpop.permute.xlu0 %658  ;;  %1990 = vmatprep.mubr.bf16.mxu0 %v3612_v23  ;;  %v3650_v8 = vcombine.low %v4774_v27, %v4776_v52  ;;  %v760_v37 = vrot.slane %v758_v12, 1 }
  0x8f   : > { %v1135_v34 = vpop.permute.xlu1 %1134  ;;  %v1287_v31 = vsel %vm1230_vm0, %v592_v51, %v659_v35 }
  0x90   : > { %v3617_v47 = vcombine.low %v1287_v31, %v1290_v21  ;;  %938 = vrot.lane.b32.xlu0 %v908_v50, %s4138_s30  ;;  %v1377_v30 = vsel %vm1230_vm0, %v4110_v53, %v1135_v34  ;;  %v4091_v50 = vld [vmem:[%s5445_s1 + $0x110] sm:$0xff]   ;;  %v749_v31 = vshrl.u32 %v4285_v28, 16 }
  0x91   : > { %940 = vrot.lane.b32.xlu1 %v909_v15, %s4138_s30 }
  0x92   : > { %v911_v2 = vpop.permute.xlu0 %910 }
  0x93   : > { %v1137_v20 = vpop.permute.xlu1 %1136  ;;  %v1329_v58 = vsel %vm1230_vm0, %v740_v17, %v911_v2  ;;  %v753_v17 = vrot.slane %v751_v16, 1  ;;  %v208_v2 = vld [vmem:[%s4190_s27 + $0x20] sm:$0xe] }
  0x94   : > { %v3613_v13 = vcombine.low %v1329_v58, %v1332_v25  ;;  %v1380_v5 = vsel %vm1230_vm0, %v4111_v32, %v1137_v20  ;;  %v4094_v25 = vld [vmem:[%s5445_s1 + $0x108] sm:$0xff]   ;;  %v4117_v32 = vld [vmem:[%s4190_s27 + $0x18] sm:$0xf] }
  0x95   : > { %v3614_v45 = vcombine.low %v1377_v30, %v1380_v5  ;;  %v209_v58 = vld [vmem:[%s4190_s27 + $0x28] sm:$0xe]  ;;  %v3518_v30 = vcombine.low %v208_v2, %v4324_v59  ;;  %v761_v5 = vor.u32 %v760_v37, %v756_v43  ;;  %v4118_v43 = vld [vmem:[%s4190_s27 + $0x30] sm:$0xf]  ;;  %v4119_v2 = vld [vmem:[%s4190_s27 + $0x38] sm:$0xf] }
  0x96   : > { %v511_v11 = vpop.permute.xlu0 %510 }
  0x97   : > { %2087 = vmatprep.mubr.bf16.mxu1 %v3614_v45  ;;  %v513_v56 = vpop.permute.xlu1 %512  ;;  %v1233_v51 = vsel %vm1230_vm0, %v4112_v54, %v511_v11  ;;  %v3519_v45 = vcombine.low %v209_v58, %v4335_v63  ;;  %v4097_v11 = vld [vmem:[%s5445_s1 + $0x100] sm:$0xff]  }
  0x98   : > { %v1236_v23 = vsel %vm1230_vm0, %v4113_v9, %v513_v56  ;;  %2088 = vmatmul.mubr.bf16.vlgmr.msra.gmra.mxu1 %v3613_v13  ;;  %v4116_v13 = vld [vmem:[%s4190_s27 + $0x10] sm:$0xf] }
  0x99   : > { %v3611_v15 = vcombine.low %v1233_v51, %v1236_v23  ;;  %3945 = vmatpush3.bf16.msra.mxu1 %v4568_v38  ;;  %v594_v51 = vrot.slane %v3518_v30, 1  ;;  %v595_v9 = vrot.slane %v3519_v45, 1  ;;  %v4120_v30 = vld [vmem:[%s4190_s27 + $0x20] sm:$0xf] }
  0x9a   : > { %v1139_v35 = vpop.permute.xlu0 %1138  ;;  %3942 = vmatprep.subr.bf16.mxu1 %v4091_v50 }
  0x9b   : > { %v1141_v21 = vpop.permute.xlu1 %1140  ;;  %1991 = vmatmul.mubr.bf16.vlgmr.msra.gmra.mxu0 %v3611_v15  ;;  %v1383_v34 = vsel %vm1230_vm0, %v4114_v33, %v1139_v35 }
  0x9c   : > { %v1386_v57 = vsel %vm1230_vm0, %v4115_v26, %v1141_v21  ;;  %1998 = vmatprep.mubr.bf16.mxu0 %v3617_v47  ;;  %3918 = vmatpush3.bf16.msra.mxu0 %v4568_v38  ;;  %v754_v47 = vor.u32 %v753_v17, %v749_v31  ;;  %v772_v21 = vshll.u32 %v4328_v60, 16  ;;  %v763_v26 = vshrl.u32 %v4341_v1, 16 }
  0x9d   : > { %v3619_v20 = vcombine.low %v1383_v34, %v1386_v57  ;;  %3919 = vmatprep.subr.bf16.mxu0 %v4091_v50  ;;  %3946 = vmatpush3.bf16.msra.mxu1 %v4091_v50 }
  0x9e   : > { %v515_v28 = vpop.permute.xlu0 %514  ;;  %3943 = vmatprep.subr.bf16.mxu1 %v4094_v25  ;;  %v774_v58 = vrot.slane %v772_v21, 1 }
  0x9f   : > { %v517_v10 = vpop.permute.xlu1 %516  ;;  %2095 = vmatprep.mubr.bf16.mxu1 %v3619_v20  ;;  %v1239_v53 = vsel %vm1230_vm0, %v4116_v13, %v515_v28  ;;  %v770_v20 = vshrl.u32 %v4328_v60, 16  ;;  %v210_v28 = vld [vmem:[%s4190_s27 + $0x30] sm:$0xe]  ;;  %v211_v13 = vld [vmem:[%s4190_s27 + $0x38] sm:$0xe] }
  0xa0   : > { %v1242_v38 = vsel %vm1230_vm0, %v4117_v32, %v517_v10  ;;  %3920 = vmatpush3.bf16.msra.mxu0 %v4091_v50  ;;  %v765_v50 = vshll.u32 %v4341_v1, 16  ;;  %v3520_v1 = vcombine.low %v210_v28, %v4420_v62  ;;  %v779_v62 = vshll.u32 %v4382_v39, 16 }
  0xa1   : > { %v3616_v16 = vcombine.low %v1239_v53, %v1242_v38  ;;  %3921 = vmatprep.subr.bf16.mxu0 %v4094_v25  ;;  %3947 = vmatpush3.bf16.msra.mxu1 %v4094_v25 }
  0xa2   : > { %v915_v56 = vpop.permute.xlu0 %914  ;;  %3944 = vmatprep.subr.bf16.mxu1 %v4097_v11  ;;  %v767_v57 = vrot.slane %v765_v50, 1 }
  0xa3   : > { %v917_v54 = vpop.permute.xlu1 %916  ;;  %1999 = vmatmul.mubr.bf16.gmra.mxu0 %v3616_v16  ;;  %v1335_v59 = vsel %vm1230_vm0, %v754_v47, %v915_v56  ;;  %v3521_v16 = vcombine.low %v211_v13, %v4435_v6 }
  0xa4   : > { %v1338_v12 = vsel %vm1230_vm0, %v761_v5, %v917_v54  ;;  %3922 = vmatpush3.bf16.msra.mxu0 %v4094_v25  ;;  %v768_v38 = vor.u32 %v767_v57, %v763_v26  ;;  %v4121_v5 = vld [vmem:[%s4190_s27 + $0x28] sm:$0xf]  ;;  %v784_v26 = vshrl.u32 %v4365_v24, 16 }
  0xa5   : > { %v3618_v63 = vcombine.low %v1335_v59, %v1338_v12  ;;  %3923 = vmatprep.subr.bf16.mxu0 %v4097_v11  ;;  %3948 = vmatpush3.bf16.msra.mxu1 %v4097_v11 }
  0xa6   : > { %v663_v23 = vpop.permute.xlu0 %662 }
  0xa7   : > { %v665_v15 = vpop.permute.xlu1 %664  ;;  %2096 = vmatmul.mubr.bf16.gmra.mxu1 %v3618_v63  ;;  %v1293_v35 = vsel %vm1230_vm0, %v594_v51, %v663_v23  ;;  %v596_v51 = vrot.slane %v3520_v1, 1 }
  0xa8   : > { %v1296_v33 = vsel %vm1230_vm0, %v595_v9, %v665_v15  ;;  %3924 = vmatpush3.bf16.msra.mxu0 %v4097_v11  ;;  %v775_v11 = vor.u32 %v774_v58, %v770_v20  ;;  %v597_v9 = vrot.slane %v3521_v16, 1  ;;  %v786_v15 = vshll.u32 %v4365_v24, 16  ;;  %v213_v20 = vld [vmem:[%s4190_s27 + $0x48] sm:$0xe] }
  0xa9   : > { %v3622_v34 = vcombine.low %v1293_v35, %v1296_v33 }
  0xaa   : > { %v1143_v31 = vpop.permute.xlu0 %1142  ;;  %v788_v57 = vrot.slane %v786_v15, 1 }
  0xab   : > { %v1145_v17 = vpop.permute.xlu1 %1144  ;;  %2006 = vmatprep.mubr.bf16.mxu0 %v3622_v34  ;;  %v1389_v37 = vsel %vm1230_vm0, %v4118_v43, %v1143_v31  ;;  %v781_v43 = vrot.slane %v779_v62, 1  ;;  %v214_v62 = vld [vmem:[%s4190_s27 + $0x50] sm:$0xe] }
  0xac   : > { %v1392_v25 = vsel %vm1230_vm0, %v4119_v2, %v1145_v17  ;;  %v777_v17 = vshrl.u32 %v4382_v39, 16  ;;  %v212_v2 = vld [vmem:[%s4190_s27 + $0x40] sm:$0xe] }
  0xad   : > { %v3624_v10 = vcombine.low %v1389_v37, %v1392_v25 }
  0xae   : > { %v519_v53 = vpop.permute.xlu0 %518  ;;  %v782_v13 = vor.u32 %v781_v43, %v777_v17 }
  0xaf   : > { %v521_v47 = vpop.permute.xlu1 %520  ;;  %2103 = vmatprep.mubr.bf16.mxu1 %v3624_v10  ;;  %v1245_v32 = vsel %vm1230_vm0, %v4120_v30, %v519_v53  ;;  %v789_v53 = vor.u32 %v788_v57, %v784_v26 }
  0xb0   : > { %v1248_v45 = vsel %vm1230_vm0, %v4121_v5, %v521_v47 }
  0xb1   : > { %v3621_v60 = vcombine.low %v1245_v32, %v1248_v45 }
  0xb2   : > { %v919_v56 = vpop.permute.xlu0 %918 }
  0xb3   : > { %v921_v54 = vpop.permute.xlu1 %920  ;;  %2007 = vmatmul.mubr.bf16.gmra.mxu0 %v3621_v60  ;;  %v1341_v59 = vsel %vm1230_vm0, %v768_v38, %v919_v56 }
  0xb4   : > { %v1344_v12 = vsel %vm1230_vm0, %v775_v11, %v921_v54 }
  0xb5   : > { %v3623_v63 = vcombine.low %v1341_v59, %v1344_v12 }
  0xb6   : > { %v667_v23 = vpop.permute.xlu0 %666 }
  0xb7   : > { %v669_v50 = vpop.permute.xlu1 %668  ;;  %2104 = vmatmul.mubr.bf16.gmra.mxu1 %v3623_v63  ;;  %v1299_v6 = vsel %vm1230_vm0, %v596_v51, %v667_v23  ;;  %v791_v51 = vshrl.u32 %v4449_v55, 16  ;;  %v798_v63 = vshrl.u32 %v4424_v0, 16 }
  0xb8   : > { %v1302_v35 = vsel %vm1230_vm0, %v597_v9, %v669_v50 }
  0xb9   : > { %v3627_v21 = vcombine.low %v1299_v6, %v1302_v35  ;;  %v215_v6 = vld [vmem:[%s4190_s27 + $0x58] sm:$0xe] }
  0xba   : > { %v1147_v33 = vpop.permute.xlu0 %1146 }
  0xbb   : > { %v1149_v34 = vpop.permute.xlu1 %1148  ;;  %2014 = vmatprep.mubr.bf16.mxu0 %v3627_v21  ;;  %v1395_v31 = vsel %vm1230_vm0, %v4394_v48, %v1147_v33  ;;  %v3522_v48 = vcombine.low %v212_v2, %v4539_v19  ;;  %v793_v19 = vshll.u32 %v4449_v55, 16 }
  0xbc   : > { %v1398_v37 = vsel %vm1230_vm0, %v4386_v42, %v1149_v34  ;;  %v3523_v42 = vcombine.low %v213_v20, %v4532_v41  ;;  %v800_v41 = vshll.u32 %v4424_v0, 16 }
  0xbd   : > { %v3629_v25 = vcombine.low %v1395_v31, %v1398_v37  ;;  %v598_v38 = vrot.slane %v3522_v48, 1  ;;  %v795_v12 = vrot.slane %v793_v19, 1 }
  0xbe   : > { %v523_v58 = vpop.permute.xlu0 %522  ;;  %v599_v5 = vrot.slane %v3523_v42, 1  ;;  %v802_v23 = vrot.slane %v800_v41, 1  ;;  %v5495_v42 = vld [vmem:[#allocation9_spill] sm:$0xff] }
  0xbf   : > { %v525_v28 = vpop.permute.xlu1 %524  ;;  %2111 = vmatprep.mubr.bf16.mxu1 %v3629_v25  ;;  %v1251_v10 = vsel %vm1230_vm0, %v4417_v61, %v523_v58  ;;  %v796_v33 = vor.u32 %v795_v12, %v791_v51 }
  0xc0   : > { %v1254_v39 = vsel %vm1230_vm0, %v4429_v4, %v525_v28  ;;  %v803_v34 = vor.u32 %v802_v23, %v798_v63 }
  0xc1   : > { %v3626_v24 = vcombine.low %v1251_v10, %v1254_v39  ;;  %v805_v39 = vshrl.u32 %v4519_v36, 16 }
  0xc2   : > { %v923_v47 = vpop.permute.xlu0 %922 }
  0xc3   : > { %v925_v30 = vpop.permute.xlu1 %924  ;;  %2015 = vmatmul.mubr.bf16.gmra.mxu0 %v3626_v24  ;;  %v1347_v32 = vsel %vm1230_vm0, %v782_v13, %v923_v47 }
  0xc4   : > { %v1350_v1 = vsel %vm1230_vm0, %v789_v53, %v925_v30 }
  0xc5   : > { %v3628_v61 = vcombine.low %v1347_v32, %v1350_v1  ;;  %v216_v32 = vld [vmem:[%s4190_s27 + $0x60] sm:$0xe]  ;;  %v217_v1 = vld [vmem:[%s4190_s27 + $0x68] sm:$0xe] }
  0xc6   : > { %v671_v45 = vpop.permute.xlu0 %670 }
  0xc7   : > { %v673_v11 = vpop.permute.xlu1 %672  ;;  %2112 = vmatmul.mubr.bf16.gmra.mxu1 %v3628_v61  ;;  %v1305_v4 = vsel %vm1230_vm0, %v598_v38, %v671_v45  ;;  %v5496_v45 = vld [vmem:[#allocation11_spill] sm:$0xff] }
  0xc8   : > { %v1308_v16 = vsel %vm1230_vm0, %v599_v5, %v673_v11 }
  0xc9   : > { %v3632_v60 = vcombine.low %v1305_v4, %v1308_v16  ;;  %v3527_v16 = vcombine.low %v217_v1, %v4668_v18  ;;  %v3483_v1 = vld [vmem:[%s4190_s27 + $0x18] sm:$0xe] }
  0xca   : > { %v1151_v56 = vpop.permute.xlu0 %1150 }
  0xcb   : > { %v1153_v54 = vpop.permute.xlu1 %1152  ;;  %2022 = vmatprep.mubr.bf16.mxu0 %v3632_v60  ;;  %v1401_v59 = vsel %vm1230_vm0, %v4504_v14, %v1151_v56  ;;  %v3524_v14 = vcombine.low %v214_v62, %v4602_v3  ;;  %v807_v3 = vshll.u32 %v4519_v36, 16  ;;  %v5497_v36 = vld [vmem:[#allocation10_spill] sm:$0xff]  ;;  %v5498_v62 = vld [vmem:[#allocation8_spill] sm:$0xff] }
  0xcc   : > { %v1404_v9 = vsel %vm1230_vm0, %v4523_v40, %v1153_v54  ;;  %v3525_v40 = vcombine.low %v215_v6, %v4596_v22  ;;  %v5494_v22 = vld [vmem:[#allocation6_spill] sm:$0xff]  ;;  %v5499_v6 = vld [vmem:[#allocation7_spill] sm:$0xff] }
  0xcd   : > { %v3634_v50 = vcombine.low %v1401_v59, %v1404_v9  ;;  %v600_v37 = vrot.slane %v3524_v14, 1  ;;  %v814_v20 = vshll.u32 %v5494_v22, 16  ;;  %v809_v53 = vrot.slane %v807_v3, 1  ;;  %v5501_v3 = vld [vmem:[#allocation18_spill] sm:$0xff] }
  0xce   : > { %v527_v15 = vpop.permute.xlu0 %526  ;;  %v601_v57 = vrot.slane %v3525_v40, 1  ;;  %v812_v47 = vshrl.u32 %v5494_v22, 16  ;;  %v603_v9 = vrot.slane %v3527_v16, 1 }
  0xcf   : > { %v529_v35 = vpop.permute.xlu1 %528  ;;  %2119 = vmatprep.mubr.bf16.mxu1 %v3634_v50  ;;  %v1257_v21 = vsel %vm1230_vm0, %v4536_v46, %v527_v15  ;;  %v816_v30 = vrot.slane %v814_v20, 1  ;;  %v810_v11 = vor.u32 %v809_v53, %v805_v39  ;;  %v828_v15 = vshll.u32 %v5499_v6, 16  ;;  %v5503_v20 = vld [vmem:[#allocation17_spill] sm:$0xff] }
  0xd0   : > { %v1260_v55 = vsel %vm1230_vm0, %v4529_v49, %v529_v35 }
  0xd1   : > { %v3631_v0 = vcombine.low %v1257_v21, %v1260_v55  ;;  %v817_v41 = vor.u32 %v816_v30, %v812_v47 }
  0xd2   : > { %v927_v31 = vpop.permute.xlu0 %926 }
  0xd3   : > { %v929_v17 = vpop.permute.xlu1 %928  ;;  %2023 = vmatmul.mubr.bf16.gmra.mxu0 %v3631_v0  ;;  %v1353_v43 = vsel %vm1230_vm0, %v796_v33, %v927_v31  ;;  %v5500_v0 = vld [vmem:[#allocation14_spill] sm:$0xff] }
  0xd4   : > { %v1356_v26 = vsel %vm1230_vm0, %v803_v34, %v929_v17  ;;  %v819_v34 = vshrl.u32 %v5498_v62, 16  ;;  %v826_v17 = vshrl.u32 %v5499_v6, 16 }
  0xd5   : > { %v3633_v46 = vcombine.low %v1353_v43, %v1356_v26  ;;  %v830_v43 = vrot.slane %v828_v15, 1  ;;  %v4125_v15 = vld [vmem:[%s4190_s27 + $0x5c] sm:$0x1] }
  0xd6   : > { %v675_v2 = vpop.permute.xlu0 %674 }
  0xd7   : > { %v677_v25 = vpop.permute.xlu1 %676  ;;  %2120 = vmatmul.mubr.bf16.gmra.mxu1 %v3633_v46  ;;  %v1311_v49 = vsel %vm1230_vm0, %v600_v37, %v675_v2  ;;  %v218_v37 = vld [vmem:[%s4190_s27 + $0x70] sm:$0xe] }
  0xd8   : > { %v1314_v58 = vsel %vm1230_vm0, %v601_v57, %v677_v25  ;;  %v219_v57 = vld [vmem:[%s4190_s27 + $0x78] sm:$0xe] }
  0xd9   : > { %v3637_v28 = vcombine.low %v1311_v49, %v1314_v58  ;;  %v5502_v49 = vld [vmem:[#allocation22_spill] sm:$0xff] }
  0xda   : > { %v1155_v10 = vpop.permute.xlu0 %1154  ;;  %v3528_v22 = vcombine.low %v218_v37, %v5502_v49 }
  0xdb   : > { %v1157_v13 = vpop.permute.xlu1 %1156  ;;  %2030 = vmatprep.mubr.bf16.mxu0 %v3637_v28  ;;  %v1407_v48 = vsel %vm1230_vm0, %v4590_v7, %v1155_v10  ;;  %v3526_v7 = vcombine.low %v216_v32, %v4678_v29  ;;  %v821_v29 = vshll.u32 %v5498_v62, 16  ;;  %v831_v28 = vor.u32 %v830_v43, %v826_v17  ;;  %v5504_v10 = vld [vmem:[#allocation24_spill] sm:$0xff]  ;;  %v5507_v62 = vld [vmem:[#allocation19_spill] sm:$0xff] }
  0xdc   : > { %v1410_v24 = vsel %vm1230_vm0, %v5495_v42, %v1157_v13  ;;  %v3529_v13 = vcombine.low %v219_v57, %v5504_v10 }
  0xdd   : > { %v3639_v38 = vcombine.low %v1407_v48, %v1410_v24  ;;  %v602_v51 = vrot.slane %v3526_v7, 1  ;;  %v823_v40 = vrot.slane %v821_v29, 1  ;;  %v604_v24 = vrot.slane %v3528_v22, 1  ;;  %v5506_v7 = vld [vmem:[#allocation12_spill] sm:$0xff] }
  0xde   : > { %v531_v5 = vpop.permute.xlu0 %530  ;;  %v605_v30 = vrot.slane %v3529_v13, 1  ;;  %v3494_v13 = vld [vmem:[%s4190_s27 + $0x70] sm:$0xe] }
  0xdf   : > { %v533_v61 = vpop.permute.xlu1 %532  ;;  %2127 = vmatprep.mubr.bf16.mxu1 %v3639_v38  ;;  %v1263_v19 = vsel %vm1230_vm0, %v5496_v45, %v531_v5  ;;  %v3482_v38 = vld [vmem:[%s4190_s27 + $0x10] sm:$0xe]  ;;  %v5505_v5 = vld [vmem:[#allocation13_spill] sm:$0xff] }
  0xe0   : > { %v1266_v4 = vsel %vm1230_vm0, %v5497_v36, %v533_v61  ;;  %v835_v61 = vshll.u32 %v5505_v5, 16  ;;  %v842_v36 = vshll.u32 %v5506_v7, 16 }
  0xe1   : > { %v3636_v60 = vcombine.low %v1263_v19, %v1266_v4 }
  0xe2   : > { %v931_v56 = vpop.permute.xlu0 %930 }
  0xe3   : > { %v933_v54 = vpop.permute.xlu1 %932  ;;  %2031 = vmatmul.mubr.bf16.gmra.mxu0 %v3636_v60  ;;  %v1359_v59 = vsel %vm1230_vm0, %v810_v11, %v931_v56  ;;  %v4123_v60 = vld [vmem:[%s4190_s27 + $0x1c] sm:$0x1] }
  0xe4   : > { %v1362_v12 = vsel %vm1230_vm0, %v817_v41, %v933_v54  ;;  %v4122_v41 = vld [vmem:[%s4190_s27 + $0x14] sm:$0x1]  ;;  %v3595_v56 = vcombine.low %v3483_v1, %v4123_v60  ;;  %v3490_v54 = vld [vmem:[%s4190_s27 + $0x50] sm:$0xe]  ;;  %v3489_v1 = vld [vmem:[%s4190_s27 + $0x48] sm:$0xe] }
  0xe5   : > { %v3638_v63 = vcombine.low %v1359_v59, %v1362_v12  ;;  %v3594_v16 = vcombine.low %v3482_v38, %v4122_v41  ;;  %v3491_v59 = vld [vmem:[%s4190_s27 + $0x58] sm:$0xe]  ;;  %v3488_v38 = vld [vmem:[%s4190_s27 + $0x40] sm:$0xe] }
  0xe6   : > { %v679_v23 = vpop.permute.xlu0 %678 }
  0xe7   : > { %v681_v50 = vpop.permute.xlu1 %680  ;;  %2128 = vmatmul.mubr.bf16.gmra.mxu1 %v3638_v63  ;;  %v1317_v18 = vsel %vm1230_vm0, %v602_v51, %v679_v23  ;;  %v837_v63 = vrot.slane %v835_v61, 1 }
  0xe8   : > { %v1320_v35 = vsel %vm1230_vm0, %v603_v9, %v681_v50  ;;  %v833_v9 = vshrl.u32 %v5505_v5, 16  ;;  %v840_v50 = vshrl.u32 %v5506_v7, 16  ;;  %v5511_v5 = vld [vmem:[#allocation15_spill] sm:$0xff]  ;;  %v4128_v7 = vld [vmem:[%s4190_s27 + $0x44] sm:$0x1] }
  0xe9   : > { %v3642_v21 = vcombine.low %v1317_v18, %v1320_v35  ;;  %v4124_v18 = vld [vmem:[%s4190_s27 + $0x54] sm:$0x1]  ;;  %v3603_v35 = vcombine.low %v3491_v59, %v4125_v15  ;;  %v3606_v61 = vcombine.low %v3494_v13, %v5511_v5  ;;  %v5514_v59 = vld [vmem:[#allocation2_spill] sm:$0xff] }
  0xea   : > { %v1159_v33 = vpop.permute.xlu0 %1158  ;;  %v3602_v6 = vcombine.low %v3490_v54, %v4124_v18  ;;  %v838_v43 = vor.u32 %v837_v63, %v833_v9  ;;  %v5513_v54 = vld [vmem:[#allocation3_spill] sm:$0xff] }
  0xeb   : > { %v1161_v14 = vpop.permute.xlu1 %1160  ;;  %2038 = vmatprep.mubr.bf16.mxu0 %v3642_v21  ;;  %v1413_v55 = vsel %vm1230_vm0, %v4652_v44, %v1159_v33  ;;  %v824_v44 = vor.u32 %v823_v40, %v819_v34  ;;  %v5508_v21 = vld [vmem:[#allocation20_spill] sm:$0xff]  ;;  %v1215_v34 = vrot.slane %v3595_v56, 1  ;;  %v1226_v60 = vrot.slane %v3606_v61, 1 }
  0xec   : > { %v1416_v31 = vsel %vm1230_vm0, %v5500_v0, %v1161_v14  ;;  %v844_v14 = vrot.slane %v842_v36, 1  ;;  %v3486_v40 = vld [vmem:[%s4190_s27 + $0x30] sm:$0xe]  ;;  %v3600_v36 = vcombine.low %v3488_v38, %v4128_v7 }
  0xed   : > { %v3644_v26 = vcombine.low %v1413_v55, %v1416_v31  ;;  %v1214_v55 = vrot.slane %v3594_v16, 1  ;;  %v3487_v31 = vld [vmem:[%s4190_s27 + $0x38] sm:$0xe] }
  0xee   : > { %v535_v46 = vpop.permute.xlu0 %534  ;;  %v845_v22 = vor.u32 %v844_v14, %v840_v50 }
  0xef   : > { %v537_v2 = vpop.permute.xlu1 %536  ;;  %2135 = vmatprep.mubr.bf16.mxu1 %v3644_v26  ;;  %v1269_v25 = vsel %vm1230_vm0, %v5501_v3, %v535_v46  ;;  %v5509_v26 = vld [vmem:[#allocation21_spill] sm:$0xff]  ;;  %v1222_v46 = vrot.slane %v3602_v6, 1  ;;  %v4126_v3 = vld [vmem:[%s4190_s27 + $0x34] sm:$0x1] }
  0xf0   : > { %v1272_v58 = vsel %vm1230_vm0, %v5503_v20, %v537_v2  ;;  %v1223_v2 = vrot.slane %v3603_v35, 1  ;;  %v3615_v20 = vcombine.low %v1214_v55, %v1215_v34 }
  0xf1   : > { %v3641_v48 = vcombine.low %v1269_v25, %v1272_v58  ;;  %v3598_v25 = vcombine.low %v3486_v40, %v4126_v3  ;;  %v4127_v58 = vld [vmem:[%s4190_s27 + $0x3c] sm:$0x1] }
  0xf2   : > { %v935_v39 = vpop.permute.xlu0 %934 }
  0xf3   : > { %v937_v53 = vpop.permute.xlu1 %936  ;;  %2039 = vmatmul.mubr.bf16.gmra.mxu0 %v3641_v48  ;;  %v1365_v42 = vsel %vm1230_vm0, %v824_v44, %v935_v39  ;;  %v5510_v44 = vld [vmem:[#allocation23_spill] sm:$0xff]  ;;  %v3495_v48 = vld [vmem:[%s4190_s27 + $0x78] sm:$0xe] }
  0xf4   : > { %v1368_v47 = vsel %vm1230_vm0, %v831_v28, %v937_v53  ;;  %v3599_v28 = vcombine.low %v3487_v31, %v4127_v58 }
  0xf5   : > { %v3643_v32 = vcombine.low %v1365_v42, %v1368_v47  ;;  %v1218_v47 = vrot.slane %v3598_v25, 1 }
  0xf6   : > { %v683_v45 = vpop.permute.xlu0 %682 }
  0xf7   : > { %v685_v19 = vpop.permute.xlu1 %684  ;;  %2136 = vmatmul.mubr.bf16.gmra.mxu1 %v3643_v32  ;;  %v1323_v11 = vsel %vm1230_vm0, %v604_v24, %v683_v45  ;;  %v3635_v24 = vcombine.low %v1222_v46, %v1223_v2  ;;  %v1219_v32 = vrot.slane %v3599_v28, 1  ;;  %v5512_v45 = vld [vmem:[#allocation16_spill] sm:$0xff] }
  0xf8   : > { %v1326_v4 = vsel %vm1230_vm0, %v605_v30, %v685_v19  ;;  %v3607_v19 = vcombine.low %v3495_v48, %v5512_v45 }
  0xf9   : > { %v3647_v51 = vcombine.low %v1323_v11, %v1326_v4  ;;  %v4129_v4 = vld [vmem:[%s4190_s27 + $0x4c] sm:$0x1]  ;;  %v3625_v16 = vcombine.low %v1218_v47, %v1219_v32  ;;  %s3950_s27 = smul.u32 40, %s5522_s13 }
  0xfa   : > { %v1163_v12 = vpop.permute.xlu0 %1162  ;;  %v3601_v41 = vcombine.low %v3489_v1, %v4129_v4  ;;  %v1227_v56 = vrot.slane %v3607_v19, 1 }
  0xfb   : > { %v1165_v23 = vpop.permute.xlu1 %1164  ;;  %2046 = vmatprep.mubr.bf16.mxu0 %v3647_v51  ;;  %v1419_v29 = vsel %vm1230_vm0, %v5507_v62, %v1163_v12  ;;  %v5515_v51 = vcombine.low %v5513_v54, %v5514_v59  ;;  %v1220_v12 = vrot.slane %v3600_v36, 1  ;;  %v5517_v62 = vld [vmem:[#allocation4_spill] sm:$0xff]  ;;  %s4996_s21 = scalar_lea.vmem %s5447_s3, %s3950_s27 }
  0xfc   : > { %v1422_v33 = vsel %vm1230_vm0, %v5508_v21, %v1165_v23  ;;  %v1221_v9 = vrot.slane %v3601_v41, 1  ;;  %v3645_v63 = vcombine.low %v1226_v60, %v1227_v56  ;;  %v5516_v23 = vld [vmem:[#allocation5_spill] sm:$0xff] }
  0xfd   : > { %v3649_v0 = vcombine.low %v1419_v29, %v1422_v33  ;;  %v5518_v29 = vcombine.low %v5516_v23, %v5517_v62 }
  0xfe   : > { %v539_v17 = vpop.permute.xlu0 %538  ;;  %v3630_v50 = vcombine.low %v1220_v12, %v1221_v9 }
  0xff   : > { %v541_v37 = vpop.permute.xlu1 %540  ;;  %2143 = vmatprep.mubr.bf16.mxu1 %v3649_v0  ;;  %v1275_v57 = vsel %vm1230_vm0, %v5509_v26, %v539_v17  ;;  %v4139_v26 = vmov 0  }
 0x100   : > { %v1278_v49 = vsel %vm1230_vm0, %v5510_v44, %v541_v37  ;;  %3131 = vst.msk [vmem:[%s4996_s21] sm:$0x7] %vm3130_vm1, %v4139_v26  ;;  %3133 = vst.msk [vmem:[%s4996_s21 + $0x8] sm:$0x7] %vm3130_vm1, %v4139_v26  ;;  %v5027_v44 = vld [vmem:[%s5446_s2] ss:$0 sm:$0xff] }
 0x101   : > { %v3646_v10 = vcombine.low %v1275_v57, %v1278_v49  ;;  %3140 = vst.msk [vmem:[%s4996_s21 + $0x24] sm:$0x7] %vm3130_vm1, %v4139_v26  ;;  %3132 = vst.msk [vmem:[%s4996_s21 + $0x4] sm:$0x7] %vm3130_vm1, %v4139_v26 }
 0x102   : > { %v939_v39 = vpop.permute.xlu0 %938  ;;  %3134 = vst.msk [vmem:[%s4996_s21 + $0xc] sm:$0x7] %vm3130_vm1, %v4139_v26  ;;  %3135 = vst.msk [vmem:[%s4996_s21 + $0x10] sm:$0x7] %vm3130_vm1, %v4139_v26 }
 0x103   : > { %v941_v53 = vpop.permute.xlu1 %940  ;;  %2047 = vmatmul.mubr.bf16.gmra.mxu0 %v3646_v10  ;;  %v1371_v42 = vsel %vm1230_vm0, %v838_v43, %v939_v39  ;;  %3136 = vst.msk [vmem:[%s4996_s21 + $0x14] sm:$0x7] %vm3130_vm1, %v4139_v26  ;;  %3137 = vst.msk [vmem:[%s4996_s21 + $0x18] sm:$0x7] %vm3130_vm1, %v4139_v26 }
 0x104   : > { %v1374_v30 = vsel %vm1230_vm0, %v845_v22, %v941_v53  ;;  %3925 = vmatprep.mubr.msk.bf16.mxu0 %vm1230_vm0, %v3615_v20  ;;  %3138 = vst.msk [vmem:[%s4996_s21 + $0x1c] sm:$0x7] %vm3130_vm1, %v4139_v26  ;;  %3139 = vst.msk [vmem:[%s4996_s21 + $0x20] sm:$0x7] %vm3130_vm1, %v4139_v26 }
 0x105   : > { %v3648_v11 = vcombine.low %v1371_v42, %v1374_v30 }
 0x107   : > { %2144 = vmatmul.mubr.bf16.gmra.mxu1 %v3648_v11 }
 0x108   : > { %3933 = vmatprep.mubr.msk.bf16.mxu1 %vm1230_vm0, %v3635_v24 }
 0x10b   : > { %3926 = vmatmul.mubr.msk.bf16.vlgmr.msra.gmra.mxu0 %vm1230_vm0, %v5515_v51 }
 0x10c   : > { %3929 = vmatprep.mubr.msk.bf16.mxu0 %vm1230_vm0, %v3625_v16 }
 0x10f   : > { %3934 = vmatmul.mubr.msk.bf16.vlgmr.msra.gmra.mxu1 %vm1230_vm0, %v5518_v29 }
 0x110   : > { %3937 = vmatprep.mubr.msk.bf16.mxu1 %vm1230_vm0, %v3645_v63 }
 0x113   : > { %3930 = vmatmul.mubr.msk.bf16.gmra.mxu0 %vm1230_vm0, %v3630_v50 }
 0x117   : > { %3938 = vmatmul.mubr.msk.bf16.gmra.mxu1 %vm1230_vm0, %v3650_v8 }
 0x158   : > { %v4970_v18 = vpop.f32.mrf.mxu1 }
 0x15a   : > { %v4974_v21 = vpop.f32.mrf.mxu1 }
 0x15b   : > { %v3793_v6 = vpop.f32.mrf.mxu0 }
 0x15c   : > { %v4978_v34 = vpop.f32.mrf.mxu1 }
 0x15d   : > { %v3794_v15 = vpop.f32.mrf.mxu0 }
 0x15e   : > { %v4972_v35 = vadd.f32 %v3794_v15, %v3793_v6  ;;  %v4982_v0 = vpop.f32.mrf.mxu1 }
 0x15f   : > { %v3796_v33 = vpop.f32.mrf.mxu0 }
 0x161   : > { %v3797_v14 = vpop.f32.mrf.mxu0 }
 0x162   : > { %v4976_v55 = vadd.f32 %v3797_v14, %v3796_v33 }
 0x163   : > { %v4980_v40 = vpop.f32.mrf.mxu0 }
 0x165   : > { %v4984_v27 = vpop.f32.mrf.mxu0 }
 0x167   : > { %v4986_v52 = vpop.f32.mrf.mxu1  ;;  %v4989_v8 = vpop.f32.mrf.mxu0 }
 0x169   : > { %v4991_v31 = vpop.f32.mrf.mxu1  ;;  %v4998_v17 = vpop.f32.mrf.mxu0 }
 0x16b   : > { %v5000_v43 = vpop.f32.mrf.mxu1 }
 0x16d   : > { %v5022_v57 = vpop.f32.mrf.mxu1 }
 0x173   : > { %v3805_v37 = vpop.f32.mrf.mxu0 }
 0x175   : > { %v3806_v46 = vpop.f32.mrf.mxu0 }
 0x176   : > { %v3807_v2 = vadd.f32 %v3806_v46, %v3805_v37 }
 0x177   : > { %v3808_v3 = vpop.f32.mrf.mxu0  ;;  %v3869_v25 = vpop.f32.mrf.mxu1 }
 0x178   : > { %v2009_v20 = vadd.f32 %v3807_v2, %v5027_v44 }
 0x179   : > { %v3809_v49 = vpop.f32.mrf.mxu0  ;;  %v3870_v22 = vpop.f32.mrf.mxu1 }
 0x17a   : > { %v3810_v58 = vadd.f32 %v3809_v49, %v3808_v3  ;;  %v3871_v28 = vadd.f32 %v3870_v22, %v3869_v25 }
 0x17b   : > { %v3872_v10 = vpop.f32.mrf.mxu1 }
 0x17c   : > { %v5030_v13 = vadd.f32 %v3871_v28, %v2009_v20  ;;  %v2012_v39 = vadd.f32 %v3810_v58, %v5027_v44 }
 0x17d   : > { %v3873_v48 = vpop.f32.mrf.mxu1 }
 0x17e   : > { %v3874_v53 = vadd.f32 %v3873_v48, %v3872_v10 }
 0x180   : > { %v5033_v42 = vadd.f32 %v3874_v53, %v2012_v39 }
 0x183   : > { %v3811_v24 = vpop.f32.mrf.mxu0 }
 0x185   : > { %v3812_v47 = vpop.f32.mrf.mxu0 }
 0x186   : > { %v3813_v30 = vadd.f32 %v3812_v47, %v3811_v24 }
 0x187   : > { %v3814_v32 = vpop.f32.mrf.mxu0  ;;  %v3875_v38 = vpop.f32.mrf.mxu1 }
 0x188   : > { %v2017_v61 = vadd.f32 %v3813_v30, %v5027_v44 }
 0x189   : > { %v3815_v1 = vpop.f32.mrf.mxu0  ;;  %v3876_v5 = vpop.f32.mrf.mxu1 }
 0x18a   : > { %v3816_v45 = vadd.f32 %v3815_v1, %v3814_v32  ;;  %v3877_v19 = vadd.f32 %v3876_v5, %v3875_v38  ;;  %v4140_v38 = vmov 1983009808   ;;  %v2285_v5 = vlaneseq }
 0x18b   : > { %v3878_v11 = vpop.f32.mrf.mxu1  ;;  %v2283_v1 = vunpack.c.l.s4 %v4140_v38 }
 0x18c   : > { %v5036_v7 = vadd.f32 %v3877_v19, %v2017_v61  ;;  %v2020_v4 = vadd.f32 %v3816_v45, %v5027_v44  ;;  %v3801_v61 = vadd.f32 %v4984_v27, %v4980_v40  ;;  %v3804_v40 = vadd.f32 %v4998_v17, %v4989_v8 }
 0x18d   : > { %v3879_v36 = vpop.f32.mrf.mxu1  ;;  %v3859_v27 = vadd.f32 %v4974_v21, %v4970_v18  ;;  %v3862_v8 = vadd.f32 %v4982_v0, %v4978_v34 }
 0x18e   : > { %v3880_v41 = vadd.f32 %v3879_v36, %v3878_v11  ;;  %v3865_v11 = vadd.f32 %v4991_v31, %v4986_v52  ;;  %v1996_v52 = vadd.f32 %v4976_v55, %v5027_v44  ;;  %v2004_v55 = vadd.f32 %v3804_v40, %v5027_v44 }
 0x190   : > { %v5039_v16 = vadd.f32 %v3880_v41, %v2020_v4  ;;  %v2284_v4 = vunpack.c.0.s8 %v2283_v1  ;;  %v2286_v41 = vshrl.u32 %v2285_v5, 7  ;;  %v5086_v0 = vadd.f32 %v3862_v8, %v1996_v52 }
 0x193   : > { %v3817_v60 = vpop.f32.mrf.mxu0 }
 0x195   : > { %v3818_v56 = vpop.f32.mrf.mxu0 }
 0x196   : > { %v5041_v54 = vadd.f32 %v3818_v56, %v3817_v60  ;;  %v2001_v56 = vadd.f32 %v3801_v61, %v5027_v44 }
 0x197   : > { %v3820_v59 = vpop.f32.mrf.mxu0  ;;  %v3881_v9 = vpop.f32.mrf.mxu1 }
 0x199   : > { %v3821_v51 = vpop.f32.mrf.mxu0  ;;  %v3882_v63 = vpop.f32.mrf.mxu1 }
 0x19a   : > { %v5043_v12 = vadd.f32 %v3821_v51, %v3820_v59  ;;  %v3883_v17 = vadd.f32 %v3882_v63, %v3881_v9 }
 0x19b   : > { %v3884_v23 = vpop.f32.mrf.mxu1 }
 0x19d   : > { %v3885_v6 = vpop.f32.mrf.mxu1 }
 0x19e   : > { %v3886_v18 = vadd.f32 %v3885_v6, %v3884_v23 }
 0x1a3   : > { %v3823_v62 = vpop.f32.mrf.mxu0 }
 0x1a5   : > { %v3824_v29 = vpop.f32.mrf.mxu0 }
 0x1a6   : > { %v5045_v50 = vadd.f32 %v3824_v29, %v3823_v62  ;;  %v1993_v62 = vadd.f32 %v4972_v35, %v5027_v44 }
 0x1a7   : > { %v3826_v15 = vpop.f32.mrf.mxu0  ;;  %v3887_v33 = vpop.f32.mrf.mxu1 }
 0x1a9   : > { %v3827_v14 = vpop.f32.mrf.mxu0  ;;  %v3888_v26 = vpop.f32.mrf.mxu1 }
 0x1aa   : > { %v5047_v37 = vadd.f32 %v3827_v14, %v3826_v15  ;;  %v2098_v15 = vadd.f32 %v3865_v11, %v2001_v56  ;;  %v5072_v14 = vsub.s32 %v2284_v4, %v2286_v41 }
 0x1ab   : > { %v5049_v46 = vpop.f32.mrf.mxu1 }
 0x1ac   : > { %v2036_v1 = vadd.f32 %v5047_v37, %v5027_v44 }
 0x1ad   : > { %v5051_v3 = vpop.f32.mrf.mxu1 }
 0x1ae   : > { %v3892_v5 = vadd.f32 %v5051_v3, %v5049_v46 }
 0x1b3   : > { %v3829_v2 = vpop.f32.mrf.mxu0 }
 0x1b5   : > { %v3830_v25 = vpop.f32.mrf.mxu0 }
 0x1b6   : > { %v3831_v49 = vadd.f32 %v3830_v25, %v3829_v2  ;;  %v3868_v2 = vadd.f32 %v5022_v57, %v5000_v43  ;;  %v2025_v43 = vadd.f32 %v5041_v54, %v5027_v44  ;;  %v2028_v57 = vadd.f32 %v5043_v12, %v5027_v44 }
 0x1b7   : > { %v3832_v22 = vpop.f32.mrf.mxu0  ;;  %v3893_v20 = vpop.f32.mrf.mxu1 }
 0x1b8   : > { %v2041_v10 = vadd.f32 %v3831_v49, %v5027_v44  ;;  %v2101_v6 = vadd.f32 %v3868_v2, %v2004_v55  ;;  %v5093_v54 = vadd.f32 %v3886_v18, %v2028_v57 }
 0x1b9   : > { %v3833_v58 = vpop.f32.mrf.mxu0  ;;  %v3894_v28 = vpop.f32.mrf.mxu1 }
 0x1ba   : > { %v3834_v48 = vadd.f32 %v3833_v58, %v3832_v22  ;;  %v3895_v39 = vadd.f32 %v3894_v28, %v3893_v20  ;;  %v2090_v58 = vadd.f32 %v3859_v27, %v1993_v62 }
 0x1bb   : > { %v3896_v53 = vpop.f32.mrf.mxu1 }
 0x1bc   : > { %v5054_v24 = vadd.f32 %v3895_v39, %v2041_v10  ;;  %v2044_v32 = vadd.f32 %v3834_v48, %v5027_v44  ;;  %v3889_v10 = vadd.f32 %v3888_v26, %v3887_v33  ;;  %v2033_v39 = vadd.f32 %v5045_v50, %v5027_v44 }
 0x1bd   : > { %v3897_v47 = vpop.f32.mrf.mxu1 }
 0x1be   : > { %v3898_v30 = vadd.f32 %v3897_v47, %v3896_v53  ;;  %v2130_v50 = vadd.f32 %v3889_v10, %v2033_v39 }
 0x1c0   : > { %v5059_v19 = vadd.f32 %v3898_v30, %v2044_v32  ;;  %v5091_v30 = vadd.f32 %v3883_v17, %v2025_v43 }
 0x1c3   : > { %v3835_v45 = vpop.f32.mrf.mxu0 }
 0x1c5   : > { %v3836_v36 = vpop.f32.mrf.mxu0 }
 0x1c6   : > { %v3837_v60 = vadd.f32 %v3836_v36, %v3835_v45 }
 0x1c7   : > { %v3838_v59 = vpop.f32.mrf.mxu0  ;;  %v3899_v51 = vpop.f32.mrf.mxu1 }
 0x1c8   : > { %v2049_v25 = vadd.f32 %v3837_v60, %v5027_v44 }
 0x1c9   : > { %v3839_v31 = vpop.f32.mrf.mxu0  ;;  %v3900_v29 = vpop.f32.mrf.mxu1 }
 0x1ca   : > { %v3840_v35 = vadd.f32 %v3839_v31, %v3838_v59  ;;  %v3901_v49 = vadd.f32 %v3900_v29, %v3899_v51 }
 0x1cb   : > { %v3902_v21 = vpop.f32.mrf.mxu1  ;;  %v3927_v22 = vpop.f32.mrf.mxu0 }
 0x1cc   : > { %v2195_v20 = vadd.f32 %v3927_v22, %v2098_v15  ;;  %v5080_v28 = vadd.f32 %v3901_v49, %v2049_v25  ;;  %v2052_v53 = vadd.f32 %v3840_v35, %v5027_v44 }
 0x1cd   : > { %v3903_v48 = vpop.f32.mrf.mxu1  ;;  %v2186_v34 = vpop.f32.mrf.mxu0 }
 0x1ce   : > { %v2251_v9 = vmax.f32 %v2195_v20, 0.0  ;;  %v3904_v63 = vadd.f32 %v3903_v48, %v3902_v21  ;;  %v2187_v23 = vadd.f32 %v2186_v34, %v2090_v58 }
 0x1cf   : > { %v3928_v47 = vpop.f32.mrf.mxu0  ;;  %v3935_v38 = vpop.f32.mrf.mxu1 }
 0x1d0   : > { %v2315_v12 = vcombine.high %v2251_v9, %v2251_v9  ;;  %v2322_v33 = vrot.slane %v2251_v9, %v5072_v14  ;;  %v2249_v26 = vmax.f32 %v2187_v23, 0.0  ;;  %v2198_v32 = vadd.f32 %v3928_v47, %v2101_v6 }
 0x1d1   : > { %v5100_v61 = vadd.f32 %v3904_v63, %v2052_v53  ;;  %v2227_v59 = vadd.f32 %v3935_v38, %v2130_v50 }
 0x1d2   : > { %v2329_v45 = vrot.slane %v2315_v12, %v5072_v14  ;;  %v2330_v11 = vcombine.high %v2322_v33, %v2322_v33  ;;  %v2674_v36 = vsel %vm2617_vm2, %v2322_v33, -inf  ;;  %v2281_v4 = vcombine.high %v2249_v26, %v2249_v26 }
 0x1d3   : > { %v2675_v41 = vrot.slane %v2674_v36, 4  ;;  %v2288_v60 = vrot.slane %v2249_v26, %v5072_v14  ;;  %v2252_v56 = vmax.f32 %v2198_v32, 0.0  ;;  %v2259_v32 = vmax.f32 %v2227_v59, 0.0 }
 0x1d4   : > { %v2331_v51 = vcombine.high %v2329_v45, %v2329_v45  ;;  %v2681_v44 = vsel %vm2617_vm2, %v2330_v11, -inf  ;;  %v2688_v37 = vsel %vm2617_vm2, %v2329_v45, -inf  ;;  %v2295_v46 = vrot.slane %v2281_v4, %v5072_v14 }
 0x1d5   : > { %v2676_v3 = vmax.f32 %v2674_v36, %v2675_v41  ;;  %v2682_v62 = vrot.slane %v2681_v44, 4  ;;  %v2689_v40 = vrot.slane %v2688_v37, 4  ;;  %v2296_v27 = vcombine.high %v2288_v60, %v2288_v60 }
 0x1d6   : > { %v2695_v52 = vsel %vm2617_vm2, %v2331_v51, -inf  ;;  %v2297_v31 = vcombine.high %v2295_v46, %v2295_v46  ;;  %v2618_v29 = vsel %vm2617_vm2, %v2288_v60, -inf  ;;  %v2632_v15 = vsel %vm2617_vm2, %v2295_v46, -inf }
 0x1d7   : > { %v2677_v2 = vrot.slane %v2676_v3, 2  ;;  %v2683_v25 = vmax.f32 %v2681_v44, %v2682_v62  ;;  %v2690_v35 = vmax.f32 %v2688_v37, %v2689_v40  ;;  %v2696_v49 = vrot.slane %v2695_v52, 4 }
 0x1d8   : > { %v2619_v8 = vrot.slane %v2618_v29, 4  ;;  %v2625_v17 = vsel %vm2617_vm2, %v2296_v27, -inf  ;;  %v2633_v18 = vrot.slane %v2632_v15, 4  ;;  %v2639_v21 = vsel %vm2617_vm2, %v2297_v31, -inf }
 0x1d9   : > { %v2678_v22 = vmax.f32 %v2676_v3, %v2677_v2  ;;  %v2684_v55 = vrot.slane %v2683_v25, 2  ;;  %v2691_v20 = vrot.slane %v2690_v35, 2  ;;  %v2697_v58 = vmax.f32 %v2695_v52, %v2696_v49 }
 0x1da   : > { %v2620_v43 = vmax.f32 %v2618_v29, %v2619_v8  ;;  %v2626_v57 = vrot.slane %v2625_v17, 4  ;;  %v2634_v10 = vmax.f32 %v2632_v15, %v2633_v18  ;;  %v2640_v48 = vrot.slane %v2639_v21, 4 }
 0x1db   : > { %v2679_v34 = vrot.slane %v2678_v22, 1  ;;  %v2685_v9 = vmax.f32 %v2683_v25, %v2684_v55  ;;  %v2692_v63 = vmax.f32 %v2690_v35, %v2691_v20  ;;  %v2698_v23 = vrot.slane %v2697_v58, 2 }
 0x1dc   : > { %v2621_v6 = vrot.slane %v2620_v43, 2  ;;  %v2627_v39 = vmax.f32 %v2625_v17, %v2626_v57  ;;  %v2635_v53 = vrot.slane %v2634_v10, 2  ;;  %v2641_v47 = vmax.f32 %v2639_v21, %v2640_v48 }
 0x1dd   : > { %v2686_v12 = vrot.slane %v2685_v9, 1  ;;  %v2693_v33 = vrot.slane %v2692_v63, 1  ;;  %v2699_v26 = vmax.f32 %v2697_v58, %v2698_v23  ;;  %v5113_v36 = vmax.f32 %v2678_v22, %v2679_v34 }
 0x1de   : > { %v2622_v38 = vmax.f32 %v2620_v43, %v2621_v6  ;;  %v2628_v50 = vrot.slane %v2627_v39, 2  ;;  %v2636_v45 = vmax.f32 %v2634_v10, %v2635_v53  ;;  %v2642_v11 = vrot.slane %v2641_v47, 2 }
 0x1df   : > { %v2700_v4 = vrot.slane %v2699_v26, 1  ;;  %v2332_v41 = vcombine.high %v2252_v56, %v2252_v56  ;;  %v5115_v60 = vadd.f32 %v3892_v5, %v2036_v1  ;;  %v5121_v3 = vmax.f32 %v2685_v9, %v2686_v12 }
 0x1e0   : > { %v2623_v51 = vrot.slane %v2622_v38, 1  ;;  %v5117_v44 = vmax.f32 %v2627_v39, %v2628_v50  ;;  %v2637_v37 = vrot.slane %v2636_v45, 1  ;;  %v5119_v46 = vmax.f32 %v2641_v47, %v2642_v11 }
 0x1e1   : > { %v2339_v59 = vrot.slane %v2252_v56, %v5072_v14  ;;  %v2346_v62 = vrot.slane %v2332_v41, %v5072_v14  ;;  %v2451_v40 = vcombine.high %v2259_v32, %v2259_v32  ;;  %v5125_v27 = vmax.f32 %v2692_v63, %v2693_v33 }
 0x1e2   : > { %v5127_v52 = vmax.f32 %v2699_v26, %v2700_v4  ;;  %v5129_v31 = vmax.f32 %v2622_v38, %v2623_v51  ;;  %v2630_v1 = vrot.slane %v5117_v44, 1  ;;  %v5134_v25 = vmax.f32 %v2636_v45, %v2637_v37 }
 0x1e3   : > { %v2347_v5 = vcombine.high %v2339_v59, %v2339_v59  ;;  %v2348_v29 = vcombine.high %v2346_v62, %v2346_v62  ;;  %v2702_v15 = vsel %vm2617_vm2, %v2339_v59, -inf  ;;  %v2716_v2 = vsel %vm2617_vm2, %v2346_v62, -inf }
 0x1e4   : > { %v2644_v56 = vrot.slane %v5119_v46, 1  ;;  %v2703_v35 = vrot.slane %v2702_v15, 4  ;;  %v2717_v49 = vrot.slane %v2716_v2, 4  ;;  %v2458_v18 = vrot.slane %v2259_v32, %v5072_v14 }
 0x1e5   : > { %v2709_v8 = vsel %vm2617_vm2, %v2347_v5, -inf  ;;  %v2723_v17 = vsel %vm2617_vm2, %v2348_v29, -inf  ;;  %v2465_v21 = vrot.slane %v2451_v40, %v5072_v14  ;;  %v2189_v29 = vpop.f32.mrf.mxu0 }
 0x1e6   : > { %v2704_v22 = vmax.f32 %v2702_v15, %v2703_v35  ;;  %v2710_v55 = vrot.slane %v2709_v8, 4  ;;  %v2718_v20 = vmax.f32 %v2716_v2, %v2717_v49  ;;  %v2724_v58 = vrot.slane %v2723_v17, 4  ;;  %v2218_v15 = vpop.f32.mrf.mxu1 }
 0x1e7   : > { %v2466_v43 = vcombine.high %v2458_v18, %v2458_v18  ;;  %v2467_v57 = vcombine.high %v2465_v21, %v2465_v21  ;;  %v2898_v10 = vsel %vm2617_vm2, %v2458_v18, -inf  ;;  %v2912_v48 = vsel %vm2617_vm2, %v2465_v21, -inf }
 0x1e8   : > { %v2705_v34 = vrot.slane %v2704_v22, 2  ;;  %v2711_v9 = vmax.f32 %v2709_v8, %v2710_v55  ;;  %v2719_v63 = vrot.slane %v2718_v20, 2  ;;  %v2725_v23 = vmax.f32 %v2723_v17, %v2724_v58 }
 0x1e9   : > { %v2899_v6 = vrot.slane %v2898_v10, 4  ;;  %v2905_v39 = vsel %vm2617_vm2, %v2466_v43, -inf  ;;  %v2913_v53 = vrot.slane %v2912_v48, 4  ;;  %v2919_v47 = vsel %vm2617_vm2, %v2467_v57, -inf }
 0x1ea   : > { %v2706_v12 = vmax.f32 %v2704_v22, %v2705_v34  ;;  %v2712_v33 = vrot.slane %v2711_v9, 2  ;;  %v2720_v26 = vmax.f32 %v2718_v20, %v2719_v63  ;;  %v2726_v32 = vrot.slane %v2725_v23, 2  ;;  %v3936_v63 = vpop.f32.mrf.mxu1 }
 0x1eb   : > { %v2900_v38 = vmax.f32 %v2898_v10, %v2899_v6  ;;  %v2906_v50 = vrot.slane %v2905_v39, 4  ;;  %v2914_v45 = vmax.f32 %v2912_v48, %v2913_v53  ;;  %v2920_v11 = vrot.slane %v2919_v47, 4 }
 0x1ec   : > { %v2707_v4 = vrot.slane %v2706_v12, 1  ;;  %v2713_v41 = vmax.f32 %v2711_v9, %v2712_v33  ;;  %v2721_v51 = vrot.slane %v2720_v26, 1  ;;  %v2727_v37 = vmax.f32 %v2725_v23, %v2726_v32  ;;  %v3931_v9 = vpop.f32.mrf.mxu0 }
 0x1ed   : > { %v2901_v59 = vrot.slane %v2900_v38, 2  ;;  %v2907_v62 = vmax.f32 %v2905_v39, %v2906_v50  ;;  %v2915_v40 = vrot.slane %v2914_v45, 2  ;;  %v2921_v5 = vmax.f32 %v2919_v47, %v2920_v11 }
 0x1ee   : > { %v2708_v2 = vmax.f32 %v2706_v12, %v2707_v4  ;;  %v2714_v35 = vrot.slane %v2713_v41, 1  ;;  %v2722_v49 = vmax.f32 %v2720_v26, %v2721_v51  ;;  %v2728_v8 = vrot.slane %v2727_v37, 1 }
 0x1ef   : > { %v2902_v17 = vmax.f32 %v2900_v38, %v2901_v59  ;;  %v2908_v18 = vrot.slane %v2907_v62, 2  ;;  %v2916_v21 = vmax.f32 %v2914_v45, %v2915_v40  ;;  %v2922_v22 = vrot.slane %v2921_v5, 2  ;;  %v2221_v45 = vpop.f32.mrf.mxu1 }
 0x1f0   : > { %v2715_v55 = vmax.f32 %v2713_v41, %v2714_v35  ;;  %v2729_v20 = vmax.f32 %v2727_v37, %v2728_v8  ;;  %v3070_v58 = vmax.f32 %v5113_v36, %v2708_v2  ;;  %v3072_v43 = vmax.f32 %v5125_v27, %v2722_v49  ;;  %v3729_v35 = vld [vmem:[%s4996_s21 + $0x8] sm:$0x7] }
 0x1f1   : > { %v2903_v57 = vrot.slane %v2902_v17, 1  ;;  %v2909_v10 = vmax.f32 %v2907_v62, %v2908_v18  ;;  %v2917_v48 = vrot.slane %v2916_v21, 1  ;;  %v2923_v34 = vmax.f32 %v2921_v5, %v2922_v22 }
 0x1f2   : > { %v3071_v23 = vmax.f32 %v5121_v3, %v2715_v55  ;;  %v3073_v6 = vmax.f32 %v5127_v52, %v2729_v20  ;;  %v3749_v39 = vpack.c.bf16 %v3070_v58, %v3070_v58  ;;  %v3751_v53 = vpack.c.bf16 %v3072_v43, %v3072_v43 }
 0x1f3   : > { %v5152_v47 = vmax.f32 %v5117_v44, %v2630_v1  ;;  %v5157_v36 = vmax.f32 %v5119_v46, %v2644_v56  ;;  %v2910_v27 = vrot.slane %v2909_v10, 1  ;;  %v2924_v12 = vrot.slane %v2923_v34, 1  ;;  %v2202_v1 = vpop.f32.mrf.mxu0 }
 0x1f4   : > { %v3750_v33 = vpack.c.bf16 %v3071_v23, %v3071_v23  ;;  %v3752_v26 = vpack.c.bf16 %v3073_v6, %v3073_v6  ;;  %v5159_v32 = vmax.f32 %v2902_v17, %v2903_v57  ;;  %v5161_v3 = vmax.f32 %v2916_v21, %v2917_v48 }
 0x1f5   : > { %v3241_v52 = vunpack.c.l.b16 %v3749_v39  ;;  %v3243_v38 = vunpack.c.l.b16 %v3751_v53  ;;  %v2190_v50 = vadd.f32 %v2189_v29, %v5086_v0  ;;  %v2219_v44 = vadd.f32 %v2218_v15, %v5091_v30 }
 0x1f6   : > { %v3242_v11 = vunpack.c.l.b16 %v3750_v33  ;;  %v3244_v4 = vunpack.c.l.b16 %v3752_v26  ;;  %v2211_v46 = vadd.f32 %v3931_v9, %v5036_v7  ;;  %v2230_v56 = vadd.f32 %v3936_v63, %v5115_v60 }
 0x1f7   : > { %v5167_v41 = vmax.f32 %v2909_v10, %v2910_v27  ;;  %v5169_v51 = vmax.f32 %v2923_v34, %v2924_v12  ;;  %v2250_v37 = vmax.f32 %v2190_v50, 0.0  ;;  %v2257_v59 = vmax.f32 %v2219_v44, 0.0 }
 0x1f8   : > { %v3275_v62 = vsel %vm3269_vm3, %v3242_v11, %v3241_v52  ;;  %v5172_v0 = vmax.f32 %v2211_v46, 0.0  ;;  %v5175_v30 = vadd.f32 %v2202_v1, %v5030_v13  ;;  %v5178_v40 = vadd.f32 %v2221_v45, %v5093_v54 }
 0x1f9   : > { %v3276_v7 = vsel %vm3271_vm4, %v3243_v38, %v3275_v62  ;;  %v2298_v5 = vcombine.high %v2250_v37, %v2250_v37  ;;  %v2305_v60 = vrot.slane %v2250_v37, %v5072_v14  ;;  %v2417_v29 = vcombine.high %v2257_v59, %v2257_v59 }
 0x1fa   : > { %v3277_v15 = vsel %vm3273_vm5, %v3244_v4, %v3276_v7  ;;  %v2424_v13 = vrot.slane %v2257_v59, %v5072_v14  ;;  %v2383_v54 = vcombine.high %v5172_v0, %v5172_v0  ;;  %v5193_v49 = vmax.f32 %v2230_v56, 0.0 }
 0x1fb   : > { %v3297_v8 = vpack.c.b16 %v3277_v15, %v3277_v15  ;;  %v2312_v17 = vrot.slane %v2298_v5, %v5072_v14  ;;  %v2313_v18 = vcombine.high %v2305_v60, %v2305_v60  ;;  %v2646_v21 = vsel %vm2617_vm2, %v2305_v60, -inf }
 0x1fc   : > { %v2647_v22 = vrot.slane %v2646_v21, 4  ;;  %v2431_v55 = vrot.slane %v2417_v29, %v5072_v14  ;;  %v2432_v20 = vcombine.high %v2424_v13, %v2424_v13  ;;  %v2842_v58 = vsel %vm2617_vm2, %v2424_v13, -inf }
 0x1fd   : > { %v3320_v43 = vsel %vm5185_vm7, %v3297_v8, %v3729_v35  ;;  %v2314_v57 = vcombine.high %v2312_v17, %v2312_v17  ;;  %v2653_v10 = vsel %vm2617_vm2, %v2313_v18, -inf  ;;  %v2660_v48 = vsel %vm2617_vm2, %v2312_v17, -inf }
 0x1fe   : > { %3730 = vst [vmem:[%s4996_s21 + $0x8] sm:$0x7] %v3320_v43  ;;  %v2648_v34 = vmax.f32 %v2646_v21, %v2647_v22  ;;  %v2654_v9 = vrot.slane %v2653_v10, 4  ;;  %v2661_v63 = vrot.slane %v2660_v48, 4  ;;  %v2433_v23 = vcombine.high %v2431_v55, %v2431_v55 }
 0x1ff   : > { %v2667_v6 = vsel %vm2617_vm2, %v2314_v57, -inf  ;;  %v2843_v39 = vrot.slane %v2842_v58, 4  ;;  %v2849_v53 = vsel %vm2617_vm2, %v2432_v20, -inf  ;;  %v2856_v27 = vsel %vm2617_vm2, %v2431_v55, -inf  ;;  %v3932_v55 = vpop.f32.mrf.mxu0 }
 0x200   : > { %v2649_v12 = vrot.slane %v2648_v34, 2  ;;  %v2655_v33 = vmax.f32 %v2653_v10, %v2654_v9  ;;  %v2662_v26 = vmax.f32 %v2660_v48, %v2661_v63  ;;  %v2668_v52 = vrot.slane %v2667_v6, 4 }
 0x201   : > { %v2844_v38 = vmax.f32 %v2842_v58, %v2843_v39  ;;  %v2850_v50 = vrot.slane %v2849_v53, 4  ;;  %v2857_v44 = vrot.slane %v2856_v27, 4  ;;  %v2863_v1 = vsel %vm2617_vm2, %v2433_v23, -inf }
 0x202   : > { %v2650_v45 = vmax.f32 %v2648_v34, %v2649_v12  ;;  %v2656_v11 = vrot.slane %v2655_v33, 2  ;;  %v2663_v4 = vrot.slane %v2662_v26, 2  ;;  %v2669_v46 = vmax.f32 %v2667_v6, %v2668_v52 }
 0x203   : > { %v2845_v56 = vrot.slane %v2844_v38, 2  ;;  %v2851_v37 = vmax.f32 %v2849_v53, %v2850_v50  ;;  %v2858_v59 = vmax.f32 %v2856_v27, %v2857_v44  ;;  %v2864_v62 = vrot.slane %v2863_v1, 4 }
 0x204   : > { %v2651_v7 = vrot.slane %v2650_v45, 1  ;;  %v2657_v5 = vmax.f32 %v2655_v33, %v2656_v11  ;;  %v2664_v60 = vmax.f32 %v2662_v26, %v2663_v4  ;;  %v2670_v29 = vrot.slane %v2669_v46, 2 }
 0x205   : > { %v2846_v15 = vmax.f32 %v2844_v38, %v2845_v56  ;;  %v2852_v35 = vrot.slane %v2851_v37, 2  ;;  %v2859_v13 = vrot.slane %v2858_v59, 2  ;;  %v2865_v8 = vmax.f32 %v2863_v1, %v2864_v62 }
 0x206   : > { %v2652_v17 = vmax.f32 %v2650_v45, %v2651_v7  ;;  %v2658_v18 = vrot.slane %v2657_v5, 1  ;;  %v2665_v21 = vrot.slane %v2664_v60, 1  ;;  %v2671_v22 = vmax.f32 %v2669_v46, %v2670_v29 }
 0x207   : > { %v2847_v20 = vrot.slane %v2846_v15, 1  ;;  %v2853_v58 = vmax.f32 %v2851_v37, %v2852_v35  ;;  %v5208_v43 = vmax.f32 %v2858_v59, %v2859_v13  ;;  %v2866_v57 = vrot.slane %v2865_v8, 2 }
 0x208   : > { %v2659_v10 = vmax.f32 %v2657_v5, %v2658_v18  ;;  %v2666_v48 = vmax.f32 %v2664_v60, %v2665_v21  ;;  %v2672_v34 = vrot.slane %v2671_v22, 1  ;;  %v3066_v9 = vmax.f32 %v5129_v31, %v2652_v17  ;;  %v3727_v17 = vld [vmem:[%s4996_s21 + $0x4] sm:$0x7] }
 0x209   : > { %v2854_v63 = vrot.slane %v2853_v58, 1  ;;  %v5211_v23 = vmax.f32 %v2865_v8, %v2866_v57  ;;  %v2390_v6 = vrot.slane %v5172_v0, %v5072_v14  ;;  %v5216_v39 = vadd.f32 %v3932_v55, %v5039_v16 }
 0x20a   : > { %v2673_v53 = vmax.f32 %v2671_v22, %v2672_v34  ;;  %v3067_v27 = vmax.f32 %v5152_v47, %v2659_v10  ;;  %v3068_v12 = vmax.f32 %v5134_v25, %v2666_v48  ;;  %v3745_v33 = vpack.c.bf16 %v3066_v9, %v3066_v9 }
 0x20b   : > { %v5220_v26 = vmax.f32 %v2846_v15, %v2847_v20  ;;  %v5222_v52 = vmax.f32 %v2853_v58, %v2854_v63  ;;  %v2861_v31 = vrot.slane %v5208_v43, 1  ;;  %v2397_v38 = vrot.slane %v2383_v54, %v5072_v14 }
 0x20c   : > { %v3069_v16 = vmax.f32 %v5157_v36, %v2673_v53  ;;  %v3746_v50 = vpack.c.bf16 %v3067_v27, %v3067_v27  ;;  %v3747_v44 = vpack.c.bf16 %v3068_v12, %v3068_v12  ;;  %v2868_v47 = vrot.slane %v5211_v23, 1 }
 0x20d   : > { %v3237_v1 = vunpack.c.l.b16 %v3745_v33  ;;  %v2398_v25 = vcombine.high %v2390_v6, %v2390_v6  ;;  %v2399_v45 = vcombine.high %v2397_v38, %v2397_v38  ;;  %v2786_v11 = vsel %vm2617_vm2, %v2390_v6, -inf }
 0x20e   : > { %v3748_v4 = vpack.c.bf16 %v3069_v16, %v3069_v16  ;;  %v3238_v46 = vunpack.c.l.b16 %v3746_v50  ;;  %v3239_v56 = vunpack.c.l.b16 %v3747_v44  ;;  %v2787_v37 = vrot.slane %v2786_v11, 4 }
 0x20f   : > { %v2793_v59 = vsel %vm2617_vm2, %v2398_v25, -inf  ;;  %v2800_v0 = vsel %vm2617_vm2, %v2397_v38, -inf  ;;  %v2807_v36 = vsel %vm2617_vm2, %v2399_v45, -inf  ;;  %v2468_v54 = vcombine.high %v5193_v49, %v5193_v49 }
 0x210   : > { %v3240_v62 = vunpack.c.l.b16 %v3748_v4  ;;  %v3270_v7 = vsel %vm3269_vm3, %v3238_v46, %v3237_v1  ;;  %v2788_v5 = vmax.f32 %v2786_v11, %v2787_v37  ;;  %v2794_v60 = vrot.slane %v2793_v59, 4 }
 0x211   : > { %v3272_v29 = vsel %vm3271_vm4, %v3239_v56, %v3270_v7  ;;  %v2801_v15 = vrot.slane %v2800_v0, 4  ;;  %v2808_v35 = vrot.slane %v2807_v36, 4  ;;  %v2475_v13 = vrot.slane %v5193_v49, %v5072_v14 }
 0x212   : > { %v3274_v8 = vsel %vm3273_vm5, %v3240_v62, %v3272_v29  ;;  %v2789_v18 = vrot.slane %v2788_v5, 2  ;;  %v2795_v21 = vmax.f32 %v2793_v59, %v2794_v60  ;;  %v2482_v22 = vrot.slane %v2468_v54, %v5072_v14 }
 0x213   : > { %v3296_v55 = vpack.c.b16 %v3274_v8, %v3274_v8  ;;  %v2802_v20 = vmax.f32 %v2800_v0, %v2801_v15  ;;  %v2809_v58 = vmax.f32 %v2807_v36, %v2808_v35  ;;  %v2483_v57 = vcombine.high %v2475_v13, %v2475_v13 }
 0x214   : > { %v2790_v10 = vmax.f32 %v2788_v5, %v2789_v18  ;;  %v2796_v48 = vrot.slane %v2795_v21, 2  ;;  %v2484_v34 = vcombine.high %v2482_v22, %v2482_v22  ;;  %v2926_v9 = vsel %vm2617_vm2, %v2475_v13, -inf }
 0x215   : > { %v3317_v49 = vsel %vm5185_vm7, %v3296_v55, %v3727_v17  ;;  %v2803_v63 = vrot.slane %v2802_v20, 2  ;;  %v2810_v6 = vrot.slane %v2809_v58, 2  ;;  %v2927_v53 = vrot.slane %v2926_v9, 4 }
 0x216   : > { %3728 = vst [vmem:[%s4996_s21 + $0x4] sm:$0x7] %v3317_v49  ;;  %v2791_v27 = vrot.slane %v2790_v10, 1  ;;  %v2797_v12 = vmax.f32 %v2795_v21, %v2796_v48  ;;  %v2933_v33 = vsel %vm2617_vm2, %v2483_v57, -inf  ;;  %v2940_v38 = vsel %vm2617_vm2, %v2482_v22, -inf }
 0x217   : > { %v2804_v16 = vmax.f32 %v2802_v20, %v2803_v63  ;;  %v5250_v50 = vmax.f32 %v2809_v58, %v2810_v6  ;;  %v2928_v44 = vmax.f32 %v2926_v9, %v2927_v53  ;;  %v2934_v1 = vrot.slane %v2933_v33, 4 }
 0x218   : > { %v5253_v25 = vmax.f32 %v5208_v43, %v2861_v31  ;;  %v2798_v45 = vrot.slane %v2797_v12, 1  ;;  %v2941_v11 = vrot.slane %v2940_v38, 4  ;;  %v2947_v4 = vsel %vm2617_vm2, %v2484_v34, -inf }
 0x219   : > { %v5257_v46 = vmax.f32 %v5211_v23, %v2868_v47  ;;  %v2805_v56 = vrot.slane %v2804_v16, 1  ;;  %v2929_v37 = vrot.slane %v2928_v44, 2  ;;  %v2935_v59 = vmax.f32 %v2933_v33, %v2934_v1 }
 0x21a   : > { %v5259_v0 = vmax.f32 %v2790_v10, %v2791_v27  ;;  %v2942_v36 = vmax.f32 %v2940_v38, %v2941_v11  ;;  %v2948_v54 = vrot.slane %v2947_v4, 4  ;;  %v2253_v62 = vmax.f32 %v5175_v30, 0.0 }
 0x21b   : > { %v5262_v7 = vmax.f32 %v2797_v12, %v2798_v45  ;;  %v2812_v43 = vrot.slane %v5250_v50, 1  ;;  %v2930_v31 = vmax.f32 %v2928_v44, %v2929_v37  ;;  %v2936_v5 = vrot.slane %v2935_v59, 2 }
 0x21c   : > { %v2943_v60 = vrot.slane %v2942_v36, 2  ;;  %v2949_v29 = vmax.f32 %v2947_v4, %v2948_v54  ;;  %v2349_v15 = vcombine.high %v2253_v62, %v2253_v62  ;;  %v2356_v23 = vrot.slane %v2253_v62, %v5072_v14 }
 0x21d   : > { %v5266_v47 = vmax.f32 %v2804_v16, %v2805_v56  ;;  %v2931_v35 = vrot.slane %v2930_v31, 1  ;;  %v2937_v13 = vmax.f32 %v2935_v59, %v2936_v5  ;;  %v2258_v8 = vmax.f32 %v5178_v40, 0.0 }
 0x21e   : > { %v2944_v17 = vmax.f32 %v2942_v36, %v2943_v60  ;;  %v2950_v18 = vrot.slane %v2949_v29, 2  ;;  %v2363_v30 = vrot.slane %v2349_v15, %v5072_v14  ;;  %v2364_v21 = vcombine.high %v2356_v23, %v2356_v23 }
 0x21f   : > { %v2932_v22 = vmax.f32 %v2930_v31, %v2931_v35  ;;  %v2938_v55 = vrot.slane %v2937_v13, 1  ;;  %v2730_v20 = vsel %vm2617_vm2, %v2356_v23, -inf  ;;  %v2434_v58 = vcombine.high %v2258_v8, %v2258_v8 }
 0x220   : > { %v2945_v57 = vrot.slane %v2944_v17, 1  ;;  %v2951_v10 = vmax.f32 %v2949_v29, %v2950_v18  ;;  %v2365_v48 = vcombine.high %v2363_v30, %v2363_v30  ;;  %v2731_v34 = vrot.slane %v2730_v20, 4 }
 0x221   : > { %v2939_v9 = vmax.f32 %v2937_v13, %v2938_v55  ;;  %v3086_v49 = vmax.f32 %v5159_v32, %v2932_v22  ;;  %v2737_v63 = vsel %vm2617_vm2, %v2364_v21, -inf  ;;  %v2744_v40 = vsel %vm2617_vm2, %v2363_v30, -inf }
 0x222   : > { %v2946_v6 = vmax.f32 %v2944_v17, %v2945_v57  ;;  %v2952_v53 = vrot.slane %v2951_v10, 1  ;;  %v2732_v27 = vmax.f32 %v2730_v20, %v2731_v34  ;;  %v2738_v12 = vrot.slane %v2737_v63, 4  ;;  %v3737_v34 = vld [vmem:[%s4996_s21 + $0x18] sm:$0x7] }
 0x223   : > { %v3087_v33 = vmax.f32 %v5167_v41, %v2939_v9  ;;  %v3765_v38 = vpack.c.bf16 %v3086_v49, %v3086_v49  ;;  %v2745_v16 = vrot.slane %v2744_v40, 4  ;;  %v2751_v44 = vsel %vm2617_vm2, %v2365_v48, -inf }
 0x224   : > { %v2953_v1 = vmax.f32 %v2951_v10, %v2952_v53  ;;  %v3088_v45 = vmax.f32 %v5161_v3, %v2946_v6  ;;  %v2733_v11 = vrot.slane %v2732_v27, 2  ;;  %v2739_v4 = vmax.f32 %v2737_v63, %v2738_v12  ;;  %v3939_v12 = vpop.f32.mrf.mxu1 }
 0x225   : > { %v3766_v32 = vpack.c.bf16 %v3087_v33, %v3087_v33  ;;  %v3257_v56 = vunpack.c.l.b16 %v3765_v38  ;;  %v2746_v37 = vmax.f32 %v2744_v40, %v2745_v16  ;;  %v2752_v59 = vrot.slane %v2751_v44, 4  ;;  %v2205_v33 = vpop.f32.mrf.mxu0 }
 0x226   : > { %v3089_v36 = vmax.f32 %v5169_v51, %v2953_v1  ;;  %v3767_v54 = vpack.c.bf16 %v3088_v45, %v3088_v45  ;;  %v2734_v62 = vmax.f32 %v2732_v27, %v2733_v11  ;;  %v2740_v31 = vrot.slane %v2739_v4, 2 }
 0x227   : > { %v3258_v5 = vunpack.c.l.b16 %v3766_v32  ;;  %v2747_v41 = vrot.slane %v2746_v37, 2  ;;  %v2753_v60 = vmax.f32 %v2751_v44, %v2752_v59  ;;  %v2441_v29 = vrot.slane %v2258_v8, %v5072_v14 }
 0x228   : > { %v3768_v15 = vpack.c.bf16 %v3089_v36, %v3089_v36  ;;  %v3259_v23 = vunpack.c.l.b16 %v3767_v54  ;;  %v2735_v3 = vrot.slane %v2734_v62, 1  ;;  %v2741_v35 = vmax.f32 %v2739_v4, %v2740_v31 }
 0x229   : > { %v3287_v13 = vsel %vm3269_vm3, %v3258_v5, %v3257_v56  ;;  %v5280_v17 = vmax.f32 %v2746_v37, %v2747_v41  ;;  %v2754_v18 = vrot.slane %v2753_v60, 2  ;;  %v2448_v51 = vrot.slane %v2434_v58, %v5072_v14 }
 0x22a   : > { %v3260_v30 = vunpack.c.l.b16 %v3768_v15  ;;  %v3288_v21 = vsel %vm3271_vm4, %v3259_v23, %v3287_v13  ;;  %v2742_v22 = vrot.slane %v2741_v35, 1  ;;  %v2256_v55 = vmax.f32 %v5216_v39, 0.0 }
 0x22b   : > { %v5288_v8 = vmax.f32 %v5250_v50, %v2812_v43  ;;  %v5290_v20 = vmax.f32 %v2753_v60, %v2754_v18  ;;  %v2449_v57 = vcombine.high %v2441_v29, %v2441_v29  ;;  %v2450_v10 = vcombine.high %v2448_v51, %v2448_v51 }
 0x22c   : > { %v3289_v48 = vsel %vm3273_vm5, %v3260_v30, %v3288_v21  ;;  %v5294_v9 = vmax.f32 %v2734_v62, %v2735_v3  ;;  %v2870_v58 = vsel %vm2617_vm2, %v2441_v29, -inf  ;;  %v2884_v49 = vsel %vm2617_vm2, %v2448_v51, -inf }
 0x22d   : > { %v3301_v39 = vpack.c.b16 %v3289_v48, %v3289_v48  ;;  %v5298_v63 = vmax.f32 %v2741_v35, %v2742_v22  ;;  %v2749_v50 = vrot.slane %v5280_v17, 1  ;;  %v2871_v43 = vrot.slane %v2870_v58, 4 }
 0x22e   : > { %v2877_v40 = vsel %vm2617_vm2, %v2449_v57, -inf  ;;  %v2885_v6 = vrot.slane %v2884_v49, 4  ;;  %v2891_v53 = vsel %vm2617_vm2, %v2450_v10, -inf  ;;  %v2400_v27 = vcombine.high %v2256_v55, %v2256_v55 }
 0x22f   : > { %v3332_v38 = vsel %vm5185_vm7, %v3301_v39, %v3737_v34  ;;  %v2756_v16 = vrot.slane %v5290_v20, 1  ;;  %v2872_v44 = vmax.f32 %v2870_v58, %v2871_v43  ;;  %v2878_v1 = vrot.slane %v2877_v40, 4 }
 0x230   : > { %3738 = vst [vmem:[%s4996_s21 + $0x18] sm:$0x7] %v3332_v38  ;;  %v2886_v45 = vmax.f32 %v2884_v49, %v2885_v6  ;;  %v2892_v11 = vrot.slane %v2891_v53, 4  ;;  %v2407_v4 = vrot.slane %v2256_v55, %v5072_v14  ;;  %v2414_v32 = vrot.slane %v2400_v27, %v5072_v14 }
 0x231   : > { %v2873_v56 = vrot.slane %v2872_v44, 2  ;;  %v2879_v37 = vmax.f32 %v2877_v40, %v2878_v1  ;;  %v2243_v59 = vadd.f32 %v3939_v12, %v5080_v28  ;;  %v2206_v36 = vadd.f32 %v2205_v33, %v5033_v42 }
 0x232   : > { %v2887_v54 = vrot.slane %v2886_v45, 2  ;;  %v2893_v62 = vmax.f32 %v2891_v53, %v2892_v11  ;;  %v2415_v31 = vcombine.high %v2407_v4, %v2407_v4  ;;  %v2416_v5 = vcombine.high %v2414_v32, %v2414_v32 }
 0x233   : > { %v2874_v41 = vmax.f32 %v2872_v44, %v2873_v56  ;;  %v2880_v60 = vrot.slane %v2879_v37, 2  ;;  %v2814_v29 = vsel %vm2617_vm2, %v2407_v4, -inf  ;;  %v2828_v15 = vsel %vm2617_vm2, %v2414_v32, -inf }
 0x234   : > { %v2888_v23 = vmax.f32 %v2886_v45, %v2887_v54  ;;  %v2894_v3 = vrot.slane %v2893_v62, 2  ;;  %v2815_v35 = vrot.slane %v2814_v29, 4  ;;  %v2821_v13 = vsel %vm2617_vm2, %v2415_v31, -inf }
 0x235   : > { %v2875_v18 = vrot.slane %v2874_v41, 1  ;;  %v2881_v51 = vmax.f32 %v2879_v37, %v2880_v60  ;;  %v2822_v28 = vrot.slane %v2821_v13, 4  ;;  %v2829_v30 = vrot.slane %v2828_v15, 4 }
 0x236   : > { %v2889_v42 = vrot.slane %v2888_v23, 1  ;;  %v2895_v21 = vmax.f32 %v2893_v62, %v2894_v3  ;;  %v2816_v22 = vmax.f32 %v2814_v29, %v2815_v35  ;;  %v2835_v55 = vsel %vm2617_vm2, %v2416_v5, -inf }
 0x237   : > { %v2876_v57 = vmax.f32 %v2874_v41, %v2875_v18  ;;  %v2882_v10 = vrot.slane %v2881_v51, 1  ;;  %v2823_v48 = vmax.f32 %v2821_v13, %v2822_v28  ;;  %v2830_v34 = vmax.f32 %v2828_v15, %v2829_v30 }
 0x238   : > { %v2890_v58 = vmax.f32 %v2888_v23, %v2889_v42  ;;  %v2896_v49 = vrot.slane %v2895_v21, 1  ;;  %v2817_v39 = vrot.slane %v2816_v22, 2  ;;  %v2836_v43 = vrot.slane %v2835_v55, 4 }
 0x239   : > { %v2883_v40 = vmax.f32 %v2881_v51, %v2882_v10  ;;  %v3082_v6 = vmax.f32 %v5220_v26, %v2876_v57  ;;  %v2824_v53 = vrot.slane %v2823_v48, 2  ;;  %v2831_v27 = vrot.slane %v2830_v34, 2  ;;  %v3735_v10 = vld [vmem:[%s4996_s21 + $0x14] sm:$0x7] }
 0x23a   : > { %v2897_v12 = vmax.f32 %v2895_v21, %v2896_v49  ;;  %v3084_v33 = vmax.f32 %v5253_v25, %v2890_v58  ;;  %v2818_v38 = vmax.f32 %v2816_v22, %v2817_v39  ;;  %v2837_v44 = vmax.f32 %v2835_v55, %v2836_v43 }
 0x23b   : > { %v3083_v1 = vmax.f32 %v5222_v52, %v2883_v40  ;;  %v3761_v45 = vpack.c.bf16 %v3082_v6, %v3082_v6  ;;  %v2825_v11 = vmax.f32 %v2823_v48, %v2824_v53  ;;  %v2832_v4 = vmax.f32 %v2830_v34, %v2831_v27 }
 0x23c   : > { %v3085_v32 = vmax.f32 %v5257_v46, %v2897_v12  ;;  %v3763_v56 = vpack.c.bf16 %v3084_v33, %v3084_v33  ;;  %v2819_v37 = vrot.slane %v2818_v38, 1  ;;  %v2838_v54 = vrot.slane %v2837_v44, 2 }
 0x23d   : > { %v3762_v62 = vpack.c.bf16 %v3083_v1, %v3083_v1  ;;  %v3253_v31 = vunpack.c.l.b16 %v3761_v45  ;;  %v2826_v26 = vrot.slane %v2825_v11, 1  ;;  %v2833_v5 = vrot.slane %v2832_v4, 1  ;;  %v2234_v1 = vpop.f32.mrf.mxu1 }
 0x23e   : > { %v3764_v41 = vpack.c.bf16 %v3085_v32, %v3085_v32  ;;  %v3255_v60 = vunpack.c.l.b16 %v3763_v56  ;;  %v2820_v29 = vmax.f32 %v2818_v38, %v2819_v37  ;;  %v2839_v25 = vmax.f32 %v2837_v44, %v2838_v54 }
 0x23f   : > { %v3254_v15 = vunpack.c.l.b16 %v3762_v62  ;;  %v2827_v23 = vmax.f32 %v2825_v11, %v2826_v26  ;;  %v2834_v52 = vmax.f32 %v2832_v4, %v2833_v5  ;;  %v2263_v3 = vmax.f32 %v2243_v59, 0.0  ;;  %v3733_v26 = vld [vmem:[%s4996_s21 + $0x10] sm:$0x7] }
 0x240   : > { %v3256_v35 = vunpack.c.l.b16 %v3764_v41  ;;  %v2840_v13 = vrot.slane %v2839_v25, 1  ;;  %v3078_v46 = vmax.f32 %v5259_v0, %v2820_v29  ;;  %v2254_v18 = vmax.f32 %v2206_v36, 0.0 }
 0x241   : > { %v3284_v51 = vsel %vm3269_vm3, %v3254_v15, %v3253_v31  ;;  %v3079_v28 = vmax.f32 %v5262_v7, %v2827_v23  ;;  %v3080_v30 = vmax.f32 %v5266_v47, %v2834_v52  ;;  %v2519_v42 = vcombine.high %v2263_v3, %v2263_v3 }
 0x242   : > { %v3285_v21 = vsel %vm3271_vm4, %v3255_v60, %v3284_v51  ;;  %v2841_v22 = vmax.f32 %v2839_v25, %v2840_v13  ;;  %v3757_v55 = vpack.c.bf16 %v3078_v46, %v3078_v46  ;;  %v2526_v57 = vrot.slane %v2263_v3, %v5072_v14 }
 0x243   : > { %v3286_v59 = vsel %vm3273_vm5, %v3256_v35, %v3285_v21  ;;  %v3758_v48 = vpack.c.bf16 %v3079_v28, %v3079_v28  ;;  %v3759_v0 = vpack.c.bf16 %v3080_v30, %v3080_v30  ;;  %v2533_v36 = vrot.slane %v2519_v42, %v5072_v14  ;;  %v3940_v30 = vpop.f32.mrf.mxu1 }
 0x244   : > { %v3300_v34 = vpack.c.b16 %v3286_v59, %v3286_v59  ;;  %v3081_v7 = vmax.f32 %v5288_v8, %v2841_v22  ;;  %v3249_v58 = vunpack.c.l.b16 %v3757_v55  ;;  %v2534_v47 = vcombine.high %v2526_v57, %v2526_v57 }
 0x245   : > { %v3250_v49 = vunpack.c.l.b16 %v3758_v48  ;;  %v3251_v39 = vunpack.c.l.b16 %v3759_v0  ;;  %v2535_v43 = vcombine.high %v2533_v36, %v2533_v36  ;;  %v3010_v40 = vsel %vm2617_vm2, %v2526_v57, -inf }
 0x246   : > { %v3329_v6 = vsel %vm5185_vm7, %v3300_v34, %v3735_v10  ;;  %v3760_v53 = vpack.c.bf16 %v3081_v7, %v3081_v7  ;;  %v3011_v27 = vrot.slane %v3010_v40, 4  ;;  %v3017_v12 = vsel %vm2617_vm2, %v2534_v47, -inf }
 0x247   : > { %3736 = vst [vmem:[%s4996_s21 + $0x14] sm:$0x7] %v3329_v6  ;;  %v3281_v33 = vsel %vm3269_vm3, %v3250_v49, %v3249_v58  ;;  %v3018_v38 = vrot.slane %v3017_v12, 4  ;;  %v3024_v8 = vsel %vm2617_vm2, %v2533_v36, -inf  ;;  %v3031_v44 = vsel %vm2617_vm2, %v2535_v43, -inf }
 0x248   : > { %v3252_v45 = vunpack.c.l.b16 %v3760_v53  ;;  %v3282_v11 = vsel %vm3271_vm4, %v3251_v39, %v3281_v33  ;;  %v3012_v4 = vmax.f32 %v3010_v40, %v3011_v27  ;;  %v3025_v32 = vrot.slane %v3024_v8, 4  ;;  %v2237_v39 = vpop.f32.mrf.mxu1 }
 0x249   : > { %v3019_v56 = vmax.f32 %v3017_v12, %v3018_v38  ;;  %v3032_v37 = vrot.slane %v3031_v44, 4  ;;  %v2366_v54 = vcombine.high %v2254_v18, %v2254_v18  ;;  %v2373_v62 = vrot.slane %v2254_v18, %v5072_v14 }
 0x24a   : > { %v3283_v31 = vsel %vm3273_vm5, %v3252_v45, %v3282_v11  ;;  %v3013_v5 = vrot.slane %v3012_v4, 2  ;;  %v3026_v41 = vmax.f32 %v3024_v8, %v3025_v32  ;;  %v2235_v60 = vadd.f32 %v2234_v1, %v5054_v24 }
 0x24b   : > { %v3299_v29 = vpack.c.b16 %v3283_v31, %v3283_v31  ;;  %v3020_v25 = vrot.slane %v3019_v56, 2  ;;  %v3033_v15 = vmax.f32 %v3031_v44, %v3032_v37  ;;  %v2380_v23 = vrot.slane %v2366_v54, %v5072_v14 }
 0x24c   : > { %v3014_v52 = vmax.f32 %v3012_v4, %v3013_v5  ;;  %v3027_v3 = vrot.slane %v3026_v41, 2  ;;  %v2381_v35 = vcombine.high %v2373_v62, %v2373_v62  ;;  %v2758_v13 = vsel %vm2617_vm2, %v2373_v62, -inf }
 0x24d   : > { %v3326_v46 = vsel %vm5185_vm7, %v3299_v29, %v3733_v26  ;;  %v3021_v18 = vmax.f32 %v3019_v56, %v3020_v25  ;;  %v3034_v51 = vrot.slane %v3033_v15, 2  ;;  %v2382_v28 = vcombine.high %v2380_v23, %v2380_v23 }
 0x24e   : > { %3734 = vst [vmem:[%s4996_s21 + $0x10] sm:$0x7] %v3326_v46  ;;  %v3015_v42 = vrot.slane %v3014_v52, 1  ;;  %v5347_v24 = vmax.f32 %v3026_v41, %v3027_v3  ;;  %v2759_v21 = vrot.slane %v2758_v13, 4  ;;  %v2765_v22 = vsel %vm2617_vm2, %v2381_v35, -inf }
 0x24f   : > { %v3022_v55 = vrot.slane %v3021_v18, 1  ;;  %v5350_v57 = vmax.f32 %v3033_v15, %v3034_v51  ;;  %v2766_v59 = vrot.slane %v2765_v22, 4  ;;  %v2772_v10 = vsel %vm2617_vm2, %v2380_v23, -inf }
 0x250   : > { %v2750_v48 = vmax.f32 %v5280_v17, %v2749_v50  ;;  %v2757_v0 = vmax.f32 %v5290_v20, %v2756_v16  ;;  %v2760_v36 = vmax.f32 %v2758_v13, %v2759_v21  ;;  %v2773_v34 = vrot.slane %v2772_v10, 4 }
 0x251   : > { %v5359_v7 = vmax.f32 %v3014_v52, %v3015_v42  ;;  %v3029_v58 = vrot.slane %v5347_v24, 1  ;;  %v2767_v47 = vmax.f32 %v2765_v22, %v2766_v59  ;;  %v2779_v49 = vsel %vm2617_vm2, %v2382_v28, -inf }
 0x252   : > { %v5363_v43 = vmax.f32 %v3021_v18, %v3022_v55  ;;  %v2761_v40 = vrot.slane %v2760_v36, 2  ;;  %v2774_v6 = vmax.f32 %v2772_v10, %v2773_v34  ;;  %v2780_v53 = vrot.slane %v2779_v49, 4 }
 0x253   : > { %v3036_v17 = vrot.slane %v5350_v57, 1  ;;  %v2768_v50 = vrot.slane %v2767_v47, 2  ;;  %v2261_v27 = vmax.f32 %v2235_v60, 0.0  ;;  %v2246_v20 = vadd.f32 %v3940_v30, %v5100_v61 }
 0x254   : > { %v2762_v16 = vmax.f32 %v2760_v36, %v2761_v40  ;;  %v2775_v12 = vrot.slane %v2774_v6, 2  ;;  %v2781_v33 = vmax.f32 %v2779_v49, %v2780_v53  ;;  %v2238_v38 = vadd.f32 %v2237_v39, %v5059_v19 }
 0x255   : > { %v2769_v8 = vmax.f32 %v2767_v47, %v2768_v50  ;;  %v2485_v44 = vcombine.high %v2261_v27, %v2261_v27  ;;  %v2492_v1 = vrot.slane %v2261_v27, %v5072_v14  ;;  %v2264_v45 = vmax.f32 %v2246_v20, 0.0 }
 0x256   : > { %v2763_v11 = vrot.slane %v2762_v16, 1  ;;  %v2776_v4 = vmax.f32 %v2774_v6, %v2775_v12  ;;  %v2782_v32 = vrot.slane %v2781_v33, 2  ;;  %v5369_v56 = vmax.f32 %v2238_v38, 0.0 }
 0x257   : > { %v2770_v37 = vrot.slane %v2769_v8, 1  ;;  %v2499_v54 = vrot.slane %v2485_v44, %v5072_v14  ;;  %v2500_v62 = vcombine.high %v2492_v1, %v2492_v1  ;;  %v2954_v61 = vsel %vm2617_vm2, %v2492_v1, -inf }
 0x258   : > { %v2764_v31 = vmax.f32 %v2762_v16, %v2763_v11  ;;  %v2777_v26 = vrot.slane %v2776_v4, 1  ;;  %v2783_v5 = vmax.f32 %v2781_v33, %v2782_v32  ;;  %v2955_v19 = vrot.slane %v2954_v61, 4  ;;  %v3731_v32 = vld [vmem:[%s4996_s21 + $0xc] sm:$0x7] }
 0x259   : > { %v2771_v41 = vmax.f32 %v2769_v8, %v2770_v37  ;;  %v2501_v60 = vcombine.high %v2499_v54, %v2499_v54  ;;  %v2961_v29 = vsel %vm2617_vm2, %v2500_v62, -inf  ;;  %v2968_v25 = vsel %vm2617_vm2, %v2499_v54, -inf }
 0x25a   : > { %v2778_v15 = vmax.f32 %v2776_v4, %v2777_v26  ;;  %v2784_v23 = vrot.slane %v2783_v5, 1  ;;  %v3074_v52 = vmax.f32 %v5294_v9, %v2764_v31  ;;  %v2956_v3 = vmax.f32 %v2954_v61, %v2955_v19 }
 0x25b   : > { %v3075_v35 = vmax.f32 %v5298_v63, %v2771_v41  ;;  %v2962_v13 = vrot.slane %v2961_v29, 4  ;;  %v2969_v46 = vrot.slane %v2968_v25, 4  ;;  %v2975_v18 = vsel %vm2617_vm2, %v2501_v60, -inf }
 0x25c   : > { %v2785_v51 = vmax.f32 %v2783_v5, %v2784_v23  ;;  %v3076_v28 = vmax.f32 %v2750_v48, %v2778_v15  ;;  %v3753_v30 = vpack.c.bf16 %v3074_v52, %v3074_v52  ;;  %v2957_v42 = vrot.slane %v2956_v3, 2 }
 0x25d   : > { %v3754_v21 = vpack.c.bf16 %v3075_v35, %v3075_v35  ;;  %v2963_v22 = vmax.f32 %v2961_v29, %v2962_v13  ;;  %v2970_v55 = vmax.f32 %v2968_v25, %v2969_v46  ;;  %v2976_v59 = vrot.slane %v2975_v18, 4 }
 0x25e   : > { %v3077_v10 = vmax.f32 %v2757_v0, %v2785_v51  ;;  %v3755_v36 = vpack.c.bf16 %v3076_v28, %v3076_v28  ;;  %v3245_v34 = vunpack.c.l.b16 %v3753_v30  ;;  %v2958_v47 = vmax.f32 %v2956_v3, %v2957_v42 }
 0x25f   : > { %v3246_v9 = vunpack.c.l.b16 %v3754_v21  ;;  %v2964_v49 = vrot.slane %v2963_v22, 2  ;;  %v2971_v39 = vrot.slane %v2970_v55, 2  ;;  %v2977_v63 = vmax.f32 %v2975_v18, %v2976_v59 }
 0x260   : > { %v3756_v40 = vpack.c.bf16 %v3077_v10, %v3077_v10  ;;  %v3247_v6 = vunpack.c.l.b16 %v3755_v36  ;;  %v2959_v53 = vrot.slane %v2958_v47, 1  ;;  %v2536_v50 = vcombine.high %v2264_v45, %v2264_v45 }
 0x261   : > { %v3278_v48 = vsel %vm3269_vm3, %v3246_v9, %v3245_v34  ;;  %v2965_v27 = vmax.f32 %v2963_v22, %v2964_v49  ;;  %v2972_v20 = vmax.f32 %v2970_v55, %v2971_v39  ;;  %v2978_v16 = vrot.slane %v2977_v63, 2 }
 0x262   : > { %v5382_v0 = vmax.f32 %v5347_v24, %v3029_v58  ;;  %v3248_v12 = vunpack.c.l.b16 %v3756_v40  ;;  %v3279_v33 = vsel %vm3271_vm4, %v3247_v6, %v3278_v48  ;;  %v2543_v38 = vrot.slane %v2264_v45, %v5072_v14 }
 0x263   : > { %v5389_v8 = vmax.f32 %v5350_v57, %v3036_v17  ;;  %v2966_v44 = vrot.slane %v2965_v27, 1  ;;  %v2973_v1 = vrot.slane %v2972_v20, 1  ;;  %v2550_v11 = vrot.slane %v2536_v50, %v5072_v14 }
 0x264   : > { %v3280_v4 = vsel %vm3273_vm5, %v3248_v12, %v3279_v33  ;;  %v2551_v24 = vcombine.high %v2543_v38, %v2543_v38  ;;  %v3038_v58 = vsel %vm2617_vm2, %v2543_v38, -inf  ;;  %v2502_v37 = vcombine.high %v5369_v56, %v5369_v56 }
 0x265   : > { %v3298_v45 = vpack.c.b16 %v3280_v4, %v3280_v4  ;;  %v5397_v54 = vmax.f32 %v2958_v47, %v2959_v53  ;;  %v5399_v62 = vmax.f32 %v2965_v27, %v2966_v44  ;;  %v5401_v57 = vmax.f32 %v2977_v63, %v2978_v16 }
 0x266   : > { %v2552_v17 = vcombine.high %v2550_v11, %v2550_v11  ;;  %v3039_v61 = vrot.slane %v3038_v58, 4  ;;  %v3045_v31 = vsel %vm2617_vm2, %v2551_v24, -inf  ;;  %v3052_v26 = vsel %vm2617_vm2, %v2550_v11, -inf }
 0x267   : > { %v3323_v5 = vsel %vm5185_vm7, %v3298_v45, %v3731_v32  ;;  %v5407_v19 = vmax.f32 %v2972_v20, %v2973_v1  ;;  %v3046_v41 = vrot.slane %v3045_v31, 4  ;;  %v3053_v60 = vrot.slane %v3052_v26, 4 }
 0x268   : > { %3732 = vst [vmem:[%s4996_s21 + $0xc] sm:$0x7] %v3323_v5  ;;  %v3040_v29 = vmax.f32 %v3038_v58, %v3039_v61  ;;  %v3059_v25 = vsel %vm2617_vm2, %v2552_v17, -inf  ;;  %v2509_v15 = vrot.slane %v5369_v56, %v5072_v14  ;;  %v2516_v23 = vrot.slane %v2502_v37, %v5072_v14 }
 0x269   : > { %v2980_v52 = vrot.slane %v5401_v57, 1  ;;  %v3047_v3 = vmax.f32 %v3045_v31, %v3046_v41  ;;  %v3054_v35 = vmax.f32 %v3052_v26, %v3053_v60  ;;  %v3060_v13 = vrot.slane %v3059_v25, 4 }
 0x26a   : > { %v3041_v46 = vrot.slane %v3040_v29, 2  ;;  %v2517_v18 = vcombine.high %v2509_v15, %v2509_v15  ;;  %v2518_v51 = vcombine.high %v2516_v23, %v2516_v23  ;;  %v2982_v28 = vsel %vm2617_vm2, %v2509_v15, -inf }
 0x26b   : > { %v3048_v30 = vrot.slane %v3047_v3, 2  ;;  %v3055_v42 = vrot.slane %v3054_v35, 2  ;;  %v3061_v21 = vmax.f32 %v3059_v25, %v3060_v13  ;;  %v2983_v22 = vrot.slane %v2982_v28, 4 }
 0x26c   : > { %v3042_v55 = vmax.f32 %v3040_v29, %v3041_v46  ;;  %v2989_v59 = vsel %vm2617_vm2, %v2517_v18, -inf  ;;  %v2996_v56 = vsel %vm2617_vm2, %v2516_v23, -inf  ;;  %v3003_v14 = vsel %vm2617_vm2, %v2518_v51, -inf }
 0x26d   : > { %v3049_v10 = vmax.f32 %v3047_v3, %v3048_v30  ;;  %v3056_v36 = vmax.f32 %v3054_v35, %v3055_v42  ;;  %v3062_v34 = vrot.slane %v3061_v21, 2  ;;  %v2984_v47 = vmax.f32 %v2982_v28, %v2983_v22 }
 0x26e   : > { %v3043_v9 = vrot.slane %v3042_v55, 1  ;;  %v2990_v49 = vrot.slane %v2989_v59, 4  ;;  %v2997_v39 = vrot.slane %v2996_v56, 4  ;;  %v3004_v63 = vrot.slane %v3003_v14, 4 }
 0x26f   : > { %v3050_v40 = vrot.slane %v3049_v10, 1  ;;  %v3057_v6 = vrot.slane %v3056_v36, 1  ;;  %v3063_v53 = vmax.f32 %v3061_v21, %v3062_v34  ;;  %v2985_v50 = vrot.slane %v2984_v47, 2 }
 0x270   : > { %v3044_v48 = vmax.f32 %v3042_v55, %v3043_v9  ;;  %v2991_v27 = vmax.f32 %v2989_v59, %v2990_v49  ;;  %v2998_v20 = vmax.f32 %v2996_v56, %v2997_v39  ;;  %v3005_v16 = vmax.f32 %v3003_v14, %v3004_v63  ;;  %v3741_v59 = vld [vmem:[%s4996_s21 + $0x20] sm:$0x7]  ;;  %v3739_v39 = vld [vmem:[%s4996_s21 + $0x1c] sm:$0x7] }
 0x271   : > { %v3051_v12 = vmax.f32 %v3049_v10, %v3050_v40  ;;  %v3058_v33 = vmax.f32 %v3056_v36, %v3057_v6  ;;  %v3064_v38 = vrot.slane %v3063_v53, 1  ;;  %v2986_v44 = vmax.f32 %v2984_v47, %v2985_v50 }
 0x272   : > { %v3094_v1 = vmax.f32 %v5359_v7, %v3044_v48  ;;  %v2992_v11 = vrot.slane %v2991_v27, 2  ;;  %v2999_v4 = vrot.slane %v2998_v20, 2  ;;  %v3006_v32 = vrot.slane %v3005_v16, 2 }
 0x273   : > { %v3065_v24 = vmax.f32 %v3063_v53, %v3064_v38  ;;  %v3095_v58 = vmax.f32 %v5363_v43, %v3051_v12  ;;  %v3096_v37 = vmax.f32 %v5382_v0, %v3058_v33  ;;  %v2987_v45 = vrot.slane %v2986_v44, 1 }
 0x274   : > { %v3773_v17 = vpack.c.bf16 %v3094_v1, %v3094_v1  ;;  %v2993_v61 = vmax.f32 %v2991_v27, %v2992_v11  ;;  %v3000_v31 = vmax.f32 %v2998_v20, %v2999_v4  ;;  %v3007_v26 = vmax.f32 %v3005_v16, %v3006_v32 }
 0x275   : > { %v3097_v5 = vmax.f32 %v5389_v8, %v3065_v24  ;;  %v3774_v41 = vpack.c.bf16 %v3095_v58, %v3095_v58  ;;  %v3775_v60 = vpack.c.bf16 %v3096_v37, %v3096_v37  ;;  %v2988_v29 = vmax.f32 %v2986_v44, %v2987_v45 }
 0x276   : > { %v3265_v25 = vunpack.c.l.b16 %v3773_v17  ;;  %v2994_v7 = vrot.slane %v2993_v61, 1  ;;  %v3001_v15 = vrot.slane %v3000_v31, 1  ;;  %v3008_v23 = vrot.slane %v3007_v26, 1 }
 0x277   : > { %v3776_v3 = vpack.c.bf16 %v3097_v5, %v3097_v5  ;;  %v3266_v35 = vunpack.c.l.b16 %v3774_v41  ;;  %v3267_v43 = vunpack.c.l.b16 %v3775_v60  ;;  %v3090_v0 = vmax.f32 %v5397_v54, %v2988_v29 }
 0x278   : > { %v2981_v13 = vmax.f32 %v5401_v57, %v2980_v52  ;;  %v2995_v46 = vmax.f32 %v2993_v61, %v2994_v7  ;;  %v3002_v18 = vmax.f32 %v3000_v31, %v3001_v15  ;;  %v3009_v51 = vmax.f32 %v3007_v26, %v3008_v23 }
 0x279   : > { %v3268_v28 = vunpack.c.l.b16 %v3776_v3  ;;  %v3293_v8 = vsel %vm3269_vm3, %v3266_v35, %v3265_v25  ;;  %v3769_v30 = vpack.c.bf16 %v3090_v0, %v3090_v0 }
 0x27a   : > { %v3294_v42 = vsel %vm3271_vm4, %v3267_v43, %v3293_v8  ;;  %v3091_v21 = vmax.f32 %v5399_v62, %v2995_v46  ;;  %v3092_v22 = vmax.f32 %v5407_v19, %v3002_v18  ;;  %v3093_v55 = vmax.f32 %v2981_v13, %v3009_v51 }
 0x27b   : > { %v3295_v54 = vsel %vm3273_vm5, %v3268_v28, %v3294_v42  ;;  %v3261_v10 = vunpack.c.l.b16 %v3769_v30 }
 0x27c   : > { %v3303_v57 = vpack.c.b16 %v3295_v54, %v3295_v54  ;;  %v3770_v52 = vpack.c.bf16 %v3091_v21, %v3091_v21  ;;  %v3771_v56 = vpack.c.bf16 %v3092_v22, %v3092_v22  ;;  %v3772_v14 = vpack.c.bf16 %v3093_v55, %v3093_v55 }
 0x27e   : > { %v3338_v36 = vsel %vm5185_vm7, %v3303_v57, %v3741_v59  ;;  %v3262_v34 = vunpack.c.l.b16 %v3770_v52  ;;  %v3263_v47 = vunpack.c.l.b16 %v3771_v56  ;;  %v3264_v9 = vunpack.c.l.b16 %v3772_v14 }
 0x27f   : > { %3742 = vst [vmem:[%s4996_s21 + $0x20] sm:$0x7] %v3338_v36 }
 0x280   : > { %v3290_v62 = vsel %vm3269_vm3, %v3262_v34, %v3261_v10 }
 0x281   : > { %v3291_v19 = vsel %vm3271_vm4, %v3263_v47, %v3290_v62 }
 0x282   : > { %v3292_v49 = vsel %vm3273_vm5, %v3264_v9, %v3291_v19 }
 0x283   : > { %v3302_v63 = vpack.c.b16 %v3292_v49, %v3292_v49 }
 0x285   : > { %v3335_v40 = vsel %vm5185_vm7, %v3302_v63, %v3739_v39 }
 0x286   : > { %3740 = vst [vmem:[%s4996_s21 + $0x1c] sm:$0x7] %v3335_v40 }
 0x287 PF: > { %s13_s12 = sadd.s32 1, %s4136_s12  }
 0x288   : > { %p10_p4 = scmp.ge.s32.totalorder %s13_s12, 4  }
 0x28a   :  { %12 = sbr.rel (!%p10_p4) target bundleno = 1 (0x1), region = 65 }

// kernel: slicer_forward.5
= control target key start
LH: loop header
LB: loop body
LE: loop exit
PB: predicated region body
PF: predicated region fallthrough
CT: control target
= control target key end

     0   :  { %s5809_s12 = smov 0   ;;  %s7181_s0 = inlined_call_operand.vmem [shape: bf16[2,32,16,9], index: 0, kind: input, shape index: {}]   ;;  %s7182_s1 = inlined_call_operand.vmem [shape: bf16[9,64], index: 1, kind: input, shape index: {}]   ;;  %s7183_s2 = inlined_call_operand.vmem [shape: f32[1,64], index: 2, kind: input, shape index: {}]   ;;  %s7184_s3 = inlined_call_operand.vmem [shape: bf16[2,18,10,64], index: 3, kind: output, shape index: {}]  }
   0x1 LB: > { %s5198_s13 = sadd.s32 4294967295, %s5784_s12   ;;  %p5202_p0 = scmp.ge.s32.totalorder %s5784_s12, 1  ;;  %s5784_s12 = sphi %s5809_s12, %s13_s12  }
   0x2   : > { %p137_p1 = scmp.lt.s32.totalorder %s5784_s12, 3 }
   0x4   : > { %p138_p2 = pnand %p5202_p0, %p137_p1 }
   0x5   : > { %p161_p3 = scmp.lt.s32.totalorder (!%p138_p2), %s5198_s13, 1 }
   0x6   : > { %141 = sbr.rel (%p138_p2) target bundleno = 911 (0x38f), region = 32 }
   0xb   : > { %v5740_v0 = vld [vmem:[%s7182_s1] sm:$0x1f]   ;;  %vm507_vm0 = vcmask 1043456   ;;  %vm508_vm1 = vcmask 1044480   ;;  %v5786_v1 = vmov 65535   ;;  %s7190_s13 = smov (!%p161_p3, %s5198_s13), 1  ;;  %v935_v40 = vlaneseq }
   0xc   : > { %v509_v2 = vsel %vm507_vm0, 4294967295, %v5786_v1  ;;  %s5482_s16 = sshll.u32 %s7190_s13, 8  ;;  %vm410_vm2 = vcmask 72704   ;;  %s5728_s20 = smul.u32 144, %s7190_s13  ;;  %vm4326_vm3 = vcmask 516096   ;;  %v5787_v37 = vmov 0  }
   0xd   : > { %v510_v3 = vsel %vm508_vm1, %v509_v2, 0  ;;  %s5826_s19 = scalar_lea.vmem %s7181_s0, %s5482_s16  ;;  %vm4324_vm4 = vcmask 519168   ;;  %v5788_v38 = vmov 1983009808   ;;  %v936_v42 = vshrl.u32 %v935_v40, 7 }
   0xe   : > { %v512_v4 = vand.u32 %v5740_v0, %v510_v3  ;;  %v5741_v5 = vld [vmem:[%s5826_s19] sm:$0xff]   ;;  %v5743_v7 = vld [vmem:[%s5826_s19 + $0x8] sm:$0xff]   ;;  %v5745_v9 = vld [vmem:[%s5826_s19 + $0x10] sm:$0xff]   ;;  %s5896_s23 = scalar_lea.vmem %s7184_s3, %s5728_s20  ;;  %v933_v39 = vunpack.c.l.s4 %v5788_v38  ;;  %vm2275_vm5 = vcmask 517120   ;;  %vm4874_vm6 = vcmask 1042434  }
   0xf   : > { %v5742_v6 = vld [vmem:[%s5826_s19 + $0x80] sm:$0xff]   ;;  %5662 = vmatprep.mubr.msk.bf16.mxu0 %vm410_vm2, %v5741_v5  ;;  %v5744_v8 = vld [vmem:[%s5826_s19 + $0x88] sm:$0xff]   ;;  %v5746_v10 = vld [vmem:[%s5826_s19 + $0x90] sm:$0xff]   ;;  %4329 = vst.msk [vmem:[%s5896_s23 + $0xc] sm:$0x1] %vm4326_vm3, %v5787_v37  ;;  %vm4876_vm7 = vcmask 1043459  }
  0x10   : > { %5660 = vmatprep.subr.bf16.mxu0 %v512_v4  ;;  %5726 = vmatprep.subr.bf16.mxu1 %v512_v4  ;;  %v5747_v11 = vld [vmem:[%s5826_s19 + $0x18] sm:$0xff]   ;;  %v5749_v13 = vld [vmem:[%s5826_s19 + $0x20] sm:$0xff]   ;;  %v5751_v15 = vld [vmem:[%s5826_s19 + $0x28] sm:$0xff]   ;;  %4327 = vst.msk [vmem:[%s5896_s23 + $0x4] sm:$0x1] %vm4326_vm3, %v5787_v37  ;;  %v934_v41 = vunpack.c.0.s8 %v933_v39  ;;  %vm4878_vm8 = vcmask 1044484  }
  0x11   : > { %5661 = vmatpush3.bf16.msra.mxu0 %v512_v4  ;;  %5727 = vmatpush3.bf16.msra.mxu1 %v512_v4  ;;  %v5748_v12 = vld [vmem:[%s5826_s19 + $0x98] sm:$0xff]   ;;  %v5750_v14 = vld [vmem:[%s5826_s19 + $0xa0] sm:$0xff]   ;;  %v5752_v16 = vld [vmem:[%s5826_s19 + $0xa8] sm:$0xff]   ;;  %4331 = vst.msk [vmem:[%s5896_s23 + $0x14] sm:$0x1] %vm4326_vm3, %v5787_v37  ;;  %vm4880_vm10 = vcmask 1045509  }
  0x12   : > { %5694 = vmatprep.mubr.msk.bf16.mxu1 %vm410_vm2, %v5742_v6  ;;  %v5753_v17 = vld [vmem:[%s5826_s19 + $0x30] sm:$0xff]   ;;  %v5755_v19 = vld [vmem:[%s5826_s19 + $0x38] sm:$0xff]   ;;  %v5757_v21 = vld [vmem:[%s5826_s19 + $0x40] sm:$0xff]   ;;  %4333 = vst.msk [vmem:[%s5896_s23 + $0x1c] sm:$0x1] %vm4326_vm3, %v5787_v37  ;;  %v5976_v46 = vsub.s32 %v934_v41, %v936_v42  ;;  %vm4882_vm11 = vcmask 1046534  }
  0x13   : > { %v5754_v18 = vld [vmem:[%s5826_s19 + $0xb0] sm:$0xff]   ;;  %v5756_v20 = vld [vmem:[%s5826_s19 + $0xb8] sm:$0xff]   ;;  %v5758_v22 = vld [vmem:[%s5826_s19 + $0xc0] sm:$0xff]   ;;  %4335 = vst.msk [vmem:[%s5896_s23 + $0x24] sm:$0x1] %vm4326_vm3, %v5787_v37  ;;  %vm4884_vm12 = vcmask 1047559  }
  0x14   : > { %5663 = vmatmul.mubr.msk.bf16.vlgmr.msra.gmra.mxu0 %vm410_vm2, %v5743_v7  ;;  %5695 = vmatmul.mubr.msk.bf16.vlgmr.msra.gmra.mxu1 %vm410_vm2, %v5744_v8  ;;  %v5759_v23 = vld [vmem:[%s5826_s19 + $0x48] sm:$0xff]   ;;  %v5761_v25 = vld [vmem:[%s5826_s19 + $0x50] sm:$0xff]   ;;  %v5763_v27 = vld [vmem:[%s5826_s19 + $0x58] sm:$0xff]   ;;  %4337 = vst.msk [vmem:[%s5896_s23 + $0x2c] sm:$0x1] %vm4326_vm3, %v5787_v37 }
  0x15   : > { %5666 = vmatprep.mubr.msk.bf16.mxu0 %vm410_vm2, %v5745_v9  ;;  %5698 = vmatprep.mubr.msk.bf16.mxu1 %vm410_vm2, %v5746_v10  ;;  %v5760_v24 = vld [vmem:[%s5826_s19 + $0xc8] sm:$0xff]   ;;  %v5762_v26 = vld [vmem:[%s5826_s19 + $0xd0] sm:$0xff]   ;;  %v5764_v28 = vld [vmem:[%s5826_s19 + $0xd8] sm:$0xff]   ;;  %4339 = vst.msk [vmem:[%s5896_s23 + $0x34] sm:$0x1] %vm4326_vm3, %v5787_v37 }
  0x16   : > { %v5765_v29 = vld [vmem:[%s5826_s19 + $0x60] sm:$0xff]   ;;  %v5767_v31 = vld [vmem:[%s5826_s19 + $0x68] sm:$0xff]   ;;  %v5769_v33 = vld [vmem:[%s5826_s19 + $0x70] sm:$0xff]   ;;  %4341 = vst.msk [vmem:[%s5896_s23 + $0x3c] sm:$0x1] %vm4326_vm3, %v5787_v37 }
  0x17   : > { %v5766_v30 = vld [vmem:[%s5826_s19 + $0xe0] sm:$0xff]   ;;  %v5768_v32 = vld [vmem:[%s5826_s19 + $0xe8] sm:$0xff]   ;;  %v5770_v34 = vld [vmem:[%s5826_s19 + $0xf0] sm:$0xff]   ;;  %4343 = vst.msk [vmem:[%s5896_s23 + $0x44] sm:$0x1] %vm4326_vm3, %v5787_v37 }
  0x18   : > { %v5771_v35 = vld [vmem:[%s5826_s19 + $0x78] sm:$0xff]   ;;  %4345 = vst.msk [vmem:[%s5896_s23 + $0x4c] sm:$0x1] %vm4326_vm3, %v5787_v37  ;;  %4347 = vst.msk [vmem:[%s5896_s23 + $0x54] sm:$0x1] %vm4326_vm3, %v5787_v37 }
  0x19   : > { %v5772_v36 = vld [vmem:[%s5826_s19 + $0xf8] sm:$0xff]   ;;  %4349 = vst.msk [vmem:[%s5896_s23 + $0x5c] sm:$0x1] %vm4326_vm3, %v5787_v37  ;;  %4351 = vst.msk [vmem:[%s5896_s23 + $0x64] sm:$0x1] %vm4326_vm3, %v5787_v37 }
  0x1a   : > { %4353 = vst.msk [vmem:[%s5896_s23 + $0x6c] sm:$0x1] %vm4326_vm3, %v5787_v37  ;;  %4355 = vst.msk [vmem:[%s5896_s23 + $0x74] sm:$0x1] %vm4326_vm3, %v5787_v37  ;;  %v5973_v43 = vld [vmem:[%s7183_s2] ss:$0 sm:$0xff] }
  0x1b   : > { %4357 = vst.msk [vmem:[%s5896_s23 + $0x7c] sm:$0x1] %vm4326_vm3, %v5787_v37  ;;  %4359 = vst.msk [vmem:[%s5896_s23 + $0x84] sm:$0x1] %vm4326_vm3, %v5787_v37  ;;  %vm5048_vm9 = vsmask.f32 256 }
  0x1c   : > { %5667 = vmatmul.mubr.msk.bf16.gmra.mxu0 %vm410_vm2, %v5747_v11  ;;  %5699 = vmatmul.mubr.msk.bf16.gmra.mxu1 %vm410_vm2, %v5748_v12  ;;  %4361 = vst.msk [vmem:[%s5896_s23 + $0x8c] sm:$0x1] %vm4326_vm3, %v5787_v37  ;;  %vm5042_vm13 = vsmask.f32 7938  ;;  %vm6121_vm14 = vmand %vm4326_vm3, %vm5048_vm9 }
  0x1d   : > { %5670 = vmatprep.mubr.msk.bf16.mxu0 %vm410_vm2, %v5749_v13  ;;  %5702 = vmatprep.mubr.msk.bf16.mxu1 %vm410_vm2, %v5750_v14  ;;  %4328 = vst.msk [vmem:[%s5896_s23 + $0x8] sm:$0xf] %vm4324_vm4, %v5787_v37  ;;  %4325 = vst.msk [vmem:[%s5896_s23] sm:$0xf] %vm4324_vm4, %v5787_v37 }
  0x1e   : > { %4330 = vst.msk [vmem:[%s5896_s23 + $0x10] sm:$0xf] %vm4324_vm4, %v5787_v37  ;;  %4332 = vst.msk [vmem:[%s5896_s23 + $0x18] sm:$0xf] %vm4324_vm4, %v5787_v37 }
  0x1f   : > { %4334 = vst.msk [vmem:[%s5896_s23 + $0x20] sm:$0xf] %vm4324_vm4, %v5787_v37  ;;  %4336 = vst.msk [vmem:[%s5896_s23 + $0x28] sm:$0xf] %vm4324_vm4, %v5787_v37 }
  0x20   : > { %4338 = vst.msk [vmem:[%s5896_s23 + $0x30] sm:$0xf] %vm4324_vm4, %v5787_v37  ;;  %4340 = vst.msk [vmem:[%s5896_s23 + $0x38] sm:$0xf] %vm4324_vm4, %v5787_v37 }
  0x21   : > { %4342 = vst.msk [vmem:[%s5896_s23 + $0x40] sm:$0xf] %vm4324_vm4, %v5787_v37  ;;  %4344 = vst.msk [vmem:[%s5896_s23 + $0x48] sm:$0xf] %vm4324_vm4, %v5787_v37 }
  0x22   : > { %4346 = vst.msk [vmem:[%s5896_s23 + $0x50] sm:$0xf] %vm4324_vm4, %v5787_v37  ;;  %4348 = vst.msk [vmem:[%s5896_s23 + $0x58] sm:$0xf] %vm4324_vm4, %v5787_v37 }
  0x23   : > { %4350 = vst.msk [vmem:[%s5896_s23 + $0x60] sm:$0xf] %vm4324_vm4, %v5787_v37  ;;  %4352 = vst.msk [vmem:[%s5896_s23 + $0x68] sm:$0xf] %vm4324_vm4, %v5787_v37 }
  0x24   : > { %5671 = vmatmul.mubr.msk.bf16.gmra.mxu0 %vm410_vm2, %v5751_v15  ;;  %5703 = vmatmul.mubr.msk.bf16.gmra.mxu1 %vm410_vm2, %v5752_v16  ;;  %4354 = vst.msk [vmem:[%s5896_s23 + $0x70] sm:$0xf] %vm4324_vm4, %v5787_v37  ;;  %4356 = vst.msk [vmem:[%s5896_s23 + $0x78] sm:$0xf] %vm4324_vm4, %v5787_v37 }
  0x25   : > { %5674 = vmatprep.mubr.msk.bf16.mxu0 %vm410_vm2, %v5753_v17  ;;  %5706 = vmatprep.mubr.msk.bf16.mxu1 %vm410_vm2, %v5754_v18  ;;  %4358 = vst.msk [vmem:[%s5896_s23 + $0x80] sm:$0xf] %vm4324_vm4, %v5787_v37  ;;  %4360 = vst.msk [vmem:[%s5896_s23 + $0x88] sm:$0xf] %vm4324_vm4, %v5787_v37 }
  0x26   : > { %vm6140_vm15 = vmand %vm4324_vm4, %vm5042_vm13 }
  0x2c   : > { %5675 = vmatmul.mubr.msk.bf16.gmra.mxu0 %vm410_vm2, %v5755_v19  ;;  %5707 = vmatmul.mubr.msk.bf16.gmra.mxu1 %vm410_vm2, %v5756_v20 }
  0x2d   : > { %5678 = vmatprep.mubr.msk.bf16.mxu0 %vm410_vm2, %v5757_v21  ;;  %5710 = vmatprep.mubr.msk.bf16.mxu1 %vm410_vm2, %v5758_v22 }
  0x34   : > { %5679 = vmatmul.mubr.msk.bf16.gmra.mxu0 %vm410_vm2, %v5759_v23  ;;  %5711 = vmatmul.mubr.msk.bf16.gmra.mxu1 %vm410_vm2, %v5760_v24 }
  0x35   : > { %5682 = vmatprep.mubr.msk.bf16.mxu0 %vm410_vm2, %v5761_v25  ;;  %5714 = vmatprep.mubr.msk.bf16.mxu1 %vm410_vm2, %v5762_v26 }
  0x3c   : > { %5683 = vmatmul.mubr.msk.bf16.gmra.mxu0 %vm410_vm2, %v5763_v27  ;;  %5715 = vmatmul.mubr.msk.bf16.gmra.mxu1 %vm410_vm2, %v5764_v28 }
  0x3d   : > { %5686 = vmatprep.mubr.msk.bf16.mxu0 %vm410_vm2, %v5765_v29  ;;  %5718 = vmatprep.mubr.msk.bf16.mxu1 %vm410_vm2, %v5766_v30 }
  0x44   : > { %5687 = vmatmul.mubr.msk.bf16.gmra.mxu0 %vm410_vm2, %v5767_v31  ;;  %5719 = vmatmul.mubr.msk.bf16.gmra.mxu1 %vm410_vm2, %v5768_v32 }
  0x45   : > { %5690 = vmatprep.mubr.msk.bf16.mxu0 %vm410_vm2, %v5769_v33  ;;  %5722 = vmatprep.mubr.msk.bf16.mxu1 %vm410_vm2, %v5770_v34 }
  0x4c   : > { %5691 = vmatmul.mubr.msk.bf16.gmra.mxu0 %vm410_vm2, %v5771_v35  ;;  %5723 = vmatmul.mubr.msk.bf16.gmra.mxu1 %vm410_vm2, %v5772_v36 }
  0xd4   : > { %v5664_v44 = vpop.f32.mrf.mxu0  ;;  %v5696_v47 = vpop.f32.mrf.mxu1 }
  0xd5   : > { %v557_v45 = vadd.f32 %v5664_v44, %v5973_v43  ;;  %v685_v48 = vadd.f32 %v5696_v47, %v5973_v43 }
  0xd6   : > { %v548_v49 = vpop.f32.mrf.mxu0  ;;  %v676_v52 = vpop.f32.mrf.mxu1 }
  0xd7   : > { %v805_v50 = vmax.f32 %v557_v45, 0.0  ;;  %v549_v51 = vadd.f32 %v5973_v43, %v548_v49  ;;  %v837_v53 = vmax.f32 %v685_v48, 0.0  ;;  %v677_v54 = vadd.f32 %v5973_v43, %v676_v52 }
  0xd8   : > { %v5665_v55 = vpop.f32.mrf.mxu0  ;;  %v5697_v60 = vpop.f32.mrf.mxu1 }
  0xd9   : > { %v965_v56 = vcombine.high %v805_v50, %v805_v50  ;;  %v972_v57 = vrot.slane %v805_v50, %v5976_v46  ;;  %v5982_v58 = vmax.f32 %v549_v51, 0.0  ;;  %v5985_v59 = vadd.f32 %v5665_v55, %v5973_v43 }
  0xda   : > { %v1509_v61 = vcombine.high %v837_v53, %v837_v53  ;;  %v1516_v62 = vrot.slane %v837_v53, %v5976_v46  ;;  %v5988_v63 = vmax.f32 %v677_v54, 0.0  ;;  %v5991_v0 = vadd.f32 %v5697_v60, %v5973_v43 }
  0xdb   : > { %v979_v1 = vrot.slane %v965_v56, %v5976_v46  ;;  %v980_v2 = vcombine.high %v972_v57, %v972_v57  ;;  %v2332_v3 = vsel %vm2275_vm5, %v972_v57, -inf  ;;  %v931_v4 = vcombine.high %v5982_v58, %v5982_v58 }
  0xdc   : > { %v2333_v5 = vrot.slane %v2332_v3, 4  ;;  %v1523_v6 = vrot.slane %v1509_v61, %v5976_v46  ;;  %v1524_v7 = vcombine.high %v1516_v62, %v1516_v62  ;;  %v3228_v8 = vsel %vm2275_vm5, %v1516_v62, -inf }
  0xdd   : > { %v981_v9 = vcombine.high %v979_v1, %v979_v1  ;;  %v2339_v10 = vsel %vm2275_vm5, %v980_v2, -inf  ;;  %v2346_v11 = vsel %vm2275_vm5, %v979_v1, -inf  ;;  %v3229_v12 = vrot.slane %v3228_v8, 4 }
  0xde   : > { %v2334_v13 = vmax.f32 %v2332_v3, %v2333_v5  ;;  %v2340_v14 = vrot.slane %v2339_v10, 4  ;;  %v2347_v15 = vrot.slane %v2346_v11, 4  ;;  %v1525_v16 = vcombine.high %v1523_v6, %v1523_v6 }
  0xdf   : > { %v2353_v17 = vsel %vm2275_vm5, %v981_v9, -inf  ;;  %v3230_v18 = vmax.f32 %v3228_v8, %v3229_v12  ;;  %v3235_v19 = vsel %vm2275_vm5, %v1524_v7, -inf  ;;  %v3242_v20 = vsel %vm2275_vm5, %v1523_v6, -inf }
  0xe0   : > { %v2335_v21 = vrot.slane %v2334_v13, 2  ;;  %v2341_v22 = vmax.f32 %v2339_v10, %v2340_v14  ;;  %v2348_v23 = vmax.f32 %v2346_v11, %v2347_v15  ;;  %v2354_v24 = vrot.slane %v2353_v17, 4 }
  0xe1   : > { %v3231_v25 = vrot.slane %v3230_v18, 2  ;;  %v3236_v26 = vrot.slane %v3235_v19, 4  ;;  %v3243_v27 = vrot.slane %v3242_v20, 4  ;;  %v3249_v28 = vsel %vm2275_vm5, %v1525_v16, -inf }
  0xe2   : > { %v2336_v29 = vmax.f32 %v2334_v13, %v2335_v21  ;;  %v2342_v30 = vrot.slane %v2341_v22, 2  ;;  %v2349_v31 = vrot.slane %v2348_v23, 2  ;;  %v2355_v32 = vmax.f32 %v2353_v17, %v2354_v24 }
  0xe3   : > { %v3232_v33 = vmax.f32 %v3230_v18, %v3231_v25  ;;  %v3237_v34 = vmax.f32 %v3235_v19, %v3236_v26  ;;  %v3244_v35 = vmax.f32 %v3242_v20, %v3243_v27  ;;  %v3250_v36 = vrot.slane %v3249_v28, 4 }
  0xe4   : > { %v2337_v37 = vrot.slane %v2336_v29, 1  ;;  %v2343_v38 = vmax.f32 %v2341_v22, %v2342_v30  ;;  %v2350_v39 = vmax.f32 %v2348_v23, %v2349_v31  ;;  %v2356_v40 = vrot.slane %v2355_v32, 2 }
  0xe5   : > { %v3233_v41 = vrot.slane %v3232_v33, 1  ;;  %v3238_v42 = vrot.slane %v3237_v34, 2  ;;  %v3245_v44 = vrot.slane %v3244_v35, 2  ;;  %v3251_v45 = vmax.f32 %v3249_v28, %v3250_v36 }
  0xe6   : > { %v6005_v47 = vmax.f32 %v2336_v29, %v2337_v37  ;;  %v2344_v48 = vrot.slane %v2343_v38, 1  ;;  %v2351_v49 = vrot.slane %v2350_v39, 1  ;;  %v2357_v50 = vmax.f32 %v2355_v32, %v2356_v40 }
  0xe7   : > { %v6007_v51 = vmax.f32 %v3232_v33, %v3233_v41  ;;  %v3239_v52 = vmax.f32 %v3237_v34, %v3238_v42  ;;  %v3246_v53 = vmax.f32 %v3244_v35, %v3245_v44  ;;  %v3252_v54 = vrot.slane %v3251_v45, 2 }
  0xe8   : > { %v6009_v55 = vmax.f32 %v2343_v38, %v2344_v48  ;;  %v6011_v56 = vmax.f32 %v2350_v39, %v2351_v49  ;;  %v2358_v57 = vrot.slane %v2357_v50, 1  ;;  %v938_v60 = vrot.slane %v5982_v58, %v5976_v46 }
  0xe9   : > { %v3240_v61 = vrot.slane %v3239_v52, 1  ;;  %v3247_v62 = vrot.slane %v3246_v53, 1  ;;  %v3253_v1 = vmax.f32 %v3251_v45, %v3252_v54  ;;  %v945_v2 = vrot.slane %v931_v4, %v5976_v46 }
  0xea   : > { %v6016_v3 = vmax.f32 %v2357_v50, %v2358_v57  ;;  %v946_v5 = vcombine.high %v938_v60, %v938_v60  ;;  %v2276_v6 = vsel %vm2275_vm5, %v938_v60, -inf  ;;  %v1475_v7 = vcombine.high %v5988_v63, %v5988_v63 }
  0xeb   : > { %v6021_v8 = vmax.f32 %v3239_v52, %v3240_v61  ;;  %v6023_v9 = vmax.f32 %v3246_v53, %v3247_v62  ;;  %v3254_v10 = vrot.slane %v3253_v1, 1  ;;  %v947_v11 = vcombine.high %v945_v2, %v945_v2 }
  0xec   : > { %v2277_v58 = vrot.slane %v2276_v6, 4  ;;  %v2283_v12 = vsel %vm2275_vm5, %v946_v5, -inf  ;;  %v2290_v13 = vsel %vm2275_vm5, %v945_v2, -inf  ;;  %v1482_v4 = vrot.slane %v5988_v63, %v5976_v46 }
  0xed   : > { %v6029_v14 = vmax.f32 %v3253_v1, %v3254_v10  ;;  %v2284_v15 = vrot.slane %v2283_v12, 4  ;;  %v2291_v16 = vrot.slane %v2290_v13, 4  ;;  %v2297_v17 = vsel %vm2275_vm5, %v947_v11, -inf }
  0xee   : > { %v2278_v18 = vmax.f32 %v2276_v6, %v2277_v58  ;;  %v2298_v19 = vrot.slane %v2297_v17, 4  ;;  %v1489_v20 = vrot.slane %v1475_v7, %v5976_v46  ;;  %v1490_v21 = vcombine.high %v1482_v4, %v1482_v4 }
  0xef   : > { %v2285_v22 = vmax.f32 %v2283_v12, %v2284_v15  ;;  %v2292_v23 = vmax.f32 %v2290_v13, %v2291_v16  ;;  %v3172_v24 = vsel %vm2275_vm5, %v1482_v4, -inf  ;;  %v6035_v25 = vmax.f32 %v5985_v59, 0.0 }
  0xf0   : > { %v2279_v26 = vrot.slane %v2278_v18, 2  ;;  %v2299_v63 = vmax.f32 %v2297_v17, %v2298_v19  ;;  %v1491_v27 = vcombine.high %v1489_v20, %v1489_v20  ;;  %v3173_v28 = vrot.slane %v3172_v24, 4 }
  0xf1   : > { %v2286_v29 = vrot.slane %v2285_v22, 2  ;;  %v2293_v30 = vrot.slane %v2292_v23, 2  ;;  %v3179_v31 = vsel %vm2275_vm5, %v1490_v21, -inf  ;;  %v3186_v32 = vsel %vm2275_vm5, %v1489_v20, -inf }
  0xf2   : > { %v2280_v33 = vmax.f32 %v2278_v18, %v2279_v26  ;;  %v2300_v34 = vrot.slane %v2299_v63, 2  ;;  %v3174_v35 = vmax.f32 %v3172_v24, %v3173_v28  ;;  %v3180_v36 = vrot.slane %v3179_v31, 4 }
  0xf3   : > { %v2287_v37 = vmax.f32 %v2285_v22, %v2286_v29  ;;  %v2294_v38 = vmax.f32 %v2292_v23, %v2293_v30  ;;  %v3187_v39 = vrot.slane %v3186_v32, 4  ;;  %v3193_v59 = vsel %vm2275_vm5, %v1491_v27, -inf }
  0xf4   : > { %v2281_v40 = vrot.slane %v2280_v33, 1  ;;  %v2301_v41 = vmax.f32 %v2299_v63, %v2300_v34  ;;  %v3175_v42 = vrot.slane %v3174_v35, 2  ;;  %v3181_v44 = vmax.f32 %v3179_v31, %v3180_v36 }
  0xf5   : > { %v2288_v45 = vrot.slane %v2287_v37, 1  ;;  %v2295_v48 = vrot.slane %v2294_v38, 1  ;;  %v3188_v49 = vmax.f32 %v3186_v32, %v3187_v39  ;;  %v3194_v50 = vrot.slane %v3193_v59, 4 }
  0xf6   : > { %v2282_v52 = vmax.f32 %v2280_v33, %v2281_v40  ;;  %v2302_v53 = vrot.slane %v2301_v41, 1  ;;  %v3176_v54 = vmax.f32 %v3174_v35, %v3175_v42  ;;  %v3182_v57 = vrot.slane %v3181_v44, 2 }
  0xf7   : > { %v2289_v60 = vmax.f32 %v2287_v37, %v2288_v45  ;;  %v2296_v61 = vmax.f32 %v2294_v38, %v2295_v48  ;;  %v3189_v62 = vrot.slane %v3188_v49, 2  ;;  %v3195_v1 = vmax.f32 %v3193_v59, %v3194_v50  ;;  %v551_v45 = vpop.f32.mrf.mxu0 }
  0xf8   : > { %v2303_v2 = vmax.f32 %v2301_v41, %v2302_v53  ;;  %v4068_v5 = vmax.f32 %v2282_v52, %v6005_v47  ;;  %v3177_v6 = vrot.slane %v3176_v54, 1  ;;  %v3183_v7 = vmax.f32 %v3181_v44, %v3182_v57  ;;  %v679_v52 = vpop.f32.mrf.mxu1 }
  0xf9   : > { %v4069_v10 = vmax.f32 %v2289_v60, %v6009_v55  ;;  %v4070_v11 = vmax.f32 %v2296_v61, %v6011_v56  ;;  %v3190_v58 = vmax.f32 %v3188_v49, %v3189_v62  ;;  %v3196_v12 = vrot.slane %v3195_v1, 2 }
  0xfa   : > { %v4071_v13 = vmax.f32 %v2303_v2, %v6016_v3  ;;  %v5483_v4 = vpack.c.bf16 %v4068_v5, %v4068_v5  ;;  %v3178_v15 = vmax.f32 %v3176_v54, %v3177_v6  ;;  %v3184_v16 = vrot.slane %v3183_v7, 1 }
  0xfb   : > { %v5484_v17 = vpack.c.bf16 %v4069_v10, %v4069_v10  ;;  %v5485_v18 = vpack.c.bf16 %v4070_v11, %v4070_v11  ;;  %v3191_v19 = vrot.slane %v3190_v58, 1  ;;  %v3197_v20 = vmax.f32 %v3195_v1, %v3196_v12 }
  0xfc   : > { %v5486_v21 = vpack.c.bf16 %v4071_v13, %v4071_v13  ;;  %v4746_v22 = vunpack.c.l.b16 %v5483_v4  ;;  %v3185_v47 = vmax.f32 %v3183_v7, %v3184_v16  ;;  %v4132_v23 = vmax.f32 %v3178_v15, %v6007_v51 }
  0xfd   : > { %v4747_v55 = vunpack.c.l.b16 %v5484_v17  ;;  %v4748_v24 = vunpack.c.l.b16 %v5485_v18  ;;  %v3192_v56 = vmax.f32 %v3190_v58, %v3191_v19  ;;  %v3198_v26 = vrot.slane %v3197_v20, 1 }
  0xfe   : > { %v4749_v63 = vunpack.c.l.b16 %v5486_v21  ;;  %v4133_v3 = vmax.f32 %v3185_v47, %v6021_v8  ;;  %v5547_v27 = vpack.c.bf16 %v4132_v23, %v4132_v23  ;;  %v982_v28 = vcombine.high %v6035_v25, %v6035_v25 }
  0xff   : > { %v4875_v29 = vsel %vm4874_vm6, %v4747_v55, %v4746_v22  ;;  %v3199_v30 = vmax.f32 %v3197_v20, %v3198_v26  ;;  %v4134_v31 = vmax.f32 %v3192_v56, %v6023_v9  ;;  %v989_v51 = vrot.slane %v6035_v25, %v5976_v46 }
 0x100   : > { %v4877_v32 = vsel %vm4876_vm7, %v4748_v24, %v4875_v29  ;;  %v5548_v33 = vpack.c.bf16 %v4133_v3, %v4133_v3  ;;  %v4810_v34 = vunpack.c.l.b16 %v5547_v27  ;;  %v996_v35 = vrot.slane %v982_v28, %v5976_v46 }
 0x101   : > { %v4135_v8 = vmax.f32 %v3199_v30, %v6029_v14  ;;  %v5549_v36 = vpack.c.bf16 %v4134_v31, %v4134_v31  ;;  %v997_v37 = vcombine.high %v989_v51, %v989_v51  ;;  %v2360_v38 = vsel %vm2275_vm5, %v989_v51, -inf }
 0x102   : > { %v4811_v39 = vunpack.c.l.b16 %v5548_v33  ;;  %v998_v59 = vcombine.high %v996_v35, %v996_v35  ;;  %v2361_v40 = vrot.slane %v2360_v38, 4  ;;  %v2374_v9 = vsel %vm2275_vm5, %v996_v35, -inf }
 0x103   : > { %v5550_v41 = vpack.c.bf16 %v4135_v8, %v4135_v8  ;;  %v4812_v42 = vunpack.c.l.b16 %v5549_v36  ;;  %v2367_v25 = vsel %vm2275_vm5, %v997_v37, -inf  ;;  %v2375_v44 = vrot.slane %v2374_v9, 4 }
 0x104   : > { %v4928_v48 = vsel %vm4874_vm6, %v4811_v39, %v4810_v34  ;;  %v2362_v49 = vmax.f32 %v2360_v38, %v2361_v40  ;;  %v2368_v50 = vrot.slane %v2367_v25, 4  ;;  %v2381_v14 = vsel %vm2275_vm5, %v998_v59, -inf }
 0x105   : > { %v6060_v53 = vunpack.c.l.b16 %v5550_v41  ;;  %v6063_v54 = vsel %vm4876_vm7, %v4812_v42, %v4928_v48  ;;  %v2376_v57 = vmax.f32 %v2374_v9, %v2375_v44  ;;  %v2382_v60 = vrot.slane %v2381_v14, 4 }
 0x106   : > { %v2363_v61 = vrot.slane %v2362_v49, 2  ;;  %v2369_v62 = vmax.f32 %v2367_v25, %v2368_v50  ;;  %v838_v1 = vmax.f32 %v5991_v0, 0.0  ;;  %v552_v2 = vadd.f32 %v5973_v43, %v551_v45 }
 0x107   : > { %v2377_v5 = vrot.slane %v2376_v57, 2  ;;  %v2383_v6 = vmax.f32 %v2381_v14, %v2382_v60  ;;  %v6068_v7 = vsel %vm4878_vm8, %v4749_v63, %v4877_v32  ;;  %v680_v10 = vadd.f32 %v5973_v43, %v679_v52 }
 0x108   : > { %v2364_v11 = vmax.f32 %v2362_v49, %v2363_v61  ;;  %v2370_v58 = vrot.slane %v2369_v62, 2  ;;  %v1526_v12 = vcombine.high %v838_v1, %v838_v1  ;;  %v1533_v13 = vrot.slane %v838_v1, %v5976_v46 }
 0x109   : > { %v2378_v4 = vmax.f32 %v2376_v57, %v2377_v5  ;;  %v2384_v15 = vrot.slane %v2383_v6, 2  ;;  %v804_v16 = vmax.f32 %v552_v2, 0.0  ;;  %v6072_v17 = vmax.f32 %v680_v10, 0.0 }
 0x10a   : > { %v2365_v0 = vrot.slane %v2364_v11, 1  ;;  %v2371_v18 = vmax.f32 %v2369_v62, %v2370_v58  ;;  %v1540_v19 = vrot.slane %v1526_v12, %v5976_v46  ;;  %v1541_v20 = vcombine.high %v1533_v13, %v1533_v13 }
 0x10b   : > { %v2379_v21 = vrot.slane %v2378_v4, 1  ;;  %v2385_v22 = vmax.f32 %v2383_v6, %v2384_v15  ;;  %v3256_v47 = vsel %vm2275_vm5, %v1533_v13, -inf  ;;  %v948_v23 = vcombine.high %v804_v16, %v804_v16 }
 0x10c   : > { %v6076_v55 = vmax.f32 %v2364_v11, %v2365_v0  ;;  %v2372_v24 = vrot.slane %v2371_v18, 1  ;;  %v1542_v56 = vcombine.high %v1540_v19, %v1540_v19  ;;  %v3257_v26 = vrot.slane %v3256_v47, 4 }
 0x10d   : > { %v6078_v63 = vmax.f32 %v2378_v4, %v2379_v21  ;;  %v2386_v3 = vrot.slane %v2385_v22, 1  ;;  %v3263_v27 = vsel %vm2275_vm5, %v1541_v20, -inf  ;;  %v3270_v28 = vsel %vm2275_vm5, %v1540_v19, -inf }
 0x10e   : > { %v6082_v29 = vmax.f32 %v2371_v18, %v2372_v24  ;;  %v3258_v30 = vmax.f32 %v3256_v47, %v3257_v26  ;;  %v3264_v31 = vrot.slane %v3263_v27, 4  ;;  %v3271_v51 = vrot.slane %v3270_v28, 4 }
 0x10f   : > { %v6084_v32 = vmax.f32 %v2385_v22, %v2386_v3  ;;  %v3277_v33 = vsel %vm2275_vm5, %v1542_v56, -inf  ;;  %v955_v34 = vrot.slane %v804_v16, %v5976_v46  ;;  %v962_v35 = vrot.slane %v948_v23, %v5976_v46 }
 0x110   : > { %v3259_v8 = vrot.slane %v3258_v30, 2  ;;  %v3265_v36 = vmax.f32 %v3263_v27, %v3264_v31  ;;  %v3272_v37 = vmax.f32 %v3270_v28, %v3271_v51  ;;  %v3278_v38 = vrot.slane %v3277_v33, 4 }
 0x111   : > { %v963_v39 = vcombine.high %v955_v34, %v955_v34  ;;  %v964_v59 = vcombine.high %v962_v35, %v962_v35  ;;  %v2304_v40 = vsel %vm2275_vm5, %v955_v34, -inf  ;;  %v2318_v9 = vsel %vm2275_vm5, %v962_v35, -inf }
 0x112   : > { %v3260_v41 = vmax.f32 %v3258_v30, %v3259_v8  ;;  %v3266_v42 = vrot.slane %v3265_v36, 2  ;;  %v3273_v25 = vrot.slane %v3272_v37, 2  ;;  %v3279_v44 = vmax.f32 %v3277_v33, %v3278_v38 }
 0x113   : > { %v2305_v45 = vrot.slane %v2304_v40, 4  ;;  %v2311_v48 = vsel %vm2275_vm5, %v963_v39, -inf  ;;  %v2319_v49 = vrot.slane %v2318_v9, 4  ;;  %v2325_v50 = vsel %vm2275_vm5, %v964_v59, -inf }
 0x114   : > { %v3261_v14 = vrot.slane %v3260_v41, 1  ;;  %v3267_v52 = vmax.f32 %v3265_v36, %v3266_v42  ;;  %v3274_v57 = vmax.f32 %v3272_v37, %v3273_v25  ;;  %v3280_v60 = vrot.slane %v3279_v44, 2 }
 0x115   : > { %v2306_v61 = vmax.f32 %v2304_v40, %v2305_v45  ;;  %v2312_v62 = vrot.slane %v2311_v48, 4  ;;  %v2320_v1 = vmax.f32 %v2318_v9, %v2319_v49  ;;  %v2326_v2 = vrot.slane %v2325_v50, 4 }
 0x116   : > { %v6093_v5 = vmax.f32 %v3260_v41, %v3261_v14  ;;  %v3268_v6 = vrot.slane %v3267_v52, 1  ;;  %v3275_v10 = vrot.slane %v3274_v57, 1  ;;  %v3281_v11 = vmax.f32 %v3279_v44, %v3280_v60  ;;  %v5668_v44 = vpop.f32.mrf.mxu0 }
 0x117   : > { %v2307_v58 = vrot.slane %v2306_v61, 2  ;;  %v2313_v12 = vmax.f32 %v2311_v48, %v2312_v62  ;;  %v2321_v13 = vrot.slane %v2320_v1, 2  ;;  %v2327_v4 = vmax.f32 %v2325_v50, %v2326_v2 }
 0x118   : > { %v6095_v15 = vmax.f32 %v3267_v52, %v3268_v6  ;;  %v6097_v16 = vmax.f32 %v3274_v57, %v3275_v10  ;;  %v3282_v0 = vrot.slane %v3281_v11, 1  ;;  %v1492_v18 = vcombine.high %v6072_v17, %v6072_v17 }
 0x119   : > { %v2308_v19 = vmax.f32 %v2306_v61, %v2307_v58  ;;  %v2314_v20 = vrot.slane %v2313_v12, 2  ;;  %v2322_v21 = vmax.f32 %v2320_v1, %v2321_v13  ;;  %v2328_v22 = vrot.slane %v2327_v4, 2  ;;  %v564_v58 = vpop.f32.mrf.mxu0 }
 0x11a   : > { %v6101_v47 = vmax.f32 %v3281_v11, %v3282_v0  ;;  %v1499_v23 = vrot.slane %v6072_v17, %v5976_v46  ;;  %v1506_v24 = vrot.slane %v1492_v18, %v5976_v46  ;;  %v6109_v56 = vsel %vm4878_vm8, %v6060_v53, %v6063_v54  ;;  %v5700_v11 = vpop.f32.mrf.mxu1 }
 0x11b   : > { %v2309_v26 = vrot.slane %v2308_v19, 1  ;;  %v2315_v3 = vmax.f32 %v2313_v12, %v2314_v20  ;;  %v2323_v27 = vrot.slane %v2322_v21, 1  ;;  %v2329_v28 = vmax.f32 %v2327_v4, %v2328_v22 }
 0x11c   : > { %v1507_v30 = vcombine.high %v1499_v23, %v1499_v23  ;;  %v1508_v31 = vcombine.high %v1506_v24, %v1506_v24  ;;  %v3200_v51 = vsel %vm2275_vm5, %v1499_v23, -inf  ;;  %v3214_v33 = vsel %vm2275_vm5, %v1506_v24, -inf }
 0x11d   : > { %v2310_v34 = vmax.f32 %v2308_v19, %v2309_v26  ;;  %v2316_v17 = vrot.slane %v2315_v3, 1  ;;  %v2324_v35 = vmax.f32 %v2322_v21, %v2323_v27  ;;  %v2330_v8 = vrot.slane %v2329_v28, 1  ;;  %v5416_v27 = vld [vmem:[%s5896_s23 + $0x8] sm:$0xf] }
 0x11e   : > { %v3201_v36 = vrot.slane %v3200_v51, 4  ;;  %v3207_v53 = vsel %vm2275_vm5, %v1507_v30, -inf  ;;  %v3215_v54 = vrot.slane %v3214_v33, 4  ;;  %v3221_v37 = vsel %vm2275_vm5, %v1508_v31, -inf }
 0x11f   : > { %v2317_v38 = vmax.f32 %v2315_v3, %v2316_v17  ;;  %v2331_v39 = vmax.f32 %v2329_v28, %v2330_v8  ;;  %v4072_v59 = vmax.f32 %v2310_v34, %v6076_v55  ;;  %v4074_v40 = vmax.f32 %v2324_v35, %v6078_v63  ;;  %v5418_v55 = vld [vmem:[%s5896_s23 + $0xc] sm:$0x1] }
 0x120   : > { %v3202_v9 = vmax.f32 %v3200_v51, %v3201_v36  ;;  %v3208_v41 = vrot.slane %v3207_v53, 4  ;;  %v3216_v42 = vmax.f32 %v3214_v33, %v3215_v54  ;;  %v3222_v25 = vrot.slane %v3221_v37, 4 }
 0x121   : > { %v4073_v45 = vmax.f32 %v2317_v38, %v6082_v29  ;;  %v4075_v48 = vmax.f32 %v2331_v39, %v6084_v32  ;;  %v5487_v49 = vpack.c.bf16 %v4072_v59, %v4072_v59  ;;  %v5489_v50 = vpack.c.bf16 %v4074_v40, %v4074_v40 }
 0x122   : > { %v3203_v52 = vrot.slane %v3202_v9, 2  ;;  %v3209_v63 = vmax.f32 %v3207_v53, %v3208_v41  ;;  %v3217_v57 = vrot.slane %v3216_v42, 2  ;;  %v3223_v60 = vmax.f32 %v3221_v37, %v3222_v25 }
 0x123   : > { %v5488_v61 = vpack.c.bf16 %v4073_v45, %v4073_v45  ;;  %v4750_v62 = vunpack.c.l.b16 %v5487_v49  ;;  %v4752_v1 = vunpack.c.l.b16 %v5489_v50  ;;  %v5611_v29 = vpack.c.bf16 %v4075_v48, %v4075_v48  ;;  %v5450_v49 = vld [vmem:[%s5896_s23 + $0x4c] sm:$0x1] }
 0x124   : > { %v3204_v2 = vmax.f32 %v3202_v9, %v3203_v52  ;;  %v3210_v32 = vrot.slane %v3209_v63, 2  ;;  %v3218_v6 = vmax.f32 %v3216_v42, %v3217_v57  ;;  %v3224_v10 = vrot.slane %v3223_v60, 2 }
 0x125   : > { %v4751_v12 = vunpack.c.l.b16 %v5488_v61  ;;  %v4881_v13 = vsel %vm4880_vm10, %v4750_v62, %v6068_v7  ;;  %v5051_v4 = vsel %vm6121_vm14, %v5611_v29, %v5418_v55  ;;  %v573_v0 = vadd.f32 %v5668_v44, %v5973_v43 }
 0x126   : > { %5419 = vst [vmem:[%s5896_s23 + $0xc] sm:$0x1] %v5051_v4  ;;  %v3205_v18 = vrot.slane %v3204_v2, 1  ;;  %v3211_v19 = vmax.f32 %v3209_v63, %v3210_v32  ;;  %v3219_v20 = vrot.slane %v3218_v6, 1  ;;  %v3225_v21 = vmax.f32 %v3223_v60, %v3224_v10 }
 0x127   : > { %v4883_v22 = vsel %vm4882_vm11, %v4751_v12, %v4881_v13  ;;  %v809_v23 = vmax.f32 %v573_v0, 0.0  ;;  %v701_v24 = vadd.f32 %v5700_v11, %v5973_v43  ;;  %v6135_v26 = vadd.f32 %v5973_v43, %v564_v58  ;;  %v5448_v12 = vld [vmem:[%s5896_s23 + $0x48] sm:$0xf] }
 0x128   : > { %v4885_v7 = vsel %vm4884_vm12, %v4752_v1, %v4883_v22  ;;  %v3206_v28 = vmax.f32 %v3204_v2, %v3205_v18  ;;  %v3212_v30 = vrot.slane %v3211_v19, 1  ;;  %v3220_v31 = vmax.f32 %v3218_v6, %v3219_v20 }
 0x129   : > { %v4976_v51 = vpack.c.b16 %v4885_v7, %v4885_v7  ;;  %v3226_v33 = vrot.slane %v3225_v21, 1  ;;  %v1033_v34 = vcombine.high %v809_v23, %v809_v23  ;;  %v1040_v17 = vrot.slane %v809_v23, %v5976_v46 }
 0x12a   : > { %v3213_v35 = vmax.f32 %v3211_v19, %v3212_v30  ;;  %v4136_v8 = vmax.f32 %v3206_v28, %v6093_v5  ;;  %v4138_v36 = vmax.f32 %v3220_v31, %v6097_v16  ;;  %v841_v53 = vmax.f32 %v701_v24, 0.0 }
 0x12b   : > { %v5045_v54 = vsel %vm6140_vm15, %v4976_v51, %v5416_v27  ;;  %v3227_v37 = vmax.f32 %v3225_v21, %v3226_v33  ;;  %v1047_v38 = vrot.slane %v1033_v34, %v5976_v46  ;;  %v1048_v39 = vcombine.high %v1040_v17, %v1040_v17 }
 0x12c   : > { %5417 = vst [vmem:[%s5896_s23 + $0x8] sm:$0xf] %v5045_v54  ;;  %v4137_v59 = vmax.f32 %v3213_v35, %v6095_v15  ;;  %v5551_v40 = vpack.c.bf16 %v4136_v8, %v4136_v8  ;;  %v5553_v9 = vpack.c.bf16 %v4138_v36, %v4138_v36  ;;  %v2444_v41 = vsel %vm2275_vm5, %v1040_v17, -inf }
 0x12d   : > { %v4139_v5 = vmax.f32 %v3227_v37, %v6101_v47  ;;  %v1049_v42 = vcombine.high %v1047_v38, %v1047_v38  ;;  %v2445_v16 = vrot.slane %v2444_v41, 4  ;;  %v2451_v25 = vsel %vm2275_vm5, %v1048_v39, -inf  ;;  %v692_v39 = vpop.f32.mrf.mxu1 }
 0x12e   : > { %v5552_v44 = vpack.c.bf16 %v4137_v59, %v4137_v59  ;;  %v4814_v45 = vunpack.c.l.b16 %v5551_v40  ;;  %v4816_v48 = vunpack.c.l.b16 %v5553_v9  ;;  %v2452_v50 = vrot.slane %v2451_v25, 4 }
 0x12f   : > { %v5619_v55 = vpack.c.bf16 %v4139_v5, %v4139_v5  ;;  %v2446_v52 = vmax.f32 %v2444_v41, %v2445_v16  ;;  %v2458_v15 = vsel %vm2275_vm5, %v1047_v38, -inf  ;;  %v2465_v63 = vsel %vm2275_vm5, %v1049_v42, -inf }
 0x130   : > { %v4815_v57 = vunpack.c.l.b16 %v5552_v44  ;;  %v4931_v47 = vsel %vm4880_vm10, %v4814_v45, %v6109_v56  ;;  %v2453_v60 = vmax.f32 %v2451_v25, %v2452_v50  ;;  %v2459_v61 = vrot.slane %v2458_v15, 4 }
 0x131   : > { %v5099_v62 = vsel %vm6121_vm14, %v5619_v55, %v5450_v49  ;;  %v2447_v1 = vrot.slane %v2446_v52, 2  ;;  %v2466_v29 = vrot.slane %v2465_v63, 4  ;;  %v1577_v2 = vcombine.high %v841_v53, %v841_v53 }
 0x132   : > { %v4932_v32 = vsel %vm4882_vm11, %v4815_v57, %v4931_v47  ;;  %5451 = vst [vmem:[%s5896_s23 + $0x4c] sm:$0x1] %v5099_v62  ;;  %v2454_v6 = vrot.slane %v2453_v60, 2  ;;  %v2460_v10 = vmax.f32 %v2458_v15, %v2459_v61  ;;  %v1584_v11 = vrot.slane %v841_v53, %v5976_v46 }
 0x133   : > { %v4933_v58 = vsel %vm4884_vm12, %v4816_v48, %v4932_v32  ;;  %v2448_v56 = vmax.f32 %v2446_v52, %v2447_v1  ;;  %v2467_v13 = vmax.f32 %v2465_v63, %v2466_v29  ;;  %v1591_v4 = vrot.slane %v1577_v2, %v5976_v46 }
 0x134   : > { %v4992_v0 = vpack.c.b16 %v4933_v58, %v4933_v58  ;;  %v2455_v18 = vmax.f32 %v2453_v60, %v2454_v6  ;;  %v2461_v19 = vrot.slane %v2460_v10, 2  ;;  %v1592_v20 = vcombine.high %v1584_v11, %v1584_v11 }
 0x135   : > { %v2449_v21 = vrot.slane %v2448_v56, 1  ;;  %v2468_v22 = vrot.slane %v2467_v13, 2  ;;  %v1593_v23 = vcombine.high %v1591_v4, %v1591_v4  ;;  %v3340_v24 = vsel %vm2275_vm5, %v1584_v11, -inf }
 0x136   : > { %v5096_v7 = vsel %vm6140_vm15, %v4992_v0, %v5448_v12  ;;  %v2456_v27 = vrot.slane %v2455_v18, 1  ;;  %v2462_v28 = vmax.f32 %v2460_v10, %v2461_v19  ;;  %v3341_v30 = vrot.slane %v3340_v24, 4 }
 0x137   : > { %5449 = vst [vmem:[%s5896_s23 + $0x48] sm:$0xf] %v5096_v7  ;;  %v6173_v31 = vmax.f32 %v2448_v56, %v2449_v21  ;;  %v2469_v51 = vmax.f32 %v2467_v13, %v2468_v22  ;;  %v3347_v33 = vsel %vm2275_vm5, %v1592_v20, -inf  ;;  %v3354_v34 = vsel %vm2275_vm5, %v1591_v4, -inf  ;;  %v5669_v56 = vpop.f32.mrf.mxu0 }
 0x138   : > { %v6177_v17 = vmax.f32 %v2455_v18, %v2456_v27  ;;  %v2463_v35 = vrot.slane %v2462_v28, 1  ;;  %v3342_v8 = vmax.f32 %v3340_v24, %v3341_v30  ;;  %v3348_v36 = vrot.slane %v3347_v33, 4 }
 0x139   : > { %v2470_v53 = vrot.slane %v2469_v51, 1  ;;  %v3355_v54 = vrot.slane %v3354_v34, 4  ;;  %v3361_v37 = vsel %vm2275_vm5, %v1593_v23, -inf  ;;  %v807_v38 = vmax.f32 %v6135_v26, 0.0  ;;  %v5701_v23 = vpop.f32.mrf.mxu1 }
 0x13a   : > { %v6181_v59 = vmax.f32 %v2462_v28, %v2463_v35  ;;  %v3343_v40 = vrot.slane %v3342_v8, 2  ;;  %v3349_v9 = vmax.f32 %v3347_v33, %v3348_v36  ;;  %v3362_v41 = vrot.slane %v3361_v37, 4 }
 0x13b   : > { %v6183_v5 = vmax.f32 %v2469_v51, %v2470_v53  ;;  %v3356_v42 = vmax.f32 %v3354_v34, %v3355_v54  ;;  %v999_v16 = vcombine.high %v807_v38, %v807_v38  ;;  %v1006_v25 = vrot.slane %v807_v38, %v5976_v46 }
 0x13c   : > { %v3344_v44 = vmax.f32 %v3342_v8, %v3343_v40  ;;  %v3350_v45 = vrot.slane %v3349_v9, 2  ;;  %v3363_v48 = vmax.f32 %v3361_v37, %v3362_v41  ;;  %v693_v49 = vadd.f32 %v5973_v43, %v692_v39 }
 0x13d   : > { %v3357_v50 = vrot.slane %v3356_v42, 2  ;;  %v1013_v26 = vrot.slane %v999_v16, %v5976_v46  ;;  %v1014_v55 = vcombine.high %v1006_v25, %v1006_v25  ;;  %v2388_v52 = vsel %vm2275_vm5, %v1006_v25, -inf }
 0x13e   : > { %v3345_v15 = vrot.slane %v3344_v44, 1  ;;  %v3351_v63 = vmax.f32 %v3349_v9, %v3350_v45  ;;  %v3364_v57 = vrot.slane %v3363_v48, 2  ;;  %v2389_v47 = vrot.slane %v2388_v52, 4 }
 0x13f   : > { %v3358_v60 = vmax.f32 %v3356_v42, %v3357_v50  ;;  %v1015_v61 = vcombine.high %v1013_v26, %v1013_v26  ;;  %v2395_v62 = vsel %vm2275_vm5, %v1014_v55, -inf  ;;  %v2402_v1 = vsel %vm2275_vm5, %v1013_v26, -inf }
 0x140   : > { %v6191_v29 = vmax.f32 %v3344_v44, %v3345_v15  ;;  %v3352_v2 = vrot.slane %v3351_v63, 1  ;;  %v3365_v32 = vmax.f32 %v3363_v48, %v3364_v57  ;;  %v2390_v6 = vmax.f32 %v2388_v52, %v2389_v47 }
 0x141   : > { %v3359_v10 = vrot.slane %v3358_v60, 1  ;;  %v2396_v11 = vrot.slane %v2395_v62, 4  ;;  %v2403_v58 = vrot.slane %v2402_v1, 4  ;;  %v2409_v12 = vsel %vm2275_vm5, %v1015_v61, -inf }
 0x142   : > { %v6194_v13 = vmax.f32 %v3351_v63, %v3352_v2  ;;  %v3366_v4 = vrot.slane %v3365_v32, 1  ;;  %v2391_v0 = vrot.slane %v2390_v6, 2  ;;  %v2410_v18 = vrot.slane %v2409_v12, 4 }
 0x143   : > { %v6196_v19 = vmax.f32 %v3358_v60, %v3359_v10  ;;  %v2397_v20 = vmax.f32 %v2395_v62, %v2396_v11  ;;  %v2404_v21 = vmax.f32 %v2402_v1, %v2403_v58  ;;  %v839_v22 = vmax.f32 %v693_v49, 0.0 }
 0x144   : > { %v6198_v24 = vmax.f32 %v3365_v32, %v3366_v4  ;;  %v2392_v7 = vmax.f32 %v2390_v6, %v2391_v0  ;;  %v2411_v27 = vmax.f32 %v2409_v12, %v2410_v18  ;;  %v576_v28 = vadd.f32 %v5669_v56, %v5973_v43 }
 0x145   : > { %v2398_v30 = vrot.slane %v2397_v20, 2  ;;  %v2405_v51 = vrot.slane %v2404_v21, 2  ;;  %v1543_v33 = vcombine.high %v839_v22, %v839_v22  ;;  %v1550_v34 = vrot.slane %v839_v22, %v5976_v46 }
 0x146   : > { %v2393_v35 = vrot.slane %v2392_v7, 1  ;;  %v2412_v8 = vrot.slane %v2411_v27, 2  ;;  %v810_v36 = vmax.f32 %v576_v28, 0.0  ;;  %v6203_v53 = vadd.f32 %v5701_v23, %v5973_v43 }
 0x147   : > { %v2399_v54 = vmax.f32 %v2397_v20, %v2398_v30  ;;  %v2406_v37 = vmax.f32 %v2404_v21, %v2405_v51  ;;  %v1557_v38 = vrot.slane %v1543_v33, %v5976_v46  ;;  %v1558_v39 = vcombine.high %v1550_v34, %v1550_v34 }
 0x148   : > { %v2394_v40 = vmax.f32 %v2392_v7, %v2393_v35  ;;  %v2413_v9 = vmax.f32 %v2411_v27, %v2412_v8  ;;  %v3284_v41 = vsel %vm2275_vm5, %v1550_v34, -inf  ;;  %v1050_v42 = vcombine.high %v810_v36, %v810_v36 }
 0x149   : > { %v2400_v16 = vrot.slane %v2399_v54, 1  ;;  %v2407_v25 = vrot.slane %v2406_v37, 1  ;;  %v1559_v44 = vcombine.high %v1557_v38, %v1557_v38  ;;  %v3285_v45 = vrot.slane %v3284_v41, 4 }
 0x14a   : > { %v2414_v48 = vrot.slane %v2413_v9, 1  ;;  %v4076_v49 = vmax.f32 %v2394_v40, %v6173_v31  ;;  %v3291_v43 = vsel %vm2275_vm5, %v1558_v39, -inf  ;;  %v3298_v50 = vsel %vm2275_vm5, %v1557_v38, -inf }
 0x14b   : > { %v2401_v26 = vmax.f32 %v2399_v54, %v2400_v16  ;;  %v2408_v55 = vmax.f32 %v2406_v37, %v2407_v25  ;;  %v3286_v52 = vmax.f32 %v3284_v41, %v3285_v45  ;;  %v3292_v15 = vrot.slane %v3291_v43, 4 }
 0x14c   : > { %v2415_v63 = vmax.f32 %v2413_v9, %v2414_v48  ;;  %v5491_v57 = vpack.c.bf16 %v4076_v49, %v4076_v49  ;;  %v3299_v47 = vrot.slane %v3298_v50, 4  ;;  %v3305_v60 = vsel %vm2275_vm5, %v1559_v44, -inf }
 0x14d   : > { %v4077_v61 = vmax.f32 %v2401_v26, %v6177_v17  ;;  %v4078_v62 = vmax.f32 %v2408_v55, %v6181_v59  ;;  %v3287_v1 = vrot.slane %v3286_v52, 2  ;;  %v3293_v2 = vmax.f32 %v3291_v43, %v3292_v15 }
 0x14e   : > { %v4079_v31 = vmax.f32 %v2415_v63, %v6183_v5  ;;  %v4754_v32 = vunpack.c.l.b16 %v5491_v57  ;;  %v3300_v6 = vmax.f32 %v3298_v50, %v3299_v47  ;;  %v3306_v10 = vrot.slane %v3305_v60, 4 }
 0x14f   : > { %v5492_v11 = vpack.c.bf16 %v4077_v61, %v4077_v61  ;;  %v5493_v58 = vpack.c.bf16 %v4078_v62, %v4078_v62  ;;  %v3288_v12 = vmax.f32 %v3286_v52, %v3287_v1  ;;  %v3294_v56 = vrot.slane %v3293_v2, 2 }
 0x150   : > { %v5494_v4 = vpack.c.bf16 %v4079_v31, %v4079_v31  ;;  %v3301_v0 = vrot.slane %v3300_v6, 2  ;;  %v3307_v18 = vmax.f32 %v3305_v60, %v3306_v10  ;;  %v1057_v20 = vrot.slane %v810_v36, %v5976_v46 }
 0x151   : > { %v4755_v21 = vunpack.c.l.b16 %v5492_v11  ;;  %v4756_v17 = vunpack.c.l.b16 %v5493_v58  ;;  %v3289_v22 = vrot.slane %v3288_v12, 1  ;;  %v3295_v59 = vmax.f32 %v3293_v2, %v3294_v56  ;;  %v567_v58 = vpop.f32.mrf.mxu0 }
 0x152   : > { %v6215_v23 = vunpack.c.l.b16 %v5494_v4  ;;  %v3302_v7 = vmax.f32 %v3300_v6, %v3301_v0  ;;  %v3308_v5 = vrot.slane %v3307_v18, 2  ;;  %v1064_v27 = vrot.slane %v1050_v42, %v5976_v46 }
 0x153   : > { %v4886_v28 = vsel %vm4874_vm6, %v4755_v21, %v4754_v32  ;;  %v3290_v30 = vmax.f32 %v3288_v12, %v3289_v22  ;;  %v3296_v51 = vrot.slane %v3295_v59, 1  ;;  %v1065_v33 = vcombine.high %v1057_v20, %v1057_v20  ;;  %v695_v21 = vpop.f32.mrf.mxu1 }
 0x154   : > { %v4887_v34 = vsel %vm4876_vm7, %v4756_v17, %v4886_v28  ;;  %v3303_v35 = vrot.slane %v3302_v7, 1  ;;  %v3309_v8 = vmax.f32 %v3307_v18, %v3308_v5  ;;  %v1066_v36 = vcombine.high %v1064_v27, %v1064_v27 }
 0x155   : > { %v3297_v54 = vmax.f32 %v3295_v59, %v3296_v51  ;;  %v4140_v37 = vmax.f32 %v3290_v30, %v6191_v29  ;;  %v2472_v38 = vsel %vm2275_vm5, %v1057_v20, -inf  ;;  %v2479_v39 = vsel %vm2275_vm5, %v1065_v33, -inf  ;;  %v6240_v59 = vld [vmem:[%s7183_s2] ss:$0 sm:$0xff] }
 0x156   : > { %v3304_v40 = vmax.f32 %v3302_v7, %v3303_v35  ;;  %v3310_v9 = vrot.slane %v3309_v8, 1  ;;  %v2473_v41 = vrot.slane %v2472_v38, 4  ;;  %v2480_v42 = vrot.slane %v2479_v39, 4 }
 0x157   : > { %v4141_v16 = vmax.f32 %v3297_v54, %v6194_v13  ;;  %v5555_v25 = vpack.c.bf16 %v4140_v37, %v4140_v37  ;;  %v2486_v44 = vsel %vm2275_vm5, %v1064_v27, -inf  ;;  %v2493_v45 = vsel %vm2275_vm5, %v1066_v36, -inf }
 0x158   : > { %v3311_v48 = vmax.f32 %v3309_v8, %v3310_v9  ;;  %v4142_v49 = vmax.f32 %v3304_v40, %v6196_v19  ;;  %v2474_v43 = vmax.f32 %v2472_v38, %v2473_v41  ;;  %v2481_v29 = vmax.f32 %v2479_v39, %v2480_v42 }
 0x159   : > { %v5556_v50 = vpack.c.bf16 %v4141_v16, %v4141_v16  ;;  %v4818_v26 = vunpack.c.l.b16 %v5555_v25  ;;  %v2487_v55 = vrot.slane %v2486_v44, 4  ;;  %v2494_v52 = vrot.slane %v2493_v45, 4 }
 0x15a   : > { %v4143_v15 = vmax.f32 %v3311_v48, %v6198_v24  ;;  %v5557_v63 = vpack.c.bf16 %v4142_v49, %v4142_v49  ;;  %v2475_v57 = vrot.slane %v2474_v43, 2  ;;  %v2482_v47 = vrot.slane %v2481_v29, 2 }
 0x15b   : > { %v4819_v13 = vunpack.c.l.b16 %v5556_v50  ;;  %v2488_v60 = vmax.f32 %v2486_v44, %v2487_v55  ;;  %v2495_v61 = vmax.f32 %v2493_v45, %v2494_v52  ;;  %v842_v62 = vmax.f32 %v6203_v53, 0.0 }
 0x15c   : > { %v5558_v1 = vpack.c.bf16 %v4143_v15, %v4143_v15  ;;  %v4820_v2 = vunpack.c.l.b16 %v5557_v63  ;;  %v2476_v31 = vmax.f32 %v2474_v43, %v2475_v57  ;;  %v2483_v19 = vmax.f32 %v2481_v29, %v2482_v47 }
 0x15d   : > { %v4934_v32 = vsel %vm4874_vm6, %v4819_v13, %v4818_v26  ;;  %v2489_v6 = vrot.slane %v2488_v60, 2  ;;  %v2496_v10 = vrot.slane %v2495_v61, 2  ;;  %v1594_v11 = vcombine.high %v842_v62, %v842_v62 }
 0x15e   : > { %v4821_v12 = vunpack.c.l.b16 %v5558_v1  ;;  %v4935_v24 = vsel %vm4876_vm7, %v4820_v2, %v4934_v32  ;;  %v2477_v56 = vrot.slane %v2476_v31, 1  ;;  %v2484_v4 = vrot.slane %v2483_v19, 1 }
 0x15f   : > { %v2490_v0 = vmax.f32 %v2488_v60, %v2489_v6  ;;  %v2497_v18 = vmax.f32 %v2495_v61, %v2496_v10  ;;  %v1601_v20 = vrot.slane %v842_v62, %v5976_v46  ;;  %v1608_v53 = vrot.slane %v1594_v11, %v5976_v46 }
 0x160   : > { %v6233_v17 = vmax.f32 %v2476_v31, %v2477_v56  ;;  %v6235_v22 = vmax.f32 %v2483_v19, %v2484_v4  ;;  %v568_v7 = vadd.f32 %v6240_v59, %v567_v58  ;;  %v6245_v5 = vsel %vm4878_vm8, %v6215_v23, %v4887_v34 }
 0x161   : > { %v2491_v27 = vrot.slane %v2490_v0, 1  ;;  %v2498_v28 = vrot.slane %v2497_v18, 1  ;;  %v1609_v30 = vcombine.high %v1601_v20, %v1601_v20  ;;  %v1610_v51 = vcombine.high %v1608_v53, %v1608_v53 }
 0x162   : > { %v3368_v33 = vsel %vm2275_vm5, %v1601_v20, -inf  ;;  %v3382_v35 = vsel %vm2275_vm5, %v1608_v53, -inf  ;;  %v808_v8 = vmax.f32 %v568_v7, 0.0  ;;  %v696_v36 = vadd.f32 %v6240_v59, %v695_v21 }
 0x163   : > { %v6250_v54 = vmax.f32 %v2490_v0, %v2491_v27  ;;  %v6252_v37 = vmax.f32 %v2497_v18, %v2498_v28  ;;  %v3369_v38 = vrot.slane %v3368_v33, 4  ;;  %v3375_v39 = vsel %vm2275_vm5, %v1609_v30, -inf  ;;  %v5672_v18 = vpop.f32.mrf.mxu0  ;;  %v5704_v27 = vpop.f32.mrf.mxu1 }
 0x164   : > { %v3376_v23 = vrot.slane %v3375_v39, 4  ;;  %v3383_v34 = vrot.slane %v3382_v35, 4  ;;  %v3389_v40 = vsel %vm2275_vm5, %v1610_v51, -inf  ;;  %v1016_v9 = vcombine.high %v808_v8, %v808_v8 }
 0x165   : > { %v3370_v41 = vmax.f32 %v3368_v33, %v3369_v38  ;;  %v3390_v42 = vrot.slane %v3389_v40, 4  ;;  %v1023_v16 = vrot.slane %v808_v8, %v5976_v46  ;;  %v840_v25 = vmax.f32 %v696_v36, 0.0 }
 0x166   : > { %v3377_v44 = vmax.f32 %v3375_v39, %v3376_v23  ;;  %v3384_v45 = vmax.f32 %v3382_v35, %v3383_v34  ;;  %v1030_v48 = vrot.slane %v1016_v9, %v5976_v46  ;;  %v6259_v49 = vsel %vm4878_vm8, %v4821_v12, %v4935_v24 }
 0x167   : > { %v3371_v43 = vrot.slane %v3370_v41, 2  ;;  %v3391_v29 = vmax.f32 %v3389_v40, %v3390_v42  ;;  %v1031_v50 = vcombine.high %v1023_v16, %v1023_v16  ;;  %v2416_v26 = vsel %vm2275_vm5, %v1023_v16, -inf }
 0x168   : > { %v3378_v55 = vrot.slane %v3377_v44, 2  ;;  %v3385_v52 = vrot.slane %v3384_v45, 2  ;;  %v1032_v15 = vcombine.high %v1030_v48, %v1030_v48  ;;  %v2417_v63 = vrot.slane %v2416_v26, 4 }
 0x169   : > { %v3372_v57 = vmax.f32 %v3370_v41, %v3371_v43  ;;  %v3392_v47 = vrot.slane %v3391_v29, 2  ;;  %v2423_v13 = vsel %vm2275_vm5, %v1031_v50, -inf  ;;  %v2430_v60 = vsel %vm2275_vm5, %v1030_v48, -inf }
 0x16a   : > { %v3379_v61 = vmax.f32 %v3377_v44, %v3378_v55  ;;  %v3386_v62 = vmax.f32 %v3384_v45, %v3385_v52  ;;  %v2418_v1 = vmax.f32 %v2416_v26, %v2417_v63  ;;  %v2424_v2 = vrot.slane %v2423_v13, 4 }
 0x16b   : > { %v3373_v31 = vrot.slane %v3372_v57, 1  ;;  %v3393_v19 = vmax.f32 %v3391_v29, %v3392_v47  ;;  %v2431_v32 = vrot.slane %v2430_v60, 4  ;;  %v2437_v6 = vsel %vm2275_vm5, %v1032_v15, -inf }
 0x16c   : > { %v3380_v10 = vrot.slane %v3379_v61, 1  ;;  %v3387_v11 = vrot.slane %v3386_v62, 1  ;;  %v2419_v58 = vrot.slane %v2418_v1, 2  ;;  %v2425_v12 = vmax.f32 %v2423_v13, %v2424_v2 }
 0x16d   : > { %v6265_v24 = vmax.f32 %v3372_v57, %v3373_v31  ;;  %v3394_v56 = vrot.slane %v3393_v19, 1  ;;  %v2432_v4 = vmax.f32 %v2430_v60, %v2431_v32  ;;  %v2438_v0 = vrot.slane %v2437_v6, 4 }
 0x16e   : > { %v6267_v20 = vmax.f32 %v3379_v61, %v3380_v10  ;;  %v6269_v53 = vmax.f32 %v3386_v62, %v3387_v11  ;;  %v2420_v21 = vmax.f32 %v2418_v1, %v2419_v58  ;;  %v2426_v7 = vrot.slane %v2425_v12, 2 }
 0x16f   : > { %v6271_v28 = vmax.f32 %v3393_v19, %v3394_v56  ;;  %v2433_v30 = vrot.slane %v2432_v4, 2  ;;  %v2439_v51 = vmax.f32 %v2437_v6, %v2438_v0  ;;  %v1560_v33 = vcombine.high %v840_v25, %v840_v25  ;;  %v5422_v56 = vld [vmem:[%s5896_s23 + $0x14] sm:$0x1] }
 0x170   : > { %v2421_v35 = vrot.slane %v2420_v21, 1  ;;  %v2427_v8 = vmax.f32 %v2425_v12, %v2426_v7  ;;  %v1567_v36 = vrot.slane %v840_v25, %v5976_v46  ;;  %v589_v38 = vadd.f32 %v6240_v59, %v5672_v18 }
 0x171   : > { %v2434_v39 = vmax.f32 %v2432_v4, %v2433_v30  ;;  %v2440_v23 = vrot.slane %v2439_v51, 2  ;;  %v1574_v34 = vrot.slane %v1560_v33, %v5976_v46  ;;  %v717_v40 = vadd.f32 %v6240_v59, %v5704_v27 }
 0x172   : > { %v2422_v9 = vmax.f32 %v2420_v21, %v2421_v35  ;;  %v2428_v41 = vrot.slane %v2427_v8, 1  ;;  %v1575_v42 = vcombine.high %v1567_v36, %v1567_v36  ;;  %v3312_v16 = vsel %vm2275_vm5, %v1567_v36, -inf  ;;  %v5420_v35 = vld [vmem:[%s5896_s23 + $0x10] sm:$0xf] }
 0x173   : > { %v2435_v44 = vrot.slane %v2434_v39, 1  ;;  %v2441_v45 = vmax.f32 %v2439_v51, %v2440_v23  ;;  %v1576_v48 = vcombine.high %v1574_v34, %v1574_v34  ;;  %v3313_v43 = vrot.slane %v3312_v16, 4 }
 0x174   : > { %v2429_v29 = vmax.f32 %v2427_v8, %v2428_v41  ;;  %v4080_v25 = vmax.f32 %v2422_v9, %v6233_v17  ;;  %v3319_v50 = vsel %vm2275_vm5, %v1575_v42, -inf  ;;  %v3326_v26 = vsel %vm2275_vm5, %v1574_v34, -inf }
 0x175   : > { %v2436_v55 = vmax.f32 %v2434_v39, %v2435_v44  ;;  %v2442_v52 = vrot.slane %v2441_v45, 1  ;;  %v3314_v15 = vmax.f32 %v3312_v16, %v3313_v43  ;;  %v3320_v63 = vrot.slane %v3319_v50, 4 }
 0x176   : > { %v4081_v57 = vmax.f32 %v2429_v29, %v6235_v22  ;;  %v5495_v47 = vpack.c.bf16 %v4080_v25, %v4080_v25  ;;  %v3327_v13 = vrot.slane %v3326_v26, 4  ;;  %v3333_v60 = vsel %vm2275_vm5, %v1576_v48, -inf }
 0x177   : > { %v2443_v61 = vmax.f32 %v2441_v45, %v2442_v52  ;;  %v4082_v62 = vmax.f32 %v2436_v55, %v6250_v54  ;;  %v3315_v1 = vrot.slane %v3314_v15, 2  ;;  %v3321_v17 = vmax.f32 %v3319_v50, %v3320_v63 }
 0x178   : > { %v5496_v2 = vpack.c.bf16 %v4081_v57, %v4081_v57  ;;  %v4758_v31 = vunpack.c.l.b16 %v5495_v47  ;;  %v3328_v19 = vmax.f32 %v3326_v26, %v3327_v13  ;;  %v3334_v32 = vrot.slane %v3333_v60, 4 }
 0x179   : > { %v4083_v6 = vmax.f32 %v2443_v61, %v6252_v37  ;;  %v5497_v10 = vpack.c.bf16 %v4082_v62, %v4082_v62  ;;  %v3316_v11 = vmax.f32 %v3314_v15, %v3315_v1  ;;  %v3322_v22 = vrot.slane %v3321_v17, 2 }
 0x17a   : > { %v4759_v58 = vunpack.c.l.b16 %v5496_v2  ;;  %v4889_v12 = vsel %vm4880_vm10, %v4758_v31, %v6245_v5  ;;  %v3329_v4 = vrot.slane %v3328_v19, 2  ;;  %v3335_v54 = vmax.f32 %v3333_v60, %v3334_v32 }
 0x17b   : > { %v4760_v0 = vunpack.c.l.b16 %v5497_v10  ;;  %v5612_v18 = vpack.c.bf16 %v4083_v6, %v4083_v6  ;;  %v3317_v21 = vrot.slane %v3316_v11, 1  ;;  %v3323_v7 = vmax.f32 %v3321_v17, %v3322_v22  ;;  %v5454_v17 = vld [vmem:[%s5896_s23 + $0x54] sm:$0x1] }
 0x17c   : > { %v4890_v27 = vsel %vm4882_vm11, %v4759_v58, %v4889_v12  ;;  %v3330_v30 = vmax.f32 %v3328_v19, %v3329_v4  ;;  %v3336_v37 = vrot.slane %v3335_v54, 2  ;;  %v813_v51 = vmax.f32 %v589_v38, 0.0  ;;  %v580_v58 = vpop.f32.mrf.mxu0 }
 0x17d   : > { %v4891_v33 = vsel %vm4884_vm12, %v4760_v0, %v4890_v27  ;;  %v5057_v8 = vsel %vm6121_vm14, %v5612_v18, %v5422_v56  ;;  %v3318_v5 = vmax.f32 %v3316_v11, %v3317_v21  ;;  %v3324_v36 = vrot.slane %v3323_v7, 1  ;;  %v5452_v56 = vld [vmem:[%s5896_s23 + $0x50] sm:$0xf] }
 0x17e   : > { %v4978_v39 = vpack.c.b16 %v4891_v33, %v4891_v33  ;;  %5423 = vst [vmem:[%s5896_s23 + $0x14] sm:$0x1] %v5057_v8  ;;  %v3331_v23 = vrot.slane %v3330_v30, 1  ;;  %v3337_v34 = vmax.f32 %v3335_v54, %v3336_v37  ;;  %v1101_v9 = vcombine.high %v813_v51, %v813_v51 }
 0x17f   : > { %v3325_v41 = vmax.f32 %v3323_v7, %v3324_v36  ;;  %v4144_v42 = vmax.f32 %v3318_v5, %v6265_v24  ;;  %v1108_v16 = vrot.slane %v813_v51, %v5976_v46  ;;  %v845_v38 = vmax.f32 %v717_v40, 0.0 }
 0x180   : > { %v5054_v44 = vsel %vm6140_vm15, %v4978_v39, %v5420_v35  ;;  %v3332_v45 = vmax.f32 %v3330_v30, %v3331_v23  ;;  %v3338_v48 = vrot.slane %v3337_v34, 1  ;;  %v1115_v43 = vrot.slane %v1101_v9, %v5976_v46 }
 0x181   : > { %5421 = vst [vmem:[%s5896_s23 + $0x10] sm:$0xf] %v5054_v44  ;;  %v4145_v29 = vmax.f32 %v3325_v41, %v6267_v20  ;;  %v5559_v25 = vpack.c.bf16 %v4144_v42, %v4144_v42  ;;  %v1116_v50 = vcombine.high %v1108_v16, %v1108_v16  ;;  %v2556_v26 = vsel %vm2275_vm5, %v1108_v16, -inf }
 0x182   : > { %v3339_v55 = vmax.f32 %v3337_v34, %v3338_v48  ;;  %v4146_v24 = vmax.f32 %v3332_v45, %v6269_v53  ;;  %v1117_v52 = vcombine.high %v1115_v43, %v1115_v43  ;;  %v2557_v40 = vrot.slane %v2556_v26, 4 }
 0x183   : > { %v5560_v15 = vpack.c.bf16 %v4145_v29, %v4145_v29  ;;  %v4822_v63 = vunpack.c.l.b16 %v5559_v25  ;;  %v2563_v57 = vsel %vm2275_vm5, %v1116_v50, -inf  ;;  %v2570_v47 = vsel %vm2275_vm5, %v1115_v43, -inf  ;;  %v5673_v29 = vpop.f32.mrf.mxu0 }
 0x184   : > { %v4147_v13 = vmax.f32 %v3339_v55, %v6271_v28  ;;  %v5561_v60 = vpack.c.bf16 %v4146_v24, %v4146_v24  ;;  %v2558_v20 = vmax.f32 %v2556_v26, %v2557_v40  ;;  %v2564_v61 = vrot.slane %v2563_v57, 4 }
 0x185   : > { %v4823_v62 = vunpack.c.l.b16 %v5560_v15  ;;  %v4937_v1 = vsel %vm4880_vm10, %v4822_v63, %v6259_v49  ;;  %v2571_v53 = vrot.slane %v2570_v47, 4  ;;  %v2577_v2 = vsel %vm2275_vm5, %v1117_v52, -inf }
 0x186   : > { %v4824_v31 = vunpack.c.l.b16 %v5561_v60  ;;  %v5620_v19 = vpack.c.bf16 %v4147_v13, %v4147_v13  ;;  %v2559_v32 = vrot.slane %v2558_v20, 2  ;;  %v2565_v6 = vmax.f32 %v2563_v57, %v2564_v61 }
 0x187   : > { %v4938_v10 = vsel %vm4882_vm11, %v4823_v62, %v4937_v1  ;;  %v2572_v28 = vmax.f32 %v2570_v47, %v2571_v53  ;;  %v2578_v11 = vrot.slane %v2577_v2, 4  ;;  %v1645_v22 = vcombine.high %v845_v38, %v845_v38 }
 0x188   : > { %v4939_v12 = vsel %vm4884_vm12, %v4824_v31, %v4938_v10  ;;  %v5105_v49 = vsel %vm6121_vm14, %v5620_v19, %v5454_v17  ;;  %v2560_v4 = vmax.f32 %v2558_v20, %v2559_v32  ;;  %v2566_v54 = vrot.slane %v2565_v6, 2 }
 0x189   : > { %v4994_v0 = vpack.c.b16 %v4939_v12, %v4939_v12  ;;  %5455 = vst [vmem:[%s5896_s23 + $0x54] sm:$0x1] %v5105_v49  ;;  %v2573_v18 = vrot.slane %v2572_v28, 2  ;;  %v2579_v21 = vmax.f32 %v2577_v2, %v2578_v11  ;;  %v1652_v7 = vrot.slane %v845_v38, %v5976_v46  ;;  %v708_v38 = vpop.f32.mrf.mxu1 }
 0x18a   : > { %v2561_v27 = vrot.slane %v2560_v4, 1  ;;  %v2567_v30 = vmax.f32 %v2565_v6, %v2566_v54  ;;  %v1659_v37 = vrot.slane %v1645_v22, %v5976_v46  ;;  %v581_v51 = vadd.f32 %v6240_v59, %v580_v58 }
 0x18b   : > { %v5102_v33 = vsel %vm6140_vm15, %v4994_v0, %v5452_v56  ;;  %v2574_v35 = vmax.f32 %v2572_v28, %v2573_v18  ;;  %v2580_v8 = vrot.slane %v2579_v21, 2  ;;  %v1660_v5 = vcombine.high %v1652_v7, %v1652_v7 }
 0x18c   : > { %5453 = vst [vmem:[%s5896_s23 + $0x50] sm:$0xf] %v5102_v33  ;;  %v6322_v36 = vmax.f32 %v2560_v4, %v2561_v27  ;;  %v2568_v39 = vrot.slane %v2567_v30, 1  ;;  %v1661_v23 = vcombine.high %v1659_v37, %v1659_v37  ;;  %v3452_v34 = vsel %vm2275_vm5, %v1652_v7, -inf }
 0x18d   : > { %v2575_v9 = vrot.slane %v2574_v35, 1  ;;  %v2581_v41 = vmax.f32 %v2579_v21, %v2580_v8  ;;  %v3453_v42 = vrot.slane %v3452_v34, 4  ;;  %v3459_v16 = vsel %vm2275_vm5, %v1660_v5, -inf }
 0x18e   : > { %v6326_v44 = vmax.f32 %v2567_v30, %v2568_v39  ;;  %v3460_v45 = vrot.slane %v3459_v16, 4  ;;  %v3466_v48 = vsel %vm2275_vm5, %v1659_v37, -inf  ;;  %v3473_v43 = vsel %vm2275_vm5, %v1661_v23, -inf }
 0x18f   : > { %v6330_v25 = vmax.f32 %v2574_v35, %v2575_v9  ;;  %v2582_v50 = vrot.slane %v2581_v41, 1  ;;  %v3454_v26 = vmax.f32 %v3452_v34, %v3453_v42  ;;  %v3467_v55 = vrot.slane %v3466_v48, 4 }
 0x190   : > { %v3461_v24 = vmax.f32 %v3459_v16, %v3460_v45  ;;  %v3474_v52 = vrot.slane %v3473_v43, 4  ;;  %v811_v40 = vmax.f32 %v581_v51, 0.0  ;;  %v709_v15 = vadd.f32 %v6240_v59, %v708_v38 }
 0x191   : > { %v6333_v63 = vmax.f32 %v2581_v41, %v2582_v50  ;;  %v3455_v57 = vrot.slane %v3454_v26, 2  ;;  %v3468_v47 = vmax.f32 %v3466_v48, %v3467_v55  ;;  %v592_v13 = vadd.f32 %v6240_v59, %v5673_v29 }
 0x192   : > { %v3462_v60 = vrot.slane %v3461_v24, 2  ;;  %v3475_v20 = vmax.f32 %v3473_v43, %v3474_v52  ;;  %v1067_v61 = vcombine.high %v811_v40, %v811_v40  ;;  %v1074_v62 = vrot.slane %v811_v40, %v5976_v46 }
 0x193   : > { %v3456_v1 = vmax.f32 %v3454_v26, %v3455_v57  ;;  %v3469_v17 = vrot.slane %v3468_v47, 2  ;;  %v843_v53 = vmax.f32 %v709_v15, 0.0  ;;  %v6337_v2 = vmax.f32 %v592_v13, 0.0 }
 0x194   : > { %v3463_v31 = vmax.f32 %v3461_v24, %v3462_v60  ;;  %v3476_v19 = vrot.slane %v3475_v20, 2  ;;  %v1081_v32 = vrot.slane %v1067_v61, %v5976_v46  ;;  %v1082_v6 = vcombine.high %v1074_v62, %v1074_v62 }
 0x195   : > { %v3457_v10 = vrot.slane %v3456_v1, 1  ;;  %v3470_v28 = vmax.f32 %v3468_v47, %v3469_v17  ;;  %v2500_v11 = vsel %vm2275_vm5, %v1074_v62, -inf  ;;  %v1611_v22 = vcombine.high %v843_v53, %v843_v53 }
 0x196   : > { %v3464_v58 = vrot.slane %v3463_v31, 1  ;;  %v3477_v12 = vmax.f32 %v3475_v20, %v3476_v19  ;;  %v1083_v56 = vcombine.high %v1081_v32, %v1081_v32  ;;  %v2501_v49 = vrot.slane %v2500_v11, 4 }
 0x197   : > { %v6341_v4 = vmax.f32 %v3456_v1, %v3457_v10  ;;  %v3471_v54 = vrot.slane %v3470_v28, 1  ;;  %v2507_v0 = vsel %vm2275_vm5, %v1082_v6, -inf  ;;  %v2514_v18 = vsel %vm2275_vm5, %v1081_v32, -inf }
 0x198   : > { %v6345_v21 = vmax.f32 %v3463_v31, %v3464_v58  ;;  %v3478_v7 = vrot.slane %v3477_v12, 1  ;;  %v2502_v27 = vmax.f32 %v2500_v11, %v2501_v49  ;;  %v2508_v30 = vrot.slane %v2507_v0, 4 }
 0x199   : > { %v6347_v37 = vmax.f32 %v3470_v28, %v3471_v54  ;;  %v2515_v51 = vrot.slane %v2514_v18, 4  ;;  %v2521_v33 = vsel %vm2275_vm5, %v1083_v56, -inf  ;;  %v1618_v35 = vrot.slane %v843_v53, %v5976_v46 }
 0x19a   : > { %v6351_v8 = vmax.f32 %v3477_v12, %v3478_v7  ;;  %v2503_v5 = vrot.slane %v2502_v27, 2  ;;  %v2509_v39 = vmax.f32 %v2507_v0, %v2508_v30  ;;  %v2522_v23 = vrot.slane %v2521_v33, 4 }
 0x19b   : > { %v2516_v34 = vmax.f32 %v2514_v18, %v2515_v51  ;;  %v1625_v9 = vrot.slane %v1611_v22, %v5976_v46  ;;  %v1626_v41 = vcombine.high %v1618_v35, %v1618_v35  ;;  %v3396_v42 = vsel %vm2275_vm5, %v1618_v35, -inf }
 0x19c   : > { %v2504_v16 = vmax.f32 %v2502_v27, %v2503_v5  ;;  %v2510_v38 = vrot.slane %v2509_v39, 2  ;;  %v2523_v45 = vmax.f32 %v2521_v33, %v2522_v23  ;;  %v3397_v48 = vrot.slane %v3396_v42, 4 }
 0x19d   : > { %v2517_v43 = vrot.slane %v2516_v34, 2  ;;  %v1627_v29 = vcombine.high %v1625_v9, %v1625_v9  ;;  %v3403_v50 = vsel %vm2275_vm5, %v1626_v41, -inf  ;;  %v3410_v26 = vsel %vm2275_vm5, %v1625_v9, -inf }
 0x19e   : > { %v2505_v55 = vrot.slane %v2504_v16, 1  ;;  %v2511_v24 = vmax.f32 %v2509_v39, %v2510_v38  ;;  %v2524_v52 = vrot.slane %v2523_v45, 2  ;;  %v3398_v40 = vmax.f32 %v3396_v42, %v3397_v48 }
 0x19f   : > { %v2518_v15 = vmax.f32 %v2516_v34, %v2517_v43  ;;  %v3404_v57 = vrot.slane %v3403_v50, 4  ;;  %v3411_v47 = vrot.slane %v3410_v26, 4  ;;  %v3417_v13 = vsel %vm2275_vm5, %v1627_v29, -inf }
 0x1a0   : > { %v2506_v60 = vmax.f32 %v2504_v16, %v2505_v55  ;;  %v2512_v20 = vrot.slane %v2511_v24, 1  ;;  %v2525_v61 = vmax.f32 %v2523_v45, %v2524_v52  ;;  %v3399_v62 = vrot.slane %v3398_v40, 2  ;;  %v5705_v55 = vpop.f32.mrf.mxu1 }
 0x1a1   : > { %v2519_v1 = vrot.slane %v2518_v15, 1  ;;  %v3405_v17 = vmax.f32 %v3403_v50, %v3404_v57  ;;  %v3412_v53 = vmax.f32 %v3410_v26, %v3411_v47  ;;  %v3418_v31 = vrot.slane %v3417_v13, 4 }
 0x1a2   : > { %v2513_v19 = vmax.f32 %v2511_v24, %v2512_v20  ;;  %v2526_v32 = vrot.slane %v2525_v61, 1  ;;  %v4084_v6 = vmax.f32 %v2506_v60, %v6322_v36  ;;  %v3400_v10 = vmax.f32 %v3398_v40, %v3399_v62 }
 0x1a3   : > { %v2520_v28 = vmax.f32 %v2518_v15, %v2519_v1  ;;  %v3406_v11 = vrot.slane %v3405_v17, 2  ;;  %v3413_v22 = vrot.slane %v3412_v53, 2  ;;  %v3419_v58 = vmax.f32 %v3417_v13, %v3418_v31 }
 0x1a4   : > { %v2527_v12 = vmax.f32 %v2525_v61, %v2526_v32  ;;  %v4085_v56 = vmax.f32 %v2513_v19, %v6326_v44  ;;  %v5499_v49 = vpack.c.bf16 %v4084_v6, %v4084_v6  ;;  %v3401_v54 = vrot.slane %v3400_v10, 1 }
 0x1a5   : > { %v4086_v0 = vmax.f32 %v2520_v28, %v6330_v25  ;;  %v3407_v18 = vmax.f32 %v3405_v17, %v3406_v11  ;;  %v3414_v7 = vmax.f32 %v3412_v53, %v3413_v22  ;;  %v3420_v27 = vrot.slane %v3419_v58, 2 }
 0x1a6   : > { %v4087_v30 = vmax.f32 %v2527_v12, %v6333_v63  ;;  %v5500_v51 = vpack.c.bf16 %v4085_v56, %v4085_v56  ;;  %v4762_v33 = vunpack.c.l.b16 %v5499_v49  ;;  %v3402_v36 = vmax.f32 %v3400_v10, %v3401_v54 }
 0x1a7   : > { %v5501_v35 = vpack.c.bf16 %v4086_v0, %v4086_v0  ;;  %v3408_v5 = vrot.slane %v3407_v18, 1  ;;  %v3415_v39 = vrot.slane %v3414_v7, 1  ;;  %v3421_v23 = vmax.f32 %v3419_v58, %v3420_v27 }
 0x1a8   : > { %v5502_v34 = vpack.c.bf16 %v4087_v30, %v4087_v30  ;;  %v4763_v9 = vunpack.c.l.b16 %v5500_v51  ;;  %v4148_v44 = vmax.f32 %v3402_v36, %v6341_v4  ;;  %v1118_v41 = vcombine.high %v6337_v2, %v6337_v2 }
 0x1a9   : > { %v4764_v25 = vunpack.c.l.b16 %v5501_v35  ;;  %v3409_v42 = vmax.f32 %v3407_v18, %v3408_v5  ;;  %v3416_v16 = vmax.f32 %v3414_v7, %v3415_v39  ;;  %v3422_v38 = vrot.slane %v3421_v23, 1 }
 0x1aa   : > { %v4765_v45 = vunpack.c.l.b16 %v5502_v34  ;;  %v4892_v63 = vsel %vm4874_vm6, %v4763_v9, %v4762_v33  ;;  %v5563_v48 = vpack.c.bf16 %v4148_v44, %v4148_v44  ;;  %v1125_v43 = vrot.slane %v6337_v2, %v5976_v46 }
 0x1ab   : > { %v4893_v29 = vsel %vm4876_vm7, %v4764_v25, %v4892_v63  ;;  %v3423_v50 = vmax.f32 %v3421_v23, %v3422_v38  ;;  %v4149_v26 = vmax.f32 %v3409_v42, %v6345_v21  ;;  %v4150_v4 = vmax.f32 %v3416_v16, %v6347_v37 }
 0x1ac   : > { %v4826_v24 = vunpack.c.l.b16 %v5563_v48  ;;  %v1132_v52 = vrot.slane %v1118_v41, %v5976_v46  ;;  %v1133_v40 = vcombine.high %v1125_v43, %v1125_v43  ;;  %v2584_v15 = vsel %vm2275_vm5, %v1125_v43, -inf }
 0x1ad   : > { %v4151_v57 = vmax.f32 %v3423_v50, %v6351_v8  ;;  %v5564_v47 = vpack.c.bf16 %v4149_v26, %v4149_v26  ;;  %v5565_v13 = vpack.c.bf16 %v4150_v4, %v4150_v4  ;;  %v2585_v60 = vrot.slane %v2584_v15, 4  ;;  %v583_v8 = vpop.f32.mrf.mxu0  ;;  %v711_v26 = vpop.f32.mrf.mxu1 }
 0x1ae   : > { %v1134_v2 = vcombine.high %v1132_v52, %v1132_v52  ;;  %v2591_v20 = vsel %vm2275_vm5, %v1133_v40, -inf  ;;  %v2598_v61 = vsel %vm2275_vm5, %v1132_v52, -inf  ;;  %v720_v21 = vadd.f32 %v6240_v59, %v5705_v55 }
 0x1af   : > { %v5566_v37 = vpack.c.bf16 %v4151_v57, %v4151_v57  ;;  %v4827_v62 = vunpack.c.l.b16 %v5564_v47  ;;  %v4828_v1 = vunpack.c.l.b16 %v5565_v13  ;;  %v2586_v17 = vmax.f32 %v2584_v15, %v2585_v60 }
 0x1b0   : > { %v2592_v53 = vrot.slane %v2591_v20, 4  ;;  %v2599_v31 = vrot.slane %v2598_v61, 4  ;;  %v2605_v19 = vsel %vm2275_vm5, %v1134_v2, -inf  ;;  %v846_v32 = vmax.f32 %v720_v21, 0.0 }
 0x1b1   : > { %v4829_v6 = vunpack.c.l.b16 %v5566_v37  ;;  %v4940_v10 = vsel %vm4874_vm6, %v4827_v62, %v4826_v24  ;;  %v2587_v28 = vrot.slane %v2586_v17, 2  ;;  %v2606_v11 = vrot.slane %v2605_v19, 4 }
 0x1b2   : > { %v4941_v22 = vsel %vm4876_vm7, %v4828_v1, %v4940_v10  ;;  %v2593_v58 = vmax.f32 %v2591_v20, %v2592_v53  ;;  %v2600_v12 = vmax.f32 %v2598_v61, %v2599_v31  ;;  %v1662_v56 = vcombine.high %v846_v32, %v846_v32 }
 0x1b3   : > { %v2588_v49 = vmax.f32 %v2586_v17, %v2587_v28  ;;  %v2607_v54 = vmax.f32 %v2605_v19, %v2606_v11  ;;  %v1669_v0 = vrot.slane %v846_v32, %v5976_v46  ;;  %v584_v18 = vadd.f32 %v6240_v59, %v583_v8 }
 0x1b4   : > { %v2594_v7 = vrot.slane %v2593_v58, 2  ;;  %v2601_v27 = vrot.slane %v2600_v12, 2  ;;  %v1676_v30 = vrot.slane %v1662_v56, %v5976_v46  ;;  %v6384_v51 = vsel %vm4878_vm8, %v4765_v45, %v4893_v29 }
 0x1b5   : > { %v2589_v33 = vrot.slane %v2588_v49, 1  ;;  %v2608_v36 = vrot.slane %v2607_v54, 2  ;;  %v1677_v35 = vcombine.high %v1669_v0, %v1669_v0  ;;  %v3480_v5 = vsel %vm2275_vm5, %v1669_v0, -inf }
 0x1b6   : > { %v2595_v39 = vmax.f32 %v2593_v58, %v2594_v7  ;;  %v2602_v23 = vmax.f32 %v2600_v12, %v2601_v27  ;;  %v1678_v34 = vcombine.high %v1676_v30, %v1676_v30  ;;  %v3481_v9 = vrot.slane %v3480_v5, 4  ;;  %v5676_v27 = vpop.f32.mrf.mxu0 }
 0x1b7   : > { %v6387_v44 = vmax.f32 %v2588_v49, %v2589_v33  ;;  %v2609_v41 = vmax.f32 %v2607_v54, %v2608_v36  ;;  %v3487_v25 = vsel %vm2275_vm5, %v1677_v35, -inf  ;;  %v3494_v42 = vsel %vm2275_vm5, %v1676_v30, -inf }
 0x1b8   : > { %v2596_v16 = vrot.slane %v2595_v39, 1  ;;  %v2603_v38 = vrot.slane %v2602_v23, 1  ;;  %v3482_v45 = vmax.f32 %v3480_v5, %v3481_v9  ;;  %v3488_v63 = vrot.slane %v3487_v25, 4 }
 0x1b9   : > { %v2610_v48 = vrot.slane %v2609_v41, 1  ;;  %v3495_v43 = vrot.slane %v3494_v42, 4  ;;  %v3501_v29 = vsel %vm2275_vm5, %v1678_v34, -inf  ;;  %v812_v50 = vmax.f32 %v584_v18, 0.0 }
 0x1ba   : > { %v6392_v4 = vmax.f32 %v2595_v39, %v2596_v16  ;;  %v6394_v55 = vmax.f32 %v2602_v23, %v2603_v38  ;;  %v3483_v24 = vrot.slane %v3482_v45, 2  ;;  %v3489_v52 = vmax.f32 %v3487_v25, %v3488_v63 }
 0x1bb   : > { %v6396_v40 = vmax.f32 %v2609_v41, %v2610_v48  ;;  %v3496_v15 = vmax.f32 %v3494_v42, %v3495_v43  ;;  %v3502_v57 = vrot.slane %v3501_v29, 4  ;;  %v1084_v47 = vcombine.high %v812_v50, %v812_v50 }
 0x1bc   : > { %v3484_v13 = vmax.f32 %v3482_v45, %v3483_v24  ;;  %v3490_v60 = vrot.slane %v3489_v52, 2  ;;  %v1091_v2 = vrot.slane %v812_v50, %v5976_v46  ;;  %v712_v20 = vadd.f32 %v6240_v59, %v711_v26 }
 0x1bd   : > { %v3497_v61 = vrot.slane %v3496_v15, 2  ;;  %v3503_v21 = vmax.f32 %v3501_v29, %v3502_v57  ;;  %v1098_v37 = vrot.slane %v1084_v47, %v5976_v46  ;;  %v6402_v62 = vsel %vm4878_vm8, %v4829_v6, %v4941_v22 }
 0x1be   : > { %v3485_v1 = vrot.slane %v3484_v13, 1  ;;  %v3491_v17 = vmax.f32 %v3489_v52, %v3490_v60  ;;  %v1099_v53 = vcombine.high %v1091_v2, %v1091_v2  ;;  %v2528_v31 = vsel %vm2275_vm5, %v1091_v2, -inf }
 0x1bf   : > { %v3498_v19 = vmax.f32 %v3496_v15, %v3497_v61  ;;  %v3504_v32 = vrot.slane %v3503_v21, 2  ;;  %v1100_v8 = vcombine.high %v1098_v37, %v1098_v37  ;;  %v2529_v10 = vrot.slane %v2528_v31, 4 }
 0x1c0   : > { %v6405_v28 = vmax.f32 %v3484_v13, %v3485_v1  ;;  %v3492_v11 = vrot.slane %v3491_v17, 1  ;;  %v2535_v58 = vsel %vm2275_vm5, %v1099_v53, -inf  ;;  %v2542_v12 = vsel %vm2275_vm5, %v1098_v37, -inf }
 0x1c1   : > { %v3499_v56 = vrot.slane %v3498_v19, 1  ;;  %v3505_v49 = vmax.f32 %v3503_v21, %v3504_v32  ;;  %v2530_v6 = vmax.f32 %v2528_v31, %v2529_v10  ;;  %v2536_v22 = vrot.slane %v2535_v58, 4 }
 0x1c2   : > { %v6409_v54 = vmax.f32 %v3491_v17, %v3492_v11  ;;  %v2543_v0 = vrot.slane %v2542_v12, 4  ;;  %v2549_v18 = vsel %vm2275_vm5, %v1100_v8, -inf  ;;  %v844_v7 = vmax.f32 %v712_v20, 0.0 }
 0x1c3   : > { %v6412_v30 = vmax.f32 %v3498_v19, %v3499_v56  ;;  %v3506_v33 = vrot.slane %v3505_v49, 1  ;;  %v2531_v36 = vrot.slane %v2530_v6, 2  ;;  %v2537_v35 = vmax.f32 %v2535_v58, %v2536_v22 }
 0x1c4   : > { %v2544_v5 = vmax.f32 %v2542_v12, %v2543_v0  ;;  %v2550_v39 = vrot.slane %v2549_v18, 4  ;;  %v1628_v23 = vcombine.high %v844_v7, %v844_v7  ;;  %v1635_v34 = vrot.slane %v844_v7, %v5976_v46 }
 0x1c5   : > { %v6415_v9 = vmax.f32 %v3505_v49, %v3506_v33  ;;  %v2532_v41 = vmax.f32 %v2530_v6, %v2531_v36  ;;  %v2538_v25 = vrot.slane %v2537_v35, 2  ;;  %v605_v42 = vadd.f32 %v6240_v59, %v5676_v27 }
 0x1c6   : > { %v2545_v16 = vrot.slane %v2544_v5, 2  ;;  %v2551_v38 = vmax.f32 %v2549_v18, %v2550_v39  ;;  %v1642_v45 = vrot.slane %v1628_v23, %v5976_v46  ;;  %v1643_v63 = vcombine.high %v1635_v34, %v1635_v34  ;;  %v5426_v39 = vld [vmem:[%s5896_s23 + $0x1c] sm:$0x1] }
 0x1c7   : > { %v2533_v48 = vrot.slane %v2532_v41, 1  ;;  %v2539_v43 = vmax.f32 %v2537_v35, %v2538_v25  ;;  %v3424_v29 = vsel %vm2275_vm5, %v1635_v34, -inf  ;;  %v6420_v50 = vmax.f32 %v605_v42, 0.0 }
 0x1c8   : > { %v2546_v26 = vmax.f32 %v2544_v5, %v2545_v16  ;;  %v2552_v24 = vrot.slane %v2551_v38, 2  ;;  %v1644_v52 = vcombine.high %v1642_v45, %v1642_v45  ;;  %v3425_v15 = vrot.slane %v3424_v29, 4 }
 0x1c9   : > { %v2534_v57 = vmax.f32 %v2532_v41, %v2533_v48  ;;  %v2540_v47 = vrot.slane %v2539_v43, 1  ;;  %v3431_v13 = vsel %vm2275_vm5, %v1643_v63, -inf  ;;  %v3438_v60 = vsel %vm2275_vm5, %v1642_v45, -inf  ;;  %v5708_v63 = vpop.f32.mrf.mxu1 }
 0x1ca   : > { %v2547_v2 = vrot.slane %v2546_v26, 1  ;;  %v2553_v20 = vmax.f32 %v2551_v38, %v2552_v24  ;;  %v3426_v61 = vmax.f32 %v3424_v29, %v3425_v15  ;;  %v3432_v21 = vrot.slane %v3431_v13, 4 }
 0x1cb   : > { %v2541_v37 = vmax.f32 %v2539_v43, %v2540_v47  ;;  %v4088_v1 = vmax.f32 %v2534_v57, %v6387_v44  ;;  %v3439_v17 = vrot.slane %v3438_v60, 4  ;;  %v3445_v53 = vsel %vm2275_vm5, %v1644_v52, -inf  ;;  %v5424_v43 = vld [vmem:[%s5896_s23 + $0x18] sm:$0xf] }
 0x1cc   : > { %v2548_v31 = vmax.f32 %v2546_v26, %v2547_v2  ;;  %v2554_v19 = vrot.slane %v2553_v20, 1  ;;  %v3427_v32 = vrot.slane %v3426_v61, 2  ;;  %v3433_v8 = vmax.f32 %v3431_v13, %v3432_v21 }
 0x1cd   : > { %v4089_v10 = vmax.f32 %v2541_v37, %v6392_v4  ;;  %v5503_v11 = vpack.c.bf16 %v4088_v1, %v4088_v1  ;;  %v3440_v58 = vmax.f32 %v3438_v60, %v3439_v17  ;;  %v3446_v12 = vrot.slane %v3445_v53, 4 }
 0x1ce   : > { %v2555_v56 = vmax.f32 %v2553_v20, %v2554_v19  ;;  %v4090_v49 = vmax.f32 %v2548_v31, %v6394_v55  ;;  %v3428_v6 = vmax.f32 %v3426_v61, %v3427_v32  ;;  %v3434_v22 = vrot.slane %v3433_v8, 2 }
 0x1cf   : > { %v5504_v0 = vpack.c.bf16 %v4089_v10, %v4089_v10  ;;  %v4766_v44 = vunpack.c.l.b16 %v5503_v11  ;;  %v3441_v18 = vrot.slane %v3440_v58, 2  ;;  %v3447_v7 = vmax.f32 %v3445_v53, %v3446_v12 }
 0x1d0   : > { %v4091_v27 = vmax.f32 %v2555_v56, %v6396_v40  ;;  %v5505_v33 = vpack.c.bf16 %v4090_v49, %v4090_v49  ;;  %v3429_v36 = vrot.slane %v3428_v6, 1  ;;  %v3435_v35 = vmax.f32 %v3433_v8, %v3434_v22  ;;  %v5458_v8 = vld [vmem:[%s5896_s23 + $0x5c] sm:$0x1] }
 0x1d1   : > { %v4767_v4 = vunpack.c.l.b16 %v5504_v0  ;;  %v4895_v5 = vsel %vm4880_vm10, %v4766_v44, %v6384_v51  ;;  %v3442_v23 = vmax.f32 %v3440_v58, %v3441_v18  ;;  %v3448_v34 = vrot.slane %v3447_v7, 2  ;;  %v596_v0 = vpop.f32.mrf.mxu0  ;;  %v5456_v18 = vld [vmem:[%s5896_s23 + $0x58] sm:$0xf] }
 0x1d2   : > { %v4768_v55 = vunpack.c.l.b16 %v5505_v33  ;;  %v5613_v41 = vpack.c.bf16 %v4091_v27, %v4091_v27  ;;  %v3430_v25 = vmax.f32 %v3428_v6, %v3429_v36  ;;  %v3436_v42 = vrot.slane %v3435_v35, 1 }
 0x1d3   : > { %v4896_v16 = vsel %vm4882_vm11, %v4767_v4, %v4895_v5  ;;  %v3443_v38 = vrot.slane %v3442_v23, 1  ;;  %v3449_v40 = vmax.f32 %v3447_v7, %v3448_v34  ;;  %v1169_v45 = vcombine.high %v6420_v50, %v6420_v50  ;;  %v6468_v34 = vld [vmem:[%s7183_s2] ss:$0 sm:$0xff] }
 0x1d4   : > { %v4897_v48 = vsel %vm4884_vm12, %v4768_v55, %v4896_v16  ;;  %v5063_v51 = vsel %vm6121_vm14, %v5613_v41, %v5426_v39  ;;  %v3437_v29 = vmax.f32 %v3435_v35, %v3436_v42  ;;  %v4152_v26 = vmax.f32 %v3430_v25, %v6405_v28 }
 0x1d5   : > { %v4980_v24 = vpack.c.b16 %v4897_v48, %v4897_v48  ;;  %5427 = vst [vmem:[%s5896_s23 + $0x1c] sm:$0x1] %v5063_v51  ;;  %v3444_v52 = vmax.f32 %v3442_v23, %v3443_v38  ;;  %v3450_v15 = vrot.slane %v3449_v40, 1  ;;  %v1176_v57 = vrot.slane %v6420_v50, %v5976_v46 }
 0x1d6   : > { %v4153_v47 = vmax.f32 %v3437_v29, %v6409_v54  ;;  %v5567_v13 = vpack.c.bf16 %v4152_v26, %v4152_v26  ;;  %v1183_v60 = vrot.slane %v1169_v45, %v5976_v46  ;;  %v733_v2 = vadd.f32 %v6240_v59, %v5708_v63 }
 0x1d7   : > { %v5060_v20 = vsel %vm6140_vm15, %v4980_v24, %v5424_v43  ;;  %v3451_v61 = vmax.f32 %v3449_v40, %v3450_v15  ;;  %v4154_v28 = vmax.f32 %v3444_v52, %v6412_v30  ;;  %v1184_v21 = vcombine.high %v1176_v57, %v1176_v57 }
 0x1d8   : > { %5425 = vst [vmem:[%s5896_s23 + $0x18] sm:$0xf] %v5060_v20  ;;  %v5568_v37 = vpack.c.bf16 %v4153_v47, %v4153_v47  ;;  %v4830_v1 = vunpack.c.l.b16 %v5567_v13  ;;  %v1185_v17 = vcombine.high %v1183_v60, %v1183_v60  ;;  %v2668_v50 = vsel %vm2275_vm5, %v1176_v57, -inf }
 0x1d9   : > { %v4155_v54 = vmax.f32 %v3451_v61, %v6415_v9  ;;  %v5569_v53 = vpack.c.bf16 %v4154_v28, %v4154_v28  ;;  %v2669_v31 = vrot.slane %v2668_v50, 4  ;;  %v2675_v59 = vsel %vm2275_vm5, %v1184_v21, -inf }
 0x1da   : > { %v4831_v19 = vunpack.c.l.b16 %v5568_v37  ;;  %v4943_v32 = vsel %vm4880_vm10, %v4830_v1, %v6402_v62  ;;  %v2676_v30 = vrot.slane %v2675_v59, 4  ;;  %v2682_v10 = vsel %vm2275_vm5, %v1183_v60, -inf }
 0x1db   : > { %v4832_v11 = vunpack.c.l.b16 %v5569_v53  ;;  %v5621_v58 = vpack.c.bf16 %v4155_v54, %v4155_v54  ;;  %v2670_v12 = vmax.f32 %v2668_v50, %v2669_v31  ;;  %v2683_v56 = vrot.slane %v2682_v10, 4 }
 0x1dc   : > { %v4944_v9 = vsel %vm4882_vm11, %v4831_v19, %v4943_v32  ;;  %v2677_v49 = vmax.f32 %v2675_v59, %v2676_v30  ;;  %v2689_v6 = vsel %vm2275_vm5, %v1185_v17, -inf  ;;  %v849_v22 = vmax.f32 %v733_v2, 0.0  ;;  %v724_v2 = vpop.f32.mrf.mxu1 }
 0x1dd   : > { %v4945_v44 = vsel %vm4884_vm12, %v4832_v11, %v4944_v9  ;;  %v5111_v62 = vsel %vm6121_vm14, %v5621_v58, %v5458_v8  ;;  %v2671_v7 = vrot.slane %v2670_v12, 2  ;;  %v2684_v27 = vmax.f32 %v2682_v10, %v2683_v56 }
 0x1de   : > { %v4996_v33 = vpack.c.b16 %v4945_v44, %v4945_v44  ;;  %5459 = vst [vmem:[%s5896_s23 + $0x5c] sm:$0x1] %v5111_v62  ;;  %v2678_v36 = vrot.slane %v2677_v49, 2  ;;  %v2690_v35 = vrot.slane %v2689_v6, 4  ;;  %v1713_v4 = vcombine.high %v849_v22, %v849_v22 }
 0x1df   : > { %v2672_v5 = vmax.f32 %v2670_v12, %v2671_v7  ;;  %v2685_v39 = vrot.slane %v2684_v27, 2  ;;  %v1720_v23 = vrot.slane %v849_v22, %v5976_v46  ;;  %v597_v55 = vadd.f32 %v6468_v34, %v596_v0 }
 0x1e0   : > { %v5108_v41 = vsel %vm6140_vm15, %v4996_v33, %v5456_v18  ;;  %v2679_v25 = vmax.f32 %v2677_v49, %v2678_v36  ;;  %v2691_v42 = vmax.f32 %v2689_v6, %v2690_v35  ;;  %v1727_v16 = vrot.slane %v1713_v4, %v5976_v46 }
 0x1e1   : > { %5457 = vst [vmem:[%s5896_s23 + $0x58] sm:$0xf] %v5108_v41  ;;  %v2673_v38 = vrot.slane %v2672_v5, 1  ;;  %v2686_v40 = vmax.f32 %v2684_v27, %v2685_v39  ;;  %v1728_v45 = vcombine.high %v1720_v23, %v1720_v23  ;;  %v3564_v63 = vsel %vm2275_vm5, %v1720_v23, -inf  ;;  %v5677_v39 = vpop.f32.mrf.mxu0 }
 0x1e2   : > { %v2680_v48 = vrot.slane %v2679_v25, 1  ;;  %v2692_v43 = vrot.slane %v2691_v42, 2  ;;  %v1729_v51 = vcombine.high %v1727_v16, %v1727_v16  ;;  %v3565_v29 = vrot.slane %v3564_v63, 4 }
 0x1e3   : > { %v6476_v26 = vmax.f32 %v2672_v5, %v2673_v38  ;;  %v2687_v24 = vrot.slane %v2686_v40, 1  ;;  %v3571_v52 = vsel %vm2275_vm5, %v1728_v45, -inf  ;;  %v3578_v15 = vsel %vm2275_vm5, %v1727_v16, -inf  ;;  %v5709_v45 = vpop.f32.mrf.mxu1 }
 0x1e4   : > { %v6480_v57 = vmax.f32 %v2679_v25, %v2680_v48  ;;  %v2693_v47 = vmax.f32 %v2691_v42, %v2692_v43  ;;  %v3566_v13 = vmax.f32 %v3564_v63, %v3565_v29  ;;  %v3572_v60 = vrot.slane %v3571_v52, 4 }
 0x1e5   : > { %v6482_v20 = vmax.f32 %v2686_v40, %v2687_v24  ;;  %v3579_v61 = vrot.slane %v3578_v15, 4  ;;  %v3585_v28 = vsel %vm2275_vm5, %v1729_v51, -inf  ;;  %v815_v21 = vmax.f32 %v597_v55, 0.0 }
 0x1e6   : > { %v2694_v37 = vrot.slane %v2693_v47, 1  ;;  %v3567_v1 = vrot.slane %v3566_v13, 2  ;;  %v3573_v17 = vmax.f32 %v3571_v52, %v3572_v60  ;;  %v3586_v50 = vrot.slane %v3585_v28, 4 }
 0x1e7   : > { %v3580_v54 = vmax.f32 %v3578_v15, %v3579_v61  ;;  %v1135_v53 = vcombine.high %v815_v21, %v815_v21  ;;  %v1142_v31 = vrot.slane %v815_v21, %v5976_v46  ;;  %v725_v59 = vadd.f32 %v6468_v34, %v724_v2 }
 0x1e8   : > { %v6487_v19 = vmax.f32 %v2693_v47, %v2694_v37  ;;  %v3568_v32 = vmax.f32 %v3566_v13, %v3567_v1  ;;  %v3574_v8 = vrot.slane %v3573_v17, 2  ;;  %v3587_v30 = vmax.f32 %v3585_v28, %v3586_v50 }
 0x1e9   : > { %v3581_v10 = vrot.slane %v3580_v54, 2  ;;  %v1149_v11 = vrot.slane %v1135_v53, %v5976_v46  ;;  %v1150_v58 = vcombine.high %v1142_v31, %v1142_v31  ;;  %v2612_v12 = vsel %vm2275_vm5, %v1142_v31, -inf }
 0x1ea   : > { %v3569_v56 = vrot.slane %v3568_v32, 1  ;;  %v3575_v9 = vmax.f32 %v3573_v17, %v3574_v8  ;;  %v3588_v49 = vrot.slane %v3587_v30, 2  ;;  %v2613_v6 = vrot.slane %v2612_v12, 4 }
 0x1eb   : > { %v3582_v22 = vmax.f32 %v3580_v54, %v3581_v10  ;;  %v1151_v0 = vcombine.high %v1149_v11, %v1149_v11  ;;  %v2619_v44 = vsel %vm2275_vm5, %v1150_v58, -inf  ;;  %v2626_v18 = vsel %vm2275_vm5, %v1149_v11, -inf }
 0x1ec   : > { %v6493_v62 = vmax.f32 %v3568_v32, %v3569_v56  ;;  %v3576_v7 = vrot.slane %v3575_v9, 1  ;;  %v3589_v27 = vmax.f32 %v3587_v30, %v3588_v49  ;;  %v2614_v33 = vmax.f32 %v2612_v12, %v2613_v6 }
 0x1ed   : > { %v3583_v36 = vrot.slane %v3582_v22, 1  ;;  %v2620_v35 = vrot.slane %v2619_v44, 4  ;;  %v2627_v4 = vrot.slane %v2626_v18, 4  ;;  %v2633_v5 = vsel %vm2275_vm5, %v1151_v0, -inf }
 0x1ee   : > { %v6496_v23 = vmax.f32 %v3575_v9, %v3576_v7  ;;  %v3590_v55 = vrot.slane %v3589_v27, 1  ;;  %v2615_v41 = vrot.slane %v2614_v33, 2  ;;  %v2634_v25 = vrot.slane %v2633_v5, 4 }
 0x1ef   : > { %v6498_v42 = vmax.f32 %v3582_v22, %v3583_v36  ;;  %v2621_v16 = vmax.f32 %v2619_v44, %v2620_v35  ;;  %v2628_v38 = vmax.f32 %v2626_v18, %v2627_v4  ;;  %v847_v40 = vmax.f32 %v725_v59, 0.0 }
 0x1f0   : > { %v6500_v63 = vmax.f32 %v3589_v27, %v3590_v55  ;;  %v2616_v48 = vmax.f32 %v2614_v33, %v2615_v41  ;;  %v2635_v43 = vmax.f32 %v2633_v5, %v2634_v25  ;;  %v608_v51 = vadd.f32 %v6468_v34, %v5677_v39 }
 0x1f1   : > { %v2622_v29 = vrot.slane %v2621_v16, 2  ;;  %v2629_v24 = vrot.slane %v2628_v38, 2  ;;  %v1679_v52 = vcombine.high %v847_v40, %v847_v40  ;;  %v1686_v15 = vrot.slane %v847_v40, %v5976_v46 }
 0x1f2   : > { %v2617_v47 = vrot.slane %v2616_v48, 1  ;;  %v2636_v13 = vrot.slane %v2635_v43, 2  ;;  %v818_v60 = vmax.f32 %v608_v51, 0.0  ;;  %v6505_v2 = vadd.f32 %v6468_v34, %v5709_v45 }
 0x1f3   : > { %v2623_v61 = vmax.f32 %v2621_v16, %v2622_v29  ;;  %v2630_v28 = vmax.f32 %v2628_v38, %v2629_v24  ;;  %v1693_v21 = vrot.slane %v1679_v52, %v5976_v46  ;;  %v1694_v37 = vcombine.high %v1686_v15, %v1686_v15 }
 0x1f4   : > { %v2618_v1 = vmax.f32 %v2616_v48, %v2617_v47  ;;  %v2637_v17 = vmax.f32 %v2635_v43, %v2636_v13  ;;  %v3508_v50 = vsel %vm2275_vm5, %v1686_v15, -inf  ;;  %v1186_v54 = vcombine.high %v818_v60, %v818_v60 }
 0x1f5   : > { %v2624_v53 = vrot.slane %v2623_v61, 1  ;;  %v2631_v31 = vrot.slane %v2630_v28, 1  ;;  %v1695_v59 = vcombine.high %v1693_v21, %v1693_v21  ;;  %v3509_v32 = vrot.slane %v3508_v50, 4 }
 0x1f6   : > { %v2638_v8 = vrot.slane %v2637_v17, 1  ;;  %v4092_v30 = vmax.f32 %v2618_v1, %v6476_v26  ;;  %v3515_v10 = vsel %vm2275_vm5, %v1694_v37, -inf  ;;  %v3522_v11 = vsel %vm2275_vm5, %v1693_v21, -inf }
 0x1f7   : > { %v2625_v58 = vmax.f32 %v2623_v61, %v2624_v53  ;;  %v2632_v12 = vmax.f32 %v2630_v28, %v2631_v31  ;;  %v3510_v56 = vmax.f32 %v3508_v50, %v3509_v32  ;;  %v3516_v9 = vrot.slane %v3515_v10, 4 }
 0x1f8   : > { %v2639_v49 = vmax.f32 %v2637_v17, %v2638_v8  ;;  %v5507_v6 = vpack.c.bf16 %v4092_v30, %v4092_v30  ;;  %v3523_v22 = vrot.slane %v3522_v11, 4  ;;  %v3529_v0 = vsel %vm2275_vm5, %v1695_v59, -inf }
 0x1f9   : > { %v4093_v44 = vmax.f32 %v2625_v58, %v6480_v57  ;;  %v4094_v18 = vmax.f32 %v2632_v12, %v6482_v20  ;;  %v3511_v7 = vrot.slane %v3510_v56, 2  ;;  %v3517_v27 = vmax.f32 %v3515_v10, %v3516_v9 }
 0x1fa   : > { %v4095_v26 = vmax.f32 %v2639_v49, %v6487_v19  ;;  %v4770_v33 = vunpack.c.l.b16 %v5507_v6  ;;  %v3524_v36 = vmax.f32 %v3522_v11, %v3523_v22  ;;  %v3530_v35 = vrot.slane %v3529_v0, 4 }
 0x1fb   : > { %v5508_v4 = vpack.c.bf16 %v4093_v44, %v4093_v44  ;;  %v5509_v5 = vpack.c.bf16 %v4094_v18, %v4094_v18  ;;  %v3512_v39 = vmax.f32 %v3510_v56, %v3511_v7  ;;  %v3518_v55 = vrot.slane %v3517_v27, 2 }
 0x1fc   : > { %v5510_v41 = vpack.c.bf16 %v4095_v26, %v4095_v26  ;;  %v3525_v25 = vrot.slane %v3524_v36, 2  ;;  %v3531_v16 = vmax.f32 %v3529_v0, %v3530_v35  ;;  %v1193_v38 = vrot.slane %v818_v60, %v5976_v46 }
 0x1fd   : > { %v4771_v40 = vunpack.c.l.b16 %v5508_v4  ;;  %v4772_v57 = vunpack.c.l.b16 %v5509_v5  ;;  %v3513_v45 = vrot.slane %v3512_v39, 1  ;;  %v3519_v20 = vmax.f32 %v3517_v27, %v3518_v55 }
 0x1fe   : > { %v4773_v48 = vunpack.c.l.b16 %v5510_v41  ;;  %v3526_v43 = vmax.f32 %v3524_v36, %v3525_v25  ;;  %v3532_v51 = vrot.slane %v3531_v16, 2  ;;  %v1200_v19 = vrot.slane %v1186_v54, %v5976_v46 }
 0x1ff   : > { %v4898_v29 = vsel %vm4874_vm6, %v4771_v40, %v4770_v33  ;;  %v3514_v24 = vmax.f32 %v3512_v39, %v3513_v45  ;;  %v3520_v52 = vrot.slane %v3519_v20, 1  ;;  %v1201_v15 = vcombine.high %v1193_v38, %v1193_v38  ;;  %v599_v39 = vpop.f32.mrf.mxu0 }
 0x200   : > { %v4899_v47 = vsel %vm4876_vm7, %v4772_v57, %v4898_v29  ;;  %v3527_v13 = vrot.slane %v3526_v43, 1  ;;  %v3533_v61 = vmax.f32 %v3531_v16, %v3532_v51  ;;  %v1202_v28 = vcombine.high %v1200_v19, %v1200_v19  ;;  %v727_v57 = vpop.f32.mrf.mxu1 }
 0x201   : > { %v3521_v60 = vmax.f32 %v3519_v20, %v3520_v52  ;;  %v4156_v21 = vmax.f32 %v3514_v24, %v6493_v62  ;;  %v2696_v37 = vsel %vm2275_vm5, %v1193_v38, -inf  ;;  %v2703_v1 = vsel %vm2275_vm5, %v1201_v15, -inf }
 0x202   : > { %v3528_v17 = vmax.f32 %v3526_v43, %v3527_v13  ;;  %v3534_v50 = vrot.slane %v3533_v61, 1  ;;  %v2697_v54 = vrot.slane %v2696_v37, 4  ;;  %v2704_v53 = vrot.slane %v2703_v1, 4 }
 0x203   : > { %v4157_v31 = vmax.f32 %v3521_v60, %v6496_v23  ;;  %v5571_v59 = vpack.c.bf16 %v4156_v21, %v4156_v21  ;;  %v2710_v32 = vsel %vm2275_vm5, %v1200_v19, -inf  ;;  %v2717_v8 = vsel %vm2275_vm5, %v1202_v28, -inf }
 0x204   : > { %v3535_v30 = vmax.f32 %v3533_v61, %v3534_v50  ;;  %v4158_v10 = vmax.f32 %v3528_v17, %v6498_v42  ;;  %v2698_v11 = vmax.f32 %v2696_v37, %v2697_v54  ;;  %v2705_v62 = vmax.f32 %v2703_v1, %v2704_v53 }
 0x205   : > { %v5572_v58 = vpack.c.bf16 %v4157_v31, %v4157_v31  ;;  %v4834_v12 = vunpack.c.l.b16 %v5571_v59  ;;  %v2711_v56 = vrot.slane %v2710_v32, 4  ;;  %v2718_v9 = vrot.slane %v2717_v8, 4 }
 0x206   : > { %v4159_v49 = vmax.f32 %v3535_v30, %v6500_v63  ;;  %v5573_v6 = vpack.c.bf16 %v4158_v10, %v4158_v10  ;;  %v2699_v22 = vrot.slane %v2698_v11, 2  ;;  %v2706_v0 = vrot.slane %v2705_v62, 2 }
 0x207   : > { %v4835_v23 = vunpack.c.l.b16 %v5572_v58  ;;  %v2712_v44 = vmax.f32 %v2710_v32, %v2711_v56  ;;  %v2719_v18 = vmax.f32 %v2717_v8, %v2718_v9  ;;  %v850_v7 = vmax.f32 %v6505_v2, 0.0 }
 0x208   : > { %v5574_v27 = vpack.c.bf16 %v4159_v49, %v4159_v49  ;;  %v4836_v26 = vunpack.c.l.b16 %v5573_v6  ;;  %v2700_v33 = vmax.f32 %v2698_v11, %v2699_v22  ;;  %v2707_v42 = vmax.f32 %v2705_v62, %v2706_v0 }
 0x209   : > { %v4946_v36 = vsel %vm4874_vm6, %v4835_v23, %v4834_v12  ;;  %v2713_v35 = vrot.slane %v2712_v44, 2  ;;  %v2720_v4 = vrot.slane %v2719_v18, 2  ;;  %v1730_v5 = vcombine.high %v850_v7, %v850_v7 }
 0x20a   : > { %v4837_v55 = vunpack.c.l.b16 %v5574_v27  ;;  %v4947_v63 = vsel %vm4876_vm7, %v4836_v26, %v4946_v36  ;;  %v2701_v41 = vrot.slane %v2700_v33, 1  ;;  %v2708_v25 = vrot.slane %v2707_v42, 1 }
 0x20b   : > { %v2714_v16 = vmax.f32 %v2712_v44, %v2713_v35  ;;  %v2721_v38 = vmax.f32 %v2719_v18, %v2720_v4  ;;  %v1737_v40 = vrot.slane %v850_v7, %v5976_v46  ;;  %v1744_v2 = vrot.slane %v1730_v5, %v5976_v46 }
 0x20c   : > { %v6533_v45 = vmax.f32 %v2700_v33, %v2701_v41  ;;  %v6535_v20 = vmax.f32 %v2707_v42, %v2708_v25  ;;  %v600_v43 = vadd.f32 %v6468_v34, %v599_v39  ;;  %v6539_v51 = vsel %vm4878_vm8, %v4773_v48, %v4899_v47 }
 0x20d   : > { %v2715_v19 = vrot.slane %v2714_v16, 1  ;;  %v2722_v29 = vrot.slane %v2721_v38, 1  ;;  %v1745_v24 = vcombine.high %v1737_v40, %v1737_v40  ;;  %v1746_v52 = vcombine.high %v1744_v2, %v1744_v2 }
 0x20e   : > { %v3592_v15 = vsel %vm2275_vm5, %v1737_v40, -inf  ;;  %v3606_v13 = vsel %vm2275_vm5, %v1744_v2, -inf  ;;  %v816_v61 = vmax.f32 %v600_v43, 0.0  ;;  %v728_v28 = vadd.f32 %v6468_v34, %v727_v57 }
 0x20f   : > { %v6544_v60 = vmax.f32 %v2714_v16, %v2715_v19  ;;  %v6546_v21 = vmax.f32 %v2721_v38, %v2722_v29  ;;  %v3593_v37 = vrot.slane %v3592_v15, 4  ;;  %v3599_v1 = vsel %vm2275_vm5, %v1745_v24, -inf  ;;  %v5680_v38 = vpop.f32.mrf.mxu0  ;;  %v5712_v19 = vpop.f32.mrf.mxu1 }
 0x210   : > { %v3600_v48 = vrot.slane %v3599_v1, 4  ;;  %v3607_v47 = vrot.slane %v3606_v13, 4  ;;  %v3613_v17 = vsel %vm2275_vm5, %v1746_v52, -inf  ;;  %v1152_v50 = vcombine.high %v816_v61, %v816_v61 }
 0x211   : > { %v3594_v54 = vmax.f32 %v3592_v15, %v3593_v37  ;;  %v3614_v53 = vrot.slane %v3613_v17, 4  ;;  %v1159_v31 = vrot.slane %v816_v61, %v5976_v46  ;;  %v848_v59 = vmax.f32 %v728_v28, 0.0 }
 0x212   : > { %v3601_v32 = vmax.f32 %v3599_v1, %v3600_v48  ;;  %v3608_v8 = vmax.f32 %v3606_v13, %v3607_v47  ;;  %v1166_v30 = vrot.slane %v1152_v50, %v5976_v46  ;;  %v6553_v10 = vsel %vm4878_vm8, %v4837_v55, %v4947_v63 }
 0x213   : > { %v3595_v11 = vrot.slane %v3594_v54, 2  ;;  %v3615_v62 = vmax.f32 %v3613_v17, %v3614_v53  ;;  %v1167_v58 = vcombine.high %v1159_v31, %v1159_v31  ;;  %v2640_v12 = vsel %vm2275_vm5, %v1159_v31, -inf }
 0x214   : > { %v3602_v56 = vrot.slane %v3601_v32, 2  ;;  %v3609_v9 = vrot.slane %v3608_v8, 2  ;;  %v1168_v49 = vcombine.high %v1166_v30, %v1166_v30  ;;  %v2641_v6 = vrot.slane %v2640_v12, 4 }
 0x215   : > { %v3596_v22 = vmax.f32 %v3594_v54, %v3595_v11  ;;  %v3616_v0 = vrot.slane %v3615_v62, 2  ;;  %v2647_v23 = vsel %vm2275_vm5, %v1167_v58, -inf  ;;  %v2654_v44 = vsel %vm2275_vm5, %v1166_v30, -inf }
 0x216   : > { %v3603_v18 = vmax.f32 %v3601_v32, %v3602_v56  ;;  %v3610_v7 = vmax.f32 %v3608_v8, %v3609_v9  ;;  %v2642_v27 = vmax.f32 %v2640_v12, %v2641_v6  ;;  %v2648_v26 = vrot.slane %v2647_v23, 4 }
 0x217   : > { %v3597_v33 = vrot.slane %v3596_v22, 1  ;;  %v3617_v42 = vmax.f32 %v3615_v62, %v3616_v0  ;;  %v2655_v36 = vrot.slane %v2654_v44, 4  ;;  %v2661_v35 = vsel %vm2275_vm5, %v1168_v49, -inf }
 0x218   : > { %v3604_v4 = vrot.slane %v3603_v18, 1  ;;  %v3611_v5 = vrot.slane %v3610_v7, 1  ;;  %v2643_v39 = vrot.slane %v2642_v27, 2  ;;  %v2649_v55 = vmax.f32 %v2647_v23, %v2648_v26 }
 0x219   : > { %v6559_v63 = vmax.f32 %v3596_v22, %v3597_v33  ;;  %v3618_v41 = vrot.slane %v3617_v42, 1  ;;  %v2656_v25 = vmax.f32 %v2654_v44, %v2655_v36  ;;  %v2662_v16 = vrot.slane %v2661_v35, 4 }
 0x21a   : > { %v6561_v40 = vmax.f32 %v3603_v18, %v3604_v4  ;;  %v6563_v2 = vmax.f32 %v3610_v7, %v3611_v5  ;;  %v2644_v57 = vmax.f32 %v2642_v27, %v2643_v39  ;;  %v2650_v43 = vrot.slane %v2649_v55, 2 }
 0x21b   : > { %v6565_v29 = vmax.f32 %v3617_v42, %v3618_v41  ;;  %v2657_v24 = vrot.slane %v2656_v25, 2  ;;  %v2663_v52 = vmax.f32 %v2661_v35, %v2662_v16  ;;  %v1696_v15 = vcombine.high %v848_v59, %v848_v59  ;;  %v5430_v41 = vld [vmem:[%s5896_s23 + $0x24] sm:$0x1] }
 0x21c   : > { %v2645_v13 = vrot.slane %v2644_v57, 1  ;;  %v2651_v61 = vmax.f32 %v2649_v55, %v2650_v43  ;;  %v1703_v28 = vrot.slane %v848_v59, %v5976_v46  ;;  %v621_v37 = vadd.f32 %v6468_v34, %v5680_v38 }
 0x21d   : > { %v2658_v1 = vmax.f32 %v2656_v25, %v2657_v24  ;;  %v2664_v48 = vrot.slane %v2663_v52, 2  ;;  %v1710_v47 = vrot.slane %v1696_v15, %v5976_v46  ;;  %v749_v17 = vadd.f32 %v6468_v34, %v5712_v19 }
 0x21e   : > { %v2646_v50 = vmax.f32 %v2644_v57, %v2645_v13  ;;  %v2652_v54 = vrot.slane %v2651_v61, 1  ;;  %v1711_v53 = vcombine.high %v1703_v28, %v1703_v28  ;;  %v3536_v31 = vsel %vm2275_vm5, %v1703_v28, -inf  ;;  %v5428_v13 = vld [vmem:[%s5896_s23 + $0x20] sm:$0xf] }
 0x21f   : > { %v2659_v32 = vrot.slane %v2658_v1, 1  ;;  %v2665_v8 = vmax.f32 %v2663_v52, %v2664_v48  ;;  %v1712_v30 = vcombine.high %v1710_v47, %v1710_v47  ;;  %v3537_v11 = vrot.slane %v3536_v31, 4 }
 0x220   : > { %v2653_v62 = vmax.f32 %v2651_v61, %v2652_v54  ;;  %v4096_v59 = vmax.f32 %v2646_v50, %v6533_v45  ;;  %v3543_v58 = vsel %vm2275_vm5, %v1711_v53, -inf  ;;  %v3550_v12 = vsel %vm2275_vm5, %v1710_v47, -inf }
 0x221   : > { %v2660_v56 = vmax.f32 %v2658_v1, %v2659_v32  ;;  %v2666_v9 = vrot.slane %v2665_v8, 1  ;;  %v3538_v49 = vmax.f32 %v3536_v31, %v3537_v11  ;;  %v3544_v6 = vrot.slane %v3543_v58, 4 }
 0x222   : > { %v4097_v22 = vmax.f32 %v2653_v62, %v6535_v20  ;;  %v5511_v0 = vpack.c.bf16 %v4096_v59, %v4096_v59  ;;  %v3551_v23 = vrot.slane %v3550_v12, 4  ;;  %v3557_v44 = vsel %vm2275_vm5, %v1712_v30, -inf }
 0x223   : > { %v2667_v18 = vmax.f32 %v2665_v8, %v2666_v9  ;;  %v4098_v7 = vmax.f32 %v2660_v56, %v6544_v60  ;;  %v3539_v27 = vrot.slane %v3538_v49, 2  ;;  %v3545_v45 = vmax.f32 %v3543_v58, %v3544_v6 }
 0x224   : > { %v5512_v26 = vpack.c.bf16 %v4097_v22, %v4097_v22  ;;  %v4774_v33 = vunpack.c.l.b16 %v5511_v0  ;;  %v3552_v42 = vmax.f32 %v3550_v12, %v3551_v23  ;;  %v3558_v36 = vrot.slane %v3557_v44, 4 }
 0x225   : > { %v4099_v35 = vmax.f32 %v2667_v18, %v6546_v21  ;;  %v5513_v4 = vpack.c.bf16 %v4098_v7, %v4098_v7  ;;  %v3540_v5 = vmax.f32 %v3538_v49, %v3539_v27  ;;  %v3546_v20 = vrot.slane %v3545_v45, 2 }
 0x226   : > { %v4775_v39 = vunpack.c.l.b16 %v5512_v26  ;;  %v4901_v55 = vsel %vm4880_vm10, %v4774_v33, %v6539_v51  ;;  %v3553_v25 = vrot.slane %v3552_v42, 2  ;;  %v3559_v60 = vmax.f32 %v3557_v44, %v3558_v36 }
 0x227   : > { %v4776_v16 = vunpack.c.l.b16 %v5513_v4  ;;  %v5614_v38 = vpack.c.bf16 %v4099_v35, %v4099_v35  ;;  %v3541_v57 = vrot.slane %v3540_v5, 1  ;;  %v3547_v43 = vmax.f32 %v3545_v45, %v3546_v20  ;;  %v5462_v45 = vld [vmem:[%s5896_s23 + $0x64] sm:$0x1] }
 0x228   : > { %v4902_v19 = vsel %vm4882_vm11, %v4775_v39, %v4901_v55  ;;  %v3554_v24 = vmax.f32 %v3552_v42, %v3553_v25  ;;  %v3560_v21 = vrot.slane %v3559_v60, 2  ;;  %v821_v52 = vmax.f32 %v621_v37, 0.0  ;;  %v612_v39 = vpop.f32.mrf.mxu0 }
 0x229   : > { %v4903_v15 = vsel %vm4884_vm12, %v4776_v16, %v4902_v19  ;;  %v5069_v61 = vsel %vm6121_vm14, %v5614_v38, %v5430_v41  ;;  %v3542_v51 = vmax.f32 %v3540_v5, %v3541_v57  ;;  %v3548_v28 = vrot.slane %v3547_v43, 1  ;;  %v5460_v41 = vld [vmem:[%s5896_s23 + $0x60] sm:$0xf] }
 0x22a   : > { %v4982_v1 = vpack.c.b16 %v4903_v15, %v4903_v15  ;;  %5431 = vst [vmem:[%s5896_s23 + $0x24] sm:$0x1] %v5069_v61  ;;  %v3555_v48 = vrot.slane %v3554_v24, 1  ;;  %v3561_v47 = vmax.f32 %v3559_v60, %v3560_v21  ;;  %v1237_v50 = vcombine.high %v821_v52, %v821_v52 }
 0x22b   : > { %v3549_v54 = vmax.f32 %v3547_v43, %v3548_v28  ;;  %v4160_v53 = vmax.f32 %v3542_v51, %v6559_v63  ;;  %v1244_v31 = vrot.slane %v821_v52, %v5976_v46  ;;  %v853_v37 = vmax.f32 %v749_v17, 0.0 }
 0x22c   : > { %v5066_v32 = vsel %vm6140_vm15, %v4982_v1, %v5428_v13  ;;  %v3556_v8 = vmax.f32 %v3554_v24, %v3555_v48  ;;  %v3562_v30 = vrot.slane %v3561_v47, 1  ;;  %v1251_v11 = vrot.slane %v1237_v50, %v5976_v46 }
 0x22d   : > { %5429 = vst [vmem:[%s5896_s23 + $0x20] sm:$0xf] %v5066_v32  ;;  %v4161_v62 = vmax.f32 %v3549_v54, %v6561_v40  ;;  %v5575_v59 = vpack.c.bf16 %v4160_v53, %v4160_v53  ;;  %v1252_v58 = vcombine.high %v1244_v31, %v1244_v31  ;;  %v2780_v12 = vsel %vm2275_vm5, %v1244_v31, -inf }
 0x22e   : > { %v3563_v56 = vmax.f32 %v3561_v47, %v3562_v30  ;;  %v4162_v63 = vmax.f32 %v3556_v8, %v6563_v2  ;;  %v1253_v9 = vcombine.high %v1251_v11, %v1251_v11  ;;  %v2781_v17 = vrot.slane %v2780_v12, 4 }
 0x22f   : > { %v5576_v49 = vpack.c.bf16 %v4161_v62, %v4161_v62  ;;  %v4838_v6 = vunpack.c.l.b16 %v5575_v59  ;;  %v2787_v22 = vsel %vm2275_vm5, %v1252_v58, -inf  ;;  %v2794_v0 = vsel %vm2275_vm5, %v1251_v11, -inf  ;;  %v5681_v62 = vpop.f32.mrf.mxu0 }
 0x230   : > { %v4163_v23 = vmax.f32 %v3563_v56, %v6565_v29  ;;  %v5577_v44 = vpack.c.bf16 %v4162_v63, %v4162_v63  ;;  %v2782_v40 = vmax.f32 %v2780_v12, %v2781_v17  ;;  %v2788_v18 = vrot.slane %v2787_v22, 4 }
 0x231   : > { %v4839_v7 = vunpack.c.l.b16 %v5576_v49  ;;  %v4949_v27 = vsel %vm4880_vm10, %v4838_v6, %v6553_v10  ;;  %v2795_v2 = vrot.slane %v2794_v0, 4  ;;  %v2801_v26 = vsel %vm2275_vm5, %v1253_v9, -inf }
 0x232   : > { %v4840_v33 = vunpack.c.l.b16 %v5577_v44  ;;  %v5622_v42 = vpack.c.bf16 %v4163_v23, %v4163_v23  ;;  %v2783_v36 = vrot.slane %v2782_v40, 2  ;;  %v2789_v35 = vmax.f32 %v2787_v22, %v2788_v18 }
 0x233   : > { %v4950_v4 = vsel %vm4882_vm11, %v4839_v7, %v4949_v27  ;;  %v2796_v29 = vmax.f32 %v2794_v0, %v2795_v2  ;;  %v2802_v5 = vrot.slane %v2801_v26, 4  ;;  %v1781_v20 = vcombine.high %v853_v37, %v853_v37 }
 0x234   : > { %v4951_v55 = vsel %vm4884_vm12, %v4840_v33, %v4950_v4  ;;  %v5117_v10 = vsel %vm6121_vm14, %v5622_v42, %v5462_v45  ;;  %v2784_v25 = vmax.f32 %v2782_v40, %v2783_v36  ;;  %v2790_v60 = vrot.slane %v2789_v35, 2 }
 0x235   : > { %v4998_v16 = vpack.c.b16 %v4951_v55, %v4951_v55  ;;  %5463 = vst [vmem:[%s5896_s23 + $0x64] sm:$0x1] %v5117_v10  ;;  %v2797_v38 = vrot.slane %v2796_v29, 2  ;;  %v2803_v57 = vmax.f32 %v2801_v26, %v2802_v5  ;;  %v1788_v43 = vrot.slane %v853_v37, %v5976_v46  ;;  %v740_v37 = vpop.f32.mrf.mxu1 }
 0x236   : > { %v2785_v19 = vrot.slane %v2784_v25, 1  ;;  %v2791_v24 = vmax.f32 %v2789_v35, %v2790_v60  ;;  %v1795_v21 = vrot.slane %v1781_v20, %v5976_v46  ;;  %v613_v52 = vadd.f32 %v6468_v34, %v612_v39 }
 0x237   : > { %v5114_v15 = vsel %vm6140_vm15, %v4998_v16, %v5460_v41  ;;  %v2798_v13 = vmax.f32 %v2796_v29, %v2797_v38  ;;  %v2804_v61 = vrot.slane %v2803_v57, 2  ;;  %v1796_v51 = vcombine.high %v1788_v43, %v1788_v43 }
 0x238   : > { %5461 = vst [vmem:[%s5896_s23 + $0x60] sm:$0xf] %v5114_v15  ;;  %v6616_v28 = vmax.f32 %v2784_v25, %v2785_v19  ;;  %v2792_v1 = vrot.slane %v2791_v24, 1  ;;  %v1797_v48 = vcombine.high %v1795_v21, %v1795_v21  ;;  %v3676_v47 = vsel %vm2275_vm5, %v1788_v43, -inf }
 0x239   : > { %v2799_v50 = vrot.slane %v2798_v13, 1  ;;  %v2805_v54 = vmax.f32 %v2803_v57, %v2804_v61  ;;  %v3677_v53 = vrot.slane %v3676_v47, 4  ;;  %v3683_v31 = vsel %vm2275_vm5, %v1796_v51, -inf }
 0x23a   : > { %v6620_v32 = vmax.f32 %v2791_v24, %v2792_v1  ;;  %v3684_v8 = vrot.slane %v3683_v31, 4  ;;  %v3690_v30 = vsel %vm2275_vm5, %v1795_v21, -inf  ;;  %v3697_v11 = vsel %vm2275_vm5, %v1797_v48, -inf }
 0x23b   : > { %v6624_v59 = vmax.f32 %v2798_v13, %v2799_v50  ;;  %v2806_v58 = vrot.slane %v2805_v54, 1  ;;  %v3678_v12 = vmax.f32 %v3676_v47, %v3677_v53  ;;  %v3691_v56 = vrot.slane %v3690_v30, 4 }
 0x23c   : > { %v3685_v63 = vmax.f32 %v3683_v31, %v3684_v8  ;;  %v3698_v9 = vrot.slane %v3697_v11, 4  ;;  %v819_v17 = vmax.f32 %v613_v52, 0.0  ;;  %v741_v49 = vadd.f32 %v6468_v34, %v740_v37 }
 0x23d   : > { %v6627_v6 = vmax.f32 %v2805_v54, %v2806_v58  ;;  %v3679_v22 = vrot.slane %v3678_v12, 2  ;;  %v3692_v0 = vmax.f32 %v3690_v30, %v3691_v56  ;;  %v624_v23 = vadd.f32 %v6468_v34, %v5681_v62 }
 0x23e   : > { %v3686_v44 = vrot.slane %v3685_v63, 2  ;;  %v3699_v40 = vmax.f32 %v3697_v11, %v3698_v9  ;;  %v1203_v18 = vcombine.high %v819_v17, %v819_v17  ;;  %v1210_v7 = vrot.slane %v819_v17, %v5976_v46 }
 0x23f   : > { %v3680_v27 = vmax.f32 %v3678_v12, %v3679_v22  ;;  %v3693_v45 = vrot.slane %v3692_v0, 2  ;;  %v851_v2 = vmax.f32 %v741_v49, 0.0  ;;  %v6631_v26 = vmax.f32 %v624_v23, 0.0 }
 0x240   : > { %v3687_v33 = vmax.f32 %v3685_v63, %v3686_v44  ;;  %v3700_v42 = vrot.slane %v3699_v40, 2  ;;  %v1217_v36 = vrot.slane %v1203_v18, %v5976_v46  ;;  %v1218_v35 = vcombine.high %v1210_v7, %v1210_v7 }
 0x241   : > { %v3681_v4 = vrot.slane %v3680_v27, 1  ;;  %v3694_v29 = vmax.f32 %v3692_v0, %v3693_v45  ;;  %v2724_v5 = vsel %vm2275_vm5, %v1210_v7, -inf  ;;  %v1747_v34 = vcombine.high %v851_v2, %v851_v2 }
 0x242   : > { %v3688_v20 = vrot.slane %v3687_v33, 1  ;;  %v3701_v39 = vmax.f32 %v3699_v40, %v3700_v42  ;;  %v1219_v55 = vcombine.high %v1217_v36, %v1217_v36  ;;  %v2725_v41 = vrot.slane %v2724_v5, 4 }
 0x243   : > { %v6635_v10 = vmax.f32 %v3680_v27, %v3681_v4  ;;  %v3695_v25 = vrot.slane %v3694_v29, 1  ;;  %v2731_v60 = vsel %vm2275_vm5, %v1218_v35, -inf  ;;  %v2738_v16 = vsel %vm2275_vm5, %v1217_v36, -inf }
 0x244   : > { %v6639_v38 = vmax.f32 %v3687_v33, %v3688_v20  ;;  %v3702_v57 = vrot.slane %v3701_v39, 1  ;;  %v2726_v43 = vmax.f32 %v2724_v5, %v2725_v41  ;;  %v2732_v19 = vrot.slane %v2731_v60, 4 }
 0x245   : > { %v6641_v24 = vmax.f32 %v3694_v29, %v3695_v25  ;;  %v2739_v21 = vrot.slane %v2738_v16, 4  ;;  %v2745_v52 = vsel %vm2275_vm5, %v1219_v55, -inf  ;;  %v1754_v15 = vrot.slane %v851_v2, %v5976_v46 }
 0x246   : > { %v6645_v13 = vmax.f32 %v3701_v39, %v3702_v57  ;;  %v2727_v61 = vrot.slane %v2726_v43, 2  ;;  %v2733_v51 = vmax.f32 %v2731_v60, %v2732_v19  ;;  %v2746_v1 = vrot.slane %v2745_v52, 4 }
 0x247   : > { %v2740_v48 = vmax.f32 %v2738_v16, %v2739_v21  ;;  %v1761_v47 = vrot.slane %v1747_v34, %v5976_v46  ;;  %v1762_v50 = vcombine.high %v1754_v15, %v1754_v15  ;;  %v3620_v54 = vsel %vm2275_vm5, %v1754_v15, -inf }
 0x248   : > { %v2728_v53 = vmax.f32 %v2726_v43, %v2727_v61  ;;  %v2734_v31 = vrot.slane %v2733_v51, 2  ;;  %v2747_v37 = vmax.f32 %v2745_v52, %v2746_v1  ;;  %v3621_v8 = vrot.slane %v3620_v54, 4 }
 0x249   : > { %v2741_v30 = vrot.slane %v2740_v48, 2  ;;  %v1763_v11 = vcombine.high %v1761_v47, %v1761_v47  ;;  %v3627_v62 = vsel %vm2275_vm5, %v1762_v50, -inf  ;;  %v3634_v58 = vsel %vm2275_vm5, %v1761_v47, -inf }
 0x24a   : > { %v2729_v12 = vrot.slane %v2728_v53, 1  ;;  %v2735_v56 = vmax.f32 %v2733_v51, %v2734_v31  ;;  %v2748_v63 = vrot.slane %v2747_v37, 2  ;;  %v3622_v9 = vmax.f32 %v3620_v54, %v3621_v8 }
 0x24b   : > { %v2742_v17 = vmax.f32 %v2740_v48, %v2741_v30  ;;  %v3628_v49 = vrot.slane %v3627_v62, 4  ;;  %v3635_v22 = vrot.slane %v3634_v58, 4  ;;  %v3641_v0 = vsel %vm2275_vm5, %v1763_v11, -inf }
 0x24c   : > { %v2730_v23 = vmax.f32 %v2728_v53, %v2729_v12  ;;  %v2736_v44 = vrot.slane %v2735_v56, 1  ;;  %v2749_v40 = vmax.f32 %v2747_v37, %v2748_v63  ;;  %v3623_v18 = vrot.slane %v3622_v9, 2 }
 0x24d   : > { %v2743_v7 = vrot.slane %v2742_v17, 1  ;;  %v3629_v27 = vmax.f32 %v3627_v62, %v3628_v49  ;;  %v3636_v45 = vmax.f32 %v3634_v58, %v3635_v22  ;;  %v3642_v2 = vrot.slane %v3641_v0, 4  ;;  %v5713_v58 = vpop.f32.mrf.mxu1 }
 0x24e   : > { %v2737_v33 = vmax.f32 %v2735_v56, %v2736_v44  ;;  %v2750_v42 = vrot.slane %v2749_v40, 1  ;;  %v4100_v36 = vmax.f32 %v2730_v23, %v6616_v28  ;;  %v3624_v35 = vmax.f32 %v3622_v9, %v3623_v18 }
 0x24f   : > { %v2744_v4 = vmax.f32 %v2742_v17, %v2743_v7  ;;  %v3630_v29 = vrot.slane %v3629_v27, 2  ;;  %v3637_v5 = vrot.slane %v3636_v45, 2  ;;  %v3643_v34 = vmax.f32 %v3641_v0, %v3642_v2 }
 0x250   : > { %v2751_v20 = vmax.f32 %v2749_v40, %v2750_v42  ;;  %v4101_v39 = vmax.f32 %v2737_v33, %v6620_v32  ;;  %v5515_v55 = vpack.c.bf16 %v4100_v36, %v4100_v36  ;;  %v3625_v41 = vrot.slane %v3624_v35, 1  ;;  %v615_v42 = vpop.f32.mrf.mxu0 }
 0x251   : > { %v4102_v25 = vmax.f32 %v2744_v4, %v6624_v59  ;;  %v3631_v60 = vmax.f32 %v3629_v27, %v3630_v29  ;;  %v3638_v16 = vmax.f32 %v3636_v45, %v3637_v5  ;;  %v3644_v57 = vrot.slane %v3643_v34, 2 }
 0x252   : > { %v4103_v43 = vmax.f32 %v2751_v20, %v6627_v6  ;;  %v5516_v19 = vpack.c.bf16 %v4101_v39, %v4101_v39  ;;  %v4778_v21 = vunpack.c.l.b16 %v5515_v55  ;;  %v3626_v28 = vmax.f32 %v3624_v35, %v3625_v41 }
 0x253   : > { %v5517_v52 = vpack.c.bf16 %v4102_v25, %v4102_v25  ;;  %v3632_v15 = vrot.slane %v3631_v60, 1  ;;  %v3639_v61 = vrot.slane %v3638_v16, 1  ;;  %v3645_v51 = vmax.f32 %v3643_v34, %v3644_v57 }
 0x254   : > { %v5518_v1 = vpack.c.bf16 %v4103_v43, %v4103_v43  ;;  %v4779_v48 = vunpack.c.l.b16 %v5516_v19  ;;  %v4164_v32 = vmax.f32 %v3626_v28, %v6635_v10  ;;  %v1254_v47 = vcombine.high %v6631_v26, %v6631_v26 }
 0x255   : > { %v4780_v59 = vunpack.c.l.b16 %v5517_v52  ;;  %v3633_v50 = vmax.f32 %v3631_v60, %v3632_v15  ;;  %v3640_v54 = vmax.f32 %v3638_v16, %v3639_v61  ;;  %v3646_v53 = vrot.slane %v3645_v51, 1 }
 0x256   : > { %v4781_v31 = vunpack.c.l.b16 %v5518_v1  ;;  %v4904_v6 = vsel %vm4874_vm6, %v4779_v48, %v4778_v21  ;;  %v5579_v37 = vpack.c.bf16 %v4164_v32, %v4164_v32  ;;  %v1261_v8 = vrot.slane %v6631_v26, %v5976_v46 }
 0x257   : > { %v4905_v30 = vsel %vm4876_vm7, %v4780_v59, %v4904_v6  ;;  %v3647_v11 = vmax.f32 %v3645_v51, %v3646_v53  ;;  %v4165_v62 = vmax.f32 %v3633_v50, %v6639_v38  ;;  %v4166_v10 = vmax.f32 %v3640_v54, %v6641_v24  ;;  %v6673_v38 = vld [vmem:[%s7183_s2] ss:$0 sm:$0xff] }
 0x258   : > { %v4842_v12 = vunpack.c.l.b16 %v5579_v37  ;;  %v1268_v56 = vrot.slane %v1254_v47, %v5976_v46  ;;  %v1269_v63 = vcombine.high %v1261_v8, %v1261_v8  ;;  %v2808_v9 = vsel %vm2275_vm5, %v1261_v8, -inf }
 0x259   : > { %v4167_v17 = vmax.f32 %v3647_v11, %v6645_v13  ;;  %v5580_v49 = vpack.c.bf16 %v4165_v62, %v4165_v62  ;;  %v5581_v22 = vpack.c.bf16 %v4166_v10, %v4166_v10  ;;  %v2809_v0 = vrot.slane %v2808_v9, 4  ;;  %v743_v62 = vpop.f32.mrf.mxu1 }
 0x25a   : > { %v1270_v26 = vcombine.high %v1268_v56, %v1268_v56  ;;  %v2815_v23 = vsel %vm2275_vm5, %v1269_v63, -inf  ;;  %v2822_v44 = vsel %vm2275_vm5, %v1268_v56, -inf  ;;  %v752_v24 = vadd.f32 %v6673_v38, %v5713_v58 }
 0x25b   : > { %v5582_v40 = vpack.c.bf16 %v4167_v17, %v4167_v17  ;;  %v4843_v18 = vunpack.c.l.b16 %v5580_v49  ;;  %v4844_v7 = vunpack.c.l.b16 %v5581_v22  ;;  %v2810_v27 = vmax.f32 %v2808_v9, %v2809_v0 }
 0x25c   : > { %v2816_v13 = vrot.slane %v2815_v23, 4  ;;  %v2823_v45 = vrot.slane %v2822_v44, 4  ;;  %v2829_v2 = vsel %vm2275_vm5, %v1270_v26, -inf  ;;  %v854_v33 = vmax.f32 %v752_v24, 0.0 }
 0x25d   : > { %v4845_v36 = vunpack.c.l.b16 %v5582_v40  ;;  %v4952_v35 = vsel %vm4874_vm6, %v4843_v18, %v4842_v12  ;;  %v2811_v4 = vrot.slane %v2810_v27, 2  ;;  %v2830_v29 = vrot.slane %v2829_v2, 4 }
 0x25e   : > { %v4953_v5 = vsel %vm4876_vm7, %v4844_v7, %v4952_v35  ;;  %v2817_v34 = vmax.f32 %v2815_v23, %v2816_v13  ;;  %v2824_v20 = vmax.f32 %v2822_v44, %v2823_v45  ;;  %v1798_v39 = vcombine.high %v854_v33, %v854_v33 }
 0x25f   : > { %v2812_v55 = vmax.f32 %v2810_v27, %v2811_v4  ;;  %v2831_v41 = vmax.f32 %v2829_v2, %v2830_v29  ;;  %v1805_v25 = vrot.slane %v854_v33, %v5976_v46  ;;  %v616_v60 = vadd.f32 %v6673_v38, %v615_v42 }
 0x260   : > { %v2818_v16 = vrot.slane %v2817_v34, 2  ;;  %v2825_v57 = vrot.slane %v2824_v20, 2  ;;  %v1812_v43 = vrot.slane %v1798_v39, %v5976_v46  ;;  %v6683_v19 = vsel %vm4878_vm8, %v4781_v31, %v4905_v30 }
 0x261   : > { %v2813_v21 = vrot.slane %v2812_v55, 1  ;;  %v2832_v28 = vrot.slane %v2831_v41, 2  ;;  %v1813_v52 = vcombine.high %v1805_v25, %v1805_v25  ;;  %v3704_v15 = vsel %vm2275_vm5, %v1805_v25, -inf }
 0x262   : > { %v2819_v61 = vmax.f32 %v2817_v34, %v2818_v16  ;;  %v2826_v51 = vmax.f32 %v2824_v20, %v2825_v57  ;;  %v1814_v1 = vcombine.high %v1812_v43, %v1812_v43  ;;  %v3705_v48 = vrot.slane %v3704_v15, 4  ;;  %v5684_v57 = vpop.f32.mrf.mxu0 }
 0x263   : > { %v6686_v32 = vmax.f32 %v2812_v55, %v2813_v21  ;;  %v2833_v47 = vmax.f32 %v2831_v41, %v2832_v28  ;;  %v3711_v59 = vsel %vm2275_vm5, %v1813_v52, -inf  ;;  %v3718_v50 = vsel %vm2275_vm5, %v1812_v43, -inf }
 0x264   : > { %v2820_v54 = vrot.slane %v2819_v61, 1  ;;  %v2827_v53 = vrot.slane %v2826_v51, 1  ;;  %v3706_v31 = vmax.f32 %v3704_v15, %v3705_v48  ;;  %v3712_v6 = vrot.slane %v3711_v59, 4 }
 0x265   : > { %v2834_v37 = vrot.slane %v2833_v47, 1  ;;  %v3719_v8 = vrot.slane %v3718_v50, 4  ;;  %v3725_v30 = vsel %vm2275_vm5, %v1814_v1, -inf  ;;  %v820_v11 = vmax.f32 %v616_v60, 0.0 }
 0x266   : > { %v6691_v10 = vmax.f32 %v2819_v61, %v2820_v54  ;;  %v6693_v58 = vmax.f32 %v2826_v51, %v2827_v53  ;;  %v3707_v12 = vrot.slane %v3706_v31, 2  ;;  %v3713_v56 = vmax.f32 %v3711_v59, %v3712_v6 }
 0x267   : > { %v6695_v63 = vmax.f32 %v2833_v47, %v2834_v37  ;;  %v3720_v9 = vmax.f32 %v3718_v50, %v3719_v8  ;;  %v3726_v17 = vrot.slane %v3725_v30, 4  ;;  %v1220_v49 = vcombine.high %v820_v11, %v820_v11 }
 0x268   : > { %v3708_v22 = vmax.f32 %v3706_v31, %v3707_v12  ;;  %v3714_v0 = vrot.slane %v3713_v56, 2  ;;  %v1227_v26 = vrot.slane %v820_v11, %v5976_v46  ;;  %v744_v23 = vadd.f32 %v6673_v38, %v743_v62 }
 0x269   : > { %v3721_v44 = vrot.slane %v3720_v9, 2  ;;  %v3727_v24 = vmax.f32 %v3725_v30, %v3726_v17  ;;  %v1234_v40 = vrot.slane %v1220_v49, %v5976_v46  ;;  %v6701_v18 = vsel %vm4878_vm8, %v4845_v36, %v4953_v5 }
 0x26a   : > { %v3709_v7 = vrot.slane %v3708_v22, 1  ;;  %v3715_v27 = vmax.f32 %v3713_v56, %v3714_v0  ;;  %v1235_v13 = vcombine.high %v1227_v26, %v1227_v26  ;;  %v2752_v45 = vsel %vm2275_vm5, %v1227_v26, -inf }
 0x26b   : > { %v3722_v2 = vmax.f32 %v3720_v9, %v3721_v44  ;;  %v3728_v33 = vrot.slane %v3727_v24, 2  ;;  %v1236_v42 = vcombine.high %v1234_v40, %v1234_v40  ;;  %v2753_v35 = vrot.slane %v2752_v45, 4 }
 0x26c   : > { %v6704_v4 = vmax.f32 %v3708_v22, %v3709_v7  ;;  %v3716_v29 = vrot.slane %v3715_v27, 1  ;;  %v2759_v34 = vsel %vm2275_vm5, %v1235_v13, -inf  ;;  %v2766_v20 = vsel %vm2275_vm5, %v1234_v40, -inf }
 0x26d   : > { %v3723_v39 = vrot.slane %v3722_v2, 1  ;;  %v3729_v55 = vmax.f32 %v3727_v24, %v3728_v33  ;;  %v2754_v36 = vmax.f32 %v2752_v45, %v2753_v35  ;;  %v2760_v5 = vrot.slane %v2759_v34, 4 }
 0x26e   : > { %v6708_v41 = vmax.f32 %v3715_v27, %v3716_v29  ;;  %v2767_v25 = vrot.slane %v2766_v20, 4  ;;  %v2773_v60 = vsel %vm2275_vm5, %v1236_v42, -inf  ;;  %v852_v16 = vmax.f32 %v744_v23, 0.0 }
 0x26f   : > { %v6711_v43 = vmax.f32 %v3722_v2, %v3723_v39  ;;  %v3730_v21 = vrot.slane %v3729_v55, 1  ;;  %v2755_v28 = vrot.slane %v2754_v36, 2  ;;  %v2761_v52 = vmax.f32 %v2759_v34, %v2760_v5 }
 0x270   : > { %v2768_v15 = vmax.f32 %v2766_v20, %v2767_v25  ;;  %v2774_v61 = vrot.slane %v2773_v60, 4  ;;  %v1764_v51 = vcombine.high %v852_v16, %v852_v16  ;;  %v1771_v1 = vrot.slane %v852_v16, %v5976_v46 }
 0x271   : > { %v6714_v48 = vmax.f32 %v3729_v55, %v3730_v21  ;;  %v2756_v47 = vmax.f32 %v2754_v36, %v2755_v28  ;;  %v2762_v59 = vrot.slane %v2761_v52, 2  ;;  %v637_v50 = vadd.f32 %v6673_v38, %v5684_v57 }
 0x272   : > { %v2769_v54 = vrot.slane %v2768_v15, 2  ;;  %v2775_v53 = vmax.f32 %v2773_v60, %v2774_v61  ;;  %v1778_v31 = vrot.slane %v1764_v51, %v5976_v46  ;;  %v1779_v6 = vcombine.high %v1771_v1, %v1771_v1  ;;  %v5434_v61 = vld [vmem:[%s5896_s23 + $0x2c] sm:$0x1] }
 0x273   : > { %v2757_v37 = vrot.slane %v2756_v47, 1  ;;  %v2763_v8 = vmax.f32 %v2761_v52, %v2762_v59  ;;  %v3648_v30 = vsel %vm2275_vm5, %v1771_v1, -inf  ;;  %v6719_v11 = vmax.f32 %v637_v50, 0.0 }
 0x274   : > { %v2770_v62 = vmax.f32 %v2768_v15, %v2769_v54  ;;  %v2776_v12 = vrot.slane %v2775_v53, 2  ;;  %v1780_v56 = vcombine.high %v1778_v31, %v1778_v31  ;;  %v3649_v9 = vrot.slane %v3648_v30, 4 }
 0x275   : > { %v2758_v17 = vmax.f32 %v2756_v47, %v2757_v37  ;;  %v2764_v49 = vrot.slane %v2763_v8, 1  ;;  %v3655_v22 = vsel %vm2275_vm5, %v1779_v6, -inf  ;;  %v3662_v0 = vsel %vm2275_vm5, %v1778_v31, -inf  ;;  %v5716_v6 = vpop.f32.mrf.mxu1 }
 0x276   : > { %v2771_v26 = vrot.slane %v2770_v62, 1  ;;  %v2777_v23 = vmax.f32 %v2775_v53, %v2776_v12  ;;  %v3650_v44 = vmax.f32 %v3648_v30, %v3649_v9  ;;  %v3656_v24 = vrot.slane %v3655_v22, 4 }
 0x277   : > { %v2765_v40 = vmax.f32 %v2763_v8, %v2764_v49  ;;  %v4104_v7 = vmax.f32 %v2758_v17, %v6686_v32  ;;  %v3663_v27 = vrot.slane %v3662_v0, 4  ;;  %v3669_v13 = vsel %vm2275_vm5, %v1780_v56, -inf  ;;  %v5432_v8 = vld [vmem:[%s5896_s23 + $0x28] sm:$0xf] }
 0x278   : > { %v2772_v45 = vmax.f32 %v2770_v62, %v2771_v26  ;;  %v2778_v2 = vrot.slane %v2777_v23, 1  ;;  %v3651_v33 = vrot.slane %v3650_v44, 2  ;;  %v3657_v42 = vmax.f32 %v3655_v22, %v3656_v24 }
 0x279   : > { %v4105_v35 = vmax.f32 %v2765_v40, %v6691_v10  ;;  %v5519_v29 = vpack.c.bf16 %v4104_v7, %v4104_v7  ;;  %v3664_v34 = vmax.f32 %v3662_v0, %v3663_v27  ;;  %v3670_v20 = vrot.slane %v3669_v13, 4 }
 0x27a   : > { %v2779_v39 = vmax.f32 %v2777_v23, %v2778_v2  ;;  %v4106_v55 = vmax.f32 %v2772_v45, %v6693_v58  ;;  %v3652_v36 = vmax.f32 %v3650_v44, %v3651_v33  ;;  %v3658_v5 = vrot.slane %v3657_v42, 2 }
 0x27b   : > { %v5520_v25 = vpack.c.bf16 %v4105_v35, %v4105_v35  ;;  %v4782_v32 = vunpack.c.l.b16 %v5519_v29  ;;  %v3665_v60 = vrot.slane %v3664_v34, 2  ;;  %v3671_v16 = vmax.f32 %v3669_v13, %v3670_v20  ;;  %v5466_v35 = vld [vmem:[%s5896_s23 + $0x6c] sm:$0x1] }
 0x27c   : > { %v4107_v57 = vmax.f32 %v2779_v39, %v6695_v63  ;;  %v5521_v21 = vpack.c.bf16 %v4106_v55, %v4106_v55  ;;  %v3653_v28 = vrot.slane %v3652_v36, 1  ;;  %v3659_v52 = vmax.f32 %v3657_v42, %v3658_v5 }
 0x27d   : > { %v4783_v10 = vunpack.c.l.b16 %v5520_v25  ;;  %v4907_v15 = vsel %vm4880_vm10, %v4782_v32, %v6683_v19  ;;  %v3666_v51 = vmax.f32 %v3664_v34, %v3665_v60  ;;  %v3672_v1 = vrot.slane %v3671_v16, 2  ;;  %v628_v32 = vpop.f32.mrf.mxu0 }
 0x27e   : > { %v4784_v58 = vunpack.c.l.b16 %v5521_v21  ;;  %v5615_v47 = vpack.c.bf16 %v4107_v57, %v4107_v57  ;;  %v3654_v59 = vmax.f32 %v3652_v36, %v3653_v28  ;;  %v3660_v50 = vrot.slane %v3659_v52, 1 }
 0x27f   : > { %v4908_v54 = vsel %vm4882_vm11, %v4783_v10, %v4907_v15  ;;  %v3667_v53 = vrot.slane %v3666_v51, 1  ;;  %v3673_v63 = vmax.f32 %v3671_v16, %v3672_v1  ;;  %v1305_v31 = vcombine.high %v6719_v11, %v6719_v11  ;;  %v5464_v16 = vld [vmem:[%s5896_s23 + $0x68] sm:$0xf] }
 0x280   : > { %v4909_v37 = vsel %vm4884_vm12, %v4784_v58, %v4908_v54  ;;  %v5075_v19 = vsel %vm6121_vm14, %v5615_v47, %v5434_v61  ;;  %v3661_v30 = vmax.f32 %v3659_v52, %v3660_v50  ;;  %v4168_v62 = vmax.f32 %v3654_v59, %v6704_v4 }
 0x281   : > { %v4984_v12 = vpack.c.b16 %v4909_v37, %v4909_v37  ;;  %5435 = vst [vmem:[%s5896_s23 + $0x2c] sm:$0x1] %v5075_v19  ;;  %v3668_v56 = vmax.f32 %v3666_v51, %v3667_v53  ;;  %v3674_v9 = vrot.slane %v3673_v63, 1  ;;  %v1312_v17 = vrot.slane %v6719_v11, %v5976_v46 }
 0x282   : > { %v4169_v49 = vmax.f32 %v3661_v30, %v6708_v41  ;;  %v5583_v22 = vpack.c.bf16 %v4168_v62, %v4168_v62  ;;  %v1319_v0 = vrot.slane %v1305_v31, %v5976_v46  ;;  %v765_v26 = vadd.f32 %v6673_v38, %v5716_v6 }
 0x283   : > { %v5072_v23 = vsel %vm6140_vm15, %v4984_v12, %v5432_v8  ;;  %v3675_v44 = vmax.f32 %v3673_v63, %v3674_v9  ;;  %v4170_v4 = vmax.f32 %v3668_v56, %v6711_v43  ;;  %v1320_v24 = vcombine.high %v1312_v17, %v1312_v17 }
 0x284   : > { %5433 = vst [vmem:[%s5896_s23 + $0x28] sm:$0xf] %v5072_v23  ;;  %v5584_v40 = vpack.c.bf16 %v4169_v49, %v4169_v49  ;;  %v4846_v7 = vunpack.c.l.b16 %v5583_v22  ;;  %v1321_v27 = vcombine.high %v1319_v0, %v1319_v0  ;;  %v2892_v11 = vsel %vm2275_vm5, %v1312_v17, -inf }
 0x285   : > { %v4171_v41 = vmax.f32 %v3675_v44, %v6714_v48  ;;  %v5585_v13 = vpack.c.bf16 %v4170_v4, %v4170_v4  ;;  %v2893_v45 = vrot.slane %v2892_v11, 4  ;;  %v2899_v2 = vsel %vm2275_vm5, %v1320_v24, -inf }
 0x286   : > { %v4847_v33 = vunpack.c.l.b16 %v5584_v40  ;;  %v4955_v42 = vsel %vm4880_vm10, %v4846_v7, %v6701_v18  ;;  %v2900_v43 = vrot.slane %v2899_v2, 4  ;;  %v2906_v29 = vsel %vm2275_vm5, %v1319_v0, -inf }
 0x287   : > { %v4848_v34 = vunpack.c.l.b16 %v5585_v13  ;;  %v5623_v20 = vpack.c.bf16 %v4171_v41, %v4171_v41  ;;  %v2894_v39 = vmax.f32 %v2892_v11, %v2893_v45  ;;  %v2907_v55 = vrot.slane %v2906_v29, 4 }
 0x288   : > { %v4956_v48 = vsel %vm4882_vm11, %v4847_v33, %v4955_v42  ;;  %v2901_v36 = vmax.f32 %v2899_v2, %v2900_v43  ;;  %v2913_v5 = vsel %vm2275_vm5, %v1321_v27, -inf  ;;  %v857_v25 = vmax.f32 %v765_v26, 0.0  ;;  %v756_v26 = vpop.f32.mrf.mxu1 }
 0x289   : > { %v4957_v60 = vsel %vm4884_vm12, %v4848_v34, %v4956_v48  ;;  %v5123_v18 = vsel %vm6121_vm14, %v5623_v20, %v5466_v35  ;;  %v2895_v57 = vrot.slane %v2894_v39, 2  ;;  %v2908_v21 = vmax.f32 %v2906_v29, %v2907_v55 }
 0x28a   : > { %v5000_v28 = vpack.c.b16 %v4957_v60, %v4957_v60  ;;  %5467 = vst [vmem:[%s5896_s23 + $0x6c] sm:$0x1] %v5123_v18  ;;  %v2902_v52 = vrot.slane %v2901_v36, 2  ;;  %v2914_v10 = vrot.slane %v2913_v5, 4  ;;  %v1849_v15 = vcombine.high %v857_v25, %v857_v25 }
 0x28b   : > { %v2896_v61 = vmax.f32 %v2894_v39, %v2895_v57  ;;  %v2909_v51 = vrot.slane %v2908_v21, 2  ;;  %v1856_v1 = vrot.slane %v857_v25, %v5976_v46  ;;  %v629_v58 = vadd.f32 %v6673_v38, %v628_v32 }
 0x28c   : > { %v5120_v47 = vsel %vm6140_vm15, %v5000_v28, %v5464_v16  ;;  %v2903_v59 = vmax.f32 %v2901_v36, %v2902_v52  ;;  %v2915_v50 = vmax.f32 %v2913_v5, %v2914_v10  ;;  %v1863_v54 = vrot.slane %v1849_v15, %v5976_v46 }
 0x28d   : > { %5465 = vst [vmem:[%s5896_s23 + $0x68] sm:$0xf] %v5120_v47  ;;  %v2897_v53 = vrot.slane %v2896_v61, 1  ;;  %v2910_v63 = vmax.f32 %v2908_v21, %v2909_v51  ;;  %v1864_v31 = vcombine.high %v1856_v1, %v1856_v1  ;;  %v3788_v6 = vsel %vm2275_vm5, %v1856_v1, -inf  ;;  %v5685_v51 = vpop.f32.mrf.mxu0 }
 0x28e   : > { %v2904_v37 = vrot.slane %v2903_v59, 1  ;;  %v2916_v8 = vrot.slane %v2915_v50, 2  ;;  %v1865_v19 = vcombine.high %v1863_v54, %v1863_v54  ;;  %v3789_v30 = vrot.slane %v3788_v6, 4 }
 0x28f   : > { %v6770_v62 = vmax.f32 %v2896_v61, %v2897_v53  ;;  %v2911_v12 = vrot.slane %v2910_v63, 1  ;;  %v3795_v56 = vsel %vm2275_vm5, %v1864_v31, -inf  ;;  %v3802_v9 = vsel %vm2275_vm5, %v1863_v54, -inf  ;;  %v5717_v31 = vpop.f32.mrf.mxu1 }
 0x290   : > { %v6774_v17 = vmax.f32 %v2903_v59, %v2904_v37  ;;  %v2917_v49 = vmax.f32 %v2915_v50, %v2916_v8  ;;  %v3790_v22 = vmax.f32 %v3788_v6, %v3789_v30  ;;  %v3796_v0 = vrot.slane %v3795_v56, 4 }
 0x291   : > { %v6776_v23 = vmax.f32 %v2910_v63, %v2911_v12  ;;  %v3803_v44 = vrot.slane %v3802_v9, 4  ;;  %v3809_v4 = vsel %vm2275_vm5, %v1865_v19, -inf  ;;  %v823_v24 = vmax.f32 %v629_v58, 0.0 }
 0x292   : > { %v2918_v40 = vrot.slane %v2917_v49, 1  ;;  %v3791_v7 = vrot.slane %v3790_v22, 2  ;;  %v3797_v27 = vmax.f32 %v3795_v56, %v3796_v0  ;;  %v3810_v11 = vrot.slane %v3809_v4, 4 }
 0x293   : > { %v3804_v41 = vmax.f32 %v3802_v9, %v3803_v44  ;;  %v1271_v13 = vcombine.high %v823_v24, %v823_v24  ;;  %v1278_v45 = vrot.slane %v823_v24, %v5976_v46  ;;  %v757_v2 = vadd.f32 %v6673_v38, %v756_v26 }
 0x294   : > { %v6781_v33 = vmax.f32 %v2917_v49, %v2918_v40  ;;  %v3792_v42 = vmax.f32 %v3790_v22, %v3791_v7  ;;  %v3798_v35 = vrot.slane %v3797_v27, 2  ;;  %v3811_v43 = vmax.f32 %v3809_v4, %v3810_v11 }
 0x295   : > { %v3805_v29 = vrot.slane %v3804_v41, 2  ;;  %v1285_v34 = vrot.slane %v1271_v13, %v5976_v46  ;;  %v1286_v20 = vcombine.high %v1278_v45, %v1278_v45  ;;  %v2836_v39 = vsel %vm2275_vm5, %v1278_v45, -inf }
 0x296   : > { %v3793_v55 = vrot.slane %v3792_v42, 1  ;;  %v3799_v48 = vmax.f32 %v3797_v27, %v3798_v35  ;;  %v3812_v36 = vrot.slane %v3811_v43, 2  ;;  %v2837_v5 = vrot.slane %v2836_v39, 4 }
 0x297   : > { %v3806_v25 = vmax.f32 %v3804_v41, %v3805_v29  ;;  %v1287_v32 = vcombine.high %v1285_v34, %v1285_v34  ;;  %v2843_v60 = vsel %vm2275_vm5, %v1286_v20, -inf  ;;  %v2850_v16 = vsel %vm2275_vm5, %v1285_v34, -inf }
 0x298   : > { %v6787_v18 = vmax.f32 %v3792_v42, %v3793_v55  ;;  %v3800_v57 = vrot.slane %v3799_v48, 1  ;;  %v3813_v21 = vmax.f32 %v3811_v43, %v3812_v36  ;;  %v2838_v28 = vmax.f32 %v2836_v39, %v2837_v5 }
 0x299   : > { %v3807_v52 = vrot.slane %v3806_v25, 1  ;;  %v2844_v10 = vrot.slane %v2843_v60, 4  ;;  %v2851_v15 = vrot.slane %v2850_v16, 4  ;;  %v2857_v61 = vsel %vm2275_vm5, %v1287_v32, -inf }
 0x29a   : > { %v6790_v1 = vmax.f32 %v3799_v48, %v3800_v57  ;;  %v3814_v58 = vrot.slane %v3813_v21, 1  ;;  %v2839_v47 = vrot.slane %v2838_v28, 2  ;;  %v2858_v59 = vrot.slane %v2857_v61, 4 }
 0x29b   : > { %v6792_v50 = vmax.f32 %v3806_v25, %v3807_v52  ;;  %v2845_v54 = vmax.f32 %v2843_v60, %v2844_v10  ;;  %v2852_v53 = vmax.f32 %v2850_v16, %v2851_v15  ;;  %v855_v63 = vmax.f32 %v757_v2, 0.0 }
 0x29c   : > { %v6794_v6 = vmax.f32 %v3813_v21, %v3814_v58  ;;  %v2840_v37 = vmax.f32 %v2838_v28, %v2839_v47  ;;  %v2859_v8 = vmax.f32 %v2857_v61, %v2858_v59  ;;  %v640_v19 = vadd.f32 %v6673_v38, %v5685_v51 }
 0x29d   : > { %v2846_v30 = vrot.slane %v2845_v54, 2  ;;  %v2853_v12 = vrot.slane %v2852_v53, 2  ;;  %v1815_v56 = vcombine.high %v855_v63, %v855_v63  ;;  %v1822_v9 = vrot.slane %v855_v63, %v5976_v46 }
 0x29e   : > { %v2841_v49 = vrot.slane %v2840_v37, 1  ;;  %v2860_v22 = vrot.slane %v2859_v8, 2  ;;  %v826_v0 = vmax.f32 %v640_v19, 0.0  ;;  %v6799_v26 = vadd.f32 %v6673_v38, %v5717_v31 }
 0x29f   : > { %v2847_v44 = vmax.f32 %v2845_v54, %v2846_v30  ;;  %v2854_v4 = vmax.f32 %v2852_v53, %v2853_v12  ;;  %v1829_v24 = vrot.slane %v1815_v56, %v5976_v46  ;;  %v1830_v40 = vcombine.high %v1822_v9, %v1822_v9 }
 0x2a0   : > { %v2842_v7 = vmax.f32 %v2840_v37, %v2841_v49  ;;  %v2861_v27 = vmax.f32 %v2859_v8, %v2860_v22  ;;  %v3732_v11 = vsel %vm2275_vm5, %v1822_v9, -inf  ;;  %v1322_v41 = vcombine.high %v826_v0, %v826_v0 }
 0x2a1   : > { %v2848_v13 = vrot.slane %v2847_v44, 1  ;;  %v2855_v45 = vrot.slane %v2854_v4, 1  ;;  %v1831_v2 = vcombine.high %v1829_v24, %v1829_v24  ;;  %v3733_v42 = vrot.slane %v3732_v11, 4 }
 0x2a2   : > { %v2862_v35 = vrot.slane %v2861_v27, 1  ;;  %v4108_v43 = vmax.f32 %v2842_v7, %v6770_v62  ;;  %v3739_v29 = vsel %vm2275_vm5, %v1830_v40, -inf  ;;  %v3746_v34 = vsel %vm2275_vm5, %v1829_v24, -inf }
 0x2a3   : > { %v2849_v20 = vmax.f32 %v2847_v44, %v2848_v13  ;;  %v2856_v39 = vmax.f32 %v2854_v4, %v2855_v45  ;;  %v3734_v55 = vmax.f32 %v3732_v11, %v3733_v42  ;;  %v3740_v48 = vrot.slane %v3739_v29, 4 }
 0x2a4   : > { %v2863_v36 = vmax.f32 %v2861_v27, %v2862_v35  ;;  %v5523_v5 = vpack.c.bf16 %v4108_v43, %v4108_v43  ;;  %v3747_v25 = vrot.slane %v3746_v34, 4  ;;  %v3753_v32 = vsel %vm2275_vm5, %v1831_v2, -inf }
 0x2a5   : > { %v4109_v60 = vmax.f32 %v2849_v20, %v6774_v17  ;;  %v4110_v16 = vmax.f32 %v2856_v39, %v6776_v23  ;;  %v3735_v57 = vrot.slane %v3734_v55, 2  ;;  %v3741_v21 = vmax.f32 %v3739_v29, %v3740_v48 }
 0x2a6   : > { %v4111_v62 = vmax.f32 %v2863_v36, %v6781_v33  ;;  %v4786_v28 = vunpack.c.l.b16 %v5523_v5  ;;  %v3748_v52 = vmax.f32 %v3746_v34, %v3747_v25  ;;  %v3754_v10 = vrot.slane %v3753_v32, 4 }
 0x2a7   : > { %v5524_v15 = vpack.c.bf16 %v4109_v60, %v4109_v60  ;;  %v5525_v61 = vpack.c.bf16 %v4110_v16, %v4110_v16  ;;  %v3736_v51 = vmax.f32 %v3734_v55, %v3735_v57  ;;  %v3742_v58 = vrot.slane %v3741_v21, 2 }
 0x2a8   : > { %v5526_v47 = vpack.c.bf16 %v4111_v62, %v4111_v62  ;;  %v3749_v59 = vrot.slane %v3748_v52, 2  ;;  %v3755_v54 = vmax.f32 %v3753_v32, %v3754_v10  ;;  %v1329_v53 = vrot.slane %v826_v0, %v5976_v46 }
 0x2a9   : > { %v4787_v63 = vunpack.c.l.b16 %v5524_v15  ;;  %v4788_v17 = vunpack.c.l.b16 %v5525_v61  ;;  %v3737_v31 = vrot.slane %v3736_v51, 1  ;;  %v3743_v23 = vmax.f32 %v3741_v21, %v3742_v58 }
 0x2aa   : > { %v4789_v37 = vunpack.c.l.b16 %v5526_v47  ;;  %v3750_v8 = vmax.f32 %v3748_v52, %v3749_v59  ;;  %v3756_v19 = vrot.slane %v3755_v54, 2  ;;  %v1336_v33 = vrot.slane %v1322_v41, %v5976_v46 }
 0x2ab   : > { %v4910_v30 = vsel %vm4874_vm6, %v4787_v63, %v4786_v28  ;;  %v3738_v12 = vmax.f32 %v3736_v51, %v3737_v31  ;;  %v3744_v56 = vrot.slane %v3743_v23, 1  ;;  %v1337_v9 = vcombine.high %v1329_v53, %v1329_v53  ;;  %v631_v51 = vpop.f32.mrf.mxu0 }
 0x2ac   : > { %v4911_v49 = vsel %vm4876_vm7, %v4788_v17, %v4910_v30  ;;  %v3751_v22 = vrot.slane %v3750_v8, 1  ;;  %v3757_v44 = vmax.f32 %v3755_v54, %v3756_v19  ;;  %v1338_v4 = vcombine.high %v1336_v33, %v1336_v33  ;;  %v759_v17 = vpop.f32.mrf.mxu1 }
 0x2ad   : > { %v3745_v0 = vmax.f32 %v3743_v23, %v3744_v56  ;;  %v4172_v24 = vmax.f32 %v3738_v12, %v6787_v18  ;;  %v2920_v40 = vsel %vm2275_vm5, %v1329_v53, -inf  ;;  %v2927_v7 = vsel %vm2275_vm5, %v1337_v9, -inf }
 0x2ae   : > { %v3752_v27 = vmax.f32 %v3750_v8, %v3751_v22  ;;  %v3758_v11 = vrot.slane %v3757_v44, 1  ;;  %v2921_v41 = vrot.slane %v2920_v40, 4  ;;  %v2928_v13 = vrot.slane %v2927_v7, 4 }
 0x2af   : > { %v4173_v45 = vmax.f32 %v3745_v0, %v6790_v1  ;;  %v5587_v2 = vpack.c.bf16 %v4172_v24, %v4172_v24  ;;  %v2934_v42 = vsel %vm2275_vm5, %v1336_v33, -inf  ;;  %v2941_v35 = vsel %vm2275_vm5, %v1338_v4, -inf }
 0x2b0   : > { %v3759_v43 = vmax.f32 %v3757_v44, %v3758_v11  ;;  %v4174_v29 = vmax.f32 %v3752_v27, %v6792_v50  ;;  %v2922_v34 = vmax.f32 %v2920_v40, %v2921_v41  ;;  %v2929_v18 = vmax.f32 %v2927_v7, %v2928_v13 }
 0x2b1   : > { %v5588_v20 = vpack.c.bf16 %v4173_v45, %v4173_v45  ;;  %v4850_v39 = vunpack.c.l.b16 %v5587_v2  ;;  %v2935_v55 = vrot.slane %v2934_v42, 4  ;;  %v2942_v48 = vrot.slane %v2941_v35, 4 }
 0x2b2   : > { %v4175_v36 = vmax.f32 %v3759_v43, %v6794_v6  ;;  %v5589_v5 = vpack.c.bf16 %v4174_v29, %v4174_v29  ;;  %v2923_v25 = vrot.slane %v2922_v34, 2  ;;  %v2930_v32 = vrot.slane %v2929_v18, 2 }
 0x2b3   : > { %v4851_v1 = vunpack.c.l.b16 %v5588_v20  ;;  %v2936_v60 = vmax.f32 %v2934_v42, %v2935_v55  ;;  %v2943_v16 = vmax.f32 %v2941_v35, %v2942_v48  ;;  %v858_v57 = vmax.f32 %v6799_v26, 0.0 }
 0x2b4   : > { %v5590_v21 = vpack.c.bf16 %v4175_v36, %v4175_v36  ;;  %v4852_v62 = vunpack.c.l.b16 %v5589_v5  ;;  %v2924_v28 = vmax.f32 %v2922_v34, %v2923_v25  ;;  %v2931_v50 = vmax.f32 %v2929_v18, %v2930_v32 }
 0x2b5   : > { %v4958_v52 = vsel %vm4874_vm6, %v4851_v1, %v4850_v39  ;;  %v2937_v10 = vrot.slane %v2936_v60, 2  ;;  %v2944_v15 = vrot.slane %v2943_v16, 2  ;;  %v1866_v61 = vcombine.high %v858_v57, %v858_v57 }
 0x2b6   : > { %v4853_v58 = vunpack.c.l.b16 %v5590_v21  ;;  %v4959_v6 = vsel %vm4876_vm7, %v4852_v62, %v4958_v52  ;;  %v2925_v47 = vrot.slane %v2924_v28, 1  ;;  %v2932_v59 = vrot.slane %v2931_v50, 1 }
 0x2b7   : > { %v2938_v54 = vmax.f32 %v2936_v60, %v2937_v10  ;;  %v2945_v53 = vmax.f32 %v2943_v16, %v2944_v15  ;;  %v1873_v63 = vrot.slane %v858_v57, %v5976_v46  ;;  %v1880_v26 = vrot.slane %v1866_v61, %v5976_v46 }
 0x2b8   : > { %v6827_v31 = vmax.f32 %v2924_v28, %v2925_v47  ;;  %v6829_v23 = vmax.f32 %v2931_v50, %v2932_v59  ;;  %v632_v8 = vadd.f32 %v6673_v38, %v631_v51  ;;  %v6833_v19 = vsel %vm4878_vm8, %v4789_v37, %v4911_v49 }
 0x2b9   : > { %v2939_v33 = vrot.slane %v2938_v54, 1  ;;  %v2946_v30 = vrot.slane %v2945_v53, 1  ;;  %v1881_v12 = vcombine.high %v1873_v63, %v1873_v63  ;;  %v1882_v56 = vcombine.high %v1880_v26, %v1880_v26 }
 0x2ba   : > { %v3816_v9 = vsel %vm2275_vm5, %v1873_v63, -inf  ;;  %v3830_v22 = vsel %vm2275_vm5, %v1880_v26, -inf  ;;  %v824_v44 = vmax.f32 %v632_v8, 0.0  ;;  %v760_v4 = vadd.f32 %v6673_v38, %v759_v17 }
 0x2bb   : > { %v6838_v0 = vmax.f32 %v2938_v54, %v2939_v33  ;;  %v6840_v24 = vmax.f32 %v2945_v53, %v2946_v30  ;;  %v3817_v40 = vrot.slane %v3816_v9, 4  ;;  %v3823_v7 = vsel %vm2275_vm5, %v1881_v12, -inf  ;;  %v5688_v53 = vpop.f32.mrf.mxu0  ;;  %v5720_v33 = vpop.f32.mrf.mxu1 }
 0x2bc   : > { %v3824_v37 = vrot.slane %v3823_v7, 4  ;;  %v3831_v49 = vrot.slane %v3830_v22, 4  ;;  %v3837_v27 = vsel %vm2275_vm5, %v1882_v56, -inf  ;;  %v1288_v11 = vcombine.high %v824_v44, %v824_v44 }
 0x2bd   : > { %v3818_v41 = vmax.f32 %v3816_v9, %v3817_v40  ;;  %v3838_v13 = vrot.slane %v3837_v27, 4  ;;  %v1295_v45 = vrot.slane %v824_v44, %v5976_v46  ;;  %v856_v2 = vmax.f32 %v760_v4, 0.0 }
 0x2be   : > { %v3825_v42 = vmax.f32 %v3823_v7, %v3824_v37  ;;  %v3832_v35 = vmax.f32 %v3830_v22, %v3831_v49  ;;  %v1302_v43 = vrot.slane %v1288_v11, %v5976_v46  ;;  %v6847_v29 = vsel %vm4878_vm8, %v4853_v58, %v4959_v6 }
 0x2bf   : > { %v3819_v34 = vrot.slane %v3818_v41, 2  ;;  %v3839_v18 = vmax.f32 %v3837_v27, %v3838_v13  ;;  %v1303_v20 = vcombine.high %v1295_v45, %v1295_v45  ;;  %v2864_v39 = vsel %vm2275_vm5, %v1295_v45, -inf }
 0x2c0   : > { %v3826_v55 = vrot.slane %v3825_v42, 2  ;;  %v3833_v48 = vrot.slane %v3832_v35, 2  ;;  %v1304_v36 = vcombine.high %v1302_v43, %v1302_v43  ;;  %v2865_v5 = vrot.slane %v2864_v39, 4 }
 0x2c1   : > { %v3820_v25 = vmax.f32 %v3818_v41, %v3819_v34  ;;  %v3840_v32 = vrot.slane %v3839_v18, 2  ;;  %v2871_v1 = vsel %vm2275_vm5, %v1303_v20, -inf  ;;  %v2878_v60 = vsel %vm2275_vm5, %v1302_v43, -inf }
 0x2c2   : > { %v3827_v16 = vmax.f32 %v3825_v42, %v3826_v55  ;;  %v3834_v57 = vmax.f32 %v3832_v35, %v3833_v48  ;;  %v2866_v21 = vmax.f32 %v2864_v39, %v2865_v5  ;;  %v2872_v62 = vrot.slane %v2871_v1, 4 }
 0x2c3   : > { %v3821_v28 = vrot.slane %v3820_v25, 1  ;;  %v3841_v50 = vmax.f32 %v3839_v18, %v3840_v32  ;;  %v2879_v52 = vrot.slane %v2878_v60, 4  ;;  %v2885_v10 = vsel %vm2275_vm5, %v1304_v36, -inf }
 0x2c4   : > { %v3828_v15 = vrot.slane %v3827_v16, 1  ;;  %v3835_v61 = vrot.slane %v3834_v57, 1  ;;  %v2867_v51 = vrot.slane %v2866_v21, 2  ;;  %v2873_v58 = vmax.f32 %v2871_v1, %v2872_v62 }
 0x2c5   : > { %v6853_v6 = vmax.f32 %v3820_v25, %v3821_v28  ;;  %v3842_v47 = vrot.slane %v3841_v50, 1  ;;  %v2880_v59 = vmax.f32 %v2878_v60, %v2879_v52  ;;  %v2886_v54 = vrot.slane %v2885_v10, 4 }
 0x2c6   : > { %v6855_v63 = vmax.f32 %v3827_v16, %v3828_v15  ;;  %v6857_v26 = vmax.f32 %v3834_v57, %v3835_v61  ;;  %v2868_v17 = vmax.f32 %v2866_v21, %v2867_v51  ;;  %v2874_v8 = vrot.slane %v2873_v58, 2 }
 0x2c7   : > { %v6859_v30 = vmax.f32 %v3841_v50, %v3842_v47  ;;  %v2881_v12 = vrot.slane %v2880_v59, 2  ;;  %v2887_v56 = vmax.f32 %v2885_v10, %v2886_v54  ;;  %v1832_v9 = vcombine.high %v856_v2, %v856_v2 }
 0x2c8   : > { %v2869_v22 = vrot.slane %v2868_v17, 1  ;;  %v2875_v44 = vmax.f32 %v2873_v58, %v2874_v8  ;;  %v1839_v4 = vrot.slane %v856_v2, %v5976_v46  ;;  %v653_v40 = vadd.f32 %v6673_v38, %v5688_v53  ;;  %v5438_v58 = vld [vmem:[%s5896_s23 + $0x34] sm:$0x1] }
 0x2c9   : > { %v2882_v7 = vmax.f32 %v2880_v59, %v2881_v12  ;;  %v2888_v37 = vrot.slane %v2887_v56, 2  ;;  %v1846_v49 = vrot.slane %v1832_v9, %v5976_v46  ;;  %v781_v27 = vadd.f32 %v6673_v38, %v5720_v33  ;;  %v5436_v9 = vld [vmem:[%s5896_s23 + $0x30] sm:$0xf] }
 0x2ca   : > { %v2870_v11 = vmax.f32 %v2868_v17, %v2869_v22  ;;  %v2876_v41 = vrot.slane %v2875_v44, 1  ;;  %v1847_v13 = vcombine.high %v1839_v4, %v1839_v4  ;;  %v3760_v45 = vsel %vm2275_vm5, %v1839_v4, -inf }
 0x2cb   : > { %v2883_v42 = vrot.slane %v2882_v7, 1  ;;  %v2889_v35 = vmax.f32 %v2887_v56, %v2888_v37  ;;  %v1848_v43 = vcombine.high %v1846_v49, %v1846_v49  ;;  %v3761_v34 = vrot.slane %v3760_v45, 4 }
 0x2cc   : > { %v2877_v18 = vmax.f32 %v2875_v44, %v2876_v41  ;;  %v4112_v2 = vmax.f32 %v2870_v11, %v6827_v31  ;;  %v3767_v20 = vsel %vm2275_vm5, %v1847_v13, -inf  ;;  %v3774_v39 = vsel %vm2275_vm5, %v1846_v49, -inf }
 0x2cd   : > { %v2884_v55 = vmax.f32 %v2882_v7, %v2883_v42  ;;  %v2890_v48 = vrot.slane %v2889_v35, 1  ;;  %v3762_v36 = vmax.f32 %v3760_v45, %v3761_v34  ;;  %v3768_v38 = vrot.slane %v3767_v20, 4 }
 0x2ce   : > { %v4113_v5 = vmax.f32 %v2877_v18, %v6829_v23  ;;  %v5527_v25 = vpack.c.bf16 %v4112_v2, %v4112_v2  ;;  %v3775_v32 = vrot.slane %v3774_v39, 4  ;;  %v3781_v1 = vsel %vm2275_vm5, %v1848_v43, -inf }
 0x2cf   : > { %v2891_v60 = vmax.f32 %v2889_v35, %v2890_v48  ;;  %v4114_v16 = vmax.f32 %v2884_v55, %v6838_v0  ;;  %v3763_v57 = vrot.slane %v3762_v36, 2  ;;  %v3769_v31 = vmax.f32 %v3767_v20, %v3768_v38 }
 0x2d0   : > { %v5528_v21 = vpack.c.bf16 %v4113_v5, %v4113_v5  ;;  %v4790_v62 = vunpack.c.l.b16 %v5527_v25  ;;  %v3776_v28 = vmax.f32 %v3774_v39, %v3775_v32  ;;  %v3782_v50 = vrot.slane %v3781_v1, 4 }
 0x2d1   : > { %v4115_v52 = vmax.f32 %v2891_v60, %v6840_v24  ;;  %v5529_v10 = vpack.c.bf16 %v4114_v16, %v4114_v16  ;;  %v3764_v15 = vmax.f32 %v3762_v36, %v3763_v57  ;;  %v3770_v23 = vrot.slane %v3769_v31, 2  ;;  %v5470_v57 = vld [vmem:[%s5896_s23 + $0x74] sm:$0x1] }
 0x2d2   : > { %v4791_v61 = vunpack.c.l.b16 %v5528_v21  ;;  %v4913_v51 = vsel %vm4880_vm10, %v4790_v62, %v6833_v19  ;;  %v3777_v47 = vrot.slane %v3776_v28, 2  ;;  %v3783_v0 = vmax.f32 %v3781_v1, %v3782_v50 }
 0x2d3   : > { %v4792_v59 = vunpack.c.l.b16 %v5529_v10  ;;  %v5616_v54 = vpack.c.bf16 %v4115_v52, %v4115_v52  ;;  %v3765_v53 = vrot.slane %v3764_v15, 1  ;;  %v3771_v17 = vmax.f32 %v3769_v31, %v3770_v23  ;;  %v644_v23 = vpop.f32.mrf.mxu0 }
 0x2d4   : > { %v4914_v8 = vsel %vm4882_vm11, %v4791_v61, %v4913_v51  ;;  %v3778_v33 = vmax.f32 %v3776_v28, %v3777_v47  ;;  %v3784_v24 = vrot.slane %v3783_v0, 2  ;;  %v829_v12 = vmax.f32 %v653_v40, 0.0  ;;  %v5468_v51 = vld [vmem:[%s5896_s23 + $0x70] sm:$0xf] }
 0x2d5   : > { %v4915_v56 = vsel %vm4884_vm12, %v4792_v59, %v4914_v8  ;;  %v5081_v22 = vsel %vm6121_vm14, %v5616_v54, %v5438_v58  ;;  %v3766_v19 = vmax.f32 %v3764_v15, %v3765_v53  ;;  %v3772_v44 = vrot.slane %v3771_v17, 1 }
 0x2d6   : > { %v4986_v4 = vpack.c.b16 %v4915_v56, %v4915_v56  ;;  %5439 = vst [vmem:[%s5896_s23 + $0x34] sm:$0x1] %v5081_v22  ;;  %v3779_v7 = vrot.slane %v3778_v33, 1  ;;  %v3785_v37 = vmax.f32 %v3783_v0, %v3784_v24  ;;  %v1373_v49 = vcombine.high %v829_v12, %v829_v12  ;;  %v6909_v24 = vld [vmem:[%s7183_s2] ss:$0 sm:$0xff] }
 0x2d7   : > { %v3773_v11 = vmax.f32 %v3771_v17, %v3772_v44  ;;  %v4176_v41 = vmax.f32 %v3766_v19, %v6853_v6  ;;  %v1380_v13 = vrot.slane %v829_v12, %v5976_v46  ;;  %v861_v40 = vmax.f32 %v781_v27, 0.0 }
 0x2d8   : > { %v5078_v45 = vsel %vm6140_vm15, %v4986_v4, %v5436_v9  ;;  %v3780_v42 = vmax.f32 %v3778_v33, %v3779_v7  ;;  %v3786_v35 = vrot.slane %v3785_v37, 1  ;;  %v1387_v43 = vrot.slane %v1373_v49, %v5976_v46 }
 0x2d9   : > { %5437 = vst [vmem:[%s5896_s23 + $0x30] sm:$0xf] %v5078_v45  ;;  %v4177_v34 = vmax.f32 %v3773_v11, %v6855_v63  ;;  %v5591_v18 = vpack.c.bf16 %v4176_v41, %v4176_v41  ;;  %v1388_v2 = vcombine.high %v1380_v13, %v1380_v13  ;;  %v3004_v20 = vsel %vm2275_vm5, %v1380_v13, -inf }
 0x2da   : > { %v3787_v39 = vmax.f32 %v3785_v37, %v3786_v35  ;;  %v4178_v6 = vmax.f32 %v3780_v42, %v6857_v26  ;;  %v1389_v55 = vcombine.high %v1387_v43, %v1387_v43  ;;  %v3005_v27 = vrot.slane %v3004_v20, 4 }
 0x2db   : > { %v5592_v48 = vpack.c.bf16 %v4177_v34, %v4177_v34  ;;  %v4854_v36 = vunpack.c.l.b16 %v5591_v18  ;;  %v3011_v38 = vsel %vm2275_vm5, %v1388_v2, -inf  ;;  %v3018_v5 = vsel %vm2275_vm5, %v1387_v43, -inf  ;;  %v5689_v34 = vpop.f32.mrf.mxu0 }
 0x2dc   : > { %v4179_v25 = vmax.f32 %v3787_v39, %v6859_v30  ;;  %v5593_v32 = vpack.c.bf16 %v4178_v6, %v4178_v6  ;;  %v3006_v63 = vmax.f32 %v3004_v20, %v3005_v27  ;;  %v3012_v1 = vrot.slane %v3011_v38, 4 }
 0x2dd   : > { %v4855_v60 = vunpack.c.l.b16 %v5592_v48  ;;  %v4961_v16 = vsel %vm4880_vm10, %v4854_v36, %v6847_v29  ;;  %v3019_v26 = vrot.slane %v3018_v5, 4  ;;  %v3025_v31 = vsel %vm2275_vm5, %v1389_v55, -inf }
 0x2de   : > { %v4856_v21 = vunpack.c.l.b16 %v5593_v32  ;;  %v5624_v62 = vpack.c.bf16 %v4179_v25, %v4179_v25  ;;  %v3007_v28 = vrot.slane %v3006_v63, 2  ;;  %v3013_v50 = vmax.f32 %v3011_v38, %v3012_v1 }
 0x2df   : > { %v4962_v52 = vsel %vm4882_vm11, %v4855_v60, %v4961_v16  ;;  %v3020_v30 = vmax.f32 %v3018_v5, %v3019_v26  ;;  %v3026_v10 = vrot.slane %v3025_v31, 4  ;;  %v1917_v15 = vcombine.high %v861_v40, %v861_v40 }
 0x2e0   : > { %v4963_v61 = vsel %vm4884_vm12, %v4856_v21, %v4962_v52  ;;  %v5129_v29 = vsel %vm6121_vm14, %v5624_v62, %v5470_v57  ;;  %v3008_v58 = vmax.f32 %v3006_v63, %v3007_v28  ;;  %v3014_v47 = vrot.slane %v3013_v50, 2 }
 0x2e1   : > { %v5002_v0 = vpack.c.b16 %v4963_v61, %v4963_v61  ;;  %5471 = vst [vmem:[%s5896_s23 + $0x74] sm:$0x1] %v5129_v29  ;;  %v3021_v59 = vrot.slane %v3020_v30, 2  ;;  %v3027_v54 = vmax.f32 %v3025_v31, %v3026_v10  ;;  %v1924_v53 = vrot.slane %v861_v40, %v5976_v46  ;;  %v772_v40 = vpop.f32.mrf.mxu1 }
 0x2e2   : > { %v3009_v17 = vrot.slane %v3008_v58, 1  ;;  %v3015_v8 = vmax.f32 %v3013_v50, %v3014_v47  ;;  %v1931_v33 = vrot.slane %v1917_v15, %v5976_v46  ;;  %v645_v12 = vadd.f32 %v6909_v24, %v644_v23 }
 0x2e3   : > { %v5126_v56 = vsel %vm6140_vm15, %v5002_v0, %v5468_v51  ;;  %v3022_v9 = vmax.f32 %v3020_v30, %v3021_v59  ;;  %v3028_v22 = vrot.slane %v3027_v54, 2  ;;  %v1932_v19 = vcombine.high %v1924_v53, %v1924_v53 }
 0x2e4   : > { %5469 = vst [vmem:[%s5896_s23 + $0x70] sm:$0xf] %v5126_v56  ;;  %v6915_v44 = vmax.f32 %v3008_v58, %v3009_v17  ;;  %v3016_v4 = vrot.slane %v3015_v8, 1  ;;  %v1933_v7 = vcombine.high %v1931_v33, %v1931_v33  ;;  %v3900_v37 = vsel %vm2275_vm5, %v1924_v53, -inf }
 0x2e5   : > { %v3023_v49 = vrot.slane %v3022_v9, 1  ;;  %v3029_v11 = vmax.f32 %v3027_v54, %v3028_v22  ;;  %v3901_v41 = vrot.slane %v3900_v37, 4  ;;  %v3907_v13 = vsel %vm2275_vm5, %v1932_v19, -inf }
 0x2e6   : > { %v6919_v45 = vmax.f32 %v3015_v8, %v3016_v4  ;;  %v3908_v42 = vrot.slane %v3907_v13, 4  ;;  %v3914_v35 = vsel %vm2275_vm5, %v1931_v33, -inf  ;;  %v3921_v43 = vsel %vm2275_vm5, %v1933_v7, -inf }
 0x2e7   : > { %v6923_v18 = vmax.f32 %v3022_v9, %v3023_v49  ;;  %v3030_v2 = vrot.slane %v3029_v11, 1  ;;  %v3902_v20 = vmax.f32 %v3900_v37, %v3901_v41  ;;  %v3915_v39 = vrot.slane %v3914_v35, 4 }
 0x2e8   : > { %v3909_v6 = vmax.f32 %v3907_v13, %v3908_v42  ;;  %v3922_v55 = vrot.slane %v3921_v43, 4  ;;  %v827_v27 = vmax.f32 %v645_v12, 0.0  ;;  %v773_v48 = vadd.f32 %v6909_v24, %v772_v40 }
 0x2e9   : > { %v6926_v36 = vmax.f32 %v3029_v11, %v3030_v2  ;;  %v3903_v38 = vrot.slane %v3902_v20, 2  ;;  %v3916_v5 = vmax.f32 %v3914_v35, %v3915_v39  ;;  %v656_v25 = vadd.f32 %v6909_v24, %v5689_v34 }
 0x2ea   : > { %v3910_v32 = vrot.slane %v3909_v6, 2  ;;  %v3923_v63 = vmax.f32 %v3921_v43, %v3922_v55  ;;  %v1339_v1 = vcombine.high %v827_v27, %v827_v27  ;;  %v1346_v60 = vrot.slane %v827_v27, %v5976_v46 }
 0x2eb   : > { %v3904_v16 = vmax.f32 %v3902_v20, %v3903_v38  ;;  %v3917_v57 = vrot.slane %v3916_v5, 2  ;;  %v859_v26 = vmax.f32 %v773_v48, 0.0  ;;  %v6930_v31 = vmax.f32 %v656_v25, 0.0 }
 0x2ec   : > { %v3911_v21 = vmax.f32 %v3909_v6, %v3910_v32  ;;  %v3924_v62 = vrot.slane %v3923_v63, 2  ;;  %v1353_v28 = vrot.slane %v1339_v1, %v5976_v46  ;;  %v1354_v50 = vcombine.high %v1346_v60, %v1346_v60 }
 0x2ed   : > { %v3905_v52 = vrot.slane %v3904_v16, 1  ;;  %v3918_v30 = vmax.f32 %v3916_v5, %v3917_v57  ;;  %v2948_v10 = vsel %vm2275_vm5, %v1346_v60, -inf  ;;  %v1883_v15 = vcombine.high %v859_v26, %v859_v26 }
 0x2ee   : > { %v3912_v23 = vrot.slane %v3911_v21, 1  ;;  %v3925_v61 = vmax.f32 %v3923_v63, %v3924_v62  ;;  %v1355_v51 = vcombine.high %v1353_v28, %v1353_v28  ;;  %v2949_v29 = vrot.slane %v2948_v10, 4 }
 0x2ef   : > { %v6934_v58 = vmax.f32 %v3904_v16, %v3905_v52  ;;  %v3919_v47 = vrot.slane %v3918_v30, 1  ;;  %v2955_v0 = vsel %vm2275_vm5, %v1354_v50, -inf  ;;  %v2962_v59 = vsel %vm2275_vm5, %v1353_v28, -inf }
 0x2f0   : > { %v6938_v54 = vmax.f32 %v3911_v21, %v3912_v23  ;;  %v3926_v53 = vrot.slane %v3925_v61, 1  ;;  %v2950_v17 = vmax.f32 %v2948_v10, %v2949_v29  ;;  %v2956_v8 = vrot.slane %v2955_v0, 4 }
 0x2f1   : > { %v6940_v33 = vmax.f32 %v3918_v30, %v3919_v47  ;;  %v2963_v12 = vrot.slane %v2962_v59, 4  ;;  %v2969_v56 = vsel %vm2275_vm5, %v1355_v51, -inf  ;;  %v1890_v9 = vrot.slane %v859_v26, %v5976_v46 }
 0x2f2   : > { %v6944_v22 = vmax.f32 %v3925_v61, %v3926_v53  ;;  %v2951_v19 = vrot.slane %v2950_v17, 2  ;;  %v2957_v4 = vmax.f32 %v2955_v0, %v2956_v8  ;;  %v2970_v7 = vrot.slane %v2969_v56, 4 }
 0x2f3   : > { %v2964_v37 = vmax.f32 %v2962_v59, %v2963_v12  ;;  %v1897_v49 = vrot.slane %v1883_v15, %v5976_v46  ;;  %v1898_v11 = vcombine.high %v1890_v9, %v1890_v9  ;;  %v3844_v41 = vsel %vm2275_vm5, %v1890_v9, -inf }
 0x2f4   : > { %v2952_v13 = vmax.f32 %v2950_v17, %v2951_v19  ;;  %v2958_v40 = vrot.slane %v2957_v4, 2  ;;  %v2971_v42 = vmax.f32 %v2969_v56, %v2970_v7  ;;  %v3845_v35 = vrot.slane %v3844_v41, 4 }
 0x2f5   : > { %v2965_v43 = vrot.slane %v2964_v37, 2  ;;  %v1899_v34 = vcombine.high %v1897_v49, %v1897_v49  ;;  %v3851_v2 = vsel %vm2275_vm5, %v1898_v11, -inf  ;;  %v3858_v20 = vsel %vm2275_vm5, %v1897_v49, -inf }
 0x2f6   : > { %v2953_v39 = vrot.slane %v2952_v13, 1  ;;  %v2959_v6 = vmax.f32 %v2957_v4, %v2958_v40  ;;  %v2972_v55 = vrot.slane %v2971_v42, 2  ;;  %v3846_v27 = vmax.f32 %v3844_v41, %v3845_v35 }
 0x2f7   : > { %v2966_v48 = vmax.f32 %v2964_v37, %v2965_v43  ;;  %v3852_v38 = vrot.slane %v3851_v2, 4  ;;  %v3859_v5 = vrot.slane %v3858_v20, 4  ;;  %v3865_v25 = vsel %vm2275_vm5, %v1899_v34, -inf }
 0x2f8   : > { %v2954_v32 = vmax.f32 %v2952_v13, %v2953_v39  ;;  %v2960_v63 = vrot.slane %v2959_v6, 1  ;;  %v2973_v1 = vmax.f32 %v2971_v42, %v2972_v55  ;;  %v3847_v60 = vrot.slane %v3846_v27, 2  ;;  %v5721_v39 = vpop.f32.mrf.mxu1 }
 0x2f9   : > { %v2967_v16 = vrot.slane %v2966_v48, 1  ;;  %v3853_v57 = vmax.f32 %v3851_v2, %v3852_v38  ;;  %v3860_v26 = vmax.f32 %v3858_v20, %v3859_v5  ;;  %v3866_v21 = vrot.slane %v3865_v25, 4 }
 0x2fa   : > { %v2961_v62 = vmax.f32 %v2959_v6, %v2960_v63  ;;  %v2974_v28 = vrot.slane %v2973_v1, 1  ;;  %v4116_v50 = vmax.f32 %v2954_v32, %v6915_v44  ;;  %v3848_v52 = vmax.f32 %v3846_v27, %v3847_v60 }
 0x2fb   : > { %v2968_v30 = vmax.f32 %v2966_v48, %v2967_v16  ;;  %v3854_v10 = vrot.slane %v3853_v57, 2  ;;  %v3861_v15 = vrot.slane %v3860_v26, 2  ;;  %v3867_v23 = vmax.f32 %v3865_v25, %v3866_v21 }
 0x2fc   : > { %v2975_v61 = vmax.f32 %v2973_v1, %v2974_v28  ;;  %v4117_v51 = vmax.f32 %v2961_v62, %v6919_v45  ;;  %v5531_v29 = vpack.c.bf16 %v4116_v50, %v4116_v50  ;;  %v3849_v47 = vrot.slane %v3848_v52, 1 }
 0x2fd   : > { %v4118_v0 = vmax.f32 %v2968_v30, %v6923_v18  ;;  %v3855_v59 = vmax.f32 %v3853_v57, %v3854_v10  ;;  %v3862_v53 = vmax.f32 %v3860_v26, %v3861_v15  ;;  %v3868_v17 = vrot.slane %v3867_v23, 2 }
 0x2fe   : > { %v4119_v8 = vmax.f32 %v2975_v61, %v6926_v36  ;;  %v5532_v12 = vpack.c.bf16 %v4117_v51, %v4117_v51  ;;  %v4794_v56 = vunpack.c.l.b16 %v5531_v29  ;;  %v3850_v44 = vmax.f32 %v3848_v52, %v3849_v47 }
 0x2ff   : > { %v5533_v9 = vpack.c.bf16 %v4118_v0, %v4118_v0  ;;  %v3856_v19 = vrot.slane %v3855_v59, 1  ;;  %v3863_v4 = vrot.slane %v3862_v53, 1  ;;  %v3869_v7 = vmax.f32 %v3867_v23, %v3868_v17 }
 0x300   : > { %v5534_v37 = vpack.c.bf16 %v4119_v8, %v4119_v8  ;;  %v4795_v49 = vunpack.c.l.b16 %v5532_v12  ;;  %v4180_v45 = vmax.f32 %v3850_v44, %v6934_v58  ;;  %v1390_v11 = vcombine.high %v6930_v31, %v6930_v31 }
 0x301   : > { %v4796_v18 = vunpack.c.l.b16 %v5533_v9  ;;  %v3857_v41 = vmax.f32 %v3855_v59, %v3856_v19  ;;  %v3864_v13 = vmax.f32 %v3862_v53, %v3863_v4  ;;  %v3870_v40 = vrot.slane %v3869_v7, 1 }
 0x302   : > { %v4797_v42 = vunpack.c.l.b16 %v5534_v37  ;;  %v4916_v36 = vsel %vm4874_vm6, %v4795_v49, %v4794_v56  ;;  %v5595_v35 = vpack.c.bf16 %v4180_v45, %v4180_v45  ;;  %v1397_v43 = vrot.slane %v6930_v31, %v5976_v46 }
 0x303   : > { %v4917_v34 = vsel %vm4876_vm7, %v4796_v18, %v4916_v36  ;;  %v3871_v2 = vmax.f32 %v3869_v7, %v3870_v40  ;;  %v4181_v20 = vmax.f32 %v3857_v41, %v6938_v54  ;;  %v4182_v58 = vmax.f32 %v3864_v13, %v6940_v33 }
 0x304   : > { %v4858_v6 = vunpack.c.l.b16 %v5595_v35  ;;  %v1404_v55 = vrot.slane %v1390_v11, %v5976_v46  ;;  %v1405_v27 = vcombine.high %v1397_v43, %v1397_v43  ;;  %v3032_v48 = vsel %vm2275_vm5, %v1397_v43, -inf }
 0x305   : > { %v4183_v38 = vmax.f32 %v3871_v2, %v6944_v22  ;;  %v5596_v5 = vpack.c.bf16 %v4181_v20, %v4181_v20  ;;  %v5597_v25 = vpack.c.bf16 %v4182_v58, %v4182_v58  ;;  %v3033_v32 = vrot.slane %v3032_v48, 4  ;;  %v647_v22 = vpop.f32.mrf.mxu0  ;;  %v775_v20 = vpop.f32.mrf.mxu1 }
 0x306   : > { %v1406_v31 = vcombine.high %v1404_v55, %v1404_v55  ;;  %v3039_v63 = vsel %vm2275_vm5, %v1405_v27, -inf  ;;  %v3046_v1 = vsel %vm2275_vm5, %v1404_v55, -inf  ;;  %v784_v54 = vadd.f32 %v6909_v24, %v5721_v39 }
 0x307   : > { %v5598_v33 = vpack.c.bf16 %v4183_v38, %v4183_v38  ;;  %v4859_v60 = vunpack.c.l.b16 %v5596_v5  ;;  %v4860_v16 = vunpack.c.l.b16 %v5597_v25  ;;  %v3034_v57 = vmax.f32 %v3032_v48, %v3033_v32 }
 0x308   : > { %v3040_v26 = vrot.slane %v3039_v63, 4  ;;  %v3047_v21 = vrot.slane %v3046_v1, 4  ;;  %v3053_v62 = vsel %vm2275_vm5, %v1406_v31, -inf  ;;  %v862_v28 = vmax.f32 %v784_v54, 0.0 }
 0x309   : > { %v4861_v50 = vunpack.c.l.b16 %v5598_v33  ;;  %v4964_v52 = vsel %vm4874_vm6, %v4859_v60, %v4858_v6  ;;  %v3035_v30 = vrot.slane %v3034_v57, 2  ;;  %v3054_v10 = vrot.slane %v3053_v62, 4 }
 0x30a   : > { %v4965_v15 = vsel %vm4876_vm7, %v4860_v16, %v4964_v52  ;;  %v3041_v23 = vmax.f32 %v3039_v63, %v3040_v26  ;;  %v3048_v61 = vmax.f32 %v3046_v1, %v3047_v21  ;;  %v1934_v51 = vcombine.high %v862_v28, %v862_v28 }
 0x30b   : > { %v3036_v29 = vmax.f32 %v3034_v57, %v3035_v30  ;;  %v3055_v47 = vmax.f32 %v3053_v62, %v3054_v10  ;;  %v1941_v0 = vrot.slane %v862_v28, %v5976_v46  ;;  %v648_v59 = vadd.f32 %v6909_v24, %v647_v22 }
 0x30c   : > { %v3042_v53 = vrot.slane %v3041_v23, 2  ;;  %v3049_v17 = vrot.slane %v3048_v61, 2  ;;  %v1948_v8 = vrot.slane %v1934_v51, %v5976_v46  ;;  %v6977_v12 = vsel %vm4878_vm8, %v4797_v42, %v4917_v34 }
 0x30d   : > { %v3037_v56 = vrot.slane %v3036_v29, 1  ;;  %v3056_v44 = vrot.slane %v3055_v47, 2  ;;  %v1949_v9 = vcombine.high %v1941_v0, %v1941_v0  ;;  %v3928_v19 = vsel %vm2275_vm5, %v1941_v0, -inf }
 0x30e   : > { %v3043_v4 = vmax.f32 %v3041_v23, %v3042_v53  ;;  %v3050_v7 = vmax.f32 %v3048_v61, %v3049_v17  ;;  %v1950_v37 = vcombine.high %v1948_v8, %v1948_v8  ;;  %v3929_v49 = vrot.slane %v3928_v19, 4  ;;  %v5692_v17 = vpop.f32.mrf.mxu0 }
 0x30f   : > { %v6980_v45 = vmax.f32 %v3036_v29, %v3037_v56  ;;  %v3057_v11 = vmax.f32 %v3055_v47, %v3056_v44  ;;  %v3935_v18 = vsel %vm2275_vm5, %v1949_v9, -inf  ;;  %v3942_v41 = vsel %vm2275_vm5, %v1948_v8, -inf }
 0x310   : > { %v3044_v13 = vrot.slane %v3043_v4, 1  ;;  %v3051_v40 = vrot.slane %v3050_v7, 1  ;;  %v3930_v42 = vmax.f32 %v3928_v19, %v3929_v49  ;;  %v3936_v36 = vrot.slane %v3935_v18, 4 }
 0x311   : > { %v3058_v35 = vrot.slane %v3057_v11, 1  ;;  %v3943_v43 = vrot.slane %v3942_v41, 4  ;;  %v3949_v34 = vsel %vm2275_vm5, %v1950_v37, -inf  ;;  %v828_v2 = vmax.f32 %v648_v59, 0.0 }
 0x312   : > { %v6985_v58 = vmax.f32 %v3043_v4, %v3044_v13  ;;  %v6987_v39 = vmax.f32 %v3050_v7, %v3051_v40  ;;  %v3931_v6 = vrot.slane %v3930_v42, 2  ;;  %v3937_v55 = vmax.f32 %v3935_v18, %v3936_v36 }
 0x313   : > { %v6989_v27 = vmax.f32 %v3057_v11, %v3058_v35  ;;  %v3944_v48 = vmax.f32 %v3942_v41, %v3943_v43  ;;  %v3950_v38 = vrot.slane %v3949_v34, 4  ;;  %v1356_v5 = vcombine.high %v828_v2, %v828_v2 }
 0x314   : > { %v3932_v25 = vmax.f32 %v3930_v42, %v3931_v6  ;;  %v3938_v32 = vrot.slane %v3937_v55, 2  ;;  %v1363_v31 = vrot.slane %v828_v2, %v5976_v46  ;;  %v776_v63 = vadd.f32 %v6909_v24, %v775_v20 }
 0x315   : > { %v3945_v1 = vrot.slane %v3944_v48, 2  ;;  %v3951_v54 = vmax.f32 %v3949_v34, %v3950_v38  ;;  %v1370_v33 = vrot.slane %v1356_v5, %v5976_v46  ;;  %v6995_v60 = vsel %vm4878_vm8, %v4861_v50, %v4965_v15 }
 0x316   : > { %v3933_v16 = vrot.slane %v3932_v25, 1  ;;  %v3939_v57 = vmax.f32 %v3937_v55, %v3938_v32  ;;  %v1371_v26 = vcombine.high %v1363_v31, %v1363_v31  ;;  %v2976_v21 = vsel %vm2275_vm5, %v1363_v31, -inf }
 0x317   : > { %v3946_v62 = vmax.f32 %v3944_v48, %v3945_v1  ;;  %v3952_v28 = vrot.slane %v3951_v54, 2  ;;  %v1372_v22 = vcombine.high %v1370_v33, %v1370_v33  ;;  %v2977_v52 = vrot.slane %v2976_v21, 4 }
 0x318   : > { %v6998_v30 = vmax.f32 %v3932_v25, %v3933_v16  ;;  %v3940_v10 = vrot.slane %v3939_v57, 1  ;;  %v2983_v23 = vsel %vm2275_vm5, %v1371_v26, -inf  ;;  %v2990_v61 = vsel %vm2275_vm5, %v1370_v33, -inf }
 0x319   : > { %v3947_v51 = vrot.slane %v3946_v62, 1  ;;  %v3953_v29 = vmax.f32 %v3951_v54, %v3952_v28  ;;  %v2978_v50 = vmax.f32 %v2976_v21, %v2977_v52  ;;  %v2984_v15 = vrot.slane %v2983_v23, 4 }
 0x31a   : > { %v7002_v47 = vmax.f32 %v3939_v57, %v3940_v10  ;;  %v2991_v0 = vrot.slane %v2990_v61, 4  ;;  %v2997_v59 = vsel %vm2275_vm5, %v1372_v22, -inf  ;;  %v860_v53 = vmax.f32 %v776_v63, 0.0 }
 0x31b   : > { %v7005_v8 = vmax.f32 %v3946_v62, %v3947_v51  ;;  %v3954_v56 = vrot.slane %v3953_v29, 1  ;;  %v2979_v44 = vrot.slane %v2978_v50, 2  ;;  %v2985_v9 = vmax.f32 %v2983_v23, %v2984_v15 }
 0x31c   : > { %v2992_v19 = vmax.f32 %v2990_v61, %v2991_v0  ;;  %v2998_v4 = vrot.slane %v2997_v59, 4  ;;  %v1900_v7 = vcombine.high %v860_v53, %v860_v53  ;;  %v1907_v37 = vrot.slane %v860_v53, %v5976_v46 }
 0x31d   : > { %v7008_v49 = vmax.f32 %v3953_v29, %v3954_v56  ;;  %v2980_v11 = vmax.f32 %v2978_v50, %v2979_v44  ;;  %v2986_v18 = vrot.slane %v2985_v9, 2  ;;  %v669_v41 = vadd.f32 %v6909_v24, %v5692_v17 }
 0x31e   : > { %v2993_v13 = vrot.slane %v2992_v19, 2  ;;  %v2999_v40 = vmax.f32 %v2997_v59, %v2998_v4  ;;  %v1914_v42 = vrot.slane %v1900_v7, %v5976_v46  ;;  %v1915_v36 = vcombine.high %v1907_v37, %v1907_v37  ;;  %v5442_v4 = vld [vmem:[%s5896_s23 + $0x3c] sm:$0x1] }
 0x31f   : > { %v2981_v35 = vrot.slane %v2980_v11, 1  ;;  %v2987_v43 = vmax.f32 %v2985_v9, %v2986_v18  ;;  %v3872_v34 = vsel %vm2275_vm5, %v1907_v37, -inf  ;;  %v7013_v2 = vmax.f32 %v669_v41, 0.0 }
 0x320   : > { %v2994_v20 = vmax.f32 %v2992_v19, %v2993_v13  ;;  %v3000_v6 = vrot.slane %v2999_v40, 2  ;;  %v1916_v55 = vcombine.high %v1914_v42, %v1914_v42  ;;  %v3873_v48 = vrot.slane %v3872_v34, 4 }
 0x321   : > { %v2982_v38 = vmax.f32 %v2980_v11, %v2981_v35  ;;  %v2988_v5 = vrot.slane %v2987_v43, 1  ;;  %v3879_v25 = vsel %vm2275_vm5, %v1915_v36, -inf  ;;  %v3886_v32 = vsel %vm2275_vm5, %v1914_v42, -inf  ;;  %v5724_v36 = vpop.f32.mrf.mxu1 }
 0x322   : > { %v2995_v31 = vrot.slane %v2994_v20, 1  ;;  %v3001_v63 = vmax.f32 %v2999_v40, %v3000_v6  ;;  %v3874_v1 = vmax.f32 %v3872_v34, %v3873_v48  ;;  %v3880_v54 = vrot.slane %v3879_v25, 4 }
 0x323   : > { %v2989_v33 = vmax.f32 %v2987_v43, %v2988_v5  ;;  %v4120_v16 = vmax.f32 %v2982_v38, %v6980_v45  ;;  %v3887_v57 = vrot.slane %v3886_v32, 4  ;;  %v3893_v26 = vsel %vm2275_vm5, %v1916_v55, -inf  ;;  %v5440_v43 = vld [vmem:[%s5896_s23 + $0x38] sm:$0xf] }
 0x324   : > { %v2996_v21 = vmax.f32 %v2994_v20, %v2995_v31  ;;  %v3002_v62 = vrot.slane %v3001_v63, 1  ;;  %v3875_v28 = vrot.slane %v3874_v1, 2  ;;  %v3881_v22 = vmax.f32 %v3879_v25, %v3880_v54 }
 0x325   : > { %v4121_v52 = vmax.f32 %v2989_v33, %v6985_v58  ;;  %v5535_v10 = vpack.c.bf16 %v4120_v16, %v4120_v16  ;;  %v3888_v23 = vmax.f32 %v3886_v32, %v3887_v57  ;;  %v3894_v61 = vrot.slane %v3893_v26, 4 }
 0x326   : > { %v3003_v51 = vmax.f32 %v3001_v63, %v3002_v62  ;;  %v4122_v29 = vmax.f32 %v2996_v21, %v6987_v39  ;;  %v3876_v50 = vmax.f32 %v3874_v1, %v3875_v28  ;;  %v3882_v15 = vrot.slane %v3881_v22, 2 }
 0x327   : > { %v5536_v0 = vpack.c.bf16 %v4121_v52, %v4121_v52  ;;  %v4798_v45 = vunpack.c.l.b16 %v5535_v10  ;;  %v3889_v59 = vrot.slane %v3888_v23, 2  ;;  %v3895_v53 = vmax.f32 %v3893_v26, %v3894_v61  ;;  %v5474_v52 = vld [vmem:[%s5896_s23 + $0x7c] sm:$0x1] }
 0x328   : > { %v4123_v17 = vmax.f32 %v3003_v51, %v6989_v27  ;;  %v5537_v56 = vpack.c.bf16 %v4122_v29, %v4122_v29  ;;  %v3877_v44 = vrot.slane %v3876_v50, 1  ;;  %v3883_v9 = vmax.f32 %v3881_v22, %v3882_v15 }
 0x329   : > { %v4799_v58 = vunpack.c.l.b16 %v5536_v0  ;;  %v4919_v19 = vsel %vm4880_vm10, %v4798_v45, %v6977_v12  ;;  %v3890_v7 = vmax.f32 %v3888_v23, %v3889_v59  ;;  %v3896_v37 = vrot.slane %v3895_v53, 2  ;;  %v5472_v59 = vld [vmem:[%s5896_s23 + $0x78] sm:$0xf] }
 0x32a   : > { %v4800_v39 = vunpack.c.l.b16 %v5537_v56  ;;  %v5617_v11 = vpack.c.bf16 %v4123_v17, %v4123_v17  ;;  %v3878_v18 = vmax.f32 %v3876_v50, %v3877_v44  ;;  %v3884_v41 = vrot.slane %v3883_v9, 1 }
 0x32b   : > { %v4920_v13 = vsel %vm4882_vm11, %v4799_v58, %v4919_v19  ;;  %v3891_v40 = vrot.slane %v3890_v7, 1  ;;  %v3897_v27 = vmax.f32 %v3895_v53, %v3896_v37  ;;  %v1441_v42 = vcombine.high %v7013_v2, %v7013_v2  ;;  %v660_v58 = vpop.f32.mrf.mxu0 }
 0x32c   : > { %v4921_v35 = vsel %vm4884_vm12, %v4800_v39, %v4920_v13  ;;  %v5087_v12 = vsel %vm6121_vm14, %v5617_v11, %v5442_v4  ;;  %v3885_v34 = vmax.f32 %v3883_v9, %v3884_v41  ;;  %v4184_v20 = vmax.f32 %v3878_v18, %v6998_v30 }
 0x32d   : > { %v4988_v6 = vpack.c.b16 %v4921_v35, %v4921_v35  ;;  %5443 = vst [vmem:[%s5896_s23 + $0x3c] sm:$0x1] %v5087_v12  ;;  %v3892_v55 = vmax.f32 %v3890_v7, %v3891_v40  ;;  %v3898_v48 = vrot.slane %v3897_v27, 1  ;;  %v1448_v38 = vrot.slane %v7013_v2, %v5976_v46 }
 0x32e   : > { %v4185_v5 = vmax.f32 %v3885_v34, %v7002_v47  ;;  %v5599_v25 = vpack.c.bf16 %v4184_v20, %v4184_v20  ;;  %v1455_v32 = vrot.slane %v1441_v42, %v5976_v46  ;;  %v797_v31 = vadd.f32 %v6909_v24, %v5724_v36 }
 0x32f   : > { %v5084_v63 = vsel %vm6140_vm15, %v4988_v6, %v5440_v43  ;;  %v3899_v1 = vmax.f32 %v3897_v27, %v3898_v48  ;;  %v4186_v30 = vmax.f32 %v3892_v55, %v7005_v8  ;;  %v1456_v54 = vcombine.high %v1448_v38, %v1448_v38 }
 0x330   : > { %5441 = vst [vmem:[%s5896_s23 + $0x38] sm:$0xf] %v5084_v63  ;;  %v5600_v33 = vpack.c.bf16 %v4185_v5, %v4185_v5  ;;  %v4862_v16 = vunpack.c.l.b16 %v5599_v25  ;;  %v1457_v57 = vcombine.high %v1455_v32, %v1455_v32  ;;  %v3116_v2 = vsel %vm2275_vm5, %v1448_v38, -inf }
 0x331   : > { %v4187_v47 = vmax.f32 %v3899_v1, %v7008_v49  ;;  %v5601_v26 = vpack.c.bf16 %v4186_v30, %v4186_v30  ;;  %v3117_v21 = vrot.slane %v3116_v2, 4  ;;  %v3123_v62 = vsel %vm2275_vm5, %v1456_v54, -inf }
 0x332   : > { %v4863_v28 = vunpack.c.l.b16 %v5600_v33  ;;  %v4967_v22 = vsel %vm4880_vm10, %v4862_v16, %v6995_v60  ;;  %v3124_v8 = vrot.slane %v3123_v62, 4  ;;  %v3130_v10 = vsel %vm2275_vm5, %v1455_v32, -inf  ;;  %v788_v33 = vpop.f32.mrf.mxu1 }
 0x333   : > { %v4864_v23 = vunpack.c.l.b16 %v5601_v26  ;;  %v5625_v61 = vpack.c.bf16 %v4187_v47, %v4187_v47  ;;  %v3118_v51 = vmax.f32 %v3116_v2, %v3117_v21  ;;  %v3131_v29 = vrot.slane %v3130_v10, 4 }
 0x334   : > { %v4968_v49 = vsel %vm4882_vm11, %v4863_v28, %v4967_v22  ;;  %v3125_v50 = vmax.f32 %v3123_v62, %v3124_v8  ;;  %v3137_v15 = vsel %vm2275_vm5, %v1457_v57, -inf  ;;  %v865_v0 = vmax.f32 %v797_v31, 0.0 }
 0x335   : > { %v4969_v45 = vsel %vm4884_vm12, %v4864_v23, %v4968_v49  ;;  %v5135_v60 = vsel %vm6121_vm14, %v5625_v61, %v5474_v52  ;;  %v3119_v53 = vrot.slane %v3118_v51, 2  ;;  %v3132_v17 = vmax.f32 %v3130_v10, %v3131_v29 }
 0x336   : > { %v5004_v56 = vpack.c.b16 %v4969_v45, %v4969_v45  ;;  %5475 = vst [vmem:[%s5896_s23 + $0x7c] sm:$0x1] %v5135_v60  ;;  %v3138_v44 = vrot.slane %v3137_v15, 4  ;;  %v1985_v9 = vcombine.high %v865_v0, %v865_v0  ;;  %v3126_v19 = vrot.slane %v3125_v50, 2 }
 0x337   : > { %v1992_v4 = vrot.slane %v865_v0, %v5976_v46  ;;  %v3120_v37 = vmax.f32 %v3118_v51, %v3119_v53  ;;  %v3133_v18 = vrot.slane %v3132_v17, 2  ;;  %v661_v40 = vadd.f32 %v6909_v24, %v660_v58 }
 0x338   : > { %v5132_v7 = vsel %vm6140_vm15, %v5004_v56, %v5472_v59  ;;  %v3139_v39 = vmax.f32 %v3137_v15, %v3138_v44  ;;  %v1999_v11 = vrot.slane %v1985_v9, %v5976_v46  ;;  %v3127_v34 = vmax.f32 %v3125_v50, %v3126_v19 }
 0x339   : > { %5473 = vst [vmem:[%s5896_s23 + $0x78] sm:$0xf] %v5132_v7  ;;  %v2000_v41 = vcombine.high %v1992_v4, %v1992_v4  ;;  %v4012_v13 = vsel %vm2275_vm5, %v1992_v4, -inf  ;;  %v3121_v12 = vrot.slane %v3120_v37, 1  ;;  %v3134_v55 = vmax.f32 %v3132_v17, %v3133_v18 }
 0x33a   : > { %v3140_v27 = vrot.slane %v3139_v39, 2  ;;  %v2001_v42 = vcombine.high %v1999_v11, %v1999_v11  ;;  %v4013_v36 = vrot.slane %v4012_v13, 4  ;;  %v4026_v43 = vsel %vm2275_vm5, %v1999_v11, -inf }
 0x33b   : > { %v4019_v35 = vsel %vm2275_vm5, %v2000_v41, -inf  ;;  %v4027_v48 = vrot.slane %v4026_v43, 4  ;;  %v831_v5 = vmax.f32 %v661_v40, 0.0  ;;  %v7068_v16 = vmax.f32 %v3120_v37, %v3121_v12  ;;  %v5693_v37 = vpop.f32.mrf.mxu0 }
 0x33c   : > { %v4014_v20 = vmax.f32 %v4012_v13, %v4013_v36  ;;  %v4020_v6 = vrot.slane %v4019_v35, 4  ;;  %v4033_v38 = vsel %vm2275_vm5, %v2001_v42, -inf  ;;  %v3141_v25 = vmax.f32 %v3139_v39, %v3140_v27 }
 0x33d   : > { %v4034_v63 = vrot.slane %v4033_v38, 4  ;;  %v4028_v1 = vmax.f32 %v4026_v43, %v4027_v48  ;;  %v1407_v30 = vcombine.high %v831_v5, %v831_v5  ;;  %v1414_v54 = vrot.slane %v831_v5, %v5976_v46 }
 0x33e   : > { %v4015_v32 = vrot.slane %v4014_v20, 2  ;;  %v4021_v31 = vmax.f32 %v4019_v35, %v4020_v6  ;;  %v3128_v57 = vrot.slane %v3127_v34, 1  ;;  %v3135_v26 = vrot.slane %v3134_v55, 1 }
 0x33f   : > { %v1421_v21 = vrot.slane %v1407_v30, %v5976_v46  ;;  %v1422_v62 = vcombine.high %v1414_v54, %v1414_v54  ;;  %v3060_v28 = vsel %vm2275_vm5, %v1414_v54, -inf  ;;  %v3142_v22 = vrot.slane %v3141_v25, 1 }
 0x340   : > { %v4016_v2 = vmax.f32 %v4014_v20, %v4015_v32  ;;  %v4022_v47 = vrot.slane %v4021_v31, 2  ;;  %v4035_v52 = vmax.f32 %v4033_v38, %v4034_v63  ;;  %v3061_v8 = vrot.slane %v3060_v28, 4 }
 0x341   : > { %v789_v10 = vadd.f32 %v6909_v24, %v788_v33  ;;  %v4029_v23 = vrot.slane %v4028_v1, 2  ;;  %v1423_v61 = vcombine.high %v1421_v21, %v1421_v21  ;;  %v3067_v51 = vsel %vm2275_vm5, %v1422_v62, -inf }
 0x342   : > { %v3074_v29 = vsel %vm2275_vm5, %v1421_v21, -inf  ;;  %v7075_v49 = vmax.f32 %v3127_v34, %v3128_v57  ;;  %v4017_v50 = vrot.slane %v4016_v2, 1  ;;  %v4023_v15 = vmax.f32 %v4021_v31, %v4022_v47 }
 0x343   : > { %v3062_v0 = vmax.f32 %v3060_v28, %v3061_v8  ;;  %v3136_v45 = vmax.f32 %v3134_v55, %v3135_v26  ;;  %v3068_v59 = vrot.slane %v3067_v51, 4  ;;  %v3075_v60 = vrot.slane %v3074_v29, 4 }
 0x344   : > { %v3081_v53 = vsel %vm2275_vm5, %v1423_v61, -inf  ;;  %v7078_v17 = vmax.f32 %v3141_v25, %v3142_v22  ;;  %v4036_v56 = vrot.slane %v4035_v52, 2  ;;  %v4030_v58 = vmax.f32 %v4028_v1, %v4029_v23 }
 0x345   : > { %v3063_v44 = vrot.slane %v3062_v0, 2  ;;  %v3082_v9 = vrot.slane %v3081_v53, 4  ;;  %v3069_v19 = vmax.f32 %v3067_v51, %v3068_v59  ;;  %v3076_v4 = vmax.f32 %v3074_v29, %v3075_v60  ;;  %v5725_v59 = vpop.f32.mrf.mxu1 }
 0x346   : > { %v863_v7 = vmax.f32 %v789_v10, 0.0  ;;  %v7080_v39 = vmax.f32 %v4016_v2, %v4017_v50  ;;  %v4024_v11 = vrot.slane %v4023_v15, 1  ;;  %v4037_v36 = vmax.f32 %v4035_v52, %v4036_v56 }
 0x347   : > { %v3064_v18 = vmax.f32 %v3062_v0, %v3063_v44  ;;  %v3083_v41 = vmax.f32 %v3081_v53, %v3082_v9  ;;  %v3070_v13 = vrot.slane %v3069_v19, 2  ;;  %v3077_v40 = vrot.slane %v3076_v4, 2 }
 0x348   : > { %v1951_v27 = vcombine.high %v863_v7, %v863_v7  ;;  %v1958_v42 = vrot.slane %v863_v7, %v5976_v46  ;;  %v672_v12 = vadd.f32 %v6909_v24, %v5693_v37  ;;  %v4031_v48 = vrot.slane %v4030_v58, 1 }
 0x349   : > { %v3065_v35 = vrot.slane %v3064_v18, 1  ;;  %v3084_v43 = vrot.slane %v3083_v41, 2  ;;  %v3071_v34 = vmax.f32 %v3069_v19, %v3070_v13  ;;  %v3078_v20 = vmax.f32 %v3076_v4, %v3077_v40 }
 0x34a   : > { %v1965_v6 = vrot.slane %v1951_v27, %v5976_v46  ;;  %v1966_v55 = vcombine.high %v1958_v42, %v1958_v42  ;;  %v3956_v25 = vsel %vm2275_vm5, %v1958_v42, -inf  ;;  %v834_v57 = vmax.f32 %v672_v12, 0.0 }
 0x34b   : > { %v3066_v38 = vmax.f32 %v3064_v18, %v3065_v35  ;;  %v3085_v5 = vmax.f32 %v3083_v41, %v3084_v43  ;;  %v3072_v32 = vrot.slane %v3071_v34, 1  ;;  %v3079_v31 = vrot.slane %v3078_v20, 1 }
 0x34c   : > { %v1967_v63 = vcombine.high %v1965_v6, %v1965_v6  ;;  %v3957_v1 = vrot.slane %v3956_v25, 4  ;;  %v3963_v54 = vsel %vm2275_vm5, %v1966_v55, -inf  ;;  %v3970_v33 = vsel %vm2275_vm5, %v1965_v6, -inf }
 0x34d   : > { %v3086_v30 = vrot.slane %v3085_v5, 1  ;;  %v4038_v2 = vrot.slane %v4037_v36, 1  ;;  %v3073_v47 = vmax.f32 %v3071_v34, %v3072_v32  ;;  %v3964_v21 = vrot.slane %v3963_v54, 4 }
 0x34e   : > { %v3958_v26 = vmax.f32 %v3956_v25, %v3957_v1  ;;  %v4025_v62 = vmax.f32 %v4023_v15, %v4024_v11  ;;  %v3080_v28 = vmax.f32 %v3078_v20, %v3079_v31  ;;  %v3971_v22 = vrot.slane %v3970_v33, 4 }
 0x34f   : > { %v3977_v52 = vsel %vm2275_vm5, %v1967_v63, -inf  ;;  %v4032_v8 = vmax.f32 %v4030_v58, %v4031_v48  ;;  %v4124_v10 = vmax.f32 %v3066_v38, %v7068_v16  ;;  %v3965_v61 = vmax.f32 %v3963_v54, %v3964_v21 }
 0x350   : > { %v3959_v23 = vrot.slane %v3958_v26, 2  ;;  %v3087_v51 = vmax.f32 %v3085_v5, %v3086_v30  ;;  %v3972_v29 = vmax.f32 %v3970_v33, %v3971_v22  ;;  %v3978_v50 = vrot.slane %v3977_v52, 4 }
 0x351   : > { %v1458_v0 = vcombine.high %v834_v57, %v834_v57  ;;  %v4039_v60 = vmax.f32 %v4037_v36, %v4038_v2  ;;  %v4125_v53 = vmax.f32 %v3073_v47, %v7075_v49  ;;  %v3966_v44 = vrot.slane %v3965_v61, 2 }
 0x352   : > { %v3960_v56 = vmax.f32 %v3958_v26, %v3959_v23  ;;  %v4126_v15 = vmax.f32 %v3080_v28, %v3136_v45  ;;  %v3973_v9 = vrot.slane %v3972_v29, 2  ;;  %v3979_v19 = vmax.f32 %v3977_v52, %v3978_v50 }
 0x353   : > { %v1465_v4 = vrot.slane %v834_v57, %v5976_v46  ;;  %v5539_v58 = vpack.c.bf16 %v4124_v10, %v4124_v10  ;;  %v3967_v16 = vmax.f32 %v3965_v61, %v3966_v44  ;;  %v800_v37 = vadd.f32 %v6909_v24, %v5725_v59 }
 0x354   : > { %v3961_v7 = vrot.slane %v3960_v56, 1  ;;  %v4127_v11 = vmax.f32 %v3087_v51, %v7078_v17  ;;  %v3974_v18 = vmax.f32 %v3972_v29, %v3973_v9  ;;  %v3980_v41 = vrot.slane %v3979_v19, 2 }
 0x355   : > { %v1472_v13 = vrot.slane %v1458_v0, %v5976_v46  ;;  %v5540_v40 = vpack.c.bf16 %v4125_v53, %v4125_v53  ;;  %v3968_v27 = vrot.slane %v3967_v16, 1  ;;  %v1473_v42 = vcombine.high %v1465_v4, %v1465_v4  ;;  %v663_v0 = vpop.f32.mrf.mxu0 }
 0x356   : > { %v3962_v49 = vmax.f32 %v3960_v56, %v3961_v7  ;;  %v5541_v45 = vpack.c.bf16 %v4126_v15, %v4126_v15  ;;  %v3975_v36 = vrot.slane %v3974_v18, 1  ;;  %v3981_v35 = vmax.f32 %v3979_v19, %v3980_v41  ;;  %v5777_v7 = vld [vmem:[%s7183_s2] ss:$0 sm:$0xff] }
 0x357   : > { %v1474_v43 = vcombine.high %v1472_v13, %v1472_v13  ;;  %v3969_v12 = vmax.f32 %v3967_v16, %v3968_v27  ;;  %v3144_v20 = vsel %vm2275_vm5, %v1465_v4, -inf  ;;  %v3151_v24 = vsel %vm2275_vm5, %v1473_v42, -inf }
 0x358   : > { %v4188_v34 = vmax.f32 %v3962_v49, %v7080_v39  ;;  %v3976_v17 = vmax.f32 %v3974_v18, %v3975_v36  ;;  %v3982_v6 = vrot.slane %v3981_v35, 1  ;;  %v3145_v55 = vrot.slane %v3144_v20, 4 }
 0x359   : > { %v3152_v48 = vrot.slane %v3151_v24, 4  ;;  %v5542_v38 = vpack.c.bf16 %v4127_v11, %v4127_v11  ;;  %v4189_v5 = vmax.f32 %v3969_v12, %v4025_v62  ;;  %v3158_v25 = vsel %vm2275_vm5, %v1472_v13, -inf }
 0x35a   : > { %v3165_v32 = vsel %vm2275_vm5, %v1474_v43, -inf  ;;  %v3983_v31 = vmax.f32 %v3981_v35, %v3982_v6  ;;  %v4190_v63 = vmax.f32 %v3976_v17, %v4032_v8  ;;  %v3146_v1 = vmax.f32 %v3144_v20, %v3145_v55  ;;  %v791_v43 = vpop.f32.mrf.mxu1 }
 0x35b   : > { %v3153_v30 = vmax.f32 %v3151_v24, %v3152_v48  ;;  %v4803_v54 = vunpack.c.l.b16 %v5540_v40  ;;  %v5604_v39 = vpack.c.bf16 %v4189_v5, %v4189_v5  ;;  %v3159_v33 = vrot.slane %v3158_v25, 4 }
 0x35c   : > { %v3166_v57 = vrot.slane %v3165_v32, 4  ;;  %v4191_v2 = vmax.f32 %v3983_v31, %v4039_v60  ;;  %v5603_v47 = vpack.c.bf16 %v4188_v34, %v4188_v34  ;;  %v3147_v26 = vrot.slane %v3146_v1, 2 }
 0x35d   : > { %v3154_v21 = vrot.slane %v3153_v30, 2  ;;  %v4802_v28 = vunpack.c.l.b16 %v5539_v58  ;;  %v3160_v22 = vmax.f32 %v3158_v25, %v3159_v33  ;;  %v866_v62 = vmax.f32 %v800_v37, 0.0 }
 0x35e   : > { %v3167_v52 = vmax.f32 %v3165_v32, %v3166_v57  ;;  %v4804_v10 = vunpack.c.l.b16 %v5541_v45  ;;  %v5605_v23 = vpack.c.bf16 %v4190_v63, %v4190_v63  ;;  %v4867_v61 = vunpack.c.l.b16 %v5604_v39 }
 0x35f   : > { %v4922_v51 = vsel %vm4874_vm6, %v4803_v54, %v4802_v28  ;;  %v5606_v8 = vpack.c.bf16 %v4191_v2, %v4191_v2  ;;  %v3148_v29 = vmax.f32 %v3146_v1, %v3147_v26  ;;  %v2002_v50 = vcombine.high %v866_v62, %v866_v62 }
 0x360   : > { %v4805_v59 = vunpack.c.l.b16 %v5542_v38  ;;  %v4866_v53 = vunpack.c.l.b16 %v5603_v47  ;;  %v3155_v56 = vmax.f32 %v3153_v30, %v3154_v21  ;;  %v3161_v60 = vrot.slane %v3160_v22, 2 }
 0x361   : > { %v3168_v44 = vrot.slane %v3167_v52, 2  ;;  %v2009_v15 = vrot.slane %v866_v62, %v5976_v46  ;;  %v2016_v9 = vrot.slane %v2002_v50, %v5976_v46  ;;  %v4923_v19 = vsel %vm4876_vm7, %v4804_v10, %v4922_v51 }
 0x362   : > { %v7104_v4 = vunpack.c.l.b16 %v5605_v23  ;;  %v7107_v58 = vsel %vm4874_vm6, %v4867_v61, %v4866_v53  ;;  %v664_v16 = vadd.f32 %v5777_v7, %v663_v0  ;;  %v7112_v37 = vunpack.c.l.b16 %v5606_v8 }
 0x363   : > { %v3149_v11 = vrot.slane %v3148_v29, 1  ;;  %v2017_v18 = vcombine.high %v2009_v15, %v2009_v15  ;;  %v2018_v41 = vcombine.high %v2016_v9, %v2016_v9  ;;  %v3156_v13 = vrot.slane %v3155_v56, 1 }
 0x364   : > { %v4040_v40 = vsel %vm2275_vm5, %v2009_v15, -inf  ;;  %v4054_v49 = vsel %vm2275_vm5, %v2016_v9, -inf  ;;  %v832_v27 = vmax.f32 %v664_v16, 0.0  ;;  %v3162_v42 = vmax.f32 %v3160_v22, %v3161_v60 }
 0x365   : > { %v3169_v45 = vmax.f32 %v3167_v52, %v3168_v44  ;;  %v4041_v36 = vrot.slane %v4040_v40, 4  ;;  %v4047_v35 = vsel %vm2275_vm5, %v2017_v18, -inf  ;;  %v4055_v34 = vrot.slane %v4054_v49, 4 }
 0x366   : > { %v4048_v12 = vrot.slane %v4047_v35, 4  ;;  %v4061_v20 = vsel %vm2275_vm5, %v2018_v41, -inf  ;;  %v1424_v24 = vcombine.high %v832_v27, %v832_v27  ;;  %v3150_v17 = vmax.f32 %v3148_v29, %v3149_v11 }
 0x367   : > { %v4042_v6 = vmax.f32 %v4040_v40, %v4041_v36  ;;  %v4062_v55 = vrot.slane %v4061_v20, 4  ;;  %v1431_v48 = vrot.slane %v832_v27, %v5976_v46  ;;  %v4056_v5 = vmax.f32 %v4054_v49, %v4055_v34 }
 0x368   : > { %v4049_v38 = vmax.f32 %v4047_v35, %v4048_v12  ;;  %v1438_v25 = vrot.slane %v1424_v24, %v5976_v46  ;;  %v792_v32 = vadd.f32 %v5777_v7, %v791_v43  ;;  %v3157_v54 = vmax.f32 %v3155_v56, %v3156_v13 }
 0x369   : > { %v4043_v31 = vrot.slane %v4042_v6, 2  ;;  %v4063_v63 = vmax.f32 %v4061_v20, %v4062_v55  ;;  %v1439_v1 = vcombine.high %v1431_v48, %v1431_v48  ;;  %v3088_v30 = vsel %vm2275_vm5, %v1431_v48, -inf }
 0x36a   : > { %v4050_v39 = vrot.slane %v4049_v38, 2  ;;  %v1440_v33 = vcombine.high %v1438_v25, %v1438_v25  ;;  %v3089_v57 = vrot.slane %v3088_v30, 4  ;;  %v3163_v2 = vrot.slane %v3162_v42, 1 }
 0x36b   : > { %v4057_v47 = vrot.slane %v4056_v5, 2  ;;  %v3095_v26 = vsel %vm2275_vm5, %v1439_v1, -inf  ;;  %v3102_v21 = vsel %vm2275_vm5, %v1438_v25, -inf  ;;  %v3170_v28 = vrot.slane %v3169_v45, 1 }
 0x36c   : > { %v7123_v22 = vmax.f32 %v4042_v6, %v4043_v31  ;;  %v3090_v52 = vmax.f32 %v3088_v30, %v3089_v57  ;;  %v3096_v62 = vrot.slane %v3095_v26, 4  ;;  %v4064_v10 = vrot.slane %v4063_v63, 2 }
 0x36d   : > { %v3103_v23 = vrot.slane %v3102_v21, 4  ;;  %v3109_v61 = vsel %vm2275_vm5, %v1440_v33, -inf  ;;  %v864_v51 = vmax.f32 %v792_v32, 0.0  ;;  %v7126_v8 = vmax.f32 %v4049_v38, %v4050_v39 }
 0x36e   : > { %v3091_v29 = vrot.slane %v3090_v52, 2  ;;  %v3097_v50 = vmax.f32 %v3095_v26, %v3096_v62  ;;  %v4924_v0 = vsel %vm4878_vm8, %v4805_v59, %v4923_v19  ;;  %v3164_v53 = vmax.f32 %v3162_v42, %v3163_v2 }
 0x36f   : > { %v7129_v56 = vmax.f32 %v4056_v5, %v4057_v47  ;;  %v3104_v60 = vmax.f32 %v3102_v21, %v3103_v23  ;;  %v3110_v44 = vrot.slane %v3109_v61, 4  ;;  %v3171_v15 = vmax.f32 %v3169_v45, %v3170_v28 }
 0x370   : > { %v4045_v9 = vrot.slane %v7123_v22, 1  ;;  %v3092_v7 = vmax.f32 %v3090_v52, %v3091_v29  ;;  %v3098_v16 = vrot.slane %v3097_v50, 2  ;;  %v7132_v11 = vmax.f32 %v4063_v63, %v4064_v10  ;;  %v5446_v29 = vld [vmem:[%s5896_s23 + $0x44] sm:$0x1] }
 0x371   : > { %v3105_v18 = vrot.slane %v3104_v60, 2  ;;  %v3111_v41 = vmax.f32 %v3109_v61, %v3110_v44  ;;  %v1968_v13 = vcombine.high %v864_v51, %v864_v51  ;;  %v4052_v40 = vrot.slane %v7126_v8, 1 }
 0x372   : > { %v3093_v49 = vrot.slane %v3092_v7, 1  ;;  %v3099_v27 = vmax.f32 %v3097_v50, %v3098_v16  ;;  %v1975_v59 = vrot.slane %v864_v51, %v5976_v46  ;;  %v4059_v19 = vrot.slane %v7129_v56, 1 }
 0x373   : > { %v3106_v42 = vmax.f32 %v3104_v60, %v3105_v18  ;;  %v3112_v36 = vrot.slane %v3111_v41, 2  ;;  %v1982_v45 = vrot.slane %v1968_v13, %v5976_v46  ;;  %v4046_v18 = vmax.f32 %v7123_v22, %v4045_v9 }
 0x374   : > { %v3094_v35 = vmax.f32 %v3092_v7, %v3093_v49  ;;  %v3100_v43 = vrot.slane %v3099_v27, 1  ;;  %v1983_v12 = vcombine.high %v1975_v59, %v1975_v59  ;;  %v3984_v34 = vsel %vm2275_vm5, %v1975_v59, -inf }
 0x375   : > { %v3107_v20 = vrot.slane %v3106_v42, 1  ;;  %v3113_v24 = vmax.f32 %v3111_v41, %v3112_v36  ;;  %v1984_v6 = vcombine.high %v1982_v45, %v1982_v45  ;;  %v3985_v55 = vrot.slane %v3984_v34, 4 }
 0x376   : > { %v3101_v48 = vmax.f32 %v3099_v27, %v3100_v43  ;;  %v4128_v38 = vmax.f32 %v3094_v35, %v3150_v17  ;;  %v3991_v5 = vsel %vm2275_vm5, %v1983_v12, -inf  ;;  %v3998_v25 = vsel %vm2275_vm5, %v1982_v45, -inf  ;;  %v5444_v27 = vld [vmem:[%s5896_s23 + $0x40] sm:$0xf] }
 0x377   : > { %v3108_v32 = vmax.f32 %v3106_v42, %v3107_v20  ;;  %v3114_v31 = vrot.slane %v3113_v24, 1  ;;  %v3986_v63 = vmax.f32 %v3984_v34, %v3985_v55  ;;  %v3992_v1 = vrot.slane %v3991_v5, 4 }
 0x378   : > { %v4129_v46 = vmax.f32 %v3101_v48, %v3157_v54  ;;  %v5543_v30 = vpack.c.bf16 %v4128_v38, %v4128_v38  ;;  %v3999_v39 = vrot.slane %v3998_v25, 4  ;;  %v4005_v33 = vsel %vm2275_vm5, %v1984_v6, -inf }
 0x379   : > { %v3115_v57 = vmax.f32 %v3113_v24, %v3114_v31  ;;  %v4130_v2 = vmax.f32 %v3108_v32, %v3164_v53  ;;  %v3987_v47 = vrot.slane %v3986_v63, 2  ;;  %v3993_v26 = vmax.f32 %v3991_v5, %v3992_v1 }
 0x37a   : > { %v5544_v21 = vpack.c.bf16 %v4129_v46, %v4129_v46  ;;  %v4806_v17 = vunpack.c.l.b16 %v5543_v30  ;;  %v4000_v28 = vmax.f32 %v3998_v25, %v3999_v39  ;;  %v4006_v52 = vrot.slane %v4005_v33, 4  ;;  %v5476_v39 = vld [vmem:[%s5896_s23 + $0x80] sm:$0xf] }
 0x37b   : > { %v4131_v62 = vmax.f32 %v3115_v57, %v3171_v15  ;;  %v5545_v10 = vpack.c.bf16 %v4130_v2, %v4130_v2  ;;  %v3988_v23 = vmax.f32 %v3986_v63, %v3987_v47  ;;  %v3994_v61 = vrot.slane %v3993_v26, 2  ;;  %v5478_v63 = vld [vmem:[%s5896_s23 + $0x84] sm:$0x1] }
 0x37c   : > { %v4807_v51 = vunpack.c.l.b16 %v5544_v21  ;;  %v4925_v54 = vsel %vm4880_vm10, %v4806_v17, %v4924_v0  ;;  %v4001_v50 = vrot.slane %v4000_v28, 2  ;;  %v4007_v60 = vmax.f32 %v4005_v33, %v4006_v52 }
 0x37d   : > { %v4808_v44 = vunpack.c.l.b16 %v5545_v10  ;;  %v5618_v53 = vpack.c.bf16 %v4131_v62, %v4131_v62  ;;  %v3989_v7 = vrot.slane %v3988_v23, 1  ;;  %v3995_v16 = vmax.f32 %v3993_v26, %v3994_v61 }
 0x37e   : > { %v4926_v41 = vsel %vm4882_vm11, %v4807_v51, %v4925_v54  ;;  %v4002_v15 = vmax.f32 %v4000_v28, %v4001_v50  ;;  %v4008_v13 = vrot.slane %v4007_v60, 2  ;;  %v4066_v36 = vrot.slane %v7132_v11, 1 }
 0x37f   : > { %v4927_v49 = vsel %vm4884_vm12, %v4808_v44, %v4926_v41  ;;  %v5093_v0 = vsel %vm6121_vm14, %v5618_v53, %v5446_v29  ;;  %v3990_v59 = vmax.f32 %v3988_v23, %v3989_v7  ;;  %v3996_v42 = vrot.slane %v3995_v16, 1 }
 0x380   : > { %v4990_v45 = vpack.c.b16 %v4927_v49, %v4927_v49  ;;  %5447 = vst [vmem:[%s5896_s23 + $0x44] sm:$0x1] %v5093_v0  ;;  %v4003_v35 = vrot.slane %v4002_v15, 1  ;;  %v4009_v43 = vmax.f32 %v4007_v60, %v4008_v13  ;;  %v4971_v22 = vsel %vm4876_vm7, %v7104_v4, %v7107_v58 }
 0x381   : > { %v4053_v9 = vmax.f32 %v7126_v8, %v4052_v40  ;;  %v3997_v12 = vmax.f32 %v3995_v16, %v3996_v42  ;;  %v4192_v34 = vmax.f32 %v3990_v59, %v4046_v18  ;;  %v4060_v20 = vmax.f32 %v7129_v56, %v4059_v19 }
 0x382   : > { %v5090_v24 = vsel %vm6140_vm15, %v4990_v45, %v5444_v27  ;;  %v4004_v6 = vmax.f32 %v4002_v15, %v4003_v35  ;;  %v4010_v55 = vrot.slane %v4009_v43, 1  ;;  %v4067_v4 = vmax.f32 %v7132_v11, %v4066_v36 }
 0x383   : > { %5445 = vst [vmem:[%s5896_s23 + $0x40] sm:$0xf] %v5090_v24  ;;  %v4193_v48 = vmax.f32 %v3997_v12, %v4053_v9  ;;  %v5607_v38 = vpack.c.bf16 %v4192_v34, %v4192_v34  ;;  %v4972_v40 = vsel %vm4878_vm8, %v7112_v37, %v4971_v22 }
 0x384   : > { %v4011_v58 = vmax.f32 %v4009_v43, %v4010_v55  ;;  %v4194_v8 = vmax.f32 %v4004_v6, %v4060_v20 }
 0x385   : > { %v5608_v5 = vpack.c.bf16 %v4193_v48, %v4193_v48  ;;  %v4870_v56 = vunpack.c.l.b16 %v5607_v38 }
 0x386   : > { %v4195_v19 = vmax.f32 %v4011_v58, %v4067_v4  ;;  %v5609_v25 = vpack.c.bf16 %v4194_v8, %v4194_v8 }
 0x387   : > { %v4871_v32 = vunpack.c.l.b16 %v5608_v5  ;;  %v4973_v31 = vsel %vm4880_vm10, %v4870_v56, %v4972_v40 }
 0x388   : > { %v4872_v1 = vunpack.c.l.b16 %v5609_v25  ;;  %v5626_v46 = vpack.c.bf16 %v4195_v19, %v4195_v19 }
 0x389   : > { %v4974_v30 = vsel %vm4882_vm11, %v4871_v32, %v4973_v31 }
 0x38a   : > { %v4975_v11 = vsel %vm4884_vm12, %v4872_v1, %v4974_v30  ;;  %v5141_v33 = vsel %vm6121_vm14, %v5626_v46, %v5478_v63 }
 0x38b   : > { %v5006_v37 = vpack.c.b16 %v4975_v11, %v4975_v11  ;;  %5479 = vst [vmem:[%s5896_s23 + $0x84] sm:$0x1] %v5141_v33 }
 0x38d   : > { %v5138_v57 = vsel %vm6140_vm15, %v5006_v37, %v5476_v39 }
 0x38e   : > { %5477 = vst [vmem:[%s5896_s23 + $0x80] sm:$0xf] %v5138_v57 }
 0x38f PF: > { %s13_s12 = sadd.s32 1, %s5784_s12  }
 0x390   : > { %p10_p4 = scmp.ge.s32.totalorder %s13_s12, 4  }
 0x392   :  { %12 = sbr.rel (!%p10_p4) target bundleno = 1 (0x1), region = 63 }

// kernel: slicer_forward.8
= control target key start
LH: loop header
LB: loop body
LE: loop exit
PB: predicated region body
PF: predicated region fallthrough
CT: control target
= control target key end

     0   :  { %s614_s18 = smov 0   ;;  %s681_s0 = inlined_call_operand.vmem [shape: bf16[2,4,128], index: 0, kind: input, shape index: {}]   ;;  %s682_s1 = inlined_call_operand.vmem [shape: bf16[128,64], index: 1, kind: input, shape index: {}]   ;;  %s683_s2 = inlined_call_operand.vmem [shape: f32[1,64], index: 2, kind: input, shape index: {}]   ;;  %s684_s3 = inlined_call_operand.vmem [shape: bf16[64,64], index: 3, kind: input, shape index: {}]   ;;  %s685_s4 = inlined_call_operand.vmem [shape: f32[1,64], index: 4, kind: input, shape index: {}]   ;;  %s686_s5 = inlined_call_operand.vmem [shape: f32[2,1,64], index: 5, kind: output, shape index: {}]  }
   0x1 LB: > { %s483_s19 = sadd.s32 4294967295, %s580_s18   ;;  %p487_p0 = scmp.ge.s32.totalorder %s580_s18, 1  ;;  %s580_s18 = sphi %s614_s18, %s15_s18  }
   0x2   : > { %p186_p1 = scmp.lt.s32.totalorder %s580_s18, 3 }
   0x4   : > { %p187_p2 = pnand %p487_p0, %p186_p1 }
   0x5   : > { %p211_p3 = scmp.lt.s32.totalorder (!%p187_p2), %s483_s19, 1 }
   0x6   : > { %190 = sbr.rel (%p187_p2) target bundleno = 458 (0x1ca), region = 40 }
   0xb   : > { %v562_v0 = vld [vmem:[%s682_s1 + $0x38] sm:$0xff]   ;;  %v582_v1 = vmov 0.0   ;;  %v563_v2 = vld [vmem:[%s682_s1 + $0x30] sm:$0xff]   ;;  %vm583_vm0 = vmmov 0   ;;  %v564_v3 = vld [vmem:[%s682_s1 + $0x28] sm:$0xff]   ;;  %s688_s19 = smov (!%p211_p3, %s483_s19), 1 }
   0xc   : > { %520 = vmatprep.subr.bf16.mxu0 %v582_v1  ;;  %540 = vmatprep.subr.bf16.mxu1 %v582_v1  ;;  %v570_v4 = vld [vmem:[%s684_s3 + $0x18] sm:$0xff]   ;;  %v565_v5 = vld [vmem:[%s682_s1 + $0x20] sm:$0xff]   ;;  %v571_v6 = vld [vmem:[%s684_s3 + $0x10] sm:$0xff]   ;;  %s488_s13 = sshll.u32 %s688_s19, 1  ;;  %vm372_vm1 = vcmask 523264   ;;  %vm417_vm2 = vcmask 519168   ;;  %s217_s6 = scalar_lea.vmem %s686_s5, %s688_s19 }
   0xd   : > { %521 = vmatpush3.bf16.msra.mxu0 %v562_v0  ;;  %536 = vmatprep.mubr.msk.bf16.mxu0 %vm583_vm0, %v582_v1  ;;  %v566_v7 = vld [vmem:[%s682_s1 + $0x18] sm:$0xff]   ;;  %v567_v8 = vld [vmem:[%s682_s1 + $0x10] sm:$0xff]   ;;  %v568_v9 = vld [vmem:[%s682_s1 + $0x8] sm:$0xff]   ;;  %s214_s20 = scalar_lea.vmem %s681_s0, %s488_s13  ;;  %vm434_vm3 = vcmask 516096  }
   0xe   : > { %522 = vmatprep.subr.bf16.mxu0 %v582_v1  ;;  %548 = vmatprep.mubr.msk.bf16.mxu1 %vm583_vm0, %v582_v1  ;;  %v569_v10 = vld [vmem:[%s682_s1] sm:$0xff]   ;;  %v572_v12 = vld [vmem:[%s684_s3 + $0x8] sm:$0xff]  }
   0xf   : > { %541 = vmatpush3.bf16.msra.mxu1 %v570_v4  ;;  %v219_v11 = vld [vmem:[%s214_s20] sm:$0x3] }
  0x10   : > { %542 = vmatprep.subr.bf16.mxu1 %v582_v1  ;;  %v573_v13 = vld [vmem:[%s684_s3] sm:$0xff]  }
  0x11   : > { %523 = vmatpush3.bf16.msra.mxu0 %v563_v2  ;;  %v489_v14 = vld [vmem:[%s683_s2] ss:$0 sm:$0xff] }
  0x12   : > { %524 = vmatprep.subr.bf16.mxu0 %v582_v1  ;;  %v498_v22 = vld [vmem:[%s685_s4] ss:$0 sm:$0xff] }
  0x13   : > { %543 = vmatpush3.bf16.msra.mxu1 %v571_v6 }
  0x14   : > { %544 = vmatprep.subr.bf16.mxu1 %v582_v1 }
  0x15   : > { %525 = vmatpush3.bf16.msra.mxu0 %v564_v3 }
  0x16   : > { %526 = vmatprep.subr.bf16.mxu0 %v582_v1 }
  0x17   : > { %545 = vmatpush3.bf16.msra.mxu1 %v572_v12 }
  0x18   : > { %546 = vmatprep.subr.bf16.mxu1 %v582_v1 }
  0x19   : > { %527 = vmatpush3.bf16.msra.mxu0 %v565_v5 }
  0x1a   : > { %528 = vmatprep.subr.bf16.mxu0 %v582_v1 }
  0x1b   : > { %547 = vmatpush3.bf16.msra.mxu1 %v573_v13 }
  0x1d   : > { %529 = vmatpush3.bf16.msra.mxu0 %v566_v7 }
  0x1e   : > { %530 = vmatprep.subr.bf16.mxu0 %v582_v1 }
  0x21   : > { %531 = vmatpush3.bf16.msra.mxu0 %v567_v8 }
  0x22   : > { %532 = vmatprep.subr.bf16.mxu0 %v582_v1 }
  0x25   : > { %533 = vmatpush3.bf16.msra.mxu0 %v568_v9 }
  0x26   : > { %534 = vmatprep.subr.bf16.mxu0 %v582_v1 }
  0x29   : > { %535 = vmatpush3.bf16.msra.mxu0 %v569_v10 }
  0x2c   : > { %537 = vmatmul.mubr.bf16.vlgmr.msra.gmra.mxu0 %v219_v11 }
  0xec   : > { %v325_v15 = vpop.f32.mrf.mxu0 }
  0xed   : > { %v326_v16 = vadd.f32 %v489_v14, %v325_v15 }
  0xee   : > { %v538_v17 = vpop.f32.mrf.mxu0 }
  0xef   : > { %v331_v18 = vmax.f32 %v326_v16, 0.0 }
  0xf0   : > { %v328_v19 = vpop.f32.mrf.mxu0 }
  0xf1   : > { %v332_v20 = vpack.c.bf16 %v331_v18, %v331_v18 }
  0xf2   : > { %v539_v21 = vpop.f32.mrf.mxu0 }
  0xf3   : > { %549 = vmatmul.mubr.msk.bf16.vlgmr.msra.gmra.mxu1 %vm372_vm1, %v332_v20 }
 0x1b3   : > { %v410_v23 = vpop.f32.mrf.mxu1 }
 0x1b4   : > { %v411_v24 = vadd.f32 %v498_v22, %v410_v23 }
 0x1b5   : > { %v550_v25 = vpop.f32.mrf.mxu1 }
 0x1b6   : > { %v416_v26 = vmax.f32 %v411_v24, 0.0 }
 0x1b7   : > { %v413_v27 = vpop.f32.mrf.mxu1 }
 0x1b8   : > { %v418_v28 = vsel %vm417_vm2, %v416_v26, -inf  ;;  %v425_v29 = vsel %vm417_vm2, %v416_v26, 0.0 }
 0x1b9   : > { %v419_v30 = vrot.slane %v418_v28, 4  ;;  %v426_v31 = vrot.slane %v425_v29, 4  ;;  %v551_v32 = vpop.f32.mrf.mxu1 }
 0x1bb   : > { %v420_v33 = vmax.f32 %v418_v28, %v419_v30  ;;  %v427_v34 = vadd.f32 %v426_v31, %v425_v29 }
 0x1bd   : > { %v421_v35 = vrot.slane %v420_v33, 2  ;;  %v428_v36 = vrot.slane %v427_v34, 2 }
 0x1bf   : > { %v422_v37 = vmax.f32 %v420_v33, %v421_v35  ;;  %v429_v38 = vadd.f32 %v428_v36, %v427_v34 }
 0x1c1   : > { %v423_v39 = vrot.slane %v422_v37, 1  ;;  %v430_v40 = vrot.slane %v429_v38, 1 }
 0x1c3   : > { %v431_v41 = vadd.f32 %v430_v40, %v429_v38  ;;  %v424_v42 = vmax.f32 %v422_v37, %v423_v39 }
 0x1c5   : > { %v432_v43 = vmul.f32 0.25, %v431_v41 }
 0x1c7   : > { %v433_v44 = vadd.f32 %v432_v43, %v424_v42 }
 0x1c9   : > { %435 = vst.msk [vmem:[%s217_s6] sm:$0x1] %vm434_vm3, %v433_v44 }
 0x1ca PF: > { %s15_s18 = sadd.s32 1, %s580_s18  }
 0x1cb   : > { %p12_p4 = scmp.ge.s32.totalorder %s15_s18, 4  }
 0x1cd   :  { %14 = sbr.rel (!%p12_p4) target bundleno = 1 (0x1), region = 70 }

// kernel: slicer_forward.9
= control target key start
LH: loop header
LB: loop body
LE: loop exit
PB: predicated region body
PF: predicated region fallthrough
CT: control target
= control target key end

     0   :  { %14 = vsyncpa [#allocation3], 0  ;;  %v479_v1 = vmov 0.0   ;;  %vm480_vm0 = vmmov 0   ;;  %s654_s0 = inlined_call_operand.vmem [shape: f32[2,64], index: 0, kind: input, shape index: {}]   ;;  %s655_s1 = inlined_call_operand.vmem [shape: f32[64,32], index: 1, kind: input, shape index: {}]   ;;  %s656_s2 = inlined_call_operand.vmem [shape: f32[1,32], index: 2, kind: input, shape index: {}]   ;;  %s657_s3 = inlined_call_operand.vmem [shape: f32[64,64], index: 3, kind: input, shape index: {}]   ;;  %s658_s4 = inlined_call_operand.vmem [shape: f32[1,64], index: 4, kind: input, shape index: {}]   ;;  %s659_s5 = inlined_call_operand.vmem [shape: f32[64,16], index: 5, kind: input, shape index: {}]   ;;  %s660_s6 = inlined_call_operand.vmem [shape: f32[1,16], index: 6, kind: input, shape index: {}]   ;;  %s661_s7 = inlined_call_operand.hbm [shape: f32[2,32], index: 7, kind: output, shape index: {0}]   ;;  %s662_s8 = inlined_call_operand.hbm [shape: f32[2,16], index: 8, kind: output, shape index: {1}]  }
   0x1   :  { %v129_v0 = vld [vmem:[%s657_s3 + $0x38] sm:$0xff]  ;;  %389 = vmatprep.subr.mxu1 %v479_v1  ;;  %v128_v2 = vld [vmem:[%s657_s3 + $0x30] sm:$0xff]  ;;  %405 = vmatprep.mubr.msk.f32.mxu1 %vm480_vm0, %v479_v1  ;;  %v127_v3 = vld [vmem:[%s657_s3 + $0x28] sm:$0xff] }
   0x2   :  { %390 = vmatpush3.msra.mxu1 %v129_v0  ;;  %370 = vmatprep.subr.mxu0 %v479_v1  ;;  %v38_v4 = vld [vmem:[%s655_s1 + $0x38] sm:$0xff]  ;;  %v37_v5 = vld [vmem:[%s655_s1 + $0x30] sm:$0xff]  ;;  %v126_v6 = vld [vmem:[%s657_s3 + $0x20] sm:$0xff] }
   0x3   :  { %391 = vmatprep.subr.mxu1 %v479_v1  ;;  %386 = vmatprep.mubr.msk.f32.mxu0 %vm480_vm0, %v479_v1  ;;  %v36_v7 = vld [vmem:[%s655_s1 + $0x28] sm:$0xff]  ;;  %v125_v8 = vld [vmem:[%s657_s3 + $0x18] sm:$0xff]  ;;  %v35_v9 = vld [vmem:[%s655_s1 + $0x20] sm:$0xff] }
   0x4   :  { %392 = vmatpush3.msra.mxu1 %v128_v2  ;;  %371 = vmatpush3.msra.mxu0 %v38_v4 }
   0x5   :  { %393 = vmatprep.subr.mxu1 %v479_v1  ;;  %372 = vmatprep.subr.mxu0 %v479_v1 }
   0x6   :  { %394 = vmatpush3.msra.mxu1 %v127_v3  ;;  %373 = vmatpush3.msra.mxu0 %v37_v5 }
   0x7   :  { %395 = vmatprep.subr.mxu1 %v479_v1  ;;  %374 = vmatprep.subr.mxu0 %v479_v1 }
   0x8   :  { %15 = vsyncpa [#allocation5], 0  ;;  %396 = vmatpush3.msra.mxu1 %v126_v6  ;;  %375 = vmatpush3.msra.mxu0 %v36_v7  ;;  %v124_v10 = vld [vmem:[%s657_s3 + $0x10] sm:$0xff]  ;;  %v34_v11 = vld [vmem:[%s655_s1 + $0x18] sm:$0xff]  ;;  %vm46_vm1 = vcmask 523264   ;;  %vm120_vm2 = vcmask 254976  }
   0x9   :  { %397 = vmatprep.subr.mxu1 %v479_v1  ;;  %376 = vmatprep.subr.mxu0 %v479_v1  ;;  %v123_v12 = vld [vmem:[%s657_s3 + $0x8] sm:$0xff]  ;;  %v33_v13 = vld [vmem:[%s655_s1 + $0x10] sm:$0xff]  ;;  %v122_v14 = vld [vmem:[%s657_s3] sm:$0xff]  ;;  %vm296_vm3 = vcmask 123904  }
   0xa   :  { %398 = vmatpush3.msra.mxu1 %v125_v8  ;;  %377 = vmatpush3.msra.mxu0 %v35_v9  ;;  %v32_v15 = vld [vmem:[%s655_s1 + $0x8] sm:$0xff]  ;;  %v30_v16 = vld [vmem:[%s654_s0] sm:$0x3]  ;;  %v215_v18 = vld [vmem:[%s659_s5 + $0x38] sm:$0xff] }
   0xb   :  { %399 = vmatprep.subr.mxu1 %v479_v1  ;;  %378 = vmatprep.subr.mxu0 %v479_v1  ;;  %v31_v17 = vld [vmem:[%s655_s1] sm:$0xff]  ;;  %v214_v19 = vld [vmem:[%s659_s5 + $0x30] sm:$0xff]  ;;  %v213_v20 = vld [vmem:[%s659_s5 + $0x28] sm:$0xff] }
   0xc   :  { %400 = vmatpush3.msra.mxu1 %v124_v10  ;;  %379 = vmatpush3.msra.mxu0 %v34_v11  ;;  %v212_v21 = vld [vmem:[%s659_s5 + $0x20] sm:$0xff]  ;;  %v211_v22 = vld [vmem:[%s659_s5 + $0x18] sm:$0xff]  ;;  %v210_v23 = vld [vmem:[%s659_s5 + $0x10] sm:$0xff] }
   0xd   :  { %401 = vmatprep.subr.mxu1 %v479_v1  ;;  %380 = vmatprep.subr.mxu0 %v479_v1  ;;  %v209_v24 = vld [vmem:[%s659_s5 + $0x8] sm:$0xff]  ;;  %v208_v25 = vld [vmem:[%s659_s5] sm:$0xff] }
   0xe   :  { %402 = vmatpush3.msra.mxu1 %v123_v12  ;;  %381 = vmatpush3.msra.mxu0 %v33_v13  ;;  %v339_v26 = vld [vmem:[%s658_s4] ss:$0 sm:$0xff] }
   0xf   :  { %403 = vmatprep.subr.mxu1 %v479_v1  ;;  %382 = vmatprep.subr.mxu0 %v479_v1  ;;  %v337_v33 = vld [vmem:[%s656_s2] ss:$0 sm:$0xff]  ;;  %s481_s2 = smov [#allocation2]  }
  0x10   :  { %404 = vmatpush3.msra.mxu1 %v122_v14  ;;  %383 = vmatpush3.msra.mxu0 %v32_v15  ;;  %v341_v35 = vld [vmem:[%s660_s6] ss:$0 sm:$0xff]  ;;  %s315_s4 = sshll.u32 %s481_s2, 4  ;;  %s316_s4 = int_to_ptr.vmem [resolvable:$true] %s315_s4 }
  0x11   :  { %406 = vmatmul.mubr.msk.f32.vlgmr.msra.gmra.mxu1 %vm46_vm1, %v30_v16  ;;  %384 = vmatprep.subr.mxu0 %v479_v1  ;;  %s435_s13 = scalar_lea.vmem %s316_s4, 32  ;;  %p440_p1 = scmp.lt.s32.totalorder %s316_s4, %s316_s4 }
  0x12   :  { %385 = vmatpush3.msra.mxu0 %v31_v17  ;;  %p436_p0 = scmp.ne.s32.totalorder %s316_s4, %s435_s13  ;;  %p441_p2 = scmp.lt.s32.totalorder %s435_s13, %s435_s13 }
  0x13   :  { %387 = vmatmul.mubr.msk.f32.vlgmr.msra.gmra.mxu0 %vm46_vm1, %v30_v16  ;;  %408 = vmatprep.subr.mxu0 %v479_v1 }
  0x14   :  { %409 = vmatpush3.msra.mxu0 %v215_v18  ;;  %424 = vmatprep.mubr.msk.f32.mxu0 %vm480_vm0, %v479_v1  ;;  %p442_p3 = por %p441_p2, %p440_p1 }
  0x15   :  { %410 = vmatprep.subr.mxu0 %v479_v1 }
  0x16   :  { %411 = vmatpush3.msra.mxu0 %v214_v19  ;;  %p443_p4 = pnand %p442_p3, %p436_p0 }
  0x17   :  { %412 = vmatprep.subr.mxu0 %v479_v1 }
  0x18   :  { %413 = vmatpush3.msra.mxu0 %v213_v20 }
  0x19   :  { %414 = vmatprep.subr.mxu0 %v479_v1 }
  0x1a   :  { %415 = vmatpush3.msra.mxu0 %v212_v21 }
  0x1b   :  { %416 = vmatprep.subr.mxu0 %v479_v1 }
  0x1c   :  { %417 = vmatpush3.msra.mxu0 %v211_v22 }
  0x1d   :  { %418 = vmatprep.subr.mxu0 %v479_v1 }
  0x1e   :  { %419 = vmatpush3.msra.mxu0 %v210_v23 }
  0x1f   :  { %420 = vmatprep.subr.mxu0 %v479_v1 }
  0x20   :  { %421 = vmatpush3.msra.mxu0 %v209_v24 }
  0x21   :  { %422 = vmatprep.subr.mxu0 %v479_v1 }
  0x22   :  { %423 = vmatpush3.msra.mxu0 %v208_v25 }
  0xd1   :  { %v203_v27 = vpop.f32.mrf.mxu1 }
  0xd2   :  { %v204_v28 = vadd.f32 %v339_v26, %v203_v27 }
  0xd3   :  { %v407_v29 = vpop.f32.mrf.mxu1  ;;  %v116_v30 = vpop.f32.mrf.mxu0 }
  0xd4   :  { %v207_v31 = vmax.f32 %v204_v28, 0.0  ;;  %v117_v34 = vadd.f32 %v337_v33, %v116_v30 }
  0xd5   :  { %v388_v32 = vpop.f32.mrf.mxu0 }
  0xd6   :  { %425 = vmatmul.mubr.msk.f32.vlgmr.msra.gmra.mxu0 %vm46_vm1, %v207_v31  ;;  %121 = vst.msk [vmem:[#allocation2] sm:$0x3] %vm120_vm2, %v117_v34 }
 0x196   :  { %v292_v36 = vpop.f32.mrf.mxu0 }
 0x197   :  { %v293_v37 = vadd.f32 %v341_v35, %v292_v36 }
 0x198   :  { %v426_v38 = vpop.f32.mrf.mxu0 }
 0x199   :  { %v297_v39 = vsel %vm296_vm3, %v293_v37, -inf }
 0x19a   :  { %298 = vmax.xlane.f32.xlu0 %v297_v39 }
 0x223   :  { %v299_v40 = vpop.xlane.xlu0 %298 }
 0x224   :  { %v300_v41 = vsub.f32 %v293_v37, %v299_v40 }
 0x226   :  { %v301_v42 = vmul.f32 1.442695, %v300_v41 }
 0x228   :  { %431 = vpow2.f32 %v301_v42 }
 0x235   :  { %v432_v43 = vpop.eup %431 }
 0x236   :  { %v303_v44 = vsel %vm296_vm3, %v432_v43, 0.0 }
 0x237   :  { %304 = vadd.xlane.f32.xlu0 %v303_v44 }
 0x238   :  { %446 = shalt.err (!%p443_p4)
}
 0x239   :  { %318 = dma.vmem_to_hbm [thread:$0]  %s316_s4, 32, %s661_s7, [#allocation3]  }
 0x23a   :  { %s482_s15 = smov [#allocation4]  }
 0x23b   :  { %s325_s16 = sshll.u32 %s482_s15, 4  ;;  %s326_s16 = int_to_ptr.vmem [resolvable:$true] %s325_s16 }
 0x23c   :  { %s455_s3 = scalar_lea.vmem %s326_s16, 32  ;;  %p460_p6 = scmp.lt.s32.totalorder %s326_s16, %s326_s16 }
 0x23d   :  { %p456_p5 = scmp.ne.s32.totalorder %s326_s16, %s455_s3  ;;  %p461_p7 = scmp.lt.s32.totalorder %s455_s3, %s455_s3 }
 0x23f   :  { %p462_p8 = por %p461_p7, %p460_p6 }
 0x241   :  { %p463_p9 = pnand %p462_p8, %p456_p5 }
 0x2c0   :  { %v305_v45 = vpop.xlane.xlu0 %304 }
 0x2c1   :  { %433 = vrcp.f32 %v305_v45 }
 0x2ce   :  { %v434_v46 = vpop.eup %433 }
 0x2cf   :  { %v307_v47 = vmul.f32 %v434_v46, %v432_v43 }
 0x2d1   :  { %308 = vst.msk [vmem:[#allocation4] sm:$0x3] %vm296_vm3, %v307_v47 }
 0x2d2   :  { %466 = shalt.err (!%p463_p9)
}
 0x2d3   :  { %328 = dma.vmem_to_hbm [thread:$0]  %s326_s16, 32, %s662_s8, [#allocation5]  }
 0x2d4   :  { %475 = dma.done.wait [#allocation3], 32  }
 0x2d5   :  { %476 = vsyncadd [#allocation3], 4294967264 }
 0x2d6   :  { %477 = dma.done.wait [#allocation5], 32  }
 0x2d7   :  { %478 = vsyncadd [#allocation5], 4294967264 }
 0x2d8   :  { %335 = vsyncpa [#allocation3], 1 }
 0x2d9   :  { %336 = vsyncpa [#allocation5], 1 }

</bundles_post_ra>
